<compile_context>
chip_gen: v6e
topology: v6e:2x2x1
jax: 0.10.0
libtpu: 0.0.40
codegen_flags: <defaults>
</compile_context>

<pallas_src>
import functools

import jax
import jax.numpy as jnp
from jax.experimental import pallas as pl
from jax.experimental.pallas import tpu as pltpu


_STEM_K = 32   # stem im2col K (9*Cin = 27) zero-padded up for an aligned MXU operand


# ---------------------------------------------------------------------------
# In-kernel building blocks (traced inline inside the fused kernel body)
# ---------------------------------------------------------------------------
def _zero_halo(pad_ref):
    """Zero only the 1-pixel halo border of a (NB, H+2, W+2, C) pad scratch.

    The interior is always fully overwritten before each use, so this runs exactly
    once per grid step per buffer (no full-buffer broadcast stores).
    """
    NB, Hp, Wp, C = pad_ref.shape
    zrow = jnp.zeros((NB, 1, Wp, C), pad_ref.dtype)
    zcol = jnp.zeros((NB, Hp, 1, C), pad_ref.dtype)
    pad_ref[:, 0:1, :, :] = zrow
    pad_ref[:, Hp - 1:Hp, :, :] = zrow
    pad_ref[:, :, 0:1, :] = zcol
    pad_ref[:, :, Wp - 1:Wp, :] = zcol


def _conv3x3(x, pad_ref, col_ref, w_ref, b_ref, residual=None):
    """'same' 3x3 conv (+optional residual) + ReLU as ONE big-K MXU matmul.

    x        : (NB, H, W, Cin) float32 value
    pad_ref  : VMEM scratch (NB, H+2, W+2, Cin) bfloat16 (halo border pre-zeroed)
    col_ref  : VMEM scratch (NB*H*W, 9*Cin) bfloat16     (im2col buffer)
    w_ref    : (9*Cin, Cout) bfloat16, rows ordered (kh, kw, cin)
    b_ref    : (1, Cout) float32
    residual : optional (NB, H, W, Cout) float32
    returns  : (NB, H, W, Cout) float32
    """
    NB, H, W, Cin = x.shape
    Cout = w_ref.shape[-1]
    rows = NB * H * W

    # Interior write, already cast to bf16 (halves store traffic); halo stays zero.
    pad_ref[:, 1:H + 1, 1:W + 1, :] = x.astype(pad_ref.dtype)

    # im2col: stack the 9 taps along K so one large-K matmul replaces nine small-K ones.
    # For Cin=64, write tap PAIRS as a single concatenated 128-lane slab so the im2col
    # stores are lane-dense (unmasked vst); K ordering (kh,kw,cin) is preserved because
    # each pair is contiguous in K.
    pair = (2 * Cin == 128)
    t = 0
    while t < 9:
        kh, kw = divmod(t, 3)
        tap = pad_ref[:, kh:kh + H, kw:kw + W, :]
        if pair and t + 1 < 9:
            kh2, kw2 = divmod(t + 1, 3)
            tap2 = pad_ref[:, kh2:kh2 + H, kw2:kw2 + W, :]
            slab = jnp.concatenate([tap, tap2], axis=-1).reshape(rows, 2 * Cin)
            col_ref[:, t * Cin:(t + 2) * Cin] = slab
            t += 2
        else:
            col_ref[:, t * Cin:(t + 1) * Cin] = tap.reshape(rows, Cin)
            t += 1

    acc = jnp.dot(col_ref[...], w_ref[...], preferred_element_type=jnp.float32)
    acc = acc + b_ref[...]
    if residual is not None:
        acc = acc + residual.reshape(rows, Cout)
    acc = jnp.maximum(acc, 0.0)                       # f32 epilogue (v5e-friendly)
    return acc.reshape(NB, H, W, Cout)


def _maxpool2x2(x):
    """2x2 / stride-2 max pool on an in-kernel f32 value."""
    # NOTE: a strided-slice variant would avoid splitting the sublane axis, but this
    # reshape form is known to lower cleanly and pooling is a tiny part of the work.
    NB, H, W, C = x.shape
    x = x.reshape(NB, H, W // 2, 2, C)
    x = jnp.max(x, axis=3)
    x = x.reshape(NB, H // 2, 2, W // 2, C)
    x = jnp.max(x, axis=2)
    return x


# ---------------------------------------------------------------------------
# Fused forward kernel:
#   stem conv -> pool -> residual block -> conv -> pool -> conv
#   -> global-avg-pool -> Linear(512,32) -> ReLU -> Linear(32,1) -> Sigmoid
# ---------------------------------------------------------------------------
def cnn_fused_kernel(H, W,
                     xcol_ref,
                     w_stem, b_stem,
                     w_b1a, b_b1a, w_b1b, b_b1b,
                     w_c2, b_c2, w_c3, b_c3,
                     w_fc1, b_fc1, w_fc2, b_fc2,
                     o_ref,
                     pad_m, col_m, pad_l, col_l):
    NB = xcol_ref.shape[0]
    H2, W2 = H // 4, W // 4

    # Zero conv halo borders once per grid step (interiors are always overwritten).
    _zero_halo(pad_m)
    _zero_halo(pad_l)

    # ---- stem conv: im2col was done in the wrapper (Cin=3 -> K padded to 32) ----
    K0 = xcol_ref.shape[-1]
    col0 = xcol_ref[...].reshape(NB * H * W, K0)                        # bf16
    acc = jnp.dot(col0, w_stem[...], preferred_element_type=jnp.float32) + b_stem[...]
    x = jnp.maximum(acc, 0.0).reshape(NB, H, W, w_stem.shape[-1])       # (NB,16,16,64)
    x = _maxpool2x2(x)                                                  # (NB, 8, 8,64)

    # residual basic block (echoes the resnet block structure)
    y = _conv3x3(x, pad_m, col_m, w_b1a, b_b1a)                         # (NB, 8, 8,64)
    x = _conv3x3(y, pad_m, col_m, w_b1b, b_b1b, residual=x)             # (NB, 8, 8,64)

    x = _conv3x3(x, pad_m, col_m, w_c2, b_c2)                           # (NB, 8, 8,128)
    x = _maxpool2x2(x)                                                  # (NB, 4, 4,128)
    x = _conv3x3(x, pad_l, col_l, w_c3, b_c3)                           # (NB, 4, 4,512)

    # global average pool -> (NB, 512) feature (x.view(B,-1) equivalent)
    C = x.shape[-1]
    feat = jnp.sum(x.reshape(NB, H2 * W2, C), axis=1) * (1.0 / float(H2 * W2))

    # final_module: Linear(512,32) -> ReLU -> Linear(32,1) -> Sigmoid
    h = jnp.dot(feat.astype(jnp.bfloat16), w_fc1[...],
                preferred_element_type=jnp.float32) + b_fc1[...]
    h = jnp.maximum(h, 0.0)                                             # (NB, 32)

    # Linear(32,1) on the VPU (mul + lane reduce) -- avoid an N=1 MXU push/drain.
    logit = jnp.sum(h * w_fc2[...], axis=-1, keepdims=True) + b_fc2[...]
    sig = 1.0 / (1.0 + jnp.exp(-logit))                                 # exact sigmoid
    o_ref[...] = sig.reshape(1, 1, NB)                                  # lane-major output


# ---------------------------------------------------------------------------
# Wrapper: single pallas_call over a batch grid; weights resident in VMEM
# ---------------------------------------------------------------------------
def _stem_im2col(x_nchw):
    """NCHW input -> stem 3x3 'same' im2col patches, K padded 27->32, bf16.

    Doing the Cin=3 stem halo/im2col in the wrapper kills the worst in-kernel layout
    case (3 channels on the 128-lane axis) and ~1 MiB/image of pad/col scratch.
    """
    x = jnp.transpose(x_nchw, (0, 2, 3, 1)).astype(jnp.float32)         # NHWC
    B, H, W, C = x.shape
    xp = jnp.pad(x, ((0, 0), (1, 1), (1, 1), (0, 0)))
    taps = [xp[:, kh:kh + H, kw:kw + W, :] for kh in range(3) for kw in range(3)]
    col = jnp.concatenate(taps, axis=-1)                                # (B,H,W,9*C), K=(kh,kw,cin)
    col = jnp.pad(col, ((0, 0), (0, 0), (0, 0), (0, _STEM_K - col.shape[-1])))
    return col.reshape(B, H * W, _STEM_K).astype(jnp.bfloat16)


@functools.partial(jax.jit, static_argnames=("batch_block",))
def cnn_classifier_forward(x_nchw, kp, batch_block=None):
    B, Cin, H, W = x_nchw.shape
    assert H % 4 == 0 and W % 4 == 0

    if batch_block is None:
        # Largest divisor of B that keeps >=2 grid steps (v7x megacore sharding) and
        # caps per-step scratch; for realistic batches this lands at 8-16 images/step.
        cap = max(1, min(16, B // 2))
        NB = max(d for d in range(1, cap + 1) if B % d == 0)
    else:
        NB = batch_block
    assert B % NB == 0

    xcol = _stem_im2col(x_nchw)                                         # (B, H*W, 32) bf16

    H1, W1, H2, W2 = H // 2, W // 2, H // 4, W // 4
    c_mid = kp["w_b1a"].shape[0] // 9                                   # 64
    c_top = kp["w_c3"].shape[0] // 9                                    # 128

    param_order = ("w_stem", "b_stem", "w_b1a", "b_b1a", "w_b1b", "b_b1b",
                   "w_c2", "b_c2", "w_c3", "b_c3",
                   "w_fc1", "b_fc1", "w_fc2", "b_fc2")
    params = [kp[k] for k in param_order]

    in_specs = [pl.BlockSpec((NB, H * W, _STEM_K), lambda b: (b, 0, 0))]
    # Weights/biases: full-array blocks with constant index maps -> fetched once per
    # core, then kept resident in VMEM across the whole batch grid.
    in_specs += [pl.BlockSpec(a.shape, lambda b: (0, 0)) for a in params]

    scratch_shapes = [
        pltpu.VMEM((NB, H1 + 2, W1 + 2, c_mid), jnp.bfloat16),          # pad_m (reused x3)
        pltpu.VMEM((NB * H1 * W1, 9 * c_mid), jnp.bfloat16),            # col_m (reused x3)
        pltpu.VMEM((NB, H2 + 2, W2 + 2, c_top), jnp.bfloat16),          # pad_l (stage 3)
        pltpu.VMEM((NB * H2 * W2, 9 * c_top), jnp.bfloat16),            # col_l (stage 3)
    ]

    out = pl.pallas_call(
        functools.partial(cnn_fused_kernel, H, W),
        out_shape=jax.ShapeDtypeStruct((B // NB, 1, NB), jnp.float32),
        grid_spec=pltpu.PrefetchScalarGridSpec(
            num_scalar_prefetch=0,
            grid=(B // NB,),
            in_specs=in_specs,
            out_specs=pl.BlockSpec((1, 1, NB), lambda b: (b, 0, 0)),
            scratch_shapes=scratch_shapes,
        ),
        compiler_params=pltpu.CompilerParams(
            # batch axis shards across TensorCores on multi-core parts (v7x)
            dimension_semantics=("parallel",),
            # Raise the scoped VMEM limit (v5e default is 16 MiB) with headroom
            # under v7x's 64 MiB physical so larger batch_block values still fit.
            vmem_limit_bytes=48 * 1024 * 1024,
        ),
    )(xcol, *params)
    return out.reshape(B, 1)


# ---------------------------------------------------------------------------
# Parameters (deterministic, synthetic)
# ---------------------------------------------------------------------------
def _conv_init(key, cin, cout):
    kw, kb = jax.random.split(key)
    scale = 1.0 / jnp.sqrt(9.0 * cin)
    w = jax.random.normal(kw, (3, 3, cin, cout), jnp.float32) * scale
    b = jax.random.normal(kb, (cout,), jnp.float32) * 0.01
    return w, b


def _linear_init(key, din, dout):
    kw, kb = jax.random.split(key)
    scale = 1.0 / jnp.sqrt(float(din))
    w = jax.random.normal(kw, (din, dout), jnp.float32) * scale
    b = jax.random.normal(kb, (dout,), jnp.float32) * 0.01
    return w, b


def init_params(key):
    keys = jax.random.split(key, 7)
    p = {}
    p["w_stem"], p["b_stem"] = _conv_init(keys[0], 3, 64)      # stem conv
    p["w_b1a"], p["b_b1a"] = _conv_init(keys[1], 64, 64)       # residual block conv a
    p["w_b1b"], p["b_b1b"] = _conv_init(keys[2], 64, 64)       # residual block conv b
    p["w_c2"], p["b_c2"] = _conv_init(keys[3], 64, 128)        # stage 2
    p["w_c3"], p["b_c3"] = _conv_init(keys[4], 128, 512)       # stage 3 -> 512-dim feature
    p["w_fc1"], p["b_fc1"] = _linear_init(keys[5], 512, 32)    # final_module Linear(512,32)
    p["w_fc2"], p["b_fc2"] = _linear_init(keys[6], 32, 1)      # final_module Linear(32,1)
    return p


def prepare_params(p):
    """One-time (outside jit) reshape/cast: im2col weight layout, bf16 MXU operands."""
    def conv_w(w):                      # (3,3,Cin,Cout) -> (9*Cin, Cout) bf16, rows (kh,kw,cin)
        kh, kw, cin, cout = w.shape
        return w.reshape(kh * kw * cin, cout).astype(jnp.bfloat16)

    def bias(b):
        return b.reshape(1, -1).astype(jnp.float32)

    w_stem = p["w_stem"].reshape(-1, p["w_stem"].shape[-1])            # (27, 64)
    w_stem = jnp.pad(w_stem, ((0, _STEM_K - w_stem.shape[0]), (0, 0)))  # K 27->32 zero rows

    return {
        "w_stem": w_stem.astype(jnp.bfloat16), "b_stem": bias(p["b_stem"]),
        "w_b1a": conv_w(p["w_b1a"]), "b_b1a": bias(p["b_b1a"]),
        "w_b1b": conv_w(p["w_b1b"]), "b_b1b": bias(p["b_b1b"]),
        "w_c2": conv_w(p["w_c2"]), "b_c2": bias(p["b_c2"]),
        "w_c3": conv_w(p["w_c3"]), "b_c3": bias(p["b_c3"]),
        "w_fc1": p["w_fc1"].astype(jnp.bfloat16), "b_fc1": bias(p["b_fc1"]),
        "w_fc2": p["w_fc2"].reshape(1, -1).astype(jnp.float32),        # (1,32) for VPU path
        "b_fc2": bias(p["b_fc2"]),
    }


if __name__ == "__main__":
    key = jax.random.PRNGKey(0)
    k_x, k_p = jax.random.split(key)
    x = jax.random.normal(k_x, (2, 3, 16, 16), jnp.float32)   # NCHW, like the PyTorch module
    kparams = prepare_params(init_params(k_p))

    out = cnn_classifier_forward(x, kparams)
    out = jax.block_until_ready(out)

    assert out.shape == (2, 1), out.shape
    assert bool(jnp.all((out >= 0.0) & (out <= 1.0)))          # sigmoid output range
    print("KERNEL_OK")
</pallas_src>

<mosaic_0001>
module attributes {stable_mosaic.version = 11 : i64} {
  func.func @cnn_fused_kernel(%arg0: i32, %arg1: memref<1x256x32xbf16, #tpu.memory_space<vmem>>, %arg2: memref<32x64xbf16, #tpu.memory_space<vmem>>, %arg3: memref<1x64xf32, #tpu.memory_space<vmem>>, %arg4: memref<576x64xbf16, #tpu.memory_space<vmem>>, %arg5: memref<1x64xf32, #tpu.memory_space<vmem>>, %arg6: memref<576x64xbf16, #tpu.memory_space<vmem>>, %arg7: memref<1x64xf32, #tpu.memory_space<vmem>>, %arg8: memref<576x128xbf16, #tpu.memory_space<vmem>>, %arg9: memref<1x128xf32, #tpu.memory_space<vmem>>, %arg10: memref<1152x512xbf16, #tpu.memory_space<vmem>>, %arg11: memref<1x512xf32, #tpu.memory_space<vmem>>, %arg12: memref<512x32xbf16, #tpu.memory_space<vmem>>, %arg13: memref<1x32xf32, #tpu.memory_space<vmem>>, %arg14: memref<1x32xf32, #tpu.memory_space<vmem>>, %arg15: memref<1x1xf32, #tpu.memory_space<vmem>>, %arg16: memref<1x1x1xf32, #tpu.memory_space<vmem>>, %arg17: memref<1x10x10x64xbf16, #tpu.memory_space<vmem>>, %arg18: memref<64x576xbf16, #tpu.memory_space<vmem>>, %arg19: memref<1x6x6x128xbf16, #tpu.memory_space<vmem>>, %arg20: memref<16x1152xbf16, #tpu.memory_space<vmem>>) attributes {dimension_semantics = [#tpu.dimension_semantics<parallel>], iteration_bounds = array<i64: 2>, scalar_prefetch = 0 : i64, scratch_operands = 4 : i64, tpu.core_type = #tpu.core_type<tc>, window_params = [{transform_indices = @transform_0, window_bounds = array<i64: 1, 256, 32>}, {pipeline_mode = #tpu.pipeline_mode<synchronous>, transform_indices = @transform_1, window_bounds = array<i64: 32, 64>}, {pipeline_mode = #tpu.pipeline_mode<synchronous>, transform_indices = @transform_2, window_bounds = array<i64: 1, 64>}, {pipeline_mode = #tpu.pipeline_mode<synchronous>, transform_indices = @transform_3, window_bounds = array<i64: 576, 64>}, {pipeline_mode = #tpu.pipeline_mode<synchronous>, transform_indices = @transform_4, window_bounds = array<i64: 1, 64>}, {pipeline_mode = #tpu.pipeline_mode<synchronous>, transform_indices = @transform_5, window_bounds = array<i64: 576, 64>}, {pipeline_mode = #tpu.pipeline_mode<synchronous>, transform_indices = @transform_6, window_bounds = array<i64: 1, 64>}, {pipeline_mode = #tpu.pipeline_mode<synchronous>, transform_indices = @transform_7, window_bounds = array<i64: 576, 128>}, {pipeline_mode = #tpu.pipeline_mode<synchronous>, transform_indices = @transform_8, window_bounds = array<i64: 1, 128>}, {pipeline_mode = #tpu.pipeline_mode<synchronous>, transform_indices = @transform_9, window_bounds = array<i64: 1152, 512>}, {pipeline_mode = #tpu.pipeline_mode<synchronous>, transform_indices = @transform_10, window_bounds = array<i64: 1, 512>}, {pipeline_mode = #tpu.pipeline_mode<synchronous>, transform_indices = @transform_11, window_bounds = array<i64: 512, 32>}, {pipeline_mode = #tpu.pipeline_mode<synchronous>, transform_indices = @transform_12, window_bounds = array<i64: 1, 32>}, {pipeline_mode = #tpu.pipeline_mode<synchronous>, transform_indices = @transform_13, window_bounds = array<i64: 1, 32>}, {pipeline_mode = #tpu.pipeline_mode<synchronous>, transform_indices = @transform_14, window_bounds = array<i64: 1, 1>}, {transform_indices = @transform_15, window_bounds = array<i64: 1, 1, 1>}]} {
    %cst = arith.constant 0.000000e+00 : bf16
    %0 = vector.broadcast %cst : bf16 to vector<1x1x10x64xbf16>
    %cst_0 = arith.constant 0.000000e+00 : bf16
    %1 = vector.broadcast %cst_0 : bf16 to vector<1x10x1x64xbf16>
    %c0 = arith.constant 0 : index
    %c0_1 = arith.constant 0 : index
    %c0_2 = arith.constant 0 : index
    %c0_3 = arith.constant 0 : index
    %2 = vector.load %arg17[%c0, %c0_1, %c0_2, %c0_3] : memref<1x10x10x64xbf16, #tpu.memory_space<vmem>>, vector<1x1x10x64xbf16>
    tpu.vector_store %arg17[%c0, %c0_1, %c0_2, %c0_3], %0 {strides = array<i32>} : memref<1x10x10x64xbf16, #tpu.memory_space<vmem>>, vector<1x1x10x64xbf16>,
    %c0_4 = arith.constant 0 : index
    %c9 = arith.constant 9 : index
    %c0_5 = arith.constant 0 : index
    %c0_6 = arith.constant 0 : index
    %3 = vector.load %arg17[%c0_4, %c9, %c0_5, %c0_6] : memref<1x10x10x64xbf16, #tpu.memory_space<vmem>>, vector<1x1x10x64xbf16>
    tpu.vector_store %arg17[%c0_4, %c9, %c0_5, %c0_6], %0 {strides = array<i32>} : memref<1x10x10x64xbf16, #tpu.memory_space<vmem>>, vector<1x1x10x64xbf16>,
    %c0_7 = arith.constant 0 : index
    %c0_8 = arith.constant 0 : index
    %c0_9 = arith.constant 0 : index
    %c0_10 = arith.constant 0 : index
    %4 = vector.load %arg17[%c0_7, %c0_8, %c0_9, %c0_10] : memref<1x10x10x64xbf16, #tpu.memory_space<vmem>>, vector<1x10x1x64xbf16>
    tpu.vector_store %arg17[%c0_7, %c0_8, %c0_9, %c0_10], %1 {strides = array<i32>} : memref<1x10x10x64xbf16, #tpu.memory_space<vmem>>, vector<1x10x1x64xbf16>,
    %c0_11 = arith.constant 0 : index
    %c0_12 = arith.constant 0 : index
    %c9_13 = arith.constant 9 : index
    %c0_14 = arith.constant 0 : index
    %5 = vector.load %arg17[%c0_11, %c0_12, %c9_13, %c0_14] : memref<1x10x10x64xbf16, #tpu.memory_space<vmem>>, vector<1x10x1x64xbf16>
    tpu.vector_store %arg17[%c0_11, %c0_12, %c9_13, %c0_14], %1 {strides = array<i32>} : memref<1x10x10x64xbf16, #tpu.memory_space<vmem>>, vector<1x10x1x64xbf16>,
    %cst_15 = arith.constant 0.000000e+00 : bf16
    %6 = vector.broadcast %cst_15 : bf16 to vector<1x1x6x128xbf16>
    %cst_16 = arith.constant 0.000000e+00 : bf16
    %7 = vector.broadcast %cst_16 : bf16 to vector<1x6x1x128xbf16>
    %c0_17 = arith.constant 0 : index
    %c0_18 = arith.constant 0 : index
    %c0_19 = arith.constant 0 : index
    %c0_20 = arith.constant 0 : index
    %8 = vector.load %arg19[%c0_17, %c0_18, %c0_19, %c0_20] : memref<1x6x6x128xbf16, #tpu.memory_space<vmem>>, vector<1x1x6x128xbf16>
    tpu.vector_store %arg19[%c0_17, %c0_18, %c0_19, %c0_20], %6 {strides = array<i32>} : memref<1x6x6x128xbf16, #tpu.memory_space<vmem>>, vector<1x1x6x128xbf16>,
    %c0_21 = arith.constant 0 : index
    %c5 = arith.constant 5 : index
    %c0_22 = arith.constant 0 : index
    %c0_23 = arith.constant 0 : index
    %9 = vector.load %arg19[%c0_21, %c5, %c0_22, %c0_23] : memref<1x6x6x128xbf16, #tpu.memory_space<vmem>>, vector<1x1x6x128xbf16>
    tpu.vector_store %arg19[%c0_21, %c5, %c0_22, %c0_23], %6 {strides = array<i32>} : memref<1x6x6x128xbf16, #tpu.memory_space<vmem>>, vector<1x1x6x128xbf16>,
    %c0_24 = arith.constant 0 : index
    %c0_25 = arith.constant 0 : index
    %c0_26 = arith.constant 0 : index
    %c0_27 = arith.constant 0 : index
    %10 = vector.load %arg19[%c0_24, %c0_25, %c0_26, %c0_27] : memref<1x6x6x128xbf16, #tpu.memory_space<vmem>>, vector<1x6x1x128xbf16>
    tpu.vector_store %arg19[%c0_24, %c0_25, %c0_26, %c0_27], %7 {strides = array<i32>} : memref<1x6x6x128xbf16, #tpu.memory_space<vmem>>, vector<1x6x1x128xbf16>,
    %c0_28 = arith.constant 0 : index
    %c0_29 = arith.constant 0 : index
    %c5_30 = arith.constant 5 : index
    %c0_31 = arith.constant 0 : index
    %11 = vector.load %arg19[%c0_28, %c0_29, %c5_30, %c0_31] : memref<1x6x6x128xbf16, #tpu.memory_space<vmem>>, vector<1x6x1x128xbf16>
    tpu.vector_store %arg19[%c0_28, %c0_29, %c5_30, %c0_31], %7 {strides = array<i32>} : memref<1x6x6x128xbf16, #tpu.memory_space<vmem>>, vector<1x6x1x128xbf16>,
    %c0_32 = arith.constant 0 : index
    %c0_33 = arith.constant 0 : index
    %c0_34 = arith.constant 0 : index
    %12 = vector.load %arg1[%c0_32, %c0_33, %c0_34] : memref<1x256x32xbf16, #tpu.memory_space<vmem>>, vector<1x256x32xbf16>
    %13 = vector.shape_cast %12 : vector<1x256x32xbf16> to vector<256x32xbf16>
    %c0_35 = arith.constant 0 : index
    %c0_36 = arith.constant 0 : index
    %14 = vector.load %arg2[%c0_35, %c0_36] : memref<32x64xbf16, #tpu.memory_space<vmem>>, vector<32x64xbf16>
    %cst_37 = arith.constant dense<0.000000e+00> : vector<256x64xf32>
    %15 = tpu.matmul %13, %14, %cst_37 {dimension_numbers = #tpu.dot_dimension_numbers<[1], [0], [0], [1], [0, 0, 1, 1], [], []>} : vector<256x32xbf16>, vector<32x64xbf16>, vector<256x64xf32> -> vector<256x64xf32>
    %c0_38 = arith.constant 0 : index
    %c0_39 = arith.constant 0 : index
    %16 = vector.load %arg3[%c0_38, %c0_39] : memref<1x64xf32, #tpu.memory_space<vmem>>, vector<1x64xf32>
    %17 = vector.broadcast %16 : vector<1x64xf32> to vector<256x64xf32>
    %18 = arith.addf %15, %17 : vector<256x64xf32>
    %cst_40 = arith.constant 0.000000e+00 : f32
    %19 = vector.broadcast %cst_40 : f32 to vector<256x64xf32>
    %20 = arith.maximumf %18, %19 : vector<256x64xf32>
    %21 = vector.shape_cast %20 : vector<256x64xf32> to vector<1x16x16x64xf32>
    %22 = vector.shape_cast %21 : vector<1x16x16x64xf32> to vector<1x16x8x2x64xf32>
    %cst_41 = arith.constant dense<0xFF800000> : vector<1x16x8x64xf32>
    %23 = vector.multi_reduction <maximumf>, %22, %cst_41 [3] : vector<1x16x8x2x64xf32> to vector<1x16x8x64xf32>
    %24 = vector.shape_cast %23 : vector<1x16x8x64xf32> to vector<1x8x2x8x64xf32>
    %cst_42 = arith.constant dense<0xFF800000> : vector<1x8x8x64xf32>
    %25 = vector.multi_reduction <maximumf>, %24, %cst_42 [2] : vector<1x8x2x8x64xf32> to vector<1x8x8x64xf32>
    %26 = arith.truncf %25 : vector<1x8x8x64xf32> to vector<1x8x8x64xbf16>
    %c0_43 = arith.constant 0 : index
    %c1 = arith.constant 1 : index
    %c1_44 = arith.constant 1 : index
    %c0_45 = arith.constant 0 : index
    %27 = vector.load %arg17[%c0_43, %c1, %c1_44, %c0_45] : memref<1x10x10x64xbf16, #tpu.memory_space<vmem>>, vector<1x8x8x64xbf16>
    tpu.vector_store %arg17[%c0_43, %c1, %c1_44, %c0_45], %26 {strides = array<i32>} : memref<1x10x10x64xbf16, #tpu.memory_space<vmem>>, vector<1x8x8x64xbf16>,
    %c0_46 = arith.constant 0 : index
    %c0_47 = arith.constant 0 : index
    %c0_48 = arith.constant 0 : index
    %c0_49 = arith.constant 0 : index
    %28 = vector.load %arg17[%c0_46, %c0_47, %c0_48, %c0_49] : memref<1x10x10x64xbf16, #tpu.memory_space<vmem>>, vector<1x8x8x64xbf16>
    %c0_50 = arith.constant 0 : index
    %c0_51 = arith.constant 0 : index
    %c1_52 = arith.constant 1 : index
    %c0_53 = arith.constant 0 : index
    %29 = vector.load %arg17[%c0_50, %c0_51, %c1_52, %c0_53] : memref<1x10x10x64xbf16, #tpu.memory_space<vmem>>, vector<1x8x8x64xbf16>
    %30 = tpu.concatenate %28, %29 in 3 : vector<1x8x8x64xbf16>, vector<1x8x8x64xbf16> -> vector<1x8x8x128xbf16>
    %31 = vector.shape_cast %30 : vector<1x8x8x128xbf16> to vector<64x128xbf16>
    %c0_54 = arith.constant 0 : index
    %c0_55 = arith.constant 0 : index
    %32 = vector.load %arg18[%c0_54, %c0_55] : memref<64x576xbf16, #tpu.memory_space<vmem>>, vector<64x128xbf16>
    tpu.vector_store %arg18[%c0_54, %c0_55], %31 {strides = array<i32>} : memref<64x576xbf16, #tpu.memory_space<vmem>>, vector<64x128xbf16>,
    %c0_56 = arith.constant 0 : index
    %c0_57 = arith.constant 0 : index
    %c2 = arith.constant 2 : index
    %c0_58 = arith.constant 0 : index
    %33 = vector.load %arg17[%c0_56, %c0_57, %c2, %c0_58] : memref<1x10x10x64xbf16, #tpu.memory_space<vmem>>, vector<1x8x8x64xbf16>
    %c0_59 = arith.constant 0 : index
    %c1_60 = arith.constant 1 : index
    %c0_61 = arith.constant 0 : index
    %c0_62 = arith.constant 0 : index
    %34 = vector.load %arg17[%c0_59, %c1_60, %c0_61, %c0_62] : memref<1x10x10x64xbf16, #tpu.memory_space<vmem>>, vector<1x8x8x64xbf16>
    %35 = tpu.concatenate %33, %34 in 3 : vector<1x8x8x64xbf16>, vector<1x8x8x64xbf16> -> vector<1x8x8x128xbf16>
    %36 = vector.shape_cast %35 : vector<1x8x8x128xbf16> to vector<64x128xbf16>
    %c0_63 = arith.constant 0 : index
    %c128 = arith.constant 128 : index
    %37 = vector.load %arg18[%c0_63, %c128] : memref<64x576xbf16, #tpu.memory_space<vmem>>, vector<64x128xbf16>
    tpu.vector_store %arg18[%c0_63, %c128], %36 {strides = array<i32>} : memref<64x576xbf16, #tpu.memory_space<vmem>>, vector<64x128xbf16>,
    %c0_64 = arith.constant 0 : index
    %c1_65 = arith.constant 1 : index
    %c1_66 = arith.constant 1 : index
    %c0_67 = arith.constant 0 : index
    %38 = vector.load %arg17[%c0_64, %c1_65, %c1_66, %c0_67] : memref<1x10x10x64xbf16, #tpu.memory_space<vmem>>, vector<1x8x8x64xbf16>
    %c0_68 = arith.constant 0 : index
    %c1_69 = arith.constant 1 : index
    %c2_70 = arith.constant 2 : index
    %c0_71 = arith.constant 0 : index
    %39 = vector.load %arg17[%c0_68, %c1_69, %c2_70, %c0_71] : memref<1x10x10x64xbf16, #tpu.memory_space<vmem>>, vector<1x8x8x64xbf16>
    %40 = tpu.concatenate %38, %39 in 3 : vector<1x8x8x64xbf16>, vector<1x8x8x64xbf16> -> vector<1x8x8x128xbf16>
    %41 = vector.shape_cast %40 : vector<1x8x8x128xbf16> to vector<64x128xbf16>
    %c0_72 = arith.constant 0 : index
    %c256 = arith.constant 256 : index
    %42 = vector.load %arg18[%c0_72, %c256] : memref<64x576xbf16, #tpu.memory_space<vmem>>, vector<64x128xbf16>
    tpu.vector_store %arg18[%c0_72, %c256], %41 {strides = array<i32>} : memref<64x576xbf16, #tpu.memory_space<vmem>>, vector<64x128xbf16>,
    %c0_73 = arith.constant 0 : index
    %c2_74 = arith.constant 2 : index
    %c0_75 = arith.constant 0 : index
    %c0_76 = arith.constant 0 : index
    %43 = vector.load %arg17[%c0_73, %c2_74, %c0_75, %c0_76] : memref<1x10x10x64xbf16, #tpu.memory_space<vmem>>, vector<1x8x8x64xbf16>
    %c0_77 = arith.constant 0 : index
    %c2_78 = arith.constant 2 : index
    %c1_79 = arith.constant 1 : index
    %c0_80 = arith.constant 0 : index
    %44 = vector.load %arg17[%c0_77, %c2_78, %c1_79, %c0_80] : memref<1x10x10x64xbf16, #tpu.memory_space<vmem>>, vector<1x8x8x64xbf16>
    %45 = tpu.concatenate %43, %44 in 3 : vector<1x8x8x64xbf16>, vector<1x8x8x64xbf16> -> vector<1x8x8x128xbf16>
    %46 = vector.shape_cast %45 : vector<1x8x8x128xbf16> to vector<64x128xbf16>
    %c0_81 = arith.constant 0 : index
    %c384 = arith.constant 384 : index
    %47 = vector.load %arg18[%c0_81, %c384] : memref<64x576xbf16, #tpu.memory_space<vmem>>, vector<64x128xbf16>
    tpu.vector_store %arg18[%c0_81, %c384], %46 {strides = array<i32>} : memref<64x576xbf16, #tpu.memory_space<vmem>>, vector<64x128xbf16>,
    %c0_82 = arith.constant 0 : index
    %c2_83 = arith.constant 2 : index
    %c2_84 = arith.constant 2 : index
    %c0_85 = arith.constant 0 : index
    %48 = vector.load %arg17[%c0_82, %c2_83, %c2_84, %c0_85] : memref<1x10x10x64xbf16, #tpu.memory_space<vmem>>, vector<1x8x8x64xbf16>
    %49 = vector.shape_cast %48 : vector<1x8x8x64xbf16> to vector<64x64xbf16>
    %c0_86 = arith.constant 0 : index
    %c512 = arith.constant 512 : index
    %50 = vector.load %arg18[%c0_86, %c512] : memref<64x576xbf16, #tpu.memory_space<vmem>>, vector<64x64xbf16>
    tpu.vector_store %arg18[%c0_86, %c512], %49 {strides = array<i32>} : memref<64x576xbf16, #tpu.memory_space<vmem>>, vector<64x64xbf16>,
    %c0_87 = arith.constant 0 : index
    %c0_88 = arith.constant 0 : index
    %51 = vector.load %arg18[%c0_87, %c0_88] : memref<64x576xbf16, #tpu.memory_space<vmem>>, vector<64x576xbf16>
    %c0_89 = arith.constant 0 : index
    %c0_90 = arith.constant 0 : index
    %52 = vector.load %arg4[%c0_89, %c0_90] : memref<576x64xbf16, #tpu.memory_space<vmem>>, vector<576x64xbf16>
    %cst_91 = arith.constant dense<0.000000e+00> : vector<64x64xf32>
    %53 = tpu.matmul %51, %52, %cst_91 {dimension_numbers = #tpu.dot_dimension_numbers<[1], [0], [0], [1], [0, 0, 1, 1], [], []>} : vector<64x576xbf16>, vector<576x64xbf16>, vector<64x64xf32> -> vector<64x64xf32>
    %c0_92 = arith.constant 0 : index
    %c0_93 = arith.constant 0 : index
    %54 = vector.load %arg5[%c0_92, %c0_93] : memref<1x64xf32, #tpu.memory_space<vmem>>, vector<1x64xf32>
    %55 = vector.broadcast %54 : vector<1x64xf32> to vector<64x64xf32>
    %56 = arith.addf %53, %55 : vector<64x64xf32>
    %cst_94 = arith.constant 0.000000e+00 : f32
    %57 = vector.broadcast %cst_94 : f32 to vector<64x64xf32>
    %58 = arith.maximumf %56, %57 : vector<64x64xf32>
    %59 = vector.shape_cast %58 : vector<64x64xf32> to vector<1x8x8x64xf32>
    %60 = arith.truncf %59 : vector<1x8x8x64xf32> to vector<1x8x8x64xbf16>
    %c0_95 = arith.constant 0 : index
    %c1_96 = arith.constant 1 : index
    %c1_97 = arith.constant 1 : index
    %c0_98 = arith.constant 0 : index
    %61 = vector.load %arg17[%c0_95, %c1_96, %c1_97, %c0_98] : memref<1x10x10x64xbf16, #tpu.memory_space<vmem>>, vector<1x8x8x64xbf16>
    tpu.vector_store %arg17[%c0_95, %c1_96, %c1_97, %c0_98], %60 {strides = array<i32>} : memref<1x10x10x64xbf16, #tpu.memory_space<vmem>>, vector<1x8x8x64xbf16>,
    %c0_99 = arith.constant 0 : index
    %c0_100 = arith.constant 0 : index
    %c0_101 = arith.constant 0 : index
    %c0_102 = arith.constant 0 : index
    %62 = vector.load %arg17[%c0_99, %c0_100, %c0_101, %c0_102] : memref<1x10x10x64xbf16, #tpu.memory_space<vmem>>, vector<1x8x8x64xbf16>
    %c0_103 = arith.constant 0 : index
    %c0_104 = arith.constant 0 : index
    %c1_105 = arith.constant 1 : index
    %c0_106 = arith.constant 0 : index
    %63 = vector.load %arg17[%c0_103, %c0_104, %c1_105, %c0_106] : memref<1x10x10x64xbf16, #tpu.memory_space<vmem>>, vector<1x8x8x64xbf16>
    %64 = tpu.concatenate %62, %63 in 3 : vector<1x8x8x64xbf16>, vector<1x8x8x64xbf16> -> vector<1x8x8x128xbf16>
    %65 = vector.shape_cast %64 : vector<1x8x8x128xbf16> to vector<64x128xbf16>
    %c0_107 = arith.constant 0 : index
    %c0_108 = arith.constant 0 : index
    %66 = vector.load %arg18[%c0_107, %c0_108] : memref<64x576xbf16, #tpu.memory_space<vmem>>, vector<64x128xbf16>
    tpu.vector_store %arg18[%c0_107, %c0_108], %65 {strides = array<i32>} : memref<64x576xbf16, #tpu.memory_space<vmem>>, vector<64x128xbf16>,
    %c0_109 = arith.constant 0 : index
    %c0_110 = arith.constant 0 : index
    %c2_111 = arith.constant 2 : index
    %c0_112 = arith.constant 0 : index
    %67 = vector.load %arg17[%c0_109, %c0_110, %c2_111, %c0_112] : memref<1x10x10x64xbf16, #tpu.memory_space<vmem>>, vector<1x8x8x64xbf16>
    %c0_113 = arith.constant 0 : index
    %c1_114 = arith.constant 1 : index
    %c0_115 = arith.constant 0 : index
    %c0_116 = arith.constant 0 : index
    %68 = vector.load %arg17[%c0_113, %c1_114, %c0_115, %c0_116] : memref<1x10x10x64xbf16, #tpu.memory_space<vmem>>, vector<1x8x8x64xbf16>
    %69 = tpu.concatenate %67, %68 in 3 : vector<1x8x8x64xbf16>, vector<1x8x8x64xbf16> -> vector<1x8x8x128xbf16>
    %70 = vector.shape_cast %69 : vector<1x8x8x128xbf16> to vector<64x128xbf16>
    %c0_117 = arith.constant 0 : index
    %c128_118 = arith.constant 128 : index
    %71 = vector.load %arg18[%c0_117, %c128_118] : memref<64x576xbf16, #tpu.memory_space<vmem>>, vector<64x128xbf16>
    tpu.vector_store %arg18[%c0_117, %c128_118], %70 {strides = array<i32>} : memref<64x576xbf16, #tpu.memory_space<vmem>>, vector<64x128xbf16>,
    %c0_119 = arith.constant 0 : index
    %c1_120 = arith.constant 1 : index
    %c1_121 = arith.constant 1 : index
    %c0_122 = arith.constant 0 : index
    %72 = vector.load %arg17[%c0_119, %c1_120, %c1_121, %c0_122] : memref<1x10x10x64xbf16, #tpu.memory_space<vmem>>, vector<1x8x8x64xbf16>
    %c0_123 = arith.constant 0 : index
    %c1_124 = arith.constant 1 : index
    %c2_125 = arith.constant 2 : index
    %c0_126 = arith.constant 0 : index
    %73 = vector.load %arg17[%c0_123, %c1_124, %c2_125, %c0_126] : memref<1x10x10x64xbf16, #tpu.memory_space<vmem>>, vector<1x8x8x64xbf16>
    %74 = tpu.concatenate %72, %73 in 3 : vector<1x8x8x64xbf16>, vector<1x8x8x64xbf16> -> vector<1x8x8x128xbf16>
    %75 = vector.shape_cast %74 : vector<1x8x8x128xbf16> to vector<64x128xbf16>
    %c0_127 = arith.constant 0 : index
    %c256_128 = arith.constant 256 : index
    %76 = vector.load %arg18[%c0_127, %c256_128] : memref<64x576xbf16, #tpu.memory_space<vmem>>, vector<64x128xbf16>
    tpu.vector_store %arg18[%c0_127, %c256_128], %75 {strides = array<i32>} : memref<64x576xbf16, #tpu.memory_space<vmem>>, vector<64x128xbf16>,
    %c0_129 = arith.constant 0 : index
    %c2_130 = arith.constant 2 : index
    %c0_131 = arith.constant 0 : index
    %c0_132 = arith.constant 0 : index
    %77 = vector.load %arg17[%c0_129, %c2_130, %c0_131, %c0_132] : memref<1x10x10x64xbf16, #tpu.memory_space<vmem>>, vector<1x8x8x64xbf16>
    %c0_133 = arith.constant 0 : index
    %c2_134 = arith.constant 2 : index
    %c1_135 = arith.constant 1 : index
    %c0_136 = arith.constant 0 : index
    %78 = vector.load %arg17[%c0_133, %c2_134, %c1_135, %c0_136] : memref<1x10x10x64xbf16, #tpu.memory_space<vmem>>, vector<1x8x8x64xbf16>
    %79 = tpu.concatenate %77, %78 in 3 : vector<1x8x8x64xbf16>, vector<1x8x8x64xbf16> -> vector<1x8x8x128xbf16>
    %80 = vector.shape_cast %79 : vector<1x8x8x128xbf16> to vector<64x128xbf16>
    %c0_137 = arith.constant 0 : index
    %c384_138 = arith.constant 384 : index
    %81 = vector.load %arg18[%c0_137, %c384_138] : memref<64x576xbf16, #tpu.memory_space<vmem>>, vector<64x128xbf16>
    tpu.vector_store %arg18[%c0_137, %c384_138], %80 {strides = array<i32>} : memref<64x576xbf16, #tpu.memory_space<vmem>>, vector<64x128xbf16>,
    %c0_139 = arith.constant 0 : index
    %c2_140 = arith.constant 2 : index
    %c2_141 = arith.constant 2 : index
    %c0_142 = arith.constant 0 : index
    %82 = vector.load %arg17[%c0_139, %c2_140, %c2_141, %c0_142] : memref<1x10x10x64xbf16, #tpu.memory_space<vmem>>, vector<1x8x8x64xbf16>
    %83 = vector.shape_cast %82 : vector<1x8x8x64xbf16> to vector<64x64xbf16>
    %c0_143 = arith.constant 0 : index
    %c512_144 = arith.constant 512 : index
    %84 = vector.load %arg18[%c0_143, %c512_144] : memref<64x576xbf16, #tpu.memory_space<vmem>>, vector<64x64xbf16>
    tpu.vector_store %arg18[%c0_143, %c512_144], %83 {strides = array<i32>} : memref<64x576xbf16, #tpu.memory_space<vmem>>, vector<64x64xbf16>,
    %c0_145 = arith.constant 0 : index
    %c0_146 = arith.constant 0 : index
    %85 = vector.load %arg18[%c0_145, %c0_146] : memref<64x576xbf16, #tpu.memory_space<vmem>>, vector<64x576xbf16>
    %c0_147 = arith.constant 0 : index
    %c0_148 = arith.constant 0 : index
    %86 = vector.load %arg6[%c0_147, %c0_148] : memref<576x64xbf16, #tpu.memory_space<vmem>>, vector<576x64xbf16>
    %cst_149 = arith.constant dense<0.000000e+00> : vector<64x64xf32>
    %87 = tpu.matmul %85, %86, %cst_149 {dimension_numbers = #tpu.dot_dimension_numbers<[1], [0], [0], [1], [0, 0, 1, 1], [], []>} : vector<64x576xbf16>, vector<576x64xbf16>, vector<64x64xf32> -> vector<64x64xf32>
    %c0_150 = arith.constant 0 : index
    %c0_151 = arith.constant 0 : index
    %88 = vector.load %arg7[%c0_150, %c0_151] : memref<1x64xf32, #tpu.memory_space<vmem>>, vector<1x64xf32>
    %89 = vector.broadcast %88 : vector<1x64xf32> to vector<64x64xf32>
    %90 = arith.addf %87, %89 : vector<64x64xf32>
    %91 = vector.shape_cast %25 : vector<1x8x8x64xf32> to vector<64x64xf32>
    %92 = arith.addf %90, %91 : vector<64x64xf32>
    %cst_152 = arith.constant 0.000000e+00 : f32
    %93 = vector.broadcast %cst_152 : f32 to vector<64x64xf32>
    %94 = arith.maximumf %92, %93 : vector<64x64xf32>
    %95 = vector.shape_cast %94 : vector<64x64xf32> to vector<1x8x8x64xf32>
    %96 = arith.truncf %95 : vector<1x8x8x64xf32> to vector<1x8x8x64xbf16>
    %c0_153 = arith.constant 0 : index
    %c1_154 = arith.constant 1 : index
    %c1_155 = arith.constant 1 : index
    %c0_156 = arith.constant 0 : index
    %97 = vector.load %arg17[%c0_153, %c1_154, %c1_155, %c0_156] : memref<1x10x10x64xbf16, #tpu.memory_space<vmem>>, vector<1x8x8x64xbf16>
    tpu.vector_store %arg17[%c0_153, %c1_154, %c1_155, %c0_156], %96 {strides = array<i32>} : memref<1x10x10x64xbf16, #tpu.memory_space<vmem>>, vector<1x8x8x64xbf16>,
    %c0_157 = arith.constant 0 : index
    %c0_158 = arith.constant 0 : index
    %c0_159 = arith.constant 0 : index
    %c0_160 = arith.constant 0 : index
    %98 = vector.load %arg17[%c0_157, %c0_158, %c0_159, %c0_160] : memref<1x10x10x64xbf16, #tpu.memory_space<vmem>>, vector<1x8x8x64xbf16>
    %c0_161 = arith.constant 0 : index
    %c0_162 = arith.constant 0 : index
    %c1_163 = arith.constant 1 : index
    %c0_164 = arith.constant 0 : index
    %99 = vector.load %arg17[%c0_161, %c0_162, %c1_163, %c0_164] : memref<1x10x10x64xbf16, #tpu.memory_space<vmem>>, vector<1x8x8x64xbf16>
    %100 = tpu.concatenate %98, %99 in 3 : vector<1x8x8x64xbf16>, vector<1x8x8x64xbf16> -> vector<1x8x8x128xbf16>
    %101 = vector.shape_cast %100 : vector<1x8x8x128xbf16> to vector<64x128xbf16>
    %c0_165 = arith.constant 0 : index
    %c0_166 = arith.constant 0 : index
    %102 = vector.load %arg18[%c0_165, %c0_166] : memref<64x576xbf16, #tpu.memory_space<vmem>>, vector<64x128xbf16>
    tpu.vector_store %arg18[%c0_165, %c0_166], %101 {strides = array<i32>} : memref<64x576xbf16, #tpu.memory_space<vmem>>, vector<64x128xbf16>,
    %c0_167 = arith.constant 0 : index
    %c0_168 = arith.constant 0 : index
    %c2_169 = arith.constant 2 : index
    %c0_170 = arith.constant 0 : index
    %103 = vector.load %arg17[%c0_167, %c0_168, %c2_169, %c0_170] : memref<1x10x10x64xbf16, #tpu.memory_space<vmem>>, vector<1x8x8x64xbf16>
    %c0_171 = arith.constant 0 : index
    %c1_172 = arith.constant 1 : index
    %c0_173 = arith.constant 0 : index
    %c0_174 = arith.constant 0 : index
    %104 = vector.load %arg17[%c0_171, %c1_172, %c0_173, %c0_174] : memref<1x10x10x64xbf16, #tpu.memory_space<vmem>>, vector<1x8x8x64xbf16>
    %105 = tpu.concatenate %103, %104 in 3 : vector<1x8x8x64xbf16>, vector<1x8x8x64xbf16> -> vector<1x8x8x128xbf16>
    %106 = vector.shape_cast %105 : vector<1x8x8x128xbf16> to vector<64x128xbf16>
    %c0_175 = arith.constant 0 : index
    %c128_176 = arith.constant 128 : index
    %107 = vector.load %arg18[%c0_175, %c128_176] : memref<64x576xbf16, #tpu.memory_space<vmem>>, vector<64x128xbf16>
    tpu.vector_store %arg18[%c0_175, %c128_176], %106 {strides = array<i32>} : memref<64x576xbf16, #tpu.memory_space<vmem>>, vector<64x128xbf16>,
    %c0_177 = arith.constant 0 : index
    %c1_178 = arith.constant 1 : index
    %c1_179 = arith.constant 1 : index
    %c0_180 = arith.constant 0 : index
    %108 = vector.load %arg17[%c0_177, %c1_178, %c1_179, %c0_180] : memref<1x10x10x64xbf16, #tpu.memory_space<vmem>>, vector<1x8x8x64xbf16>
    %c0_181 = arith.constant 0 : index
    %c1_182 = arith.constant 1 : index
    %c2_183 = arith.constant 2 : index
    %c0_184 = arith.constant 0 : index
    %109 = vector.load %arg17[%c0_181, %c1_182, %c2_183, %c0_184] : memref<1x10x10x64xbf16, #tpu.memory_space<vmem>>, vector<1x8x8x64xbf16>
    %110 = tpu.concatenate %108, %109 in 3 : vector<1x8x8x64xbf16>, vector<1x8x8x64xbf16> -> vector<1x8x8x128xbf16>
    %111 = vector.shape_cast %110 : vector<1x8x8x128xbf16> to vector<64x128xbf16>
    %c0_185 = arith.constant 0 : index
    %c256_186 = arith.constant 256 : index
    %112 = vector.load %arg18[%c0_185, %c256_186] : memref<64x576xbf16, #tpu.memory_space<vmem>>, vector<64x128xbf16>
    tpu.vector_store %arg18[%c0_185, %c256_186], %111 {strides = array<i32>} : memref<64x576xbf16, #tpu.memory_space<vmem>>, vector<64x128xbf16>,
    %c0_187 = arith.constant 0 : index
    %c2_188 = arith.constant 2 : index
    %c0_189 = arith.constant 0 : index
    %c0_190 = arith.constant 0 : index
    %113 = vector.load %arg17[%c0_187, %c2_188, %c0_189, %c0_190] : memref<1x10x10x64xbf16, #tpu.memory_space<vmem>>, vector<1x8x8x64xbf16>
    %c0_191 = arith.constant 0 : index
    %c2_192 = arith.constant 2 : index
    %c1_193 = arith.constant 1 : index
    %c0_194 = arith.constant 0 : index
    %114 = vector.load %arg17[%c0_191, %c2_192, %c1_193, %c0_194] : memref<1x10x10x64xbf16, #tpu.memory_space<vmem>>, vector<1x8x8x64xbf16>
    %115 = tpu.concatenate %113, %114 in 3 : vector<1x8x8x64xbf16>, vector<1x8x8x64xbf16> -> vector<1x8x8x128xbf16>
    %116 = vector.shape_cast %115 : vector<1x8x8x128xbf16> to vector<64x128xbf16>
    %c0_195 = arith.constant 0 : index
    %c384_196 = arith.constant 384 : index
    %117 = vector.load %arg18[%c0_195, %c384_196] : memref<64x576xbf16, #tpu.memory_space<vmem>>, vector<64x128xbf16>
    tpu.vector_store %arg18[%c0_195, %c384_196], %116 {strides = array<i32>} : memref<64x576xbf16, #tpu.memory_space<vmem>>, vector<64x128xbf16>,
    %c0_197 = arith.constant 0 : index
    %c2_198 = arith.constant 2 : index
    %c2_199 = arith.constant 2 : index
    %c0_200 = arith.constant 0 : index
    %118 = vector.load %arg17[%c0_197, %c2_198, %c2_199, %c0_200] : memref<1x10x10x64xbf16, #tpu.memory_space<vmem>>, vector<1x8x8x64xbf16>
    %119 = vector.shape_cast %118 : vector<1x8x8x64xbf16> to vector<64x64xbf16>
    %c0_201 = arith.constant 0 : index
    %c512_202 = arith.constant 512 : index
    %120 = vector.load %arg18[%c0_201, %c512_202] : memref<64x576xbf16, #tpu.memory_space<vmem>>, vector<64x64xbf16>
    tpu.vector_store %arg18[%c0_201, %c512_202], %119 {strides = array<i32>} : memref<64x576xbf16, #tpu.memory_space<vmem>>, vector<64x64xbf16>,
    %c0_203 = arith.constant 0 : index
    %c0_204 = arith.constant 0 : index
    %121 = vector.load %arg18[%c0_203, %c0_204] : memref<64x576xbf16, #tpu.memory_space<vmem>>, vector<64x576xbf16>
    %c0_205 = arith.constant 0 : index
    %c0_206 = arith.constant 0 : index
    %122 = vector.load %arg8[%c0_205, %c0_206] : memref<576x128xbf16, #tpu.memory_space<vmem>>, vector<576x128xbf16>
    %cst_207 = arith.constant dense<0.000000e+00> : vector<64x128xf32>
    %123 = tpu.matmul %121, %122, %cst_207 {dimension_numbers = #tpu.dot_dimension_numbers<[1], [0], [0], [1], [0, 0, 1, 1], [], []>} : vector<64x576xbf16>, vector<576x128xbf16>, vector<64x128xf32> -> vector<64x128xf32>
    %c0_208 = arith.constant 0 : index
    %c0_209 = arith.constant 0 : index
    %124 = vector.load %arg9[%c0_208, %c0_209] : memref<1x128xf32, #tpu.memory_space<vmem>>, vector<1x128xf32>
    %125 = vector.broadcast %124 : vector<1x128xf32> to vector<64x128xf32>
    %126 = arith.addf %123, %125 : vector<64x128xf32>
    %cst_210 = arith.constant 0.000000e+00 : f32
    %127 = vector.broadcast %cst_210 : f32 to vector<64x128xf32>
    %128 = arith.maximumf %126, %127 : vector<64x128xf32>
    %129 = vector.shape_cast %128 : vector<64x128xf32> to vector<1x8x8x128xf32>
    %130 = vector.shape_cast %129 : vector<1x8x8x128xf32> to vector<1x8x4x2x128xf32>
    %cst_211 = arith.constant dense<0xFF800000> : vector<1x8x4x128xf32>
    %131 = vector.multi_reduction <maximumf>, %130, %cst_211 [3] : vector<1x8x4x2x128xf32> to vector<1x8x4x128xf32>
    %132 = vector.shape_cast %131 : vector<1x8x4x128xf32> to vector<1x4x2x4x128xf32>
    %cst_212 = arith.constant dense<0xFF800000> : vector<1x4x4x128xf32>
    %133 = vector.multi_reduction <maximumf>, %132, %cst_212 [2] : vector<1x4x2x4x128xf32> to vector<1x4x4x128xf32>
    %134 = arith.truncf %133 : vector<1x4x4x128xf32> to vector<1x4x4x128xbf16>
    %c0_213 = arith.constant 0 : index
    %c1_214 = arith.constant 1 : index
    %c1_215 = arith.constant 1 : index
    %c0_216 = arith.constant 0 : index
    %135 = vector.load %arg19[%c0_213, %c1_214, %c1_215, %c0_216] : memref<1x6x6x128xbf16, #tpu.memory_space<vmem>>, vector<1x4x4x128xbf16>
    tpu.vector_store %arg19[%c0_213, %c1_214, %c1_215, %c0_216], %134 {strides = array<i32>} : memref<1x6x6x128xbf16, #tpu.memory_space<vmem>>, vector<1x4x4x128xbf16>,
    %c0_217 = arith.constant 0 : index
    %c0_218 = arith.constant 0 : index
    %c0_219 = arith.constant 0 : index
    %c0_220 = arith.constant 0 : index
    %136 = vector.load %arg19[%c0_217, %c0_218, %c0_219, %c0_220] : memref<1x6x6x128xbf16, #tpu.memory_space<vmem>>, vector<1x4x4x128xbf16>
    %137 = vector.shape_cast %136 : vector<1x4x4x128xbf16> to vector<16x128xbf16>
    %c0_221 = arith.constant 0 : index
    %c0_222 = arith.constant 0 : index
    %138 = vector.load %arg20[%c0_221, %c0_222] : memref<16x1152xbf16, #tpu.memory_space<vmem>>, vector<16x128xbf16>
    tpu.vector_store %arg20[%c0_221, %c0_222], %137 {strides = array<i32>} : memref<16x1152xbf16, #tpu.memory_space<vmem>>, vector<16x128xbf16>,
    %c0_223 = arith.constant 0 : index
    %c0_224 = arith.constant 0 : index
    %c1_225 = arith.constant 1 : index
    %c0_226 = arith.constant 0 : index
    %139 = vector.load %arg19[%c0_223, %c0_224, %c1_225, %c0_226] : memref<1x6x6x128xbf16, #tpu.memory_space<vmem>>, vector<1x4x4x128xbf16>
    %140 = vector.shape_cast %139 : vector<1x4x4x128xbf16> to vector<16x128xbf16>
    %c0_227 = arith.constant 0 : index
    %c128_228 = arith.constant 128 : index
    %141 = vector.load %arg20[%c0_227, %c128_228] : memref<16x1152xbf16, #tpu.memory_space<vmem>>, vector<16x128xbf16>
    tpu.vector_store %arg20[%c0_227, %c128_228], %140 {strides = array<i32>} : memref<16x1152xbf16, #tpu.memory_space<vmem>>, vector<16x128xbf16>,
    %c0_229 = arith.constant 0 : index
    %c0_230 = arith.constant 0 : index
    %c2_231 = arith.constant 2 : index
    %c0_232 = arith.constant 0 : index
    %142 = vector.load %arg19[%c0_229, %c0_230, %c2_231, %c0_232] : memref<1x6x6x128xbf16, #tpu.memory_space<vmem>>, vector<1x4x4x128xbf16>
    %143 = vector.shape_cast %142 : vector<1x4x4x128xbf16> to vector<16x128xbf16>
    %c0_233 = arith.constant 0 : index
    %c256_234 = arith.constant 256 : index
    %144 = vector.load %arg20[%c0_233, %c256_234] : memref<16x1152xbf16, #tpu.memory_space<vmem>>, vector<16x128xbf16>
    tpu.vector_store %arg20[%c0_233, %c256_234], %143 {strides = array<i32>} : memref<16x1152xbf16, #tpu.memory_space<vmem>>, vector<16x128xbf16>,
    %c0_235 = arith.constant 0 : index
    %c1_236 = arith.constant 1 : index
    %c0_237 = arith.constant 0 : index
    %c0_238 = arith.constant 0 : index
    %145 = vector.load %arg19[%c0_235, %c1_236, %c0_237, %c0_238] : memref<1x6x6x128xbf16, #tpu.memory_space<vmem>>, vector<1x4x4x128xbf16>
    %146 = vector.shape_cast %145 : vector<1x4x4x128xbf16> to vector<16x128xbf16>
    %c0_239 = arith.constant 0 : index
    %c384_240 = arith.constant 384 : index
    %147 = vector.load %arg20[%c0_239, %c384_240] : memref<16x1152xbf16, #tpu.memory_space<vmem>>, vector<16x128xbf16>
    tpu.vector_store %arg20[%c0_239, %c384_240], %146 {strides = array<i32>} : memref<16x1152xbf16, #tpu.memory_space<vmem>>, vector<16x128xbf16>,
    %c0_241 = arith.constant 0 : index
    %c1_242 = arith.constant 1 : index
    %c1_243 = arith.constant 1 : index
    %c0_244 = arith.constant 0 : index
    %148 = vector.load %arg19[%c0_241, %c1_242, %c1_243, %c0_244] : memref<1x6x6x128xbf16, #tpu.memory_space<vmem>>, vector<1x4x4x128xbf16>
    %149 = vector.shape_cast %148 : vector<1x4x4x128xbf16> to vector<16x128xbf16>
    %c0_245 = arith.constant 0 : index
    %c512_246 = arith.constant 512 : index
    %150 = vector.load %arg20[%c0_245, %c512_246] : memref<16x1152xbf16, #tpu.memory_space<vmem>>, vector<16x128xbf16>
    tpu.vector_store %arg20[%c0_245, %c512_246], %149 {strides = array<i32>} : memref<16x1152xbf16, #tpu.memory_space<vmem>>, vector<16x128xbf16>,
    %c0_247 = arith.constant 0 : index
    %c1_248 = arith.constant 1 : index
    %c2_249 = arith.constant 2 : index
    %c0_250 = arith.constant 0 : index
    %151 = vector.load %arg19[%c0_247, %c1_248, %c2_249, %c0_250] : memref<1x6x6x128xbf16, #tpu.memory_space<vmem>>, vector<1x4x4x128xbf16>
    %152 = vector.shape_cast %151 : vector<1x4x4x128xbf16> to vector<16x128xbf16>
    %c0_251 = arith.constant 0 : index
    %c640 = arith.constant 640 : index
    %153 = vector.load %arg20[%c0_251, %c640] : memref<16x1152xbf16, #tpu.memory_space<vmem>>, vector<16x128xbf16>
    tpu.vector_store %arg20[%c0_251, %c640], %152 {strides = array<i32>} : memref<16x1152xbf16, #tpu.memory_space<vmem>>, vector<16x128xbf16>,
    %c0_252 = arith.constant 0 : index
    %c2_253 = arith.constant 2 : index
    %c0_254 = arith.constant 0 : index
    %c0_255 = arith.constant 0 : index
    %154 = vector.load %arg19[%c0_252, %c2_253, %c0_254, %c0_255] : memref<1x6x6x128xbf16, #tpu.memory_space<vmem>>, vector<1x4x4x128xbf16>
    %155 = vector.shape_cast %154 : vector<1x4x4x128xbf16> to vector<16x128xbf16>
    %c0_256 = arith.constant 0 : index
    %c768 = arith.constant 768 : index
    %156 = vector.load %arg20[%c0_256, %c768] : memref<16x1152xbf16, #tpu.memory_space<vmem>>, vector<16x128xbf16>
    tpu.vector_store %arg20[%c0_256, %c768], %155 {strides = array<i32>} : memref<16x1152xbf16, #tpu.memory_space<vmem>>, vector<16x128xbf16>,
    %c0_257 = arith.constant 0 : index
    %c2_258 = arith.constant 2 : index
    %c1_259 = arith.constant 1 : index
    %c0_260 = arith.constant 0 : index
    %157 = vector.load %arg19[%c0_257, %c2_258, %c1_259, %c0_260] : memref<1x6x6x128xbf16, #tpu.memory_space<vmem>>, vector<1x4x4x128xbf16>
    %158 = vector.shape_cast %157 : vector<1x4x4x128xbf16> to vector<16x128xbf16>
    %c0_261 = arith.constant 0 : index
    %c896 = arith.constant 896 : index
    %159 = vector.load %arg20[%c0_261, %c896] : memref<16x1152xbf16, #tpu.memory_space<vmem>>, vector<16x128xbf16>
    tpu.vector_store %arg20[%c0_261, %c896], %158 {strides = array<i32>} : memref<16x1152xbf16, #tpu.memory_space<vmem>>, vector<16x128xbf16>,
    %c0_262 = arith.constant 0 : index
    %c2_263 = arith.constant 2 : index
    %c2_264 = arith.constant 2 : index
    %c0_265 = arith.constant 0 : index
    %160 = vector.load %arg19[%c0_262, %c2_263, %c2_264, %c0_265] : memref<1x6x6x128xbf16, #tpu.memory_space<vmem>>, vector<1x4x4x128xbf16>
    %161 = vector.shape_cast %160 : vector<1x4x4x128xbf16> to vector<16x128xbf16>
    %c0_266 = arith.constant 0 : index
    %c1024 = arith.constant 1024 : index
    %162 = vector.load %arg20[%c0_266, %c1024] : memref<16x1152xbf16, #tpu.memory_space<vmem>>, vector<16x128xbf16>
    tpu.vector_store %arg20[%c0_266, %c1024], %161 {strides = array<i32>} : memref<16x1152xbf16, #tpu.memory_space<vmem>>, vector<16x128xbf16>,
    %c0_267 = arith.constant 0 : index
    %c0_268 = arith.constant 0 : index
    %163 = vector.load %arg20[%c0_267, %c0_268] : memref<16x1152xbf16, #tpu.memory_space<vmem>>, vector<16x1152xbf16>
    %c0_269 = arith.constant 0 : index
    %c0_270 = arith.constant 0 : index
    %164 = vector.load %arg10[%c0_269, %c0_270] : memref<1152x512xbf16, #tpu.memory_space<vmem>>, vector<1152x512xbf16>
    %cst_271 = arith.constant dense<0.000000e+00> : vector<16x512xf32>
    %165 = tpu.matmul %163, %164, %cst_271 {dimension_numbers = #tpu.dot_dimension_numbers<[1], [0], [0], [1], [0, 0, 1, 1], [], []>} : vector<16x1152xbf16>, vector<1152x512xbf16>, vector<16x512xf32> -> vector<16x512xf32>
    %c0_272 = arith.constant 0 : index
    %c0_273 = arith.constant 0 : index
    %166 = vector.load %arg11[%c0_272, %c0_273] : memref<1x512xf32, #tpu.memory_space<vmem>>, vector<1x512xf32>
    %167 = vector.broadcast %166 : vector<1x512xf32> to vector<16x512xf32>
    %168 = arith.addf %165, %167 : vector<16x512xf32>
    %cst_274 = arith.constant 0.000000e+00 : f32
    %169 = vector.broadcast %cst_274 : f32 to vector<16x512xf32>
    %170 = arith.maximumf %168, %169 : vector<16x512xf32>
    %171 = vector.shape_cast %170 : vector<16x512xf32> to vector<1x4x4x512xf32>
    %172 = vector.shape_cast %171 : vector<1x4x4x512xf32> to vector<1x16x512xf32>
    %cst_275 = arith.constant dense<0.000000e+00> : vector<1x512xf32>
    %173 = vector.multi_reduction <add>, %172, %cst_275 [1] : vector<1x16x512xf32> to vector<1x512xf32>
    %cst_276 = arith.constant 6.250000e-02 : f32
    %174 = vector.broadcast %cst_276 : f32 to vector<1x512xf32>
    %175 = arith.mulf %173, %174 : vector<1x512xf32>
    %176 = arith.truncf %175 : vector<1x512xf32> to vector<1x512xbf16>
    %c0_277 = arith.constant 0 : index
    %c0_278 = arith.constant 0 : index
    %177 = vector.load %arg12[%c0_277, %c0_278] : memref<512x32xbf16, #tpu.memory_space<vmem>>, vector<512x32xbf16>
    %cst_279 = arith.constant dense<0.000000e+00> : vector<1x32xf32>
    %178 = tpu.matmul %176, %177, %cst_279 {dimension_numbers = #tpu.dot_dimension_numbers<[1], [0], [0], [1], [0, 0, 1, 1], [], []>} : vector<1x512xbf16>, vector<512x32xbf16>, vector<1x32xf32> -> vector<1x32xf32>
    %c0_280 = arith.constant 0 : index
    %c0_281 = arith.constant 0 : index
    %179 = vector.load %arg13[%c0_280, %c0_281] : memref<1x32xf32, #tpu.memory_space<vmem>>, vector<1x32xf32>
    %180 = arith.addf %178, %179 : vector<1x32xf32>
    %cst_282 = arith.constant 0.000000e+00 : f32
    %181 = vector.broadcast %cst_282 : f32 to vector<1x32xf32>
    %182 = arith.maximumf %180, %181 : vector<1x32xf32>
    %c0_283 = arith.constant 0 : index
    %c0_284 = arith.constant 0 : index
    %183 = vector.load %arg14[%c0_283, %c0_284] : memref<1x32xf32, #tpu.memory_space<vmem>>, vector<1x32xf32>
    %184 = arith.mulf %182, %183 : vector<1x32xf32>
    %cst_285 = arith.constant dense<0.000000e+00> : vector<1xf32>
    %185 = vector.multi_reduction <add>, %184, %cst_285 [1] : vector<1x32xf32> to vector<1xf32>
    %186 = vector.shape_cast %185 : vector<1xf32> to vector<1x1xf32>
    %c0_286 = arith.constant 0 : index
    %c0_287 = arith.constant 0 : index
    %187 = vector.load %arg15[%c0_286, %c0_287] : memref<1x1xf32, #tpu.memory_space<vmem>>, vector<1x1xf32>
    %188 = arith.addf %186, %187 : vector<1x1xf32>
    %cst_288 = arith.constant 0.000000e+00 : f32
    %189 = vector.broadcast %cst_288 : f32 to vector<1x1xf32>
    %190 = arith.subf %189, %188 : vector<1x1xf32>
    %191 = math.exp %190 : vector<1x1xf32>
    %cst_289 = arith.constant 1.000000e+00 : f32
    %192 = vector.broadcast %cst_289 : f32 to vector<1x1xf32>
    %193 = arith.addf %192, %191 : vector<1x1xf32>
    %cst_290 = arith.constant 1.000000e+00 : f32
    %194 = vector.broadcast %cst_290 : f32 to vector<1x1xf32>
    %195 = arith.divf %194, %193 : vector<1x1xf32>
    %196 = vector.shape_cast %195 : vector<1x1xf32> to vector<1x1x1xf32>
    %c0_291 = arith.constant 0 : index
    %c0_292 = arith.constant 0 : index
    %c0_293 = arith.constant 0 : index
    %197 = vector.load %arg16[%c0_291, %c0_292, %c0_293] : memref<1x1x1xf32, #tpu.memory_space<vmem>>, vector<1x1x1xf32>
    tpu.vector_store %arg16[%c0_291, %c0_292, %c0_293], %196 {strides = array<i32>} : memref<1x1x1xf32, #tpu.memory_space<vmem>>, vector<1x1x1xf32>,
    return
  }
  func.func @transform_0(%arg0: i32) -> (i32, i32, i32) {
    %c0_i32 = arith.constant 0 : i32
    %c0_i32_0 = arith.constant 0 : i32
    %c0_i32_1 = arith.constant 0 : i32
    return %arg0, %c0_i32, %c0_i32_0 : i32, i32, i32
  }
  func.func @transform_1(%arg0: i32) -> (i32, i32) {
    %c0_i32 = arith.constant 0 : i32
    %c0_i32_0 = arith.constant 0 : i32
    %c0_i32_1 = arith.constant 0 : i32
    return %c0_i32, %c0_i32_0 : i32, i32
  }
  func.func @transform_2(%arg0: i32) -> (i32, i32) {
    %c0_i32 = arith.constant 0 : i32
    %c0_i32_0 = arith.constant 0 : i32
    %c0_i32_1 = arith.constant 0 : i32
    return %c0_i32, %c0_i32_0 : i32, i32
  }
  func.func @transform_3(%arg0: i32) -> (i32, i32) {
    %c0_i32 = arith.constant 0 : i32
    %c0_i32_0 = arith.constant 0 : i32
    %c0_i32_1 = arith.constant 0 : i32
    return %c0_i32, %c0_i32_0 : i32, i32
  }
  func.func @transform_4(%arg0: i32) -> (i32, i32) {
    %c0_i32 = arith.constant 0 : i32
    %c0_i32_0 = arith.constant 0 : i32
    %c0_i32_1 = arith.constant 0 : i32
    return %c0_i32, %c0_i32_0 : i32, i32
  }
  func.func @transform_5(%arg0: i32) -> (i32, i32) {
    %c0_i32 = arith.constant 0 : i32
    %c0_i32_0 = arith.constant 0 : i32
    %c0_i32_1 = arith.constant 0 : i32
    return %c0_i32, %c0_i32_0 : i32, i32
  }
  func.func @transform_6(%arg0: i32) -> (i32, i32) {
    %c0_i32 = arith.constant 0 : i32
    %c0_i32_0 = arith.constant 0 : i32
    %c0_i32_1 = arith.constant 0 : i32
    return %c0_i32, %c0_i32_0 : i32, i32
  }
  func.func @transform_7(%arg0: i32) -> (i32, i32) {
    %c0_i32 = arith.constant 0 : i32
    %c0_i32_0 = arith.constant 0 : i32
    %c0_i32_1 = arith.constant 0 : i32
    return %c0_i32, %c0_i32_0 : i32, i32
  }
  func.func @transform_8(%arg0: i32) -> (i32, i32) {
    %c0_i32 = arith.constant 0 : i32
    %c0_i32_0 = arith.constant 0 : i32
    %c0_i32_1 = arith.constant 0 : i32
    return %c0_i32, %c0_i32_0 : i32, i32
  }
  func.func @transform_9(%arg0: i32) -> (i32, i32) {
    %c0_i32 = arith.constant 0 : i32
    %c0_i32_0 = arith.constant 0 : i32
    %c0_i32_1 = arith.constant 0 : i32
    return %c0_i32, %c0_i32_0 : i32, i32
  }
  func.func @transform_10(%arg0: i32) -> (i32, i32) {
    %c0_i32 = arith.constant 0 : i32
    %c0_i32_0 = arith.constant 0 : i32
    %c0_i32_1 = arith.constant 0 : i32
    return %c0_i32, %c0_i32_0 : i32, i32
  }
  func.func @transform_11(%arg0: i32) -> (i32, i32) {
    %c0_i32 = arith.constant 0 : i32
    %c0_i32_0 = arith.constant 0 : i32
    %c0_i32_1 = arith.constant 0 : i32
    return %c0_i32, %c0_i32_0 : i32, i32
  }
  func.func @transform_12(%arg0: i32) -> (i32, i32) {
    %c0_i32 = arith.constant 0 : i32
    %c0_i32_0 = arith.constant 0 : i32
    %c0_i32_1 = arith.constant 0 : i32
    return %c0_i32, %c0_i32_0 : i32, i32
  }
  func.func @transform_13(%arg0: i32) -> (i32, i32) {
    %c0_i32 = arith.constant 0 : i32
    %c0_i32_0 = arith.constant 0 : i32
    %c0_i32_1 = arith.constant 0 : i32
    return %c0_i32, %c0_i32_0 : i32, i32
  }
  func.func @transform_14(%arg0: i32) -> (i32, i32) {
    %c0_i32 = arith.constant 0 : i32
    %c0_i32_0 = arith.constant 0 : i32
    %c0_i32_1 = arith.constant 0 : i32
    return %c0_i32, %c0_i32_0 : i32, i32
  }
  func.func @transform_15(%arg0: i32) -> (i32, i32, i32) {
    %c0_i32 = arith.constant 0 : i32
    %c0_i32_0 = arith.constant 0 : i32
    %c0_i32_1 = arith.constant 0 : i32
    return %arg0, %c0_i32, %c0_i32_0 : i32, i32, i32
  }
}

</mosaic_0001>

<bundles_post_ra>
// kernel: cnn_classifier_forward.1
= control target key start
LH: loop header
LB: loop body
LE: loop exit
PB: predicated region body
PF: predicated region fallthrough
CT: control target
= control target key end

     0   :  { %s14929_s20 = smov 0   ;;  %s18741_s0 = inlined_call_operand.vmem [shape: bf16[2,256,32], index: 0, kind: input, shape index: {}]   ;;  %s18742_s1 = inlined_call_operand.vmem [shape: bf16[32,64], index: 1, kind: input, shape index: {}]   ;;  %s18743_s2 = inlined_call_operand.vmem [shape: f32[1,64], index: 2, kind: input, shape index: {}]   ;;  %s18744_s3 = inlined_call_operand.vmem [shape: bf16[576,64], index: 3, kind: input, shape index: {}]   ;;  %s18745_s4 = inlined_call_operand.vmem [shape: f32[1,64], index: 4, kind: input, shape index: {}]   ;;  %s18746_s5 = inlined_call_operand.vmem [shape: bf16[576,64], index: 5, kind: input, shape index: {}]   ;;  %s18747_s6 = inlined_call_operand.vmem [shape: f32[1,64], index: 6, kind: input, shape index: {}]   ;;  %s18748_s7 = inlined_call_operand.vmem [shape: bf16[576,128], index: 7, kind: input, shape index: {}]   ;;  %s18749_s8 = inlined_call_operand.vmem [shape: f32[1,128], index: 8, kind: input, shape index: {}]   ;;  %s18750_s9 = inlined_call_operand.vmem [shape: bf16[1152,512], index: 9, kind: input, shape index: {}]   ;;  %s18751_s10 = inlined_call_operand.vmem [shape: f32[1,512], index: 10, kind: input, shape index: {}]   ;;  %s18752_s11 = inlined_call_operand.vmem [shape: bf16[512,32], index: 11, kind: input, shape index: {}]   ;;  %s18753_s12 = inlined_call_operand.vmem [shape: f32[1,32], index: 12, kind: input, shape index: {}]   ;;  %s18754_s13 = inlined_call_operand.vmem [shape: f32[1,32], index: 13, kind: input, shape index: {}]   ;;  %s18755_s14 = inlined_call_operand.<no memory space> [shape: f32[1,1], index: 14, kind: input, shape index: {}]   ;;  %s18756_s15 = inlined_call_operand.vmem [shape: f32[2,1,1], index: 15, kind: output, shape index: {}]  }
   0x1   :  { %v20_v0 = vstv %s18755_s14 }
   0x2   :  { %21 = vst [vmem:[#allocation6] sm:$0x1] %v20_v0 }
   0x3 LB: > { %s12466_s21 = sadd.s32 4294967295, %s14841_s20   ;;  %p12470_p0 = scmp.ge.s32.totalorder %s14841_s20, 1  ;;  %s14841_s20 = sphi %s14929_s20, %s27_s20  }
   0x4   : > { %p439_p1 = scmp.lt.s32.totalorder %s14841_s20, 3 }
   0x6   : > { %p440_p2 = pnand %p12470_p0, %p439_p1 }
   0x8   : > { %443 = sbr.rel (%p440_p2) target bundleno = 2729 (0xaa9), region = 80 }
   0xd   : > { %v13994_v1 = vld [vmem:[%s18742_s1 + $0x8] sm:$0xff]   ;;  %p485_p3 = scmp.lt.s32.totalorder %s12466_s21, 1  ;;  %v13995_v2 = vld [vmem:[%s18742_s1] sm:$0xff]   ;;  %vm745_vm0 = vcmask 261120   ;;  %vm496_vm1 = vcmask 516096   ;;  %v18811_v23 = vmov 0  ;;  %v1023_v29 = vlaneseq }
   0xe   : > { %13899 = vmatprep.subr.bf16.mxu0 %v13994_v1  ;;  %vm534_vm2 = vsmask.f32 7938  ;;  %v539_v20 = vld [vmem:[#allocation2 + $0xc] sm:$0x1]  ;;  %vm18791_vm4 = vsmask.f32 256 }
   0xf   : > { %s18940_s21 = smov (!%p485_p3, %s12466_s21), 1  ;;  %13900 = vmatpush3.bf16.msra.mxu0 %v13994_v1  ;;  %vm14985_vm3 = vmand %vm496_vm1, %vm534_vm2  ;;  %v507_v22 = vld [vmem:[#allocation2 + $0x8] sm:$0x1]  ;;  %v542_v25 = vld [vmem:[#allocation2 + $0x14] sm:$0x1]  ;;  %v15003_v30 = vshrl.u32 %v1023_v29, 7 }
  0x10   : > { %13901 = vmatprep.subr.bf16.mxu0 %v13995_v2  ;;  %s13468_s25 = sshll.u32 %s18940_s21, 7  ;;  %v540_v21 = vsel %vm14985_vm3, 0, %v539_v20  ;;  %vm14993_vm5 = vmand %vm496_vm1, %vm18791_vm4  ;;  %v543_v26 = vsel %vm14985_vm3, 0, %v542_v25  ;;  %v510_v27 = vld [vmem:[#allocation2 + $0x10] sm:$0x1]  ;;  %vm1691_vm6 = vcmask 517120  }
  0x11   : > { %s14949_s28 = scalar_lea.vmem %s18741_s0, %s13468_s25  ;;  %541 = vst [vmem:[#allocation2 + $0xc] sm:$0x1] %v540_v21  ;;  %v18812_v23 = vsel %vm14993_vm5, 4294967295, %v18811_v23  ;;  %v508_v24 = vsel %vm14993_vm5, 0, %v507_v22  ;;  %544 = vst [vmem:[#allocation2 + $0x14] sm:$0x1] %v543_v26  ;;  %s492_s25 = scalar_lea.vmem %s18756_s15, %s18940_s21 }
  0x12   : > { %v13996_v3 = vld [vmem:[%s14949_s28] sm:$0xff]   ;;  %v13997_v4 = vld [vmem:[%s14949_s28 + $0x8] sm:$0xff]   ;;  %v13998_v5 = vld [vmem:[%s14949_s28 + $0x10] sm:$0xff]   ;;  %18813 = vst [vmem:[#allocation7_spill] sm:$0xff] %v18812_v23  ;;  %v511_v28 = vsel %vm14993_vm5, 0, %v510_v27  ;;  %vm2588_vm7 = vcmask 523264  }
  0x13   : > { %13902 = vmatpush3.bf16.msra.mxu0 %v13995_v2  ;;  %13903 = vmatprep.mubr.msk.bf16.mxu0 %vm745_vm0, %v13996_v3  ;;  %v13999_v6 = vld [vmem:[%s14949_s28 + $0x18] sm:$0xff]   ;;  %v14000_v7 = vld [vmem:[%s14949_s28 + $0x20] sm:$0xff]   ;;  %v14001_v8 = vld [vmem:[%s14949_s28 + $0x28] sm:$0xff]   ;;  %509 = vst [vmem:[#allocation2 + $0x8] sm:$0x1] %v508_v24  ;;  %vm589_vm8 = vcmask 1042434  }
  0x14   : > { %v14002_v9 = vld [vmem:[%s14949_s28 + $0x30] sm:$0xff]   ;;  %v14003_v10 = vld [vmem:[%s14949_s28 + $0x38] sm:$0xff]   ;;  %v14004_v11 = vld [vmem:[%s14949_s28 + $0x40] sm:$0xff]   ;;  %512 = vst [vmem:[#allocation2 + $0x10] sm:$0x1] %v511_v28  ;;  %vm3103_vm9 = vcmask 1043459  }
  0x15   : > { %v14005_v12 = vld [vmem:[%s14949_s28 + $0x48] sm:$0xff]   ;;  %v14006_v13 = vld [vmem:[%s14949_s28 + $0x50] sm:$0xff]   ;;  %v14007_v14 = vld [vmem:[%s14949_s28 + $0x58] sm:$0xff]   ;;  %18814 = vst [vmem:[#allocation8_spill] sm:$0xff] %v15003_v30  ;;  %v14843_v31 = vmov 1983009808  }
  0x16   : > { %13904 = vmatmul.mubr.msk.bf16.vlgmr.msra.gmra.mxu0 %vm745_vm0, %v13997_v4  ;;  %v14008_v15 = vld [vmem:[%s14949_s28 + $0x60] sm:$0xff]   ;;  %v14009_v16 = vld [vmem:[%s14949_s28 + $0x68] sm:$0xff]   ;;  %v14010_v17 = vld [vmem:[%s14949_s28 + $0x70] sm:$0xff]   ;;  %v1021_v32 = vunpack.c.l.s4 %v14843_v31  ;;  %vm3105_vm10 = vcmask 1044484   ;;  %vm3107_vm11 = vcmask 1045509   ;;  %vm3109_vm12 = vcmask 1046534  }
  0x17   : > { %13907 = vmatprep.mubr.msk.bf16.mxu0 %vm745_vm0, %v13998_v5  ;;  %v14011_v18 = vld [vmem:[%s14949_s28 + $0x78] sm:$0xff]   ;;  %v15008_v33 = vld [vmem:[%s18743_s2] ss:$0 sm:$0xff]  ;;  %vm494_vm13 = vcmask 519168   ;;  %vm3111_vm14 = vcmask 1047559   ;;  %s14845_s29 = smov 64  }
  0x18   : > { %v1022_v34 = vunpack.c.0.s8 %v1021_v32  ;;  %vm15122_vm15 = vmand %vm494_vm13, %vm534_vm2  ;;  %vm3583_vm2 = vcmask 1046532  }
  0x1a   : > { %v15012_v37 = vsub.s32 %v1022_v34, %v15003_v30 }
  0x1c   : > { %18815 = vst [vmem:[#allocation9_spill] sm:$0xff] %v15012_v37 }
  0x1e   : > { %13908 = vmatmul.mubr.msk.bf16.gmra.mxu0 %vm745_vm0, %v13999_v6 }
  0x1f   : > { %13911 = vmatprep.mubr.msk.bf16.mxu0 %vm745_vm0, %v14000_v7 }
  0x26   : > { %13912 = vmatmul.mubr.msk.bf16.gmra.mxu0 %vm745_vm0, %v14001_v8 }
  0x27   : > { %13915 = vmatprep.mubr.msk.bf16.mxu0 %vm745_vm0, %v14002_v9 }
  0x2e   : > { %13916 = vmatmul.mubr.msk.bf16.gmra.mxu0 %vm745_vm0, %v14003_v10 }
  0x2f   : > { %13919 = vmatprep.mubr.msk.bf16.mxu0 %vm745_vm0, %v14004_v11 }
  0x36   : > { %13920 = vmatmul.mubr.msk.bf16.gmra.mxu0 %vm745_vm0, %v14005_v12 }
  0x37   : > { %13923 = vmatprep.mubr.msk.bf16.mxu0 %vm745_vm0, %v14006_v13 }
  0x3e   : > { %13924 = vmatmul.mubr.msk.bf16.gmra.mxu0 %vm745_vm0, %v14007_v14 }
  0x3f   : > { %13927 = vmatprep.mubr.msk.bf16.mxu0 %vm745_vm0, %v14008_v15 }
  0x46   : > { %13928 = vmatmul.mubr.msk.bf16.gmra.mxu0 %vm745_vm0, %v14009_v16 }
  0x47   : > { %13931 = vmatprep.mubr.msk.bf16.mxu0 %vm745_vm0, %v14010_v17 }
  0x4e   : > { %13932 = vmatmul.mubr.msk.bf16.gmra.mxu0 %vm745_vm0, %v14011_v18  ;;  %vm6713_vm0 = vcmask 1041409  }
  0xd6   : > { %v13905_v35 = vpop.f32.mrf.mxu0 }
  0xd7   : > { %v837_v36 = vadd.f32 %v13905_v35, %v15008_v33 }
  0xd8   : > { %v828_v38 = vpop.f32.mrf.mxu0 }
  0xd9   : > { %v957_v39 = vmax.f32 %v837_v36, 0.0  ;;  %v829_v40 = vadd.f32 %v15008_v33, %v828_v38 }
  0xda   : > { %v13906_v41 = vpop.f32.mrf.mxu0 }
  0xdb   : > { %v1053_v42 = vcombine.high %v957_v39, %v957_v39  ;;  %v1060_v43 = vrot.slane %v957_v39, %v15012_v37  ;;  %v955_v44 = vmax.f32 %v829_v40, 0.0  ;;  %v840_v45 = vadd.f32 %v13906_v41, %v15008_v33 }
  0xdc   : > { %v831_v46 = vpop.f32.mrf.mxu0 }
  0xdd   : > { %v1067_v47 = vrot.slane %v1053_v42, %v15012_v37  ;;  %v1068_v48 = vcombine.high %v1060_v43, %v1060_v43  ;;  %v1748_v49 = vsel %vm1691_vm6, %v1060_v43, -inf  ;;  %v1019_v50 = vcombine.high %v955_v44, %v955_v44 }
  0xde   : > { %v1749_v51 = vrot.slane %v1748_v49, 4  ;;  %v1026_v52 = vrot.slane %v955_v44, %v15012_v37  ;;  %v15020_v53 = vmax.f32 %v840_v45, 0.0  ;;  %v15023_v54 = vadd.f32 %v15008_v33, %v831_v46 }
  0xdf   : > { %v1069_v55 = vcombine.high %v1067_v47, %v1067_v47  ;;  %v1755_v56 = vsel %vm1691_vm6, %v1068_v48, -inf  ;;  %v1762_v57 = vsel %vm1691_vm6, %v1067_v47, -inf  ;;  %v1033_v58 = vrot.slane %v1019_v50, %v15012_v37 }
  0xe0   : > { %v1750_v59 = vmax.f32 %v1748_v49, %v1749_v51  ;;  %v1756_v60 = vrot.slane %v1755_v56, 4  ;;  %v1763_v61 = vrot.slane %v1762_v57, 4  ;;  %v1034_v62 = vcombine.high %v1026_v52, %v1026_v52 }
  0xe1   : > { %v1769_v63 = vsel %vm1691_vm6, %v1069_v55, -inf  ;;  %v1035_v0 = vcombine.high %v1033_v58, %v1033_v58  ;;  %v1692_v1 = vsel %vm1691_vm6, %v1026_v52, -inf  ;;  %v1706_v2 = vsel %vm1691_vm6, %v1033_v58, -inf }
  0xe2   : > { %v1751_v3 = vrot.slane %v1750_v59, 2  ;;  %v1757_v4 = vmax.f32 %v1755_v56, %v1756_v60  ;;  %v1764_v5 = vmax.f32 %v1762_v57, %v1763_v61  ;;  %v1770_v6 = vrot.slane %v1769_v63, 4 }
  0xe3   : > { %v1693_v7 = vrot.slane %v1692_v1, 4  ;;  %v1699_v8 = vsel %vm1691_vm6, %v1034_v62, -inf  ;;  %v1707_v9 = vrot.slane %v1706_v2, 4  ;;  %v1713_v10 = vsel %vm1691_vm6, %v1035_v0, -inf }
  0xe4   : > { %v1752_v11 = vmax.f32 %v1750_v59, %v1751_v3  ;;  %v1758_v12 = vrot.slane %v1757_v4, 2  ;;  %v1765_v13 = vrot.slane %v1764_v5, 2  ;;  %v1771_v14 = vmax.f32 %v1769_v63, %v1770_v6 }
  0xe5   : > { %v1694_v15 = vmax.f32 %v1692_v1, %v1693_v7  ;;  %v1700_v16 = vrot.slane %v1699_v8, 4  ;;  %v1708_v17 = vmax.f32 %v1706_v2, %v1707_v9  ;;  %v1714_v18 = vrot.slane %v1713_v10, 4 }
  0xe6   : > { %v1753_v20 = vrot.slane %v1752_v11, 1  ;;  %v1759_v21 = vmax.f32 %v1757_v4, %v1758_v12  ;;  %v1766_v22 = vmax.f32 %v1764_v5, %v1765_v13  ;;  %v1772_v24 = vrot.slane %v1771_v14, 2 }
  0xe7   : > { %v1695_v25 = vrot.slane %v1694_v15, 2  ;;  %v1701_v26 = vmax.f32 %v1699_v8, %v1700_v16  ;;  %v1709_v27 = vrot.slane %v1708_v17, 2  ;;  %v1715_v28 = vmax.f32 %v1713_v10, %v1714_v18 }
  0xe8   : > { %v1754_v29 = vmax.f32 %v1752_v11, %v1753_v20  ;;  %v1760_v31 = vrot.slane %v1759_v21, 1  ;;  %v1767_v32 = vrot.slane %v1766_v22, 1  ;;  %v1773_v34 = vmax.f32 %v1771_v14, %v1772_v24 }
  0xe9   : > { %v1696_v35 = vmax.f32 %v1694_v15, %v1695_v25  ;;  %v1702_v36 = vrot.slane %v1701_v26, 2  ;;  %v1710_v38 = vmax.f32 %v1708_v17, %v1709_v27  ;;  %v1716_v39 = vrot.slane %v1715_v28, 2 }
  0xea   : > { %v1761_v40 = vmax.f32 %v1759_v21, %v1760_v31  ;;  %v1768_v41 = vmax.f32 %v1766_v22, %v1767_v32  ;;  %v1774_v42 = vrot.slane %v1773_v34, 1  ;;  %v2590_v43 = vsel %vm2588_vm7, %v1754_v29, -inf }
  0xeb   : > { %v1697_v44 = vrot.slane %v1696_v35, 1  ;;  %v1703_v45 = vmax.f32 %v1701_v26, %v1702_v36  ;;  %v1711_v46 = vrot.slane %v1710_v38, 1  ;;  %v1717_v47 = vmax.f32 %v1715_v28, %v1716_v39  ;;  %v13909_v26 = vpop.f32.mrf.mxu0 }
  0xec   : > { %v1775_v48 = vmax.f32 %v1773_v34, %v1774_v42  ;;  %v2593_v49 = vsel %vm2588_vm7, %v1761_v40, -inf  ;;  %v2596_v50 = vsel %vm2588_vm7, %v1768_v41, -inf  ;;  %v1070_v51 = vcombine.high %v15020_v53, %v15020_v53 }
  0xed   : > { %v1698_v52 = vmax.f32 %v1696_v35, %v1697_v44  ;;  %v1704_v55 = vrot.slane %v1703_v45, 1  ;;  %v1712_v56 = vmax.f32 %v1710_v38, %v1711_v46  ;;  %v1718_v57 = vrot.slane %v1717_v47, 1  ;;  %v844_v46 = vpop.f32.mrf.mxu0 }
  0xee   : > { %v2599_v58 = vsel %vm2588_vm7, %v1775_v48, -inf  ;;  %v1077_v59 = vrot.slane %v15020_v53, %v15012_v37  ;;  %v1084_v60 = vrot.slane %v1070_v51, %v15012_v37  ;;  %v956_v61 = vmax.f32 %v15023_v54, 0.0 }
  0xef   : > { %v1705_v62 = vmax.f32 %v1703_v45, %v1704_v55  ;;  %v1719_v63 = vmax.f32 %v1717_v47, %v1718_v57  ;;  %v2589_v0 = vsel %vm2588_vm7, %v1698_v52, -inf  ;;  %v2595_v1 = vsel %vm2588_vm7, %v1712_v56, -inf }
  0xf0   : > { %v15045_v2 = vmax.f32 %v2589_v0, %v2590_v43  ;;  %v15047_v3 = vmax.f32 %v2595_v1, %v2596_v50  ;;  %v1085_v4 = vcombine.high %v1077_v59, %v1077_v59  ;;  %v1086_v5 = vcombine.high %v1084_v60, %v1084_v60  ;;  %v13910_v1 = vpop.f32.mrf.mxu0 }
  0xf1   : > { %v2592_v53 = vsel %vm2588_vm7, %v1705_v62, -inf  ;;  %v2598_v6 = vsel %vm2588_vm7, %v1719_v63, -inf  ;;  %v1776_v54 = vsel %vm1691_vm6, %v1077_v59, -inf  ;;  %v1790_v7 = vsel %vm1691_vm6, %v1084_v60, -inf }
  0xf2   : > { %v15053_v8 = vmax.f32 %v2592_v53, %v2593_v49  ;;  %v15055_v9 = vmax.f32 %v2598_v6, %v2599_v58  ;;  %v13469_v10 = vpack.c.bf16 %v15045_v2, %v15045_v2  ;;  %v13471_v11 = vpack.c.bf16 %v15047_v3, %v15047_v3 }
  0xf3   : > { %v1777_v12 = vrot.slane %v1776_v54, 4  ;;  %v1783_v13 = vsel %vm1691_vm6, %v1085_v4, -inf  ;;  %v1791_v14 = vrot.slane %v1790_v7, 4  ;;  %v1797_v15 = vsel %vm1691_vm6, %v1086_v5, -inf }
  0xf4   : > { %18816 = vst [vmem:[#allocation10_spill] sm:$0xff] %v15055_v9  ;;  %v13470_v16 = vpack.c.bf16 %v15053_v8, %v15053_v8  ;;  %v13472_v17 = vpack.c.bf16 %v15055_v9, %v15055_v9  ;;  %v3037_v18 = vunpack.c.l.b16 %v13469_v10  ;;  %v3039_v20 = vunpack.c.l.b16 %v13471_v11 }
  0xf5   : > { %v1778_v21 = vmax.f32 %v1776_v54, %v1777_v12  ;;  %v1784_v22 = vrot.slane %v1783_v13, 4  ;;  %v1792_v24 = vmax.f32 %v1790_v7, %v1791_v14  ;;  %v1798_v25 = vrot.slane %v1797_v15, 4 }
  0xf6   : > { %v3038_v27 = vunpack.c.l.b16 %v13470_v16  ;;  %v3040_v28 = vunpack.c.l.b16 %v13472_v17  ;;  %v1036_v29 = vcombine.high %v956_v61, %v956_v61  ;;  %v1043_v31 = vrot.slane %v956_v61, %v15012_v37 }
  0xf7   : > { %v1779_v32 = vrot.slane %v1778_v21, 2  ;;  %v1785_v34 = vmax.f32 %v1783_v13, %v1784_v22  ;;  %v1793_v35 = vrot.slane %v1792_v24, 2  ;;  %v1799_v36 = vmax.f32 %v1797_v15, %v1798_v25 }
  0xf8   : > { %v3102_v38 = vsel %vm589_vm8, %v3038_v27, %v3037_v18  ;;  %v1050_v39 = vrot.slane %v1036_v29, %v15012_v37  ;;  %v1051_v40 = vcombine.high %v1043_v31, %v1043_v31  ;;  %v1720_v41 = vsel %vm1691_vm6, %v1043_v31, -inf }
  0xf9   : > { %v3104_v42 = vsel %vm3103_vm9, %v3039_v20, %v3102_v38  ;;  %v1780_v43 = vmax.f32 %v1778_v21, %v1779_v32  ;;  %v1786_v44 = vrot.slane %v1785_v34, 2  ;;  %v1794_v45 = vmax.f32 %v1792_v24, %v1793_v35  ;;  %v847_v21 = vpop.f32.mrf.mxu0 }
  0xfa   : > { %v1800_v47 = vrot.slane %v1799_v36, 2  ;;  %v1052_v48 = vcombine.high %v1050_v39, %v1050_v39  ;;  %v1721_v49 = vrot.slane %v1720_v41, 4  ;;  %v1727_v50 = vsel %vm1691_vm6, %v1051_v40, -inf }
  0xfb   : > { %v1781_v51 = vrot.slane %v1780_v43, 1  ;;  %v1787_v52 = vmax.f32 %v1785_v34, %v1786_v44  ;;  %v1795_v55 = vrot.slane %v1794_v45, 1  ;;  %v1728_v56 = vrot.slane %v1727_v50, 4 }
  0xfc   : > { %v1801_v57 = vmax.f32 %v1799_v36, %v1800_v47  ;;  %v1722_v58 = vmax.f32 %v1720_v41, %v1721_v49  ;;  %v1734_v59 = vsel %vm1691_vm6, %v1050_v39, -inf  ;;  %v1741_v60 = vsel %vm1691_vm6, %v1052_v48, -inf }
  0xfd   : > { %v1782_v61 = vmax.f32 %v1780_v43, %v1781_v51  ;;  %v1788_v62 = vrot.slane %v1787_v52, 1  ;;  %v1796_v63 = vmax.f32 %v1794_v45, %v1795_v55  ;;  %v1729_v0 = vmax.f32 %v1727_v50, %v1728_v56 }
  0xfe   : > { %v1802_v4 = vrot.slane %v1801_v57, 1  ;;  %v1723_v5 = vrot.slane %v1722_v58, 2  ;;  %v1735_v53 = vrot.slane %v1734_v59, 4  ;;  %v1742_v6 = vrot.slane %v1741_v60, 4 }
  0xff   : > { %v1789_v54 = vmax.f32 %v1787_v52, %v1788_v62  ;;  %v2602_v7 = vsel %vm2588_vm7, %v1782_v61, -inf  ;;  %v2608_v10 = vsel %vm2588_vm7, %v1796_v63, -inf  ;;  %v1730_v11 = vrot.slane %v1729_v0, 2 }
 0x100   : > { %v1803_v12 = vmax.f32 %v1801_v57, %v1802_v4  ;;  %v1724_v13 = vmax.f32 %v1722_v58, %v1723_v5  ;;  %v1736_v14 = vmax.f32 %v1734_v59, %v1735_v53  ;;  %v1743_v15 = vmax.f32 %v1741_v60, %v1742_v6  ;;  %v3193_v6 = vld [vmem:[#allocation2 + $0xc] sm:$0x1] }
 0x101   : > { %v2605_v16 = vsel %vm2588_vm7, %v1789_v54, -inf  ;;  %v1731_v17 = vmax.f32 %v1729_v0, %v1730_v11  ;;  %v3106_v18 = vsel %vm3105_vm10, %v3040_v28, %v3104_v42  ;;  %v853_v20 = vadd.f32 %v13909_v26, %v15008_v33 }
 0x102   : > { %v2611_v22 = vsel %vm2588_vm7, %v1803_v12, -inf  ;;  %v1725_v24 = vrot.slane %v1724_v13, 1  ;;  %v1737_v25 = vrot.slane %v1736_v14, 2  ;;  %v1744_v27 = vrot.slane %v1743_v15, 2 }
 0x103   : > { %v1732_v29 = vrot.slane %v1731_v17, 1  ;;  %v961_v31 = vmax.f32 %v853_v20, 0.0  ;;  %v845_v32 = vadd.f32 %v15008_v33, %v844_v46  ;;  %v856_v34 = vadd.f32 %v13910_v1, %v15008_v33 }
 0x104   : > { %v1726_v35 = vmax.f32 %v1724_v13, %v1725_v24  ;;  %v1738_v36 = vmax.f32 %v1736_v14, %v1737_v25  ;;  %v1745_v38 = vmax.f32 %v1743_v15, %v1744_v27  ;;  %v15084_v28 = vadd.f32 %v15008_v33, %v847_v21 }
 0x105   : > { %v1733_v26 = vmax.f32 %v1731_v17, %v1732_v29  ;;  %v1121_v39 = vcombine.high %v961_v31, %v961_v31  ;;  %v1128_v40 = vrot.slane %v961_v31, %v15012_v37  ;;  %v959_v41 = vmax.f32 %v845_v32, 0.0 }
 0x106   : > { %v1739_v42 = vrot.slane %v1738_v36, 1  ;;  %v1746_v43 = vrot.slane %v1745_v38, 1  ;;  %v2601_v44 = vsel %vm2588_vm7, %v1726_v35, -inf  ;;  %v15088_v45 = vmax.f32 %v856_v34, 0.0  ;;  %v3190_v35 = vld [vmem:[#allocation2 + $0x8] sm:$0xf] }
 0x107   : > { %v15090_v46 = vmax.f32 %v2601_v44, %v2602_v7  ;;  %v2604_v47 = vsel %vm2588_vm7, %v1733_v26, -inf  ;;  %v1135_v48 = vrot.slane %v1121_v39, %v15012_v37  ;;  %v1136_v49 = vcombine.high %v1128_v40, %v1128_v40 }
 0x108   : > { %v1740_v50 = vmax.f32 %v1738_v36, %v1739_v42  ;;  %v1747_v51 = vmax.f32 %v1745_v38, %v1746_v43  ;;  %v15094_v52 = vmax.f32 %v2604_v47, %v2605_v16  ;;  %v1860_v55 = vsel %vm1691_vm6, %v1128_v40, -inf }
 0x109   : > { %18817 = vst [vmem:[#allocation11_spill] sm:$0xff] %v15090_v46  ;;  %v13473_v56 = vpack.c.bf16 %v15090_v46, %v15090_v46  ;;  %v1137_v57 = vcombine.high %v1135_v48, %v1135_v48  ;;  %v1861_v58 = vrot.slane %v1860_v55, 4  ;;  %v1867_v59 = vsel %vm1691_vm6, %v1136_v49, -inf }
 0x10a   : > { %18818 = vst [vmem:[#allocation12_spill] sm:$0xff] %v15094_v52  ;;  %v2607_v60 = vsel %vm2588_vm7, %v1740_v50, -inf  ;;  %v2610_v61 = vsel %vm2588_vm7, %v1747_v51, -inf  ;;  %v13474_v62 = vpack.c.bf16 %v15094_v52, %v15094_v52  ;;  %v1868_v63 = vrot.slane %v1867_v59, 4 }
 0x10b   : > { %v15104_v0 = vmax.f32 %v2607_v60, %v2608_v10  ;;  %v15106_v1 = vmax.f32 %v2610_v61, %v2611_v22  ;;  %v3041_v4 = vunpack.c.l.b16 %v13473_v56  ;;  %v1862_v5 = vmax.f32 %v1860_v55, %v1861_v58 }
 0x10c   : > { %v3042_v53 = vunpack.c.l.b16 %v13474_v62  ;;  %v1869_v54 = vmax.f32 %v1867_v59, %v1868_v63  ;;  %v1874_v7 = vsel %vm1691_vm6, %v1135_v48, -inf  ;;  %v1881_v11 = vsel %vm1691_vm6, %v1137_v57, -inf }
 0x10d   : > { %18819 = vst [vmem:[#allocation13_spill] sm:$0xff] %v15104_v0  ;;  %18820 = vst [vmem:[#allocation14_spill] sm:$0xff] %v15106_v1  ;;  %v13475_v12 = vpack.c.bf16 %v15104_v0, %v15104_v0  ;;  %v3108_v13 = vsel %vm3107_vm11, %v3041_v4, %v3106_v18  ;;  %v13533_v10 = vpack.c.bf16 %v15106_v1, %v15106_v1  ;;  %v1863_v14 = vrot.slane %v1862_v5, 2 }
 0x10e   : > { %v3110_v15 = vsel %vm3109_vm12, %v3042_v53, %v3108_v13  ;;  %v1870_v16 = vrot.slane %v1869_v54, 2  ;;  %v1875_v17 = vrot.slane %v1874_v7, 4  ;;  %v1882_v20 = vrot.slane %v1881_v11, 4 }
 0x10f   : > { %v3043_v21 = vunpack.c.l.b16 %v13475_v12  ;;  %v3194_v22 = vsel %vm14993_vm5, %v13533_v10, %v3193_v6  ;;  %v1864_v24 = vmax.f32 %v1862_v5, %v1863_v14  ;;  %v1087_v25 = vcombine.high %v959_v41, %v959_v41 }
 0x110   : > { %3195 = vst [vmem:[#allocation2 + $0xc] sm:$0x1] %v3194_v22  ;;  %v1871_v27 = vmax.f32 %v1869_v54, %v1870_v16  ;;  %v1876_v29 = vmax.f32 %v1874_v7, %v1875_v17  ;;  %v1883_v31 = vmax.f32 %v1881_v11, %v1882_v20  ;;  %v1094_v18 = vrot.slane %v959_v41, %v15012_v37 }
 0x111   : > { %v3112_v32 = vsel %vm3111_vm14, %v3043_v21, %v3110_v15  ;;  %v18821_v34 = vmov 0  ;;  %v1865_v36 = vrot.slane %v1864_v24, 1  ;;  %v1101_v38 = vrot.slane %v1087_v25, %v15012_v37 }
 0x112   : > { %v18822_v34 = vsel %vm15122_vm15, 4294967295, %v18821_v34  ;;  %v1138_v26 = vcombine.high %v15088_v45, %v15088_v45  ;;  %v3155_v39 = vpack.c.b16 %v3112_v32, %v3112_v32  ;;  %v1872_v40 = vrot.slane %v1871_v27, 1 }
 0x113   : > { %18823 = vst [vmem:[#allocation15_spill] sm:$0xff] %v18822_v34  ;;  %v1877_v42 = vrot.slane %v1876_v29, 2  ;;  %v1884_v43 = vrot.slane %v1883_v31, 2  ;;  %v1866_v41 = vmax.f32 %v1864_v24, %v1865_v36  ;;  %v1102_v44 = vcombine.high %v1094_v18, %v1094_v18 }
 0x114   : > { %v1103_v47 = vcombine.high %v1101_v38, %v1101_v38  ;;  %v1804_v48 = vsel %vm1691_vm6, %v1094_v18, -inf  ;;  %v3191_v49 = vsel %vm15122_vm15, %v3155_v39, %v3190_v35  ;;  %v1873_v50 = vmax.f32 %v1871_v27, %v1872_v40 }
 0x115   : > { %v1878_v51 = vmax.f32 %v1876_v29, %v1877_v42  ;;  %v1885_v55 = vmax.f32 %v1883_v31, %v1884_v43  ;;  %3192 = vst [vmem:[#allocation2 + $0x8] sm:$0xf] %v3191_v49  ;;  %v2614_v56 = vsel %vm2588_vm7, %v1866_v41, -inf  ;;  %v1805_v57 = vrot.slane %v1804_v48, 4 }
 0x116   : > { %v1811_v58 = vsel %vm1691_vm6, %v1102_v44, -inf  ;;  %v1818_v59 = vsel %vm1691_vm6, %v1101_v38, -inf  ;;  %v2617_v62 = vsel %vm2588_vm7, %v1873_v50, -inf  ;;  %v1825_v53 = vsel %vm1691_vm6, %v1103_v47, -inf }
 0x117   : > { %v1879_v60 = vrot.slane %v1878_v51, 1  ;;  %v1886_v61 = vrot.slane %v1885_v55, 1  ;;  %v1812_v63 = vrot.slane %v1811_v58, 4  ;;  %v1806_v4 = vmax.f32 %v1804_v48, %v1805_v57 }
 0x118   : > { %v1819_v5 = vrot.slane %v1818_v59, 4  ;;  %v1145_v6 = vrot.slane %v15088_v45, %v15012_v37  ;;  %v1826_v12 = vrot.slane %v1825_v53, 4  ;;  %v1152_v14 = vrot.slane %v1138_v26, %v15012_v37 }
 0x119   : > { %v1880_v54 = vmax.f32 %v1878_v51, %v1879_v60  ;;  %v1887_v7 = vmax.f32 %v1885_v55, %v1886_v61  ;;  %v1813_v11 = vmax.f32 %v1811_v58, %v1812_v63  ;;  %v1807_v13 = vrot.slane %v1806_v4, 2 }
 0x11a   : > { %v1820_v10 = vmax.f32 %v1818_v59, %v1819_v5  ;;  %v1153_v15 = vcombine.high %v1145_v6, %v1145_v6  ;;  %v1827_v21 = vmax.f32 %v1825_v53, %v1826_v12  ;;  %v1154_v25 = vcombine.high %v1152_v14, %v1152_v14  ;;  %v13913_v5 = vpop.f32.mrf.mxu0 }
 0x11b   : > { %v2620_v16 = vsel %vm2588_vm7, %v1880_v54, -inf  ;;  %v2623_v17 = vsel %vm2588_vm7, %v1887_v7, -inf  ;;  %v1814_v20 = vrot.slane %v1813_v11, 2  ;;  %v1808_v22 = vmax.f32 %v1806_v4, %v1807_v13 }
 0x11c   : > { %v1821_v24 = vrot.slane %v1820_v10, 2  ;;  %v1888_v45 = vsel %vm1691_vm6, %v1145_v6, -inf  ;;  %v1828_v29 = vrot.slane %v1827_v21, 2  ;;  %v1895_v18 = vsel %vm1691_vm6, %v1153_v15, -inf }
 0x11d   : > { %v1815_v27 = vmax.f32 %v1813_v11, %v1814_v20  ;;  %v1889_v31 = vrot.slane %v1888_v45, 4  ;;  %v1809_v32 = vrot.slane %v1808_v22, 1  ;;  %v1896_v36 = vrot.slane %v1895_v18, 4 }
 0x11e   : > { %v1822_v35 = vmax.f32 %v1820_v10, %v1821_v24  ;;  %v1902_v38 = vsel %vm1691_vm6, %v1152_v14, -inf  ;;  %v1829_v39 = vmax.f32 %v1827_v21, %v1828_v29  ;;  %v1909_v47 = vsel %vm1691_vm6, %v1154_v25, -inf  ;;  %v860_v24 = vpop.f32.mrf.mxu0 }
 0x11f   : > { %v1816_v26 = vrot.slane %v1815_v27, 1  ;;  %v1890_v40 = vmax.f32 %v1888_v45, %v1889_v31  ;;  %v1903_v42 = vrot.slane %v1902_v38, 4  ;;  %v1810_v43 = vmax.f32 %v1808_v22, %v1809_v32 }
 0x120   : > { %v1823_v41 = vrot.slane %v1822_v35, 1  ;;  %v1897_v44 = vmax.f32 %v1895_v18, %v1896_v36  ;;  %v1830_v49 = vrot.slane %v1829_v39, 1  ;;  %v1910_v59 = vrot.slane %v1909_v47, 4 }
 0x121   : > { %v1817_v48 = vmax.f32 %v1815_v27, %v1816_v26  ;;  %v1891_v50 = vrot.slane %v1890_v40, 2  ;;  %v1904_v51 = vmax.f32 %v1902_v38, %v1903_v42  ;;  %v2613_v57 = vsel %vm2588_vm7, %v1810_v43, -inf }
 0x122   : > { %v1824_v55 = vmax.f32 %v1822_v35, %v1823_v41  ;;  %v1898_v58 = vrot.slane %v1897_v44, 2  ;;  %v1831_v60 = vmax.f32 %v1829_v39, %v1830_v49  ;;  %v15147_v61 = vmax.f32 %v2613_v57, %v2614_v56  ;;  %v13914_v41 = vpop.f32.mrf.mxu0 }
 0x123   : > { %v2616_v63 = vsel %vm2588_vm7, %v1817_v48, -inf  ;;  %v1892_v4 = vmax.f32 %v1890_v40, %v1891_v50  ;;  %v1905_v7 = vrot.slane %v1904_v51, 2  ;;  %v960_v32 = vmax.f32 %v15084_v28, 0.0 }
 0x124   : > { %v15150_v53 = vmax.f32 %v2616_v63, %v2617_v62  ;;  %v2619_v6 = vsel %vm2588_vm7, %v1824_v55, -inf  ;;  %v1899_v54 = vmax.f32 %v1897_v44, %v1898_v58  ;;  %v2622_v12 = vsel %vm2588_vm7, %v1831_v60, -inf }
 0x125   : > { %v15153_v11 = vmax.f32 %v2619_v6, %v2620_v16  ;;  %v13477_v13 = vpack.c.bf16 %v15147_v61, %v15147_v61  ;;  %v1893_v10 = vrot.slane %v1892_v4, 1  ;;  %v15158_v56 = vmax.f32 %v2622_v12, %v2623_v17 }
 0x126   : > { %v13478_v14 = vpack.c.bf16 %v15150_v53, %v15150_v53  ;;  %v1900_v15 = vrot.slane %v1899_v54, 1  ;;  %v1906_v62 = vmax.f32 %v1904_v51, %v1905_v7  ;;  %v1911_v16 = vmax.f32 %v1909_v47, %v1910_v59 }
 0x127   : > { %18824 = vst [vmem:[#allocation16_spill] sm:$0xff] %v15153_v11  ;;  %18825 = vst [vmem:[#allocation17_spill] sm:$0xff] %v15158_v56  ;;  %v13479_v20 = vpack.c.bf16 %v15153_v11, %v15153_v11  ;;  %v3045_v21 = vunpack.c.l.b16 %v13477_v13  ;;  %v1894_v22 = vmax.f32 %v1892_v4, %v1893_v10  ;;  %v13480_v25 = vpack.c.bf16 %v15158_v56, %v15158_v56 }
 0x128   : > { %v3046_v45 = vunpack.c.l.b16 %v13478_v14  ;;  %v1901_v27 = vmax.f32 %v1899_v54, %v1900_v15  ;;  %v1907_v29 = vrot.slane %v1906_v62, 1  ;;  %v1912_v31 = vrot.slane %v1911_v16, 2 }
 0x129   : > { %v3047_v17 = vunpack.c.l.b16 %v13479_v20  ;;  %v15167_v18 = vsel %vm2588_vm7, %v1894_v22, -inf  ;;  %v3048_v35 = vunpack.c.l.b16 %v13480_v25  ;;  %v1104_v42 = vcombine.high %v960_v32, %v960_v32 }
 0x12a   : > { %v3113_v36 = vsel %vm589_vm8, %v3046_v45, %v3045_v21  ;;  %v1908_v38 = vmax.f32 %v1906_v62, %v1907_v29  ;;  %v15172_v26 = vsel %vm2588_vm7, %v1901_v27, -inf  ;;  %v1913_v40 = vmax.f32 %v1911_v16, %v1912_v31 }
 0x12b   : > { %v3114_v39 = vsel %vm3103_vm9, %v3047_v17, %v3113_v36  ;;  %v1111_v43 = vrot.slane %v960_v32, %v15012_v37  ;;  %v869_v28 = vadd.f32 %v13913_v5, %v15008_v33  ;;  %v861_v48 = vadd.f32 %v15008_v33, %v860_v24 }
 0x12c   : > { %v15177_v44 = vsel %vm2588_vm7, %v1908_v38, -inf  ;;  %v15180_v47 = vsel %vm3105_vm10, %v3048_v35, %v3114_v39  ;;  %v1914_v49 = vrot.slane %v1913_v40, 1  ;;  %v1118_v50 = vrot.slane %v1104_v42, %v15012_v37 }
 0x12d   : > { %v1119_v51 = vcombine.high %v1111_v43, %v1111_v43  ;;  %v1832_v55 = vsel %vm1691_vm6, %v1111_v43, -inf  ;;  %v965_v58 = vmax.f32 %v869_v28, 0.0  ;;  %v15186_v59 = vmax.f32 %v861_v48, 0.0 }
 0x12e   : > { %v1833_v57 = vrot.slane %v1832_v55, 4  ;;  %v15189_v60 = vadd.f32 %v13914_v41, %v15008_v33  ;;  %v1915_v63 = vmax.f32 %v1913_v40, %v1914_v49  ;;  %v1120_v4 = vcombine.high %v1118_v50, %v1118_v50 }
 0x12f   : > { %v1839_v6 = vsel %vm1691_vm6, %v1119_v51, -inf  ;;  %v1846_v5 = vsel %vm1691_vm6, %v1118_v50, -inf  ;;  %v1189_v13 = vcombine.high %v965_v58, %v965_v58  ;;  %v1196_v15 = vrot.slane %v965_v58, %v15012_v37 }
 0x130   : > { %v1834_v54 = vmax.f32 %v1832_v55, %v1833_v57  ;;  %v1840_v7 = vrot.slane %v1839_v6, 4  ;;  %v1847_v12 = vrot.slane %v1846_v5, 4  ;;  %v2635_v10 = vsel %vm2588_vm7, %v1915_v63, -inf }
 0x131   : > { %v1853_v14 = vsel %vm1691_vm6, %v1120_v4, -inf  ;;  %v1155_v33 = vcombine.high %v15186_v59, %v15186_v59  ;;  %v1203_v16 = vrot.slane %v1189_v13, %v15012_v37  ;;  %v1204_v24 = vcombine.high %v1196_v15, %v1196_v15 }
 0x132   : > { %v1835_v62 = vrot.slane %v1834_v54, 2  ;;  %v1841_v20 = vmax.f32 %v1839_v6, %v1840_v7  ;;  %v1848_v21 = vmax.f32 %v1846_v5, %v1847_v12  ;;  %v1854_v22 = vrot.slane %v1853_v14, 4 }
 0x133   : > { %v1972_v25 = vsel %vm1691_vm6, %v1196_v15, -inf  ;;  %v15202_v45 = vrot.slane %v15186_v59, %v15012_v37  ;;  %v1205_v32 = vcombine.high %v1203_v16, %v1203_v16  ;;  %v1979_v36 = vsel %vm1691_vm6, %v1204_v24, -inf }
 0x134   : > { %v1836_v27 = vmax.f32 %v1834_v54, %v1835_v62  ;;  %v1842_v29 = vrot.slane %v1841_v20, 2  ;;  %v1849_v17 = vrot.slane %v1848_v21, 2  ;;  %v1855_v31 = vmax.f32 %v1853_v14, %v1854_v22 }
 0x135   : > { %v1973_v35 = vrot.slane %v1972_v25, 4  ;;  %v1986_v38 = vsel %vm1691_vm6, %v1203_v16, -inf  ;;  %v1980_v28 = vrot.slane %v1979_v36, 4  ;;  %v1993_v49 = vsel %vm1691_vm6, %v1205_v32, -inf }
 0x136   : > { %v1837_v39 = vrot.slane %v1836_v27, 1  ;;  %v1843_v40 = vmax.f32 %v1841_v20, %v1842_v29  ;;  %v1850_v42 = vmax.f32 %v1848_v21, %v1849_v17  ;;  %v1856_v43 = vrot.slane %v1855_v31, 2 }
 0x137   : > { %v1974_v41 = vmax.f32 %v1972_v25, %v1973_v35  ;;  %v1987_v48 = vrot.slane %v1986_v38, 4  ;;  %v1981_v63 = vmax.f32 %v1979_v36, %v1980_v28  ;;  %v1994_v6 = vrot.slane %v1993_v49, 4 }
 0x138   : > { %v1838_v50 = vmax.f32 %v1836_v27, %v1837_v39  ;;  %v1844_v51 = vrot.slane %v1843_v40, 1  ;;  %v1851_v55 = vrot.slane %v1850_v42, 1  ;;  %v1857_v57 = vmax.f32 %v1855_v31, %v1856_v43 }
 0x139   : > { %v1975_v58 = vrot.slane %v1974_v41, 2  ;;  %v1988_v4 = vmax.f32 %v1986_v38, %v1987_v48  ;;  %v1982_v15 = vrot.slane %v1981_v63, 2  ;;  %v1995_v16 = vmax.f32 %v1993_v49, %v1994_v6  ;;  %v3196_v6 = vld [vmem:[#allocation2 + $0x10] sm:$0xf] }
 0x13a   : > { %v1845_v5 = vmax.f32 %v1843_v40, %v1844_v51  ;;  %v1852_v54 = vmax.f32 %v1850_v42, %v1851_v55  ;;  %v1858_v7 = vrot.slane %v1857_v57, 1  ;;  %v2625_v12 = vsel %vm2588_vm7, %v1838_v50, -inf }
 0x13b   : > { %v15209_v13 = vmax.f32 %v2625_v12, %v15167_v18  ;;  %v1976_v14 = vmax.f32 %v1974_v41, %v1975_v58  ;;  %v1989_v62 = vrot.slane %v1988_v4, 2  ;;  %v1983_v17 = vmax.f32 %v1981_v63, %v1982_v15  ;;  %v513_v15 = vld [vmem:[#allocation2 + $0x18] sm:$0x1] }
 0x13c   : > { %v1859_v20 = vmax.f32 %v1857_v57, %v1858_v7  ;;  %v2628_v21 = vsel %vm2588_vm7, %v1845_v5, -inf  ;;  %v2631_v22 = vsel %vm2588_vm7, %v1852_v54, -inf  ;;  %v1996_v32 = vrot.slane %v1995_v16, 2 }
 0x13d   : > { %18826 = vst [vmem:[#allocation18_spill] sm:$0xff] %v15209_v13  ;;  %v15214_v24 = vmax.f32 %v2628_v21, %v15172_v26  ;;  %v15217_v25 = vmax.f32 %v2631_v22, %v15177_v44  ;;  %v13481_v27 = vpack.c.bf16 %v15209_v13, %v15209_v13  ;;  %v1977_v18 = vrot.slane %v1976_v14, 1  ;;  %v3199_v44 = vld [vmem:[#allocation2 + $0x14] sm:$0x1] }
 0x13e   : > { %v2634_v29 = vsel %vm2588_vm7, %v1859_v20, -inf  ;;  %v1990_v31 = vmax.f32 %v1988_v4, %v1989_v62  ;;  %v1984_v40 = vrot.slane %v1983_v17, 1  ;;  %v1997_v43 = vmax.f32 %v1995_v16, %v1996_v32  ;;  %v545_v16 = vld [vmem:[#allocation2 + $0x1c] sm:$0x1] }
 0x13f   : > { %18827 = vst [vmem:[#allocation19_spill] sm:$0xff] %v15214_v24  ;;  %18828 = vst [vmem:[#allocation20_spill] sm:$0xff] %v15217_v25  ;;  %v15222_v35 = vmax.f32 %v2634_v29, %v2635_v10  ;;  %v13482_v36 = vpack.c.bf16 %v15214_v24, %v15214_v24  ;;  %v13483_v26 = vpack.c.bf16 %v15217_v25, %v15217_v25  ;;  %v3049_v38 = vunpack.c.l.b16 %v13481_v27 }
 0x140   : > { %v1978_v39 = vmax.f32 %v1976_v14, %v1977_v18  ;;  %v1991_v42 = vrot.slane %v1990_v31, 1  ;;  %v1985_v49 = vmax.f32 %v1983_v17, %v1984_v40  ;;  %v1998_v51 = vrot.slane %v1997_v43, 1 }
 0x141   : > { %18829 = vst [vmem:[#allocation21_spill] sm:$0xff] %v15222_v35  ;;  %v3050_v41 = vunpack.c.l.b16 %v13482_v36  ;;  %v3051_v28 = vunpack.c.l.b16 %v13483_v26  ;;  %v3116_v48 = vsel %vm3107_vm11, %v3049_v38, %v15180_v47  ;;  %v13534_v10 = vpack.c.bf16 %v15222_v35, %v15222_v35 }
 0x142   : > { %v1992_v50 = vmax.f32 %v1990_v31, %v1991_v42  ;;  %v15233_v55 = vsel %vm2588_vm7, %v1978_v39, -inf  ;;  %v1169_v63 = vrot.slane %v1155_v33, %v15012_v37  ;;  %v1170_v47 = vcombine.high %v15202_v45, %v15202_v45 }
 0x143   : > { %v3117_v57 = vsel %vm3109_vm12, %v3050_v41, %v3116_v48  ;;  %v3200_v58 = vsel %vm14993_vm5, %v13534_v10, %v3199_v44  ;;  %v1999_v5 = vmax.f32 %v1997_v43, %v1998_v51  ;;  %v15246_v54 = vsel %vm2588_vm7, %v1985_v49, -inf }
 0x144   : > { %v3118_v4 = vsel %vm3111_vm14, %v3051_v28, %v3117_v57  ;;  %3201 = vst [vmem:[#allocation2 + $0x14] sm:$0x1] %v3200_v58  ;;  %v15249_v7 = vsel %vm2588_vm7, %v1992_v50, -inf  ;;  %v1171_v14 = vcombine.high %v1169_v63, %v1169_v63  ;;  %v1916_v59 = vsel %vm1691_vm6, %v15202_v45, -inf  ;;  %v863_v45 = vpop.f32.mrf.mxu0 }
 0x145   : > { %v3157_v12 = vpack.c.b16 %v3118_v4, %v3118_v4  ;;  %v1923_v33 = vsel %vm1691_vm6, %v1170_v47, -inf  ;;  %v15255_v62 = vsel %vm2588_vm7, %v1999_v5, -inf  ;;  %v1917_v20 = vrot.slane %v1916_v59, 4 }
 0x146   : > { %v1924_v21 = vrot.slane %v1923_v33, 4  ;;  %v1930_v22 = vsel %vm1691_vm6, %v1169_v63, -inf  ;;  %v1937_v29 = vsel %vm1691_vm6, %v1171_v14, -inf  ;;  %v966_v17 = vmax.f32 %v15189_v60, 0.0  ;;  %v15270_v60 = vld [vmem:[%s18743_s2] ss:$0 sm:$0xff] }
 0x147   : > { %v3197_v27 = vsel %vm15122_vm15, %v3157_v12, %v3196_v6  ;;  %v1931_v18 = vrot.slane %v1930_v22, 4  ;;  %v1918_v31 = vmax.f32 %v1916_v59, %v1917_v20  ;;  %v1938_v36 = vrot.slane %v1937_v29, 4 }
 0x148   : > { %3198 = vst [vmem:[#allocation2 + $0x10] sm:$0xf] %v3197_v27  ;;  %v1925_v32 = vmax.f32 %v1923_v33, %v1924_v21  ;;  %v514_v26 = vsel %vm14993_vm5, 0, %v513_v15  ;;  %v1206_v44 = vcombine.high %v966_v17, %v966_v17  ;;  %v1213_v39 = vrot.slane %v966_v17, %v15012_v37 }
 0x149   : > { %v1932_v38 = vmax.f32 %v1930_v22, %v1931_v18  ;;  %515 = vst [vmem:[#allocation2 + $0x18] sm:$0x1] %v514_v26  ;;  %v546_v40 = vsel %vm14985_vm3, 0, %v545_v16  ;;  %v1919_v42 = vrot.slane %v1918_v31, 2  ;;  %v1939_v41 = vmax.f32 %v1937_v29, %v1938_v36 }
 0x14a   : > { %v1926_v43 = vrot.slane %v1925_v32, 2  ;;  %547 = vst [vmem:[#allocation2 + $0x1c] sm:$0x1] %v546_v40  ;;  %v864_v28 = vadd.f32 %v15270_v60, %v863_v45  ;;  %v1220_v10 = vrot.slane %v1206_v44, %v15012_v37  ;;  %v1221_v49 = vcombine.high %v1213_v39, %v1213_v39 }
 0x14b   : > { %v1933_v48 = vrot.slane %v1932_v38, 2  ;;  %v2000_v50 = vsel %vm1691_vm6, %v1213_v39, -inf  ;;  %v1920_v51 = vmax.f32 %v1918_v31, %v1919_v42  ;;  %v1940_v58 = vrot.slane %v1939_v41, 2 }
 0x14c   : > { %v1927_v57 = vmax.f32 %v1925_v32, %v1926_v43  ;;  %v2001_v63 = vrot.slane %v2000_v50, 4  ;;  %v1222_v4 = vcombine.high %v1220_v10, %v1220_v10  ;;  %v2007_v6 = vsel %vm1691_vm6, %v1221_v49, -inf }
 0x14d   : > { %v1934_v47 = vmax.f32 %v1932_v38, %v1933_v48  ;;  %v2014_v5 = vsel %vm1691_vm6, %v1220_v10, -inf  ;;  %v1921_v12 = vrot.slane %v1920_v51, 1  ;;  %v1941_v59 = vmax.f32 %v1939_v41, %v1940_v58 }
 0x14e   : > { %v1928_v14 = vrot.slane %v1927_v57, 1  ;;  %v2002_v33 = vmax.f32 %v2000_v50, %v2001_v63  ;;  %v2008_v20 = vrot.slane %v2007_v6, 4  ;;  %v2015_v21 = vrot.slane %v2014_v5, 4 }
 0x14f   : > { %v1935_v15 = vrot.slane %v1934_v47, 1  ;;  %v2021_v22 = vsel %vm1691_vm6, %v1222_v4, -inf  ;;  %v1922_v16 = vmax.f32 %v1920_v51, %v1921_v12  ;;  %v1942_v18 = vrot.slane %v1941_v59, 1 }
 0x150   : > { %v1929_v27 = vmax.f32 %v1927_v57, %v1928_v14  ;;  %v2003_v29 = vrot.slane %v2002_v33, 2  ;;  %v2009_v45 = vmax.f32 %v2007_v6, %v2008_v20  ;;  %v2016_v31 = vmax.f32 %v2014_v5, %v2015_v21 }
 0x151   : > { %v1936_v17 = vmax.f32 %v1934_v47, %v1935_v15  ;;  %v2022_v32 = vrot.slane %v2021_v22, 4  ;;  %v1943_v36 = vmax.f32 %v1941_v59, %v1942_v18  ;;  %v2637_v26 = vsel %vm2588_vm7, %v1922_v16, -inf }
 0x152   : > { %v2640_v38 = vsel %vm2588_vm7, %v1929_v27, -inf  ;;  %v2004_v44 = vmax.f32 %v2002_v33, %v2003_v29  ;;  %v2639_v39 = vmax.f32 %v2637_v26, %v15233_v55  ;;  %v2010_v43 = vrot.slane %v2009_v45, 2  ;;  %v13917_v55 = vpop.f32.mrf.mxu0 }
 0x153   : > { %v2642_v40 = vmax.f32 %v2640_v38, %v15246_v54  ;;  %v2643_v42 = vsel %vm2588_vm7, %v1936_v17, -inf  ;;  %v2646_v48 = vsel %vm2588_vm7, %v1943_v36, -inf  ;;  %v2017_v49 = vrot.slane %v2016_v31, 2 }
 0x154   : > { %v15284_v41 = vmax.f32 %v2643_v42, %v15249_v7  ;;  %v2005_v10 = vrot.slane %v2004_v44, 1  ;;  %v15288_v50 = vmax.f32 %v2646_v48, %v15255_v62  ;;  %v13485_v51 = vpack.c.bf16 %v2639_v39, %v2639_v39  ;;  %v876_v27 = vpop.f32.mrf.mxu0 }
 0x155   : > { %v13486_v57 = vpack.c.bf16 %v2642_v40, %v2642_v40  ;;  %v15291_v58 = vsel %vm6713_vm0, %v2642_v40, %v2639_v39  ;;  %v2011_v47 = vmax.f32 %v2009_v45, %v2010_v43  ;;  %v2018_v7 = vmax.f32 %v2016_v31, %v2017_v49 }
 0x156   : > { %18830 = vst [vmem:[#allocation22_spill] sm:$0xff] %v15284_v41  ;;  %18831 = vst [vmem:[#allocation23_spill] sm:$0xff] %v15288_v50  ;;  %v13487_v54 = vpack.c.bf16 %v15284_v41, %v15284_v41  ;;  %v2006_v63 = vmax.f32 %v2004_v44, %v2005_v10  ;;  %v13488_v4 = vpack.c.bf16 %v15288_v50, %v15288_v50  ;;  %v3053_v6 = vunpack.c.l.b16 %v13485_v51 }
 0x157   : > { %v3054_v5 = vunpack.c.l.b16 %v13486_v57  ;;  %v2023_v12 = vmax.f32 %v2021_v22, %v2022_v32  ;;  %v2012_v14 = vrot.slane %v2011_v47, 1  ;;  %v2019_v59 = vrot.slane %v2018_v7, 1 }
 0x158   : > { %v3055_v62 = vunpack.c.l.b16 %v13487_v54  ;;  %v15298_v33 = vsel %vm2588_vm7, %v2006_v63, -inf  ;;  %v3056_v15 = vunpack.c.l.b16 %v13488_v4  ;;  %v964_v16 = vmax.f32 %v864_v28, 0.0 }
 0x159   : > { %v3119_v20 = vsel %vm589_vm8, %v3054_v5, %v3053_v6  ;;  %v2024_v21 = vrot.slane %v2023_v12, 2  ;;  %v2013_v29 = vmax.f32 %v2011_v47, %v2012_v14  ;;  %v2020_v17 = vmax.f32 %v2018_v7, %v2019_v59 }
 0x15a   : > { %v3120_v18 = vsel %vm3103_vm9, %v3055_v62, %v3119_v20  ;;  %v885_v45 = vadd.f32 %v15270_v60, %v13917_v55  ;;  %v1172_v22 = vcombine.high %v964_v16, %v964_v16  ;;  %v1179_v32 = vrot.slane %v964_v16, %v15012_v37 }
 0x15b   : > { %v2025_v31 = vmax.f32 %v2023_v12, %v2024_v21  ;;  %v15305_v36 = vsel %vm3105_vm10, %v3056_v15, %v3120_v18  ;;  %v15308_v26 = vsel %vm2588_vm7, %v2013_v29, -inf  ;;  %v15311_v38 = vsel %vm2588_vm7, %v2020_v17, -inf }
 0x15c   : > { %v969_v28 = vmax.f32 %v885_v45, 0.0  ;;  %v877_v44 = vadd.f32 %v15270_v60, %v876_v27  ;;  %v1186_v40 = vrot.slane %v1172_v22, %v15012_v37  ;;  %v1187_v42 = vcombine.high %v1179_v32, %v1179_v32 }
 0x15d   : > { %v2026_v39 = vrot.slane %v2025_v31, 1  ;;  %v1944_v43 = vsel %vm1691_vm6, %v1179_v32, -inf }
 0x15e   : > { %v1945_v48 = vrot.slane %v1944_v43, 4  ;;  %v1257_v10 = vcombine.high %v969_v28, %v969_v28  ;;  %v1264_v49 = vrot.slane %v969_v28, %v15012_v37  ;;  %v15317_v51 = vmax.f32 %v877_v44, 0.0 }
 0x15f   : > { %v2027_v57 = vmax.f32 %v2025_v31, %v2026_v39  ;;  %v1188_v55 = vcombine.high %v1186_v40, %v1186_v40  ;;  %v1951_v54 = vsel %vm1691_vm6, %v1187_v42, -inf  ;;  %v1958_v63 = vsel %vm1691_vm6, %v1186_v40, -inf }
 0x160   : > { %v1946_v47 = vmax.f32 %v1944_v43, %v1945_v48  ;;  %v1952_v7 = vrot.slane %v1951_v54, 4  ;;  %v1959_v4 = vrot.slane %v1958_v63, 4  ;;  %v1271_v6 = vrot.slane %v1257_v10, %v15012_v37 }
 0x161   : > { %v2659_v5 = vsel %vm2588_vm7, %v2027_v57, -inf  ;;  %v1965_v12 = vsel %vm1691_vm6, %v1188_v55, -inf  ;;  %v1272_v62 = vcombine.high %v1264_v49, %v1264_v49  ;;  %v2084_v14 = vsel %vm1691_vm6, %v1264_v49, -inf }
 0x162   : > { %v1947_v59 = vrot.slane %v1946_v47, 2  ;;  %v1953_v15 = vmax.f32 %v1951_v54, %v1952_v7  ;;  %v1960_v20 = vmax.f32 %v1958_v63, %v1959_v4  ;;  %v1966_v21 = vrot.slane %v1965_v12, 4 }
 0x163   : > { %v1273_v16 = vcombine.high %v1271_v6, %v1271_v6  ;;  %v2085_v27 = vrot.slane %v2084_v14, 4  ;;  %v2091_v18 = vsel %vm1691_vm6, %v1272_v62, -inf  ;;  %v2098_v29 = vsel %vm1691_vm6, %v1271_v6, -inf }
 0x164   : > { %v1948_v17 = vmax.f32 %v1946_v47, %v1947_v59  ;;  %v1954_v45 = vrot.slane %v1953_v15, 2  ;;  %v1961_v31 = vrot.slane %v1960_v20, 2  ;;  %v1967_v22 = vmax.f32 %v1965_v12, %v1966_v21 }
 0x165   : > { %v2086_v32 = vmax.f32 %v2084_v14, %v2085_v27  ;;  %v2092_v28 = vrot.slane %v2091_v18, 4  ;;  %v2099_v44 = vrot.slane %v2098_v29, 4  ;;  %v2105_v39 = vsel %vm1691_vm6, %v1273_v16, -inf }
 0x166   : > { %v1949_v40 = vrot.slane %v1948_v17, 1  ;;  %v1955_v42 = vmax.f32 %v1953_v15, %v1954_v45  ;;  %v1962_v43 = vmax.f32 %v1960_v20, %v1961_v31  ;;  %v1968_v48 = vrot.slane %v1967_v22, 2 }
 0x167   : > { %v2087_v10 = vrot.slane %v2086_v32, 2  ;;  %v2093_v49 = vmax.f32 %v2091_v18, %v2092_v28  ;;  %v2100_v57 = vmax.f32 %v2098_v29, %v2099_v44  ;;  %v2106_v55 = vrot.slane %v2105_v39, 4 }
 0x168   : > { %v1950_v54 = vmax.f32 %v1948_v17, %v1949_v40  ;;  %v1956_v63 = vrot.slane %v1955_v42, 1  ;;  %v1963_v7 = vrot.slane %v1962_v43, 1  ;;  %v1969_v47 = vmax.f32 %v1967_v22, %v1968_v48 }
 0x169   : > { %v2088_v4 = vmax.f32 %v2086_v32, %v2087_v10  ;;  %v2094_v6 = vrot.slane %v2093_v49, 2  ;;  %v2101_v12 = vrot.slane %v2100_v57, 2  ;;  %v2107_v62 = vmax.f32 %v2105_v39, %v2106_v55 }
 0x16a   : > { %v1957_v14 = vmax.f32 %v1955_v42, %v1956_v63  ;;  %v1964_v59 = vmax.f32 %v1962_v43, %v1963_v7  ;;  %v1970_v21 = vrot.slane %v1969_v47, 1  ;;  %v2649_v16 = vsel %vm2588_vm7, %v1950_v54, -inf  ;;  %v13918_v63 = vpop.f32.mrf.mxu0 }
 0x16b   : > { %v15330_v15 = vmax.f32 %v2649_v16, %v15298_v33  ;;  %v2089_v20 = vrot.slane %v2088_v4, 1  ;;  %v2095_v27 = vmax.f32 %v2093_v49, %v2094_v6  ;;  %v2102_v18 = vmax.f32 %v2100_v57, %v2101_v12  ;;  %v516_v6 = vld [vmem:[#allocation2 + $0x20] sm:$0x1] }
 0x16c   : > { %v1971_v29 = vmax.f32 %v1969_v47, %v1970_v21  ;;  %v2652_v17 = vsel %vm2588_vm7, %v1957_v14, -inf  ;;  %v2655_v45 = vsel %vm2588_vm7, %v1964_v59, -inf  ;;  %v2108_v31 = vrot.slane %v2107_v62, 2 }
 0x16d   : > { %18832 = vst [vmem:[#allocation24_spill] sm:$0xff] %v15330_v15  ;;  %v15335_v22 = vmax.f32 %v2652_v17, %v15308_v26  ;;  %v15338_v32 = vmax.f32 %v2655_v45, %v15311_v38  ;;  %v13489_v28 = vpack.c.bf16 %v15330_v15, %v15330_v15  ;;  %v2090_v33 = vmax.f32 %v2088_v4, %v2089_v20  ;;  %v3205_v38 = vld [vmem:[#allocation2 + $0x1c] sm:$0x1] }
 0x16e   : > { %v2658_v44 = vsel %vm2588_vm7, %v1971_v29, -inf  ;;  %v2096_v39 = vrot.slane %v2095_v27, 1  ;;  %v2103_v40 = vrot.slane %v2102_v18, 1  ;;  %v2109_v42 = vmax.f32 %v2107_v62, %v2108_v31  ;;  %v3202_v29 = vld [vmem:[#allocation2 + $0x18] sm:$0xf] }
 0x16f   : > { %18833 = vst [vmem:[#allocation25_spill] sm:$0xff] %v15335_v22  ;;  %18834 = vst [vmem:[#allocation26_spill] sm:$0xff] %v15338_v32  ;;  %v15343_v43 = vmax.f32 %v2658_v44, %v2659_v5  ;;  %v13490_v48 = vpack.c.bf16 %v15335_v22, %v15335_v22  ;;  %v13491_v26 = vpack.c.bf16 %v15338_v32, %v15338_v32  ;;  %v3057_v10 = vunpack.c.l.b16 %v13489_v28 }
 0x170   : > { %v2097_v49 = vmax.f32 %v2095_v27, %v2096_v39  ;;  %v2104_v57 = vmax.f32 %v2102_v18, %v2103_v40  ;;  %v2110_v55 = vrot.slane %v2109_v42, 1  ;;  %v15350_v54 = vsel %vm2588_vm7, %v2090_v33, -inf  ;;  %v548_v27 = vld [vmem:[#allocation2 + $0x24] sm:$0x1] }
 0x171   : > { %18835 = vst [vmem:[#allocation27_spill] sm:$0xff] %v15343_v43  ;;  %v3058_v7 = vunpack.c.l.b16 %v13490_v48  ;;  %v3059_v47 = vunpack.c.l.b16 %v13491_v26  ;;  %v3122_v5 = vsel %vm3107_vm11, %v3057_v10, %v15305_v36  ;;  %v13535_v4 = vpack.c.bf16 %v15343_v43, %v15343_v43  ;;  %v879_v26 = vpop.f32.mrf.mxu0 }
 0x172   : > { %v2111_v12 = vmax.f32 %v2109_v42, %v2110_v55  ;;  %v15357_v62 = vsel %vm2588_vm7, %v2097_v49, -inf  ;;  %v15360_v14 = vsel %vm2588_vm7, %v2104_v57, -inf  ;;  %v1223_v59 = vcombine.high %v15317_v51, %v15317_v51 }
 0x173   : > { %v3123_v21 = vsel %vm3109_vm12, %v3058_v7, %v3122_v5  ;;  %v3206_v16 = vsel %vm14993_vm5, %v13535_v4, %v3205_v38  ;;  %v1230_v36 = vrot.slane %v15317_v51, %v15012_v37  ;;  %v888_v20 = vadd.f32 %v15270_v60, %v13918_v63 }
 0x174   : > { %v3124_v18 = vsel %vm3111_vm14, %v3059_v47, %v3123_v21  ;;  %3207 = vst [vmem:[#allocation2 + $0x1c] sm:$0x1] %v3206_v16  ;;  %v15372_v17 = vsel %vm2588_vm7, %v2111_v12, -inf  ;;  %v1237_v45 = vrot.slane %v1223_v59, %v15012_v37  ;;  %v517_v31 = vsel %vm14993_vm5, 0, %v516_v6 }
 0x175   : > { %v3159_v28 = vpack.c.b16 %v3124_v18, %v3124_v18  ;;  %v1238_v33 = vcombine.high %v1230_v36, %v1230_v36  ;;  %v2028_v44 = vsel %vm1691_vm6, %v1230_v36, -inf  ;;  %v970_v51 = vmax.f32 %v888_v20, 0.0  ;;  %518 = vst [vmem:[#allocation2 + $0x20] sm:$0x1] %v517_v31 }
 0x176   : > { %v1239_v39 = vcombine.high %v1237_v45, %v1237_v45  ;;  %v2029_v40 = vrot.slane %v2028_v44, 4  ;;  %v2042_v42 = vsel %vm1691_vm6, %v1237_v45, -inf  ;;  %v549_v48 = vsel %vm14985_vm3, 0, %v548_v27 }
 0x177   : > { %v3203_v10 = vsel %vm15122_vm15, %v3159_v28, %v3202_v29  ;;  %v2035_v38 = vsel %vm1691_vm6, %v1238_v33, -inf  ;;  %v2043_v49 = vrot.slane %v2042_v42, 4  ;;  %v1274_v57 = vcombine.high %v970_v51, %v970_v51  ;;  %550 = vst [vmem:[#allocation2 + $0x24] sm:$0x1] %v549_v48 }
 0x178   : > { %3204 = vst [vmem:[#allocation2 + $0x18] sm:$0xf] %v3203_v10  ;;  %v2030_v55 = vmax.f32 %v2028_v44, %v2029_v40  ;;  %v2036_v63 = vrot.slane %v2035_v38, 4  ;;  %v2049_v7 = vsel %vm1691_vm6, %v1239_v39, -inf  ;;  %v1281_v47 = vrot.slane %v970_v51, %v15012_v37 }
 0x179   : > { %v2044_v5 = vmax.f32 %v2042_v42, %v2043_v49  ;;  %v2050_v4 = vrot.slane %v2049_v7, 4  ;;  %v1288_v6 = vrot.slane %v1274_v57, %v15012_v37  ;;  %v15388_v12 = vadd.f32 %v15270_v60, %v879_v26 }
 0x17a   : > { %v2031_v59 = vrot.slane %v2030_v55, 2  ;;  %v2037_v21 = vmax.f32 %v2035_v38, %v2036_v63  ;;  %v1289_v16 = vcombine.high %v1281_v47, %v1281_v47  ;;  %v2112_v36 = vsel %vm1691_vm6, %v1281_v47, -inf }
 0x17b   : > { %v2045_v20 = vrot.slane %v2044_v5, 2  ;;  %v2051_v27 = vmax.f32 %v2049_v7, %v2050_v4  ;;  %v1290_v18 = vcombine.high %v1288_v6, %v1288_v6  ;;  %v2113_v29 = vrot.slane %v2112_v36, 4 }
 0x17c   : > { %v2032_v45 = vmax.f32 %v2030_v55, %v2031_v59  ;;  %v2038_v31 = vrot.slane %v2037_v21, 2  ;;  %v2119_v28 = vsel %vm1691_vm6, %v1289_v16, -inf  ;;  %v2126_v33 = vsel %vm1691_vm6, %v1288_v6, -inf }
 0x17d   : > { %v2046_v44 = vmax.f32 %v2044_v5, %v2045_v20  ;;  %v2052_v51 = vrot.slane %v2051_v27, 2  ;;  %v2114_v39 = vmax.f32 %v2112_v36, %v2113_v29  ;;  %v2120_v40 = vrot.slane %v2119_v28, 4  ;;  %v13921_v20 = vpop.f32.mrf.mxu0 }
 0x17e   : > { %v2033_v42 = vrot.slane %v2032_v45, 1  ;;  %v2039_v48 = vmax.f32 %v2037_v21, %v2038_v31  ;;  %v2127_v26 = vrot.slane %v2126_v33, 4  ;;  %v2133_v10 = vsel %vm1691_vm6, %v1290_v18, -inf }
 0x17f   : > { %v2047_v38 = vrot.slane %v2046_v44, 1  ;;  %v2053_v49 = vmax.f32 %v2051_v27, %v2052_v51  ;;  %v2115_v57 = vrot.slane %v2114_v39, 2  ;;  %v2121_v63 = vmax.f32 %v2119_v28, %v2120_v40 }
 0x180   : > { %v2034_v7 = vmax.f32 %v2032_v45, %v2033_v42  ;;  %v2040_v55 = vrot.slane %v2039_v48, 1  ;;  %v2128_v47 = vmax.f32 %v2126_v33, %v2127_v26  ;;  %v2134_v4 = vrot.slane %v2133_v10, 4  ;;  %v892_v26 = vpop.f32.mrf.mxu0 }
 0x181   : > { %v2048_v59 = vmax.f32 %v2046_v44, %v2047_v38  ;;  %v2054_v16 = vrot.slane %v2053_v49, 1  ;;  %v2116_v6 = vmax.f32 %v2114_v39, %v2115_v57  ;;  %v2122_v5 = vrot.slane %v2121_v63, 2 }
 0x182   : > { %v2041_v36 = vmax.f32 %v2039_v48, %v2040_v55  ;;  %v2661_v29 = vsel %vm2588_vm7, %v2034_v7, -inf  ;;  %v2129_v21 = vrot.slane %v2128_v47, 2  ;;  %v2135_v31 = vmax.f32 %v2133_v10, %v2134_v4 }
 0x183   : > { %v2055_v30 = vmax.f32 %v2053_v49, %v2054_v16  ;;  %v2663_v18 = vmax.f32 %v2661_v29, %v15350_v54  ;;  %v2667_v27 = vsel %vm2588_vm7, %v2048_v59, -inf  ;;  %v2117_v28 = vrot.slane %v2116_v6, 1 }
 0x184   : > { %v2664_v45 = vsel %vm2588_vm7, %v2041_v36, -inf  ;;  %v15399_v33 = vmax.f32 %v2667_v27, %v15360_v14  ;;  %v2123_v44 = vmax.f32 %v2121_v63, %v2122_v5  ;;  %v2130_v51 = vmax.f32 %v2128_v47, %v2129_v21 }
 0x185   : > { %v2666_v39 = vmax.f32 %v2664_v45, %v15357_v62  ;;  %v2670_v40 = vsel %vm2588_vm7, %v2055_v30, -inf  ;;  %v13493_v42 = vpack.c.bf16 %v2663_v18, %v2663_v18  ;;  %v2118_v48 = vmax.f32 %v2116_v6, %v2117_v28  ;;  %v13922_v6 = vpop.f32.mrf.mxu0 }
 0x186   : > { %18836 = vst [vmem:[#allocation28_spill] sm:$0xff] %v15399_v33  ;;  %v15404_v10 = vmax.f32 %v2670_v40, %v15372_v17  ;;  %v13495_v54 = vpack.c.bf16 %v15399_v33, %v15399_v33  ;;  %v2124_v38 = vrot.slane %v2123_v44, 1  ;;  %v2131_v49 = vrot.slane %v2130_v51, 1 }
 0x187   : > { %v13494_v57 = vpack.c.bf16 %v2666_v39, %v2666_v39  ;;  %v3061_v14 = vunpack.c.l.b16 %v13493_v42  ;;  %v15409_v63 = vsel %vm6713_vm0, %v2666_v39, %v2663_v18  ;;  %v2136_v7 = vrot.slane %v2135_v31, 2 }
 0x188   : > { %18837 = vst [vmem:[#allocation29_spill] sm:$0xff] %v15404_v10  ;;  %18838 = vst [vmem:[#allocation30_spill] sm:$0xff] %v15409_v63  ;;  %v13496_v30 = vpack.c.bf16 %v15404_v10, %v15404_v10  ;;  %v3063_v62 = vunpack.c.l.b16 %v13495_v54  ;;  %v2125_v55 = vmax.f32 %v2123_v44, %v2124_v38  ;;  %v2132_v47 = vmax.f32 %v2130_v51, %v2131_v49 }
 0x189   : > { %v3062_v4 = vunpack.c.l.b16 %v13494_v57  ;;  %v2137_v17 = vmax.f32 %v2135_v31, %v2136_v7  ;;  %v15414_v59 = vsel %vm2588_vm7, %v2118_v48, -inf  ;;  %v968_v16 = vmax.f32 %v15388_v12, 0.0 }
 0x18a   : > { %v3064_v5 = vunpack.c.l.b16 %v13496_v30  ;;  %v15418_v36 = vsel %vm2588_vm7, %v2125_v55, -inf  ;;  %v15421_v29 = vsel %vm2588_vm7, %v2132_v47, -inf  ;;  %v901_v21 = vadd.f32 %v15270_v60, %v13921_v20 }
 0x18b   : > { %v3125_v18 = vsel %vm589_vm8, %v3062_v4, %v3061_v14  ;;  %v2138_v27 = vrot.slane %v2137_v17, 1  ;;  %v1240_v28 = vcombine.high %v968_v16, %v968_v16  ;;  %v1247_v31 = vrot.slane %v968_v16, %v15012_v37 }
 0x18c   : > { %v3126_v45 = vsel %vm3103_vm9, %v3063_v62, %v3125_v18  ;;  %v973_v44 = vmax.f32 %v901_v21, 0.0  ;;  %v893_v12 = vadd.f32 %v15270_v60, %v892_v26  ;;  %v15429_v51 = vadd.f32 %v15270_v60, %v13922_v6 }
 0x18d   : > { %v2139_v39 = vmax.f32 %v2137_v17, %v2138_v27  ;;  %v1254_v40 = vrot.slane %v1240_v28, %v15012_v37  ;;  %v1255_v42 = vcombine.high %v1247_v31, %v1247_v31  ;;  %v2056_v20 = vsel %vm1691_vm6, %v1247_v31, -inf }
 0x18e   : > { %v2057_v48 = vrot.slane %v2056_v20, 4  ;;  %v15434_v54 = vsel %vm3105_vm10, %v3064_v5, %v3126_v45  ;;  %v1325_v38 = vcombine.high %v973_v44, %v973_v44  ;;  %v1332_v49 = vrot.slane %v973_v44, %v15012_v37 }
 0x18f   : > { %v15438_v57 = vsel %vm2588_vm7, %v2139_v39, -inf  ;;  %v1256_v26 = vcombine.high %v1254_v40, %v1254_v40  ;;  %v2063_v14 = vsel %vm1691_vm6, %v1255_v42, -inf  ;;  %v2070_v7 = vsel %vm1691_vm6, %v1254_v40, -inf }
 0x190   : > { %v2058_v30 = vmax.f32 %v2056_v20, %v2057_v48  ;;  %v2064_v62 = vrot.slane %v2063_v14, 4  ;;  %v2071_v55 = vrot.slane %v2070_v7, 4  ;;  %v1339_v47 = vrot.slane %v1325_v38, %v15012_v37 }
 0x191   : > { %v2077_v4 = vsel %vm1691_vm6, %v1256_v26, -inf  ;;  %v1340_v17 = vcombine.high %v1332_v49, %v1332_v49  ;;  %v2196_v16 = vsel %vm1691_vm6, %v1332_v49, -inf  ;;  %v15445_v6 = vmax.f32 %v893_v12, 0.0 }
 0x192   : > { %v2059_v5 = vrot.slane %v2058_v30, 2  ;;  %v2065_v21 = vmax.f32 %v2063_v14, %v2064_v62  ;;  %v2072_v18 = vmax.f32 %v2070_v7, %v2071_v55  ;;  %v2078_v27 = vrot.slane %v2077_v4, 4 }
 0x193   : > { %v1341_v28 = vcombine.high %v1339_v47, %v1339_v47  ;;  %v2197_v31 = vrot.slane %v2196_v16, 4  ;;  %v2203_v45 = vsel %vm1691_vm6, %v1340_v17, -inf  ;;  %v2210_v44 = vsel %vm1691_vm6, %v1339_v47, -inf }
 0x194   : > { %v2060_v39 = vmax.f32 %v2058_v30, %v2059_v5  ;;  %v2066_v40 = vrot.slane %v2065_v21, 2  ;;  %v2073_v42 = vrot.slane %v2072_v18, 2  ;;  %v2079_v20 = vmax.f32 %v2077_v4, %v2078_v27 }
 0x195   : > { %v2198_v48 = vmax.f32 %v2196_v16, %v2197_v31  ;;  %v2204_v38 = vrot.slane %v2203_v45, 4  ;;  %v2211_v26 = vrot.slane %v2210_v44, 4  ;;  %v2217_v12 = vsel %vm1691_vm6, %v1341_v28, -inf }
 0x196   : > { %v2061_v49 = vrot.slane %v2060_v39, 1  ;;  %v2067_v43 = vmax.f32 %v2065_v21, %v2066_v40  ;;  %v2074_v14 = vmax.f32 %v2072_v18, %v2073_v42  ;;  %v2080_v7 = vrot.slane %v2079_v20, 2 }
 0x197   : > { %v2199_v62 = vrot.slane %v2198_v48, 2  ;;  %v2205_v55 = vmax.f32 %v2203_v45, %v2204_v38  ;;  %v2212_v35 = vmax.f32 %v2210_v44, %v2211_v26  ;;  %v2218_v32 = vrot.slane %v2217_v12, 4 }
 0x198   : > { %v2062_v17 = vmax.f32 %v2060_v39, %v2061_v49  ;;  %v2068_v25 = vrot.slane %v2067_v43, 1  ;;  %v2075_v47 = vrot.slane %v2074_v14, 1  ;;  %v2081_v30 = vmax.f32 %v2079_v20, %v2080_v7 }
 0x199   : > { %v2200_v5 = vmax.f32 %v2198_v48, %v2199_v62  ;;  %v2206_v1 = vrot.slane %v2205_v55, 2  ;;  %v2213_v4 = vrot.slane %v2212_v35, 2  ;;  %v2219_v16 = vmax.f32 %v2217_v12, %v2218_v32  ;;  %v3211_v12 = vld [vmem:[#allocation2 + $0x24] sm:$0x1] }
 0x19a   : > { %v2069_v27 = vmax.f32 %v2067_v43, %v2068_v25  ;;  %v2076_v31 = vmax.f32 %v2074_v14, %v2075_v47  ;;  %v2082_v24 = vrot.slane %v2081_v30, 1  ;;  %v2673_v28 = vsel %vm2588_vm7, %v2062_v17, -inf }
 0x19b   : > { %v15452_v21 = vmax.f32 %v2673_v28, %v15414_v59  ;;  %v2201_v18 = vrot.slane %v2200_v5, 1  ;;  %v2207_v45 = vmax.f32 %v2205_v55, %v2206_v1  ;;  %v2214_v44 = vmax.f32 %v2212_v35, %v2213_v4 }
 0x19c   : > { %v2083_v40 = vmax.f32 %v2081_v30, %v2082_v24  ;;  %v2676_v39 = vsel %vm2588_vm7, %v2069_v27, -inf  ;;  %v2679_v42 = vsel %vm2588_vm7, %v2076_v31, -inf  ;;  %v2220_v20 = vrot.slane %v2219_v16, 2  ;;  %v519_v30 = vld [vmem:[#allocation2 + $0x28] sm:$0x1] }
 0x19d   : > { %18839 = vst [vmem:[#allocation31_spill] sm:$0xff] %v15452_v21  ;;  %v15457_v48 = vmax.f32 %v2676_v39, %v15418_v36  ;;  %v15460_v25 = vmax.f32 %v2679_v42, %v15421_v29  ;;  %v13497_v32 = vpack.c.bf16 %v15452_v21, %v15452_v21  ;;  %v2202_v43 = vmax.f32 %v2200_v5, %v2201_v18 }
 0x19e   : > { %v2682_v59 = vsel %vm2588_vm7, %v2083_v40, -inf  ;;  %v2208_v1 = vrot.slane %v2207_v45, 1  ;;  %v2215_v35 = vrot.slane %v2214_v44, 1  ;;  %v2221_v24 = vmax.f32 %v2219_v16, %v2220_v20 }
 0x19f   : > { %18840 = vst [vmem:[#allocation32_spill] sm:$0xff] %v15457_v48  ;;  %18841 = vst [vmem:[#allocation33_spill] sm:$0xff] %v15460_v25  ;;  %v15466_v38 = vmax.f32 %v2682_v59, %v15438_v57  ;;  %v13498_v26 = vpack.c.bf16 %v15457_v48, %v15457_v48  ;;  %v13499_v36 = vpack.c.bf16 %v15460_v25, %v15460_v25  ;;  %v3065_v29 = vunpack.c.l.b16 %v13497_v32 }
 0x1a0   : > { %v2209_v49 = vmax.f32 %v2207_v45, %v2208_v1  ;;  %v2216_v14 = vmax.f32 %v2214_v44, %v2215_v35  ;;  %v2222_v7 = vrot.slane %v2221_v24, 1  ;;  %v15473_v62 = vsel %vm2588_vm7, %v2202_v43, -inf  ;;  %v3208_v44 = vld [vmem:[#allocation2 + $0x20] sm:$0xf] }
 0x1a1   : > { %18842 = vst [vmem:[#allocation34_spill] sm:$0xff] %v15466_v38  ;;  %v3066_v55 = vunpack.c.l.b16 %v13498_v26  ;;  %v3067_v17 = vunpack.c.l.b16 %v13499_v36  ;;  %v3128_v57 = vsel %vm3107_vm11, %v3065_v29, %v15434_v54  ;;  %v13536_v47 = vpack.c.bf16 %v15466_v38, %v15466_v38 }
 0x1a2   : > { %v2223_v5 = vmax.f32 %v2221_v24, %v2222_v7  ;;  %v15480_v4 = vsel %vm2588_vm7, %v2209_v49, -inf  ;;  %v15483_v16 = vsel %vm2588_vm7, %v2216_v14, -inf  ;;  %v1291_v27 = vcombine.high %v15445_v6, %v15445_v6 }
 0x1a3   : > { %v3129_v31 = vsel %vm3109_vm12, %v3066_v55, %v3128_v57  ;;  %v3212_v28 = vsel %vm14993_vm5, %v13536_v47, %v3211_v12  ;;  %v1298_v54 = vrot.slane %v15445_v6, %v15012_v37  ;;  %v974_v18 = vmax.f32 %v15429_v51, 0.0 }
 0x1a4   : > { %v3130_v45 = vsel %vm3111_vm14, %v3067_v17, %v3129_v31  ;;  %3213 = vst [vmem:[#allocation2 + $0x24] sm:$0x1] %v3212_v28  ;;  %v15495_v40 = vsel %vm2588_vm7, %v2223_v5, -inf  ;;  %v1305_v39 = vrot.slane %v1291_v27, %v15012_v37  ;;  %v520_v42 = vsel %vm14993_vm5, 0, %v519_v30 }
 0x1a5   : > { %v3161_v20 = vpack.c.b16 %v3130_v45, %v3130_v45  ;;  %v1306_v32 = vcombine.high %v1298_v54, %v1298_v54  ;;  %v2140_v43 = vsel %vm1691_vm6, %v1298_v54, -inf  ;;  %v1342_v59 = vcombine.high %v974_v18, %v974_v18  ;;  %521 = vst [vmem:[#allocation2 + $0x28] sm:$0x1] %v520_v42 }
 0x1a6   : > { %v1307_v6 = vcombine.high %v1305_v39, %v1305_v39  ;;  %v2141_v51 = vrot.slane %v2140_v43, 4  ;;  %v2154_v1 = vsel %vm1691_vm6, %v1305_v39, -inf  ;;  %v1349_v35 = vrot.slane %v974_v18, %v15012_v37 }
 0x1a7   : > { %v3209_v24 = vsel %vm15122_vm15, %v3161_v20, %v3208_v44  ;;  %v2147_v26 = vsel %vm1691_vm6, %v1306_v32, -inf  ;;  %v2155_v36 = vrot.slane %v2154_v1, 4  ;;  %v1356_v29 = vrot.slane %v1342_v59, %v15012_v37  ;;  %v895_v32 = vpop.f32.mrf.mxu0 }
 0x1a8   : > { %3210 = vst [vmem:[#allocation2 + $0x20] sm:$0xf] %v3209_v24  ;;  %v2142_v12 = vmax.f32 %v2140_v43, %v2141_v51  ;;  %v2148_v49 = vrot.slane %v2147_v26, 4  ;;  %v2161_v14 = vsel %vm1691_vm6, %v1307_v6, -inf  ;;  %v1357_v7 = vcombine.high %v1349_v35, %v1349_v35 }
 0x1a9   : > { %v2156_v55 = vmax.f32 %v2154_v1, %v2155_v36  ;;  %v2162_v17 = vrot.slane %v2161_v14, 4  ;;  %v1358_v57 = vcombine.high %v1356_v29, %v1356_v29  ;;  %v2224_v47 = vsel %vm1691_vm6, %v1349_v35, -inf }
 0x1aa   : > { %v2143_v30 = vrot.slane %v2142_v12, 2  ;;  %v2149_v5 = vmax.f32 %v2147_v26, %v2148_v49  ;;  %v2225_v27 = vrot.slane %v2224_v47, 4  ;;  %v2231_v31 = vsel %vm1691_vm6, %v1357_v7, -inf }
 0x1ab   : > { %v2157_v28 = vrot.slane %v2156_v55, 2  ;;  %v2163_v54 = vmax.f32 %v2161_v14, %v2162_v17  ;;  %v2232_v18 = vrot.slane %v2231_v31, 4  ;;  %v2238_v45 = vsel %vm1691_vm6, %v1356_v29, -inf }
 0x1ac   : > { %v2144_v44 = vmax.f32 %v2142_v12, %v2143_v30  ;;  %v2150_v39 = vrot.slane %v2149_v5, 2  ;;  %v2226_v42 = vmax.f32 %v2224_v47, %v2225_v27  ;;  %v2239_v20 = vrot.slane %v2238_v45, 4  ;;  %v13925_v47 = vpop.f32.mrf.mxu0 }
 0x1ad   : > { %v2158_v43 = vmax.f32 %v2156_v55, %v2157_v28  ;;  %v2164_v59 = vrot.slane %v2163_v54, 2  ;;  %v2233_v6 = vmax.f32 %v2231_v31, %v2232_v18  ;;  %v2245_v51 = vsel %vm1691_vm6, %v1358_v57, -inf }
 0x1ae   : > { %v2145_v1 = vrot.slane %v2144_v44, 1  ;;  %v2151_v35 = vmax.f32 %v2149_v5, %v2150_v39  ;;  %v2227_v24 = vrot.slane %v2226_v42, 2  ;;  %v2240_v26 = vmax.f32 %v2238_v45, %v2239_v20 }
 0x1af   : > { %v2159_v36 = vrot.slane %v2158_v43, 1  ;;  %v2165_v49 = vmax.f32 %v2163_v54, %v2164_v59  ;;  %v2234_v14 = vrot.slane %v2233_v6, 2  ;;  %v2246_v7 = vrot.slane %v2245_v51, 4 }
 0x1b0   : > { %v2146_v17 = vmax.f32 %v2144_v44, %v2145_v1  ;;  %v2152_v29 = vrot.slane %v2151_v35, 1  ;;  %v2228_v12 = vmax.f32 %v2226_v42, %v2227_v24  ;;  %v2241_v30 = vrot.slane %v2240_v26, 2 }
 0x1b1   : > { %v2160_v27 = vmax.f32 %v2158_v43, %v2159_v36  ;;  %v2166_v38 = vrot.slane %v2165_v49, 1  ;;  %v2235_v55 = vmax.f32 %v2233_v6, %v2234_v14  ;;  %v2247_v28 = vmax.f32 %v2245_v51, %v2246_v7  ;;  %v908_v6 = vpop.f32.mrf.mxu0 }
 0x1b2   : > { %v2153_v31 = vmax.f32 %v2151_v35, %v2152_v29  ;;  %v2685_v57 = vsel %vm2588_vm7, %v2146_v17, -inf  ;;  %v2229_v18 = vrot.slane %v2228_v12, 1  ;;  %v2242_v5 = vmax.f32 %v2240_v26, %v2241_v30 }
 0x1b3   : > { %v2167_v39 = vmax.f32 %v2165_v49, %v2166_v38  ;;  %v2687_v45 = vmax.f32 %v2685_v57, %v15473_v62  ;;  %v2691_v54 = vsel %vm2588_vm7, %v2160_v27, -inf  ;;  %v2236_v20 = vrot.slane %v2235_v55, 1  ;;  %v551_v49 = vld [vmem:[#allocation2 + $0x2c] sm:$0x1]  ;;  %v13926_v30 = vpop.f32.mrf.mxu0  ;;  %v522_v27 = vld [vmem:[#allocation2 + $0x30] sm:$0x1] }
 0x1b4   : > { %v2688_v44 = vsel %vm2588_vm7, %v2153_v31, -inf  ;;  %v15517_v42 = vmax.f32 %v2691_v54, %v15483_v16  ;;  %v2230_v43 = vmax.f32 %v2228_v12, %v2229_v18  ;;  %v2243_v59 = vrot.slane %v2242_v5, 1 }
 0x1b5   : > { %v2690_v51 = vmax.f32 %v2688_v44, %v15480_v4  ;;  %v2694_v1 = vsel %vm2588_vm7, %v2167_v39, -inf  ;;  %v13501_v35 = vpack.c.bf16 %v2687_v45, %v2687_v45  ;;  %v2237_v24 = vmax.f32 %v2235_v55, %v2236_v20 }
 0x1b6   : > { %18843 = vst [vmem:[#allocation35_spill] sm:$0xff] %v15517_v42  ;;  %v15522_v38 = vmax.f32 %v2694_v1, %v15495_v40  ;;  %v13503_v62 = vpack.c.bf16 %v15517_v42, %v15517_v42  ;;  %v2244_v26 = vmax.f32 %v2242_v5, %v2243_v59  ;;  %v2248_v36 = vrot.slane %v2247_v28, 2 }
 0x1b7   : > { %v13502_v16 = vpack.c.bf16 %v2690_v51, %v2690_v51  ;;  %v3069_v14 = vunpack.c.l.b16 %v13501_v35  ;;  %v15527_v7 = vsel %vm6713_vm0, %v2690_v51, %v2687_v45  ;;  %v15530_v4 = vsel %vm2588_vm7, %v2230_v43, -inf }
 0x1b8   : > { %18844 = vst [vmem:[#allocation36_spill] sm:$0xff] %v15522_v38  ;;  %18845 = vst [vmem:[#allocation37_spill] sm:$0xff] %v15527_v7  ;;  %v13504_v17 = vpack.c.bf16 %v15522_v38, %v15522_v38  ;;  %v3071_v29 = vunpack.c.l.b16 %v13503_v62  ;;  %v2249_v40 = vmax.f32 %v2247_v28, %v2248_v36  ;;  %v15535_v12 = vsel %vm2588_vm7, %v2237_v24, -inf }
 0x1b9   : > { %v3070_v55 = vunpack.c.l.b16 %v13502_v16  ;;  %v15538_v31 = vsel %vm2588_vm7, %v2244_v26, -inf  ;;  %v552_v57 = vsel %vm14985_vm3, 0, %v551_v49  ;;  %v896_v18 = vadd.f32 %v15270_v60, %v895_v32 }
 0x1ba   : > { %v3072_v5 = vunpack.c.l.b16 %v13504_v17  ;;  %v2250_v39 = vrot.slane %v2249_v40, 1  ;;  %553 = vst [vmem:[#allocation2 + $0x2c] sm:$0x1] %v552_v57  ;;  %v917_v45 = vadd.f32 %v15270_v60, %v13925_v47  ;;  %v909_v28 = vadd.f32 %v15270_v60, %v908_v6 }
 0x1bb   : > { %v3131_v54 = vsel %vm589_vm8, %v3070_v55, %v3069_v14  ;;  %v972_v20 = vmax.f32 %v896_v18, 0.0  ;;  %v920_v44 = vadd.f32 %v15270_v60, %v13926_v30  ;;  %v523_v43 = vsel %vm14993_vm5, 0, %v522_v27 }
 0x1bc   : > { %v3132_v59 = vsel %vm3103_vm9, %v3071_v29, %v3131_v54  ;;  %v2251_v51 = vmax.f32 %v2249_v40, %v2250_v39  ;;  %v977_v1 = vmax.f32 %v917_v45, 0.0  ;;  %v15550_v32 = vmax.f32 %v909_v28, 0.0  ;;  %524 = vst [vmem:[#allocation2 + $0x30] sm:$0x1] %v523_v43 }
 0x1bd   : > { %v1308_v35 = vcombine.high %v972_v20, %v972_v20  ;;  %v1315_v47 = vrot.slane %v972_v20, %v15012_v37  ;;  %v15554_v6 = vsel %vm3105_vm10, %v3072_v5, %v3132_v59  ;;  %v15556_v24 = vmax.f32 %v920_v44, 0.0 }
 0x1be   : > { %v15559_v60 = vsel %vm2588_vm7, %v2251_v51, -inf  ;;  %v1393_v62 = vcombine.high %v977_v1, %v977_v1  ;;  %v1400_v26 = vrot.slane %v977_v1, %v15012_v37  ;;  %v15568_v17 = vrot.slane %v15550_v32, %v15012_v37 }
 0x1bf   : > { %v1322_v49 = vrot.slane %v1308_v35, %v15012_v37  ;;  %v1323_v16 = vcombine.high %v1315_v47, %v1315_v47  ;;  %v2168_v14 = vsel %vm1691_vm6, %v1315_v47, -inf }
 0x1c0   : > { %v2169_v29 = vrot.slane %v2168_v14, 4  ;;  %v1407_v40 = vrot.slane %v1393_v62, %v15012_v37  ;;  %v1408_v30 = vcombine.high %v1400_v26, %v1400_v26  ;;  %v2308_v27 = vsel %vm1691_vm6, %v1400_v26, -inf }
 0x1c1   : > { %v1324_v55 = vcombine.high %v1322_v49, %v1322_v49  ;;  %v2175_v57 = vsel %vm1691_vm6, %v1323_v16, -inf  ;;  %v2182_v18 = vsel %vm1691_vm6, %v1322_v49, -inf  ;;  %v2309_v5 = vrot.slane %v2308_v27, 4 }
 0x1c2   : > { %v2170_v39 = vmax.f32 %v2168_v14, %v2169_v29  ;;  %v2176_v45 = vrot.slane %v2175_v57, 4  ;;  %v2183_v28 = vrot.slane %v2182_v18, 4  ;;  %v1409_v54 = vcombine.high %v1407_v40, %v1407_v40 }
 0x1c3   : > { %v2189_v20 = vsel %vm1691_vm6, %v1324_v55, -inf  ;;  %v2310_v44 = vmax.f32 %v2308_v27, %v2309_v5  ;;  %v2315_v43 = vsel %vm1691_vm6, %v1408_v30, -inf  ;;  %v2322_v59 = vsel %vm1691_vm6, %v1407_v40, -inf }
 0x1c4   : > { %v2171_v51 = vrot.slane %v2170_v39, 2  ;;  %v2177_v1 = vmax.f32 %v2175_v57, %v2176_v45  ;;  %v2184_v35 = vmax.f32 %v2182_v18, %v2183_v28  ;;  %v2190_v47 = vrot.slane %v2189_v20, 4 }
 0x1c5   : > { %v2311_v62 = vrot.slane %v2310_v44, 2  ;;  %v2316_v26 = vrot.slane %v2315_v43, 4  ;;  %v2323_v16 = vrot.slane %v2322_v59, 4  ;;  %v2329_v49 = vsel %vm1691_vm6, %v1409_v54, -inf }
 0x1c6   : > { %v2172_v14 = vmax.f32 %v2170_v39, %v2171_v51  ;;  %v2178_v29 = vrot.slane %v2177_v1, 2  ;;  %v2185_v36 = vrot.slane %v2184_v35, 2  ;;  %v2191_v25 = vmax.f32 %v2189_v20, %v2190_v47 }
 0x1c7   : > { %v2312_v48 = vmax.f32 %v2310_v44, %v2311_v62  ;;  %v2317_v55 = vmax.f32 %v2315_v43, %v2316_v26  ;;  %v2324_v27 = vmax.f32 %v2322_v59, %v2323_v16  ;;  %v2330_v5 = vrot.slane %v2329_v49, 4 }
 0x1c8   : > { %v2173_v30 = vrot.slane %v2172_v14, 1  ;;  %v2179_v21 = vmax.f32 %v2177_v1, %v2178_v29  ;;  %v2186_v40 = vmax.f32 %v2184_v35, %v2185_v36  ;;  %v2192_v22 = vrot.slane %v2191_v25, 2 }
 0x1c9   : > { %v2313_v57 = vrot.slane %v2312_v48, 1  ;;  %v2318_v18 = vrot.slane %v2317_v55, 2  ;;  %v2325_v45 = vrot.slane %v2324_v27, 2  ;;  %v2331_v28 = vmax.f32 %v2329_v49, %v2330_v5  ;;  %v3217_v5 = vld [vmem:[#allocation2 + $0x2c] sm:$0x1] }
 0x1ca   : > { %v2174_v0 = vmax.f32 %v2172_v14, %v2173_v30  ;;  %v2180_v38 = vrot.slane %v2179_v21, 1  ;;  %v2187_v10 = vrot.slane %v2186_v40, 1  ;;  %v2193_v54 = vmax.f32 %v2191_v25, %v2192_v22 }
 0x1cb   : > { %v2314_v39 = vmax.f32 %v2312_v48, %v2313_v57  ;;  %v2319_v51 = vmax.f32 %v2317_v55, %v2318_v18  ;;  %v2326_v13 = vmax.f32 %v2324_v27, %v2325_v45  ;;  %v2332_v20 = vrot.slane %v2331_v28, 2 }
 0x1cc   : > { %v2181_v44 = vmax.f32 %v2179_v21, %v2180_v38  ;;  %v2188_v43 = vmax.f32 %v2186_v40, %v2187_v10  ;;  %v2194_v59 = vrot.slane %v2193_v54, 1  ;;  %v2697_v47 = vsel %vm2588_vm7, %v2174_v0, -inf }
 0x1cd   : > { %v15580_v36 = vmax.f32 %v2697_v47, %v15530_v4  ;;  %v2320_v1 = vrot.slane %v2319_v51, 1  ;;  %v2327_v35 = vrot.slane %v2326_v13, 1  ;;  %v2333_v62 = vmax.f32 %v2331_v28, %v2332_v20 }
 0x1ce   : > { %v2195_v26 = vmax.f32 %v2193_v54, %v2194_v59  ;;  %v2700_v16 = vsel %vm2588_vm7, %v2181_v44, -inf  ;;  %v2703_v22 = vsel %vm2588_vm7, %v2188_v43, -inf  ;;  %v15585_v48 = vsel %vm2588_vm7, %v2314_v39, -inf }
 0x1cf   : > { %18846 = vst [vmem:[#allocation38_spill] sm:$0xff] %v15580_v36  ;;  %v15588_v21 = vmax.f32 %v2700_v16, %v15535_v12  ;;  %v15591_v10 = vmax.f32 %v2703_v22, %v15538_v31  ;;  %v13505_v0 = vpack.c.bf16 %v15580_v36, %v15580_v36  ;;  %v2321_v25 = vmax.f32 %v2319_v51, %v2320_v1  ;;  %v3214_v1 = vld [vmem:[#allocation2 + $0x28] sm:$0xf]  ;;  %v16089_v36 = vld [vmem:[#allocation2 + $0x1c] sm:$0x1] }
 0x1d0   : > { %v2706_v38 = vsel %vm2588_vm7, %v2195_v26, -inf  ;;  %v2328_v4 = vmax.f32 %v2326_v13, %v2327_v35  ;;  %v2334_v49 = vrot.slane %v2333_v62, 1  ;;  %v18849_v14 = vcombine.high %v15550_v32, %v15550_v32 }
 0x1d1   : > { %18847 = vst [vmem:[#allocation39_spill] sm:$0xff] %v15588_v21  ;;  %18848 = vst [vmem:[#allocation40_spill] sm:$0xff] %v15591_v10  ;;  %v15601_v55 = vmax.f32 %v2706_v38, %v15559_v60  ;;  %v13506_v12 = vpack.c.bf16 %v15588_v21, %v15588_v21  ;;  %v13507_v31 = vpack.c.bf16 %v15591_v10, %v15591_v10  ;;  %v3073_v27 = vunpack.c.l.b16 %v13505_v0 }
 0x1d2   : > { %v1373_v29 = vrot.slane %v18849_v14, %v15012_v37  ;;  %v2335_v30 = vmax.f32 %v2333_v62, %v2334_v49  ;;  %v15608_v13 = vsel %vm2588_vm7, %v2321_v25, -inf  ;;  %v15611_v40 = vsel %vm2588_vm7, %v2328_v4, -inf }
 0x1d3   : > { %18850 = vst [vmem:[#allocation41_spill] sm:$0xff] %v15601_v55  ;;  %v1374_v32 = vcombine.high %v15568_v17, %v15568_v17  ;;  %v3074_v60 = vunpack.c.l.b16 %v13506_v12  ;;  %v3075_v57 = vunpack.c.l.b16 %v13507_v31  ;;  %v3134_v18 = vsel %vm3107_vm11, %v3073_v27, %v15554_v6  ;;  %v554_v6 = vld [vmem:[#allocation2 + $0x34] sm:$0x1] }
 0x1d4   : > { %v13537_v45 = vpack.c.bf16 %v15601_v55, %v15601_v55  ;;  %v15620_v28 = vsel %vm2588_vm7, %v2335_v30, -inf  ;;  %v1375_v54 = vcombine.high %v1373_v29, %v1373_v29  ;;  %v2252_v39 = vsel %vm1691_vm6, %v15568_v17, -inf }
 0x1d5   : > { %v2259_v51 = vsel %vm1691_vm6, %v1374_v32, -inf  ;;  %v3135_v20 = vsel %vm3109_vm12, %v3074_v60, %v3134_v18  ;;  %v2253_v43 = vrot.slane %v2252_v39, 4  ;;  %v2266_v35 = vsel %vm1691_vm6, %v1373_v29, -inf }
 0x1d6   : > { %v3218_v44 = vsel %vm14993_vm5, %v13537_v45, %v3217_v5  ;;  %v2260_v59 = vrot.slane %v2259_v51, 4  ;;  %v3136_v47 = vsel %vm3111_vm14, %v3075_v57, %v3135_v20  ;;  %v2273_v62 = vsel %vm1691_vm6, %v1375_v54, -inf }
 0x1d7   : > { %3219 = vst [vmem:[#allocation2 + $0x2c] sm:$0x1] %v3218_v44  ;;  %v1410_v17 = vcombine.high %v15556_v24, %v15556_v24  ;;  %v3163_v26 = vpack.c.b16 %v3136_v47, %v3136_v47  ;;  %v2254_v16 = vmax.f32 %v2252_v39, %v2253_v43  ;;  %v2267_v0 = vrot.slane %v2266_v35, 4 }
 0x1d8   : > { %v2261_v22 = vmax.f32 %v2259_v51, %v2260_v59  ;;  %v2274_v25 = vrot.slane %v2273_v62, 4  ;;  %v1417_v38 = vrot.slane %v15556_v24, %v15012_v37  ;;  %v555_v49 = vsel %vm14985_vm3, 0, %v554_v6 }
 0x1d9   : > { %v1424_v4 = vrot.slane %v1410_v17, %v15012_v37  ;;  %v3215_v14 = vsel %vm15122_vm15, %v3163_v26, %v3214_v1  ;;  %v2255_v29 = vrot.slane %v2254_v16, 2  ;;  %v2268_v31 = vmax.f32 %v2266_v35, %v2267_v0  ;;  %556 = vst [vmem:[#allocation2 + $0x34] sm:$0x1] %v555_v49 }
 0x1da   : > { %v2262_v12 = vrot.slane %v2261_v22, 2  ;;  %3216 = vst [vmem:[#allocation2 + $0x28] sm:$0xf] %v3215_v14  ;;  %v2275_v27 = vmax.f32 %v2273_v62, %v2274_v25  ;;  %v1425_v5 = vcombine.high %v1417_v38, %v1417_v38  ;;  %v2336_v32 = vsel %vm1691_vm6, %v1417_v38, -inf }
 0x1db   : > { %v1426_v30 = vcombine.high %v1424_v4, %v1424_v4  ;;  %v2256_v60 = vmax.f32 %v2254_v16, %v2255_v29  ;;  %v2269_v57 = vrot.slane %v2268_v31, 2  ;;  %v2337_v18 = vrot.slane %v2336_v32, 4 }
 0x1dc   : > { %v2263_v24 = vmax.f32 %v2261_v22, %v2262_v12  ;;  %v2276_v45 = vrot.slane %v2275_v27, 2  ;;  %v2343_v54 = vsel %vm1691_vm6, %v1425_v5, -inf  ;;  %v2350_v39 = vsel %vm1691_vm6, %v1424_v4, -inf  ;;  %v911_v22 = vpop.f32.mrf.mxu0  ;;  %v14019_v4 = vld [vmem:[%s18744_s3 + $0x118] sm:$0xff]  }
 0x1dd   : > { %v2357_v51 = vsel %vm1691_vm6, %v1426_v30, -inf  ;;  %v2257_v20 = vrot.slane %v2256_v60, 1  ;;  %v2270_v43 = vmax.f32 %v2268_v31, %v2269_v57  ;;  %v2338_v59 = vmax.f32 %v2336_v32, %v2337_v18  ;;  %13935 = vmatprep.subr.bf16.mxu0 %v14019_v4 }
 0x1de   : > { %v2264_v44 = vrot.slane %v2263_v24, 1  ;;  %v2277_v6 = vmax.f32 %v2275_v27, %v2276_v45  ;;  %v2344_v47 = vrot.slane %v2343_v54, 4  ;;  %v2351_v1 = vrot.slane %v2350_v39, 4  ;;  %v13929_v45 = vpop.f32.mrf.mxu0  ;;  %13936 = vmatpush3.bf16.msra.mxu0 %v14019_v4 }
 0x1df   : > { %v2358_v35 = vrot.slane %v2357_v51, 4  ;;  %v2258_v62 = vmax.f32 %v2256_v60, %v2257_v20  ;;  %v2271_v26 = vrot.slane %v2270_v43, 1  ;;  %v2339_v16 = vrot.slane %v2338_v59, 2 }
 0x1e0   : > { %v2265_v17 = vmax.f32 %v2263_v24, %v2264_v44  ;;  %v2278_v0 = vrot.slane %v2277_v6, 1  ;;  %v2345_v25 = vmax.f32 %v2343_v54, %v2344_v47  ;;  %v2352_v38 = vmax.f32 %v2350_v39, %v2351_v1 }
 0x1e1   : > { %v2359_v49 = vmax.f32 %v2357_v51, %v2358_v35  ;;  %v2272_v14 = vmax.f32 %v2270_v43, %v2271_v26  ;;  %v2709_v29 = vsel %vm2588_vm7, %v2258_v62, -inf  ;;  %v2340_v31 = vmax.f32 %v2338_v59, %v2339_v16  ;;  %v16154_v46 = vld [vmem:[#allocation2 + $0x28] sm:$0xf] }
 0x1e2   : > { %v2712_v12 = vsel %vm2588_vm7, %v2265_v17, -inf  ;;  %v2279_v27 = vmax.f32 %v2277_v6, %v2278_v0  ;;  %v2711_v5 = vmax.f32 %v2709_v29, %v15585_v48  ;;  %v2346_v32 = vrot.slane %v2345_v25, 2 }
 0x1e3   : > { %v2714_v30 = vmax.f32 %v2712_v12, %v15608_v13  ;;  %v2715_v60 = vsel %vm2588_vm7, %v2272_v14, -inf  ;;  %v2341_v24 = vrot.slane %v2340_v31, 1  ;;  %v2353_v57 = vrot.slane %v2352_v38, 2 }
 0x1e4   : > { %v2360_v18 = vrot.slane %v2359_v49, 2  ;;  %v15653_v54 = vmax.f32 %v2715_v60, %v15611_v40  ;;  %v2718_v39 = vsel %vm2588_vm7, %v2279_v27, -inf  ;;  %v13509_v51 = vpack.c.bf16 %v2711_v5, %v2711_v5 }
 0x1e5   : > { %v13510_v20 = vpack.c.bf16 %v2714_v30, %v2714_v30  ;;  %v15657_v48 = vmax.f32 %v2718_v39, %v15620_v28  ;;  %v15660_v13 = vsel %vm6713_vm0, %v2714_v30, %v2711_v5  ;;  %v2342_v44 = vmax.f32 %v2340_v31, %v2341_v24  ;;  %v924_v28 = vpop.f32.mrf.mxu0 }
 0x1e6   : > { %18851 = vst [vmem:[#allocation42_spill] sm:$0xff] %v15653_v54  ;;  %18853 = vst [vmem:[#allocation44_spill] sm:$0xff] %v15660_v13  ;;  %v2347_v43 = vmax.f32 %v2345_v25, %v2346_v32  ;;  %v13511_v59 = vpack.c.bf16 %v15653_v54, %v15653_v54  ;;  %v3077_v6 = vunpack.c.l.b16 %v13509_v51  ;;  %v2354_v1 = vmax.f32 %v2352_v38, %v2353_v57  ;;  %v15673_v25 = vld [vmem:[%s18743_s2] ss:$0 sm:$0xff]  ;;  %v14024_v57 = vld [vmem:[%s18744_s3 + $0x108] sm:$0xff]  }
 0x1e7   : > { %18852 = vst [vmem:[#allocation43_spill] sm:$0xff] %v15657_v48  ;;  %v3078_v47 = vunpack.c.l.b16 %v13510_v20  ;;  %v13512_v40 = vpack.c.bf16 %v15657_v48, %v15657_v48  ;;  %v2361_v62 = vmax.f32 %v2359_v49, %v2360_v18  ;;  %v15667_v17 = vsel %vm2588_vm7, %v2342_v44, -inf }
 0x1e8   : > { %v2348_v35 = vrot.slane %v2347_v43, 1  ;;  %v3079_v26 = vunpack.c.l.b16 %v13511_v59  ;;  %v2355_v0 = vrot.slane %v2354_v1, 1  ;;  %v912_v38 = vadd.f32 %v15673_v25, %v911_v22  ;;  %v14022_v22 = vld [vmem:[%s18744_s3 + $0x110] sm:$0xff]  }
 0x1e9   : > { %v3137_v16 = vsel %vm589_vm8, %v3078_v47, %v3077_v6  ;;  %v3080_v4 = vunpack.c.l.b16 %v13512_v40  ;;  %v2362_v29 = vrot.slane %v2361_v62, 1  ;;  %v933_v49 = vadd.f32 %v15673_v25, %v13929_v45  ;;  %13937 = vmatprep.subr.bf16.mxu0 %v14022_v22 }
 0x1ea   : > { %v2349_v14 = vmax.f32 %v2347_v43, %v2348_v35  ;;  %v3138_v12 = vsel %vm3103_vm9, %v3079_v26, %v3137_v16  ;;  %v2356_v31 = vmax.f32 %v2354_v1, %v2355_v0  ;;  %v976_v27 = vmax.f32 %v912_v38, 0.0  ;;  %13938 = vmatpush3.bf16.msra.mxu0 %v14022_v22  ;;  %v14026_v16 = vld [vmem:[%s18744_s3 + $0x100] sm:$0xff]  }
 0x1eb   : > { %v925_v5 = vadd.f32 %v15673_v25, %v924_v28  ;;  %v2363_v30 = vmax.f32 %v2361_v62, %v2362_v29  ;;  %v15683_v60 = vsel %vm3105_vm10, %v3080_v4, %v3138_v12  ;;  %v981_v24 = vmax.f32 %v933_v49, 0.0  ;;  %13939 = vmatprep.subr.bf16.mxu0 %v14024_v57 }
 0x1ec   : > { %v15680_v32 = vsel %vm2588_vm7, %v2349_v14, -inf  ;;  %v15692_v18 = vsel %vm2588_vm7, %v2356_v31, -inf  ;;  %v1376_v45 = vcombine.high %v976_v27, %v976_v27  ;;  %v1383_v39 = vrot.slane %v976_v27, %v15012_v37 }
 0x1ed   : > { %v15695_v51 = vmax.f32 %v925_v5, 0.0  ;;  %v15698_v20 = vsel %vm2588_vm7, %v2363_v30, -inf  ;;  %v1461_v44 = vcombine.high %v981_v24, %v981_v24  ;;  %v1468_v43 = vrot.slane %v981_v24, %v15012_v37 }
 0x1ee   : > { %v1390_v59 = vrot.slane %v1376_v45, %v15012_v37  ;;  %v1391_v6 = vcombine.high %v1383_v39, %v1383_v39  ;;  %v2280_v47 = vsel %vm1691_vm6, %v1383_v39, -inf  ;;  %v18774_v40 = vmov 0   ;;  %13940 = vmatpush3.bf16.msra.mxu0 %v14024_v57 }
 0x1ef   : > { %495 = vst.msk [vmem:[#allocation2] sm:$0xf] %vm494_vm13, %v18774_v40  ;;  %566 = vst [vmem:[#allocation4] sm:$0x7] %v18774_v40  ;;  %v2281_v35 = vrot.slane %v2280_v47, 4  ;;  %v1475_v62 = vrot.slane %v1461_v44, %v15012_v37  ;;  %v1476_v28 = vcombine.high %v1468_v43, %v1468_v43  ;;  %v2420_v26 = vsel %vm1691_vm6, %v1468_v43, -inf  ;;  %13941 = vmatprep.subr.bf16.mxu0 %v14026_v16 }
 0x1f0   : > { %497 = vst.msk [vmem:[#allocation2 + $0x4] sm:$0x1] %vm496_vm1, %v18774_v40  ;;  %568 = vst [vmem:[#allocation4 + $0x14] sm:$0x7] %v18774_v40  ;;  %v1392_v0 = vcombine.high %v1390_v59, %v1390_v59  ;;  %v2287_v38 = vsel %vm1691_vm6, %v1391_v6, -inf  ;;  %v2294_v4 = vsel %vm1691_vm6, %v1390_v59, -inf }
 0x1f1   : > { %499 = vst.msk [vmem:[#allocation2 + $0x48] sm:$0xf] %vm494_vm13, %v18774_v40  ;;  %v2421_v14 = vrot.slane %v2420_v26, 4  ;;  %v2282_v29 = vmax.f32 %v2280_v47, %v2281_v35  ;;  %v2288_v49 = vrot.slane %v2287_v38, 4  ;;  %v2295_v12 = vrot.slane %v2294_v4, 4 }
 0x1f2   : > { %500 = vst.msk [vmem:[#allocation2 + $0x4c] sm:$0x1] %vm496_vm1, %v18774_v40  ;;  %v1477_v31 = vcombine.high %v1475_v62, %v1475_v62  ;;  %v2301_v27 = vsel %vm1691_vm6, %v1392_v0, -inf  ;;  %v2427_v30 = vsel %vm1691_vm6, %v1476_v28, -inf  ;;  %v2434_v24 = vsel %vm1691_vm6, %v1475_v62, -inf  ;;  %13942 = vmatpush3.bf16.msra.mxu0 %v14026_v16 }
 0x1f3   : > { %v2422_v5 = vmax.f32 %v2420_v26, %v2421_v14  ;;  %v2283_v22 = vrot.slane %v2282_v29, 2  ;;  %v2289_v45 = vmax.f32 %v2287_v38, %v2288_v49  ;;  %v2296_v39 = vmax.f32 %v2294_v4, %v2295_v12 }
 0x1f4   : > { %v2302_v44 = vrot.slane %v2301_v27, 4  ;;  %v2428_v59 = vrot.slane %v2427_v30, 4  ;;  %v2435_v6 = vrot.slane %v2434_v24, 4  ;;  %v2441_v47 = vsel %vm1691_vm6, %v1477_v31, -inf }
 0x1f5   : > { %v2423_v43 = vrot.slane %v2422_v5, 2  ;;  %v2284_v35 = vmax.f32 %v2282_v29, %v2283_v22  ;;  %v2290_v40 = vrot.slane %v2289_v45, 2  ;;  %v2297_v1 = vrot.slane %v2296_v39, 2 }
 0x1f6   : > { %v2303_v0 = vmax.f32 %v2301_v27, %v2302_v44  ;;  %v2429_v14 = vmax.f32 %v2427_v30, %v2428_v59  ;;  %v2436_v28 = vmax.f32 %v2434_v24, %v2435_v6  ;;  %v2442_v55 = vrot.slane %v2441_v47, 4 }
 0x1f7   : > { %v2424_v26 = vmax.f32 %v2422_v5, %v2423_v43  ;;  %v2285_v57 = vrot.slane %v2284_v35, 1  ;;  %v2291_v62 = vmax.f32 %v2289_v45, %v2290_v40  ;;  %v2298_v38 = vmax.f32 %v2296_v39, %v2297_v1 }
 0x1f8   : > { %v2304_v4 = vrot.slane %v2303_v0, 2  ;;  %v2430_v12 = vrot.slane %v2429_v14, 2  ;;  %v2437_v10 = vrot.slane %v2436_v28, 2  ;;  %v2443_v48 = vmax.f32 %v2441_v47, %v2442_v55 }
 0x1f9   : > { %v2425_v49 = vrot.slane %v2424_v26, 1  ;;  %v2286_v21 = vmax.f32 %v2284_v35, %v2285_v57  ;;  %v2292_v54 = vrot.slane %v2291_v62, 1  ;;  %v2299_v31 = vrot.slane %v2298_v38, 1 }
 0x1fa   : > { %v2305_v29 = vmax.f32 %v2303_v0, %v2304_v4  ;;  %v2431_v13 = vmax.f32 %v2429_v14, %v2430_v12  ;;  %v2438_v27 = vmax.f32 %v2436_v28, %v2437_v10  ;;  %v2444_v5 = vrot.slane %v2443_v48, 2  ;;  %v3223_v28 = vld [vmem:[#allocation2 + $0x34] sm:$0x1]  ;;  %v13930_v4 = vpop.f32.mrf.mxu0 }
 0x1fb   : > { %v2426_v22 = vmax.f32 %v2424_v26, %v2425_v49  ;;  %v2293_v30 = vmax.f32 %v2291_v62, %v2292_v54  ;;  %v2300_v24 = vmax.f32 %v2298_v38, %v2299_v31  ;;  %v2721_v16 = vsel %vm2588_vm7, %v2286_v21, -inf }
 0x1fc   : > { %v2306_v44 = vrot.slane %v2305_v29, 1  ;;  %v15728_v1 = vmax.f32 %v2721_v16, %v15667_v17  ;;  %v2432_v40 = vrot.slane %v2431_v13, 1  ;;  %v2439_v45 = vrot.slane %v2438_v27, 1 }
 0x1fd   : > { %v2445_v39 = vmax.f32 %v2443_v48, %v2444_v5  ;;  %v2724_v43 = vsel %vm2588_vm7, %v2293_v30, -inf  ;;  %v2727_v59 = vsel %vm2588_vm7, %v2300_v24, -inf  ;;  %v15733_v6 = vsel %vm2588_vm7, %v2426_v22, -inf  ;;  %v14013_v24 = vld [vmem:[#allocation2 + $0x8] ss:$0 sps:$4 sm:$0xff]  }
 0x1fe   : > { %18854 = vst [vmem:[#allocation45_spill] sm:$0xff] %v15728_v1  ;;  %v2307_v55 = vmax.f32 %v2305_v29, %v2306_v44  ;;  %v15736_v10 = vmax.f32 %v2724_v43, %v15680_v32  ;;  %v15739_v54 = vmax.f32 %v2727_v59, %v15692_v18  ;;  %v13513_v21 = vpack.c.bf16 %v15728_v1, %v15728_v1 }
 0x1ff   : > { %v2433_v17 = vmax.f32 %v2431_v13, %v2432_v40  ;;  %v2440_v47 = vmax.f32 %v2438_v27, %v2439_v45  ;;  %v2446_v35 = vrot.slane %v2445_v39, 1  ;;  %v1434_v0 = vrot.slane %v15695_v51, %v15012_v37  ;;  %v536_v45 = vld [vmem:[#allocation2 + $0x4] sm:$0x1] }
 0x200   : > { %18855 = vst [vmem:[#allocation46_spill] sm:$0xff] %v15736_v10  ;;  %18856 = vst [vmem:[#allocation47_spill] sm:$0xff] %v15739_v54  ;;  %v2730_v48 = vsel %vm2588_vm7, %v2307_v55, -inf  ;;  %v13514_v32 = vpack.c.bf16 %v15736_v10, %v15736_v10  ;;  %v13515_v18 = vpack.c.bf16 %v15739_v54, %v15739_v54  ;;  %v3081_v14 = vunpack.c.l.b16 %v13513_v21  ;;  %v3220_v55 = vld [vmem:[#allocation2 + $0x30] sm:$0xf] }
 0x201   : > { %v15747_v26 = vmax.f32 %v2730_v48, %v15698_v20  ;;  %v2447_v57 = vmax.f32 %v2445_v39, %v2446_v35  ;;  %v15754_v13 = vsel %vm2588_vm7, %v2433_v17, -inf  ;;  %v15757_v62 = vsel %vm2588_vm7, %v2440_v47, -inf  ;;  %v927_v17 = vpop.f32.mrf.mxu0 }
 0x202   : > { %v18858_v20 = vcombine.high %v15695_v51, %v15695_v51  ;;  %v3082_v49 = vunpack.c.l.b16 %v13514_v32  ;;  %v3083_v12 = vunpack.c.l.b16 %v13515_v18  ;;  %v3140_v31 = vsel %vm3107_vm11, %v3081_v14, %v15683_v60  ;;  %v504_v60 = vld [vmem:[#allocation2] sm:$0x1]  ;;  %v525_v32 = vld [vmem:[#allocation2 + $0x38] sm:$0x1] }
 0x203   : > { %18857 = vst [vmem:[#allocation48_spill] sm:$0xff] %v15747_v26  ;;  %v13538_v29 = vpack.c.bf16 %v15747_v26, %v15747_v26  ;;  %v15768_v22 = vsel %vm2588_vm7, %v2447_v57, -inf  ;;  %v1442_v27 = vcombine.high %v1434_v0, %v1434_v0  ;;  %v2364_v30 = vsel %vm1691_vm6, %v1434_v0, -inf }
 0x204   : > { %v1441_v38 = vrot.slane %v18858_v20, %v15012_v37  ;;  %v3141_v51 = vsel %vm3109_vm12, %v3082_v49, %v3140_v31  ;;  %v2365_v16 = vrot.slane %v2364_v30, 4  ;;  %v505_v14 = vsel %vm14993_vm5, 0, %v504_v60  ;;  %v557_v20 = vld [vmem:[#allocation2 + $0x3c] sm:$0x1] }
 0x205   : > { %v3224_v44 = vsel %vm14993_vm5, %v13538_v29, %v3223_v28  ;;  %v3142_v39 = vsel %vm3111_vm14, %v3083_v12, %v3141_v51  ;;  %v2371_v43 = vsel %vm1691_vm6, %v1442_v27, -inf  ;;  %v537_v28 = vsel %vm14985_vm3, 0, %v536_v45  ;;  %506 = vst [vmem:[#allocation2] sm:$0x1] %v505_v14  ;;  %v13933_v51 = vpop.f32.mrf.mxu0 }
 0x206   : > { %v1443_v5 = vcombine.high %v1441_v38, %v1441_v38  ;;  %v2378_v40 = vsel %vm1691_vm6, %v1441_v38, -inf  ;;  %3225 = vst [vmem:[#allocation2 + $0x34] sm:$0x1] %v3224_v44  ;;  %v3165_v48 = vpack.c.b16 %v3142_v39, %v3142_v39  ;;  %v2366_v47 = vmax.f32 %v2364_v30, %v2365_v16  ;;  %538 = vst [vmem:[#allocation2 + $0x4] sm:$0x1] %v537_v28 }
 0x207   : > { %v2379_v59 = vrot.slane %v2378_v40, 4  ;;  %v2372_v35 = vrot.slane %v2371_v43, 4  ;;  %v936_v57 = vadd.f32 %v15673_v25, %v13930_v4  ;;  %v526_v30 = vsel %vm14993_vm5, 0, %v525_v32 }
 0x208   : > { %v2385_v21 = vsel %vm1691_vm6, %v1443_v5, -inf  ;;  %v3221_v38 = vsel %vm15122_vm15, %v3165_v48, %v3220_v55  ;;  %v2367_v49 = vrot.slane %v2366_v47, 2  ;;  %v3494_v5 = vrot.slane %v14013_v24, 7  ;;  %527 = vst [vmem:[#allocation2 + $0x38] sm:$0x1] %v526_v30 }
 0x209   : > { %v2386_v0 = vrot.slane %v2385_v21, 4  ;;  %v2380_v18 = vmax.f32 %v2378_v40, %v2379_v59  ;;  %v2373_v12 = vmax.f32 %v2371_v43, %v2372_v35  ;;  %3222 = vst [vmem:[#allocation2 + $0x30] sm:$0xf] %v3221_v38  ;;  %v982_v27 = vmax.f32 %v936_v57, 0.0 }
 0x20a   : > { %v2368_v44 = vmax.f32 %v2366_v47, %v2367_v49  ;;  %v558_v40 = vsel %vm14985_vm3, 0, %v557_v20  ;;  %3502 = vrot.lane.b32.xlu0 %v3494_v5, %s14845_s29  ;;  %v928_v24 = vadd.f32 %v15673_v25, %v927_v17  ;;  %vm3582_vm1 = vcmask 1042432  }
 0x20b   : > { %v2387_v31 = vmax.f32 %v2385_v21, %v2386_v0  ;;  %v2381_v29 = vrot.slane %v2380_v18, 2  ;;  %v2374_v16 = vrot.slane %v2373_v12, 2  ;;  %v1478_v45 = vcombine.high %v982_v27, %v982_v27  ;;  %559 = vst [vmem:[#allocation2 + $0x3c] sm:$0x1] %v558_v40  ;;  %vm16013_vm4 = vmor %vm3582_vm1, %vm3583_vm2 }
 0x20c   : > { %v1485_v39 = vrot.slane %v982_v27, %v15012_v37  ;;  %v2369_v55 = vrot.slane %v2368_v44, 1  ;;  %v949_v21 = vadd.f32 %v15673_v25, %v13933_v51  ;;  %v3238_v20 = vld [vmem:[#allocation2] sm:$0xf] }
 0x20d   : > { %v2388_v4 = vrot.slane %v2387_v31, 2  ;;  %v2382_v60 = vmax.f32 %v2380_v18, %v2381_v29  ;;  %v2375_v43 = vmax.f32 %v2373_v12, %v2374_v16  ;;  %v1492_v47 = vrot.slane %v1478_v45, %v15012_v37  ;;  %v3246_v38 = vld [vmem:[#allocation2 + $0x4] sm:$0x1] }
 0x20e   : > { %v1493_v35 = vcombine.high %v1485_v39, %v1485_v39  ;;  %v2448_v0 = vsel %vm1691_vm6, %v1485_v39, -inf  ;;  %v2370_v32 = vmax.f32 %v2368_v44, %v2369_v55  ;;  %v12580_v5 = vcombine.low %v3238_v20, %v3246_v38 }
 0x20f   : > { %v2389_v59 = vmax.f32 %v2387_v31, %v2388_v4  ;;  %v2383_v48 = vrot.slane %v2382_v60, 1  ;;  %v2376_v18 = vrot.slane %v2375_v43, 1  ;;  %v2449_v28 = vrot.slane %v2448_v0, 4 }
 0x210   : > { %v1494_v49 = vcombine.high %v1492_v47, %v1492_v47  ;;  %v2455_v17 = vsel %vm1691_vm6, %v1493_v35, -inf  ;;  %v2462_v12 = vsel %vm1691_vm6, %v1492_v47, -inf  ;;  %v2733_v27 = vsel %vm2588_vm7, %v2370_v32, -inf }
 0x211   : > { %v2390_v14 = vrot.slane %v2389_v59, 1  ;;  %v2384_v57 = vmax.f32 %v2382_v60, %v2383_v48  ;;  %v2377_v31 = vmax.f32 %v2375_v43, %v2376_v18  ;;  %v2735_v30 = vmax.f32 %v2733_v27, %v15733_v6 }
 0x212   : > { %v2450_v44 = vmax.f32 %v2448_v0, %v2449_v28  ;;  %v2456_v16 = vrot.slane %v2455_v17, 4  ;;  %v3295_v45 = vshrl.u32 %v12580_v5, 16  ;;  %v2463_v35 = vrot.slane %v2462_v12, 4 }
 0x213   : > { %v2391_v29 = vmax.f32 %v2389_v59, %v2390_v14  ;;  %v2739_v51 = vsel %vm2588_vm7, %v2384_v57, -inf  ;;  %v2736_v4 = vsel %vm2588_vm7, %v2377_v31, -inf  ;;  %v13517_v43 = vpack.c.bf16 %v2735_v30, %v2735_v30 }
 0x214   : > { %v15802_v40 = vmax.f32 %v2739_v51, %v15757_v62  ;;  %v2738_v39 = vmax.f32 %v2736_v4, %v15754_v13  ;;  %v3297_v59 = vshll.u32 %v12580_v5, 16  ;;  %v2451_v48 = vrot.slane %v2450_v44, 2 }
 0x215   : > { %v2742_v60 = vsel %vm2588_vm7, %v2391_v29, -inf  ;;  %v2457_v47 = vmax.f32 %v2455_v17, %v2456_v16  ;;  %v3085_v32 = vunpack.c.l.b16 %v13517_v43  ;;  %v2464_v38 = vmax.f32 %v2462_v12, %v2463_v35  ;;  %v14053_v12 = vld [vmem:[%s18744_s3 + $0x38] sm:$0xff]  }
 0x216   : > { %18859 = vst [vmem:[#allocation49_spill] sm:$0xff] %v15802_v40  ;;  %v15807_v55 = vmax.f32 %v2742_v60, %v15768_v22  ;;  %v13519_v6 = vpack.c.bf16 %v15802_v40, %v15802_v40  ;;  %v13518_v0 = vpack.c.bf16 %v2738_v39, %v2738_v39  ;;  %v15814_v18 = vsel %vm6713_vm0, %v2738_v39, %v2735_v30 }
 0x217   : > { %18861 = vst [vmem:[#allocation51_spill] sm:$0xff] %v15814_v18  ;;  %v3299_v14 = vrot.slane %v3297_v59, 1  ;;  %v2452_v22 = vmax.f32 %v2450_v44, %v2451_v48  ;;  %v2458_v28 = vrot.slane %v2457_v47, 2  ;;  %v2469_v31 = vsel %vm1691_vm6, %v1494_v49, -inf  ;;  %v14052_v49 = vld [vmem:[%s18744_s3 + $0x78] sm:$0xff]  }
 0x218   : > { %18860 = vst [vmem:[#allocation50_spill] sm:$0xff] %v15807_v55  ;;  %v13520_v62 = vpack.c.bf16 %v15807_v55, %v15807_v55  ;;  %v3087_v13 = vunpack.c.l.b16 %v13519_v6  ;;  %v3086_v57 = vunpack.c.l.b16 %v13518_v0  ;;  %v2470_v5 = vrot.slane %v2469_v31, 4  ;;  %13591 = vmatprep.subr.bf16.mxu1 %v14052_v49  ;;  %v14058_v49 = vld [vmem:[%s18744_s3 + $0x28] sm:$0xff]  }
 0x219   : > { %v3300_v29 = vor.u32 %v3299_v14, %v3295_v45  ;;  %v2453_v17 = vrot.slane %v2452_v22, 1  ;;  %v2459_v27 = vmax.f32 %v2457_v47, %v2458_v28  ;;  %v2465_v16 = vrot.slane %v2464_v38, 2  ;;  %13592 = vmatpush3.bf16.msra.mxu1 %v14053_v12 }
 0x21a   : > { %v3088_v20 = vunpack.c.l.b16 %v13520_v62  ;;  %v3143_v51 = vsel %vm589_vm8, %v3086_v57, %v3085_v32  ;;  %v980_v4 = vmax.f32 %v928_v24, 0.0  ;;  %v985_v60 = vmax.f32 %v949_v21, 0.0  ;;  %v14054_v24 = vld [vmem:[%s18744_s3 + $0x70] sm:$0xff]  }
 0x21b   : > { %v3144_v30 = vsel %vm3103_vm9, %v3087_v13, %v3143_v51  ;;  %3350 = vrot.lane.b32.xlu1 %v3300_v29, %s14845_s29  ;;  %v2454_v44 = vmax.f32 %v2452_v22, %v2453_v17  ;;  %v2460_v39 = vrot.slane %v2459_v27, 1  ;;  %v2471_v43 = vmax.f32 %v2469_v31, %v2470_v5  ;;  %v14055_v22 = vld [vmem:[%s18744_s3 + $0x30] sm:$0xff]   ;;  %13593 = vmatprep.subr.bf16.mxu1 %v14054_v24  ;;  %v14057_v31 = vld [vmem:[%s18744_s3 + $0x68] sm:$0xff]  }
 0x21c   : > { %v2466_v21 = vmax.f32 %v2464_v38, %v2465_v16  ;;  %v1444_v45 = vcombine.high %v980_v4, %v980_v4  ;;  %v1451_v59 = vrot.slane %v980_v4, %v15012_v37  ;;  %v15831_v6 = vsel %vm3105_vm10, %v3088_v20, %v3144_v30 }
 0x21d   : > { %v2461_v48 = vmax.f32 %v2459_v27, %v2460_v39  ;;  %v2472_v47 = vrot.slane %v2471_v43, 2  ;;  %v15834_v35 = vsel %vm2588_vm7, %v2454_v44, -inf  ;;  %v1529_v0 = vcombine.high %v985_v60, %v985_v60  ;;  %13594 = vmatpush3.bf16.msra.mxu1 %v14055_v22 }
 0x21e   : > { %v2467_v62 = vrot.slane %v2466_v21, 1  ;;  %v1458_v32 = vrot.slane %v1444_v45, %v15012_v37  ;;  %v1459_v13 = vcombine.high %v1451_v59, %v1451_v59  ;;  %v2392_v14 = vsel %vm1691_vm6, %v1451_v59, -inf  ;;  %13595 = vmatprep.subr.bf16.mxu1 %v14057_v31 }
 0x21f   : > { %v2473_v28 = vmax.f32 %v2471_v43, %v2472_v47  ;;  %v15842_v57 = vsel %vm2588_vm7, %v2461_v48, -inf  ;;  %v2393_v20 = vrot.slane %v2392_v14, 4  ;;  %v1536_v38 = vrot.slane %v985_v60, %v15012_v37 }
 0x220   : > { %v2468_v29 = vmax.f32 %v2466_v21, %v2467_v62  ;;  %v1460_v17 = vcombine.high %v1458_v32, %v1458_v32  ;;  %v2399_v27 = vsel %vm1691_vm6, %v1459_v13, -inf  ;;  %v2406_v5 = vsel %vm1691_vm6, %v1458_v32, -inf }
 0x221   : > { %v2474_v51 = vrot.slane %v2473_v28, 1  ;;  %v2394_v16 = vmax.f32 %v2392_v14, %v2393_v20  ;;  %v2400_v4 = vrot.slane %v2399_v27, 4  ;;  %v2407_v30 = vrot.slane %v2406_v5, 4  ;;  %13596 = vmatpush3.bf16.msra.mxu1 %v14058_v49 }
 0x222   : > { %v2752_v44 = vsel %vm2588_vm7, %v2468_v29, -inf  ;;  %v2413_v39 = vsel %vm1691_vm6, %v1460_v17, -inf  ;;  %v1543_v60 = vrot.slane %v1529_v0, %v15012_v37  ;;  %v1544_v43 = vcombine.high %v1536_v38, %v1536_v38 }
 0x223   : > { %v2475_v12 = vmax.f32 %v2473_v28, %v2474_v51  ;;  %v2395_v24 = vrot.slane %v2394_v16, 2  ;;  %v2401_v21 = vmax.f32 %v2399_v27, %v2400_v4  ;;  %v2408_v45 = vmax.f32 %v2406_v5, %v2407_v30 }
 0x224   : > { %v2414_v59 = vrot.slane %v2413_v39, 4  ;;  %v1545_v48 = vcombine.high %v1543_v60, %v1543_v60  ;;  %v2532_v47 = vsel %vm1691_vm6, %v1536_v38, -inf  ;;  %v2539_v62 = vsel %vm1691_vm6, %v1544_v43, -inf }
 0x225   : > { %v2755_v32 = vsel %vm2588_vm7, %v2475_v12, -inf  ;;  %v2396_v0 = vmax.f32 %v2394_v16, %v2395_v24  ;;  %v2402_v13 = vrot.slane %v2401_v21, 2  ;;  %v2409_v14 = vrot.slane %v2408_v45, 2 }
 0x226   : > { %v2415_v22 = vmax.f32 %v2413_v39, %v2414_v59  ;;  %v2533_v20 = vrot.slane %v2532_v47, 4  ;;  %v2540_v29 = vrot.slane %v2539_v62, 4  ;;  %v2546_v28 = vsel %vm1691_vm6, %v1543_v60, -inf }
 0x227   : > { %v2397_v17 = vrot.slane %v2396_v0, 1  ;;  %v2403_v27 = vmax.f32 %v2401_v21, %v2402_v13  ;;  %v2410_v31 = vmax.f32 %v2408_v45, %v2409_v14  ;;  %v2547_v5 = vrot.slane %v2546_v28, 4 }
 0x228   : > { %v2416_v51 = vrot.slane %v2415_v22, 2  ;;  %v2534_v4 = vmax.f32 %v2532_v47, %v2533_v20  ;;  %v2541_v38 = vmax.f32 %v2539_v62, %v2540_v29  ;;  %v2553_v30 = vsel %vm1691_vm6, %v1545_v48, -inf  ;;  %v940_v20 = vpop.f32.mrf.mxu0 }
 0x229   : > { %v2398_v43 = vmax.f32 %v2396_v0, %v2397_v17  ;;  %v2404_v12 = vrot.slane %v2403_v27, 1  ;;  %v2411_v16 = vrot.slane %v2410_v31, 1  ;;  %v2548_v24 = vmax.f32 %v2546_v28, %v2547_v5 }
 0x22a   : > { %v2417_v26 = vmax.f32 %v2415_v22, %v2416_v51  ;;  %v2535_v39 = vrot.slane %v2534_v4, 2  ;;  %v2542_v59 = vrot.slane %v2541_v38, 2  ;;  %v2554_v54 = vrot.slane %v2553_v30, 4 }
 0x22b   : > { %v2405_v10 = vmax.f32 %v2403_v27, %v2404_v12  ;;  %v2412_v60 = vmax.f32 %v2410_v31, %v2411_v16  ;;  %v2745_v49 = vsel %vm2588_vm7, %v2398_v43, -inf  ;;  %v2549_v21 = vrot.slane %v2548_v24, 2 }
 0x22c   : > { %v2418_v45 = vrot.slane %v2417_v26, 1  ;;  %v15863_v13 = vmax.f32 %v2745_v49, %v15834_v35  ;;  %v2536_v47 = vmax.f32 %v2534_v4, %v2535_v39  ;;  %v2543_v62 = vmax.f32 %v2541_v38, %v2542_v59  ;;  %v14062_v38 = vld [vmem:[%s18744_s3 + $0x58] sm:$0xff]   ;;  %v13934_v39 = vpop.f32.mrf.mxu0  ;;  %v14015_v59 = vld [vmem:[#allocation2 + $0x10] ss:$0 sps:$4 sm:$0xff]  }
 0x22d   : > { %v2748_v48 = vsel %vm2588_vm7, %v2405_v10, -inf  ;;  %v2751_v0 = vsel %vm2588_vm7, %v2412_v60, -inf  ;;  %v2550_v14 = vmax.f32 %v2548_v24, %v2549_v21  ;;  %v2555_v22 = vmax.f32 %v2553_v30, %v2554_v54  ;;  %v3239_v24 = vld [vmem:[#allocation2 + $0x8] sm:$0xf] }
 0x22e   : > { %18862 = vst [vmem:[#allocation52_spill] sm:$0xff] %v15863_v13  ;;  %v2419_v29 = vmax.f32 %v2417_v26, %v2418_v45  ;;  %v15868_v28 = vmax.f32 %v2748_v48, %v15842_v57  ;;  %v15870_v17 = vmax.f32 %v2751_v0, %v2752_v44  ;;  %v13521_v27 = vpack.c.bf16 %v15863_v13, %v15863_v13  ;;  %v14059_v57 = vld [vmem:[%s18744_s3 + $0x60] sm:$0xff]   ;;  %v3229_v45 = vld [vmem:[#allocation2 + $0x3c] sm:$0x1] }
 0x22f   : > { %v2537_v35 = vrot.slane %v2536_v47, 1  ;;  %v2544_v31 = vrot.slane %v2543_v62, 1  ;;  %v2551_v5 = vrot.slane %v2550_v14, 1  ;;  %v2556_v51 = vrot.slane %v2555_v22, 2  ;;  %v14060_v44 = vld [vmem:[%s18744_s3 + $0x20] sm:$0xff]   ;;  %13597 = vmatprep.subr.bf16.mxu1 %v14059_v57 }
 0x230   : > { %18863 = vst [vmem:[#allocation53_spill] sm:$0xff] %v15868_v28  ;;  %18864 = vst [vmem:[#allocation54_spill] sm:$0xff] %v15870_v17  ;;  %v2754_v10 = vsel %vm2588_vm7, %v2419_v29, -inf  ;;  %v13522_v4 = vpack.c.bf16 %v15868_v28, %v15868_v28  ;;  %v13523_v54 = vpack.c.bf16 %v15870_v17, %v15870_v17  ;;  %v3089_v26 = vunpack.c.l.b16 %v13521_v27  ;;  %13598 = vmatpush3.bf16.msra.mxu1 %v14060_v44  ;;  %v943_v44 = vpop.f32.mrf.mxu0 }
 0x231   : > { %v15888_v30 = vmax.f32 %v2754_v10, %v2755_v32  ;;  %v2538_v43 = vmax.f32 %v2536_v47, %v2537_v35  ;;  %v2545_v12 = vmax.f32 %v2543_v62, %v2544_v31  ;;  %v2552_v16 = vmax.f32 %v2550_v14, %v2551_v5  ;;  %v3247_v14 = vld [vmem:[#allocation2 + $0xc] sm:$0x1]  ;;  %v528_v31 = vld [vmem:[#allocation2 + $0x40] sm:$0x1]  ;;  %v560_v5 = vld [vmem:[#allocation2 + $0x44] sm:$0x1]  ;;  %13599 = vmatprep.subr.bf16.mxu1 %v14062_v38 }
 0x232   : > { %v3090_v60 = vunpack.c.l.b16 %v13522_v4  ;;  %v3091_v49 = vunpack.c.l.b16 %v13523_v54  ;;  %v3146_v21 = vsel %vm3107_vm11, %v3089_v26, %v15831_v6  ;;  %v2557_v48 = vmax.f32 %v2555_v22, %v2556_v51  ;;  %v14063_v6 = vld [vmem:[%s18744_s3 + $0x18] sm:$0xff]   ;;  %v14064_v51 = vld [vmem:[%s18744_s3 + $0x50] sm:$0xff]  }
 0x233   : > { %18865 = vst [vmem:[#allocation55_spill] sm:$0xff] %v15888_v30  ;;  %v13539_v0 = vpack.c.bf16 %v15888_v30, %v15888_v30  ;;  %v15895_v32 = vsel %vm2588_vm7, %v2538_v43, -inf  ;;  %v15898_v47 = vsel %vm2588_vm7, %v2545_v12, -inf  ;;  %v15901_v62 = vsel %vm2588_vm7, %v2552_v16, -inf  ;;  %v3226_v4 = vld [vmem:[#allocation2 + $0x38] sm:$0xf] }
 0x234   : > { %v3147_v22 = vsel %vm3109_vm12, %v3090_v60, %v3146_v21  ;;  %v2558_v29 = vrot.slane %v2557_v48, 1  ;;  %v12581_v27 = vcombine.low %v3239_v24, %v3247_v14  ;;  %v941_v35 = vadd.f32 %v15673_v25, %v940_v20  ;;  %v14016_v38 = vld [vmem:[#allocation2 + $0x18] ss:$0 sps:$4 sm:$0xff]   ;;  %v3240_v24 = vld [vmem:[#allocation2 + $0x10] sm:$0xf]  ;;  %13600 = vmatpush3.bf16.msra.mxu1 %v14063_v6 }
 0x235   : > { %v3148_v10 = vsel %vm3111_vm14, %v3091_v49, %v3147_v22  ;;  %v3230_v54 = vsel %vm14993_vm5, %v13539_v0, %v3229_v45  ;;  %v952_v26 = vadd.f32 %v15673_v25, %v13934_v39  ;;  %v3495_v57 = vrot.slane %v14015_v59, 7  ;;  %v14065_v39 = vld [vmem:[%s18744_s3 + $0x10] sm:$0xff]   ;;  %13601 = vmatprep.subr.bf16.mxu1 %v14064_v51 }
 0x236   : > { %v3167_v43 = vpack.c.b16 %v3148_v10, %v3148_v10  ;;  %3231 = vst [vmem:[#allocation2 + $0x3c] sm:$0x1] %v3230_v54  ;;  %v2559_v20 = vmax.f32 %v2557_v48, %v2558_v29  ;;  %v3302_v12 = vshrl.u32 %v12581_v27, 16  ;;  %v3304_v16 = vshll.u32 %v12581_v27, 16 }
 0x237   : > { %v983_v60 = vmax.f32 %v941_v35, 0.0  ;;  %v986_v21 = vmax.f32 %v952_v26, 0.0  ;;  %3504 = vrot.lane.b32.xlu0 %v3495_v57, %s14845_s29  ;;  %v529_v49 = vsel %vm14993_vm5, 0, %v528_v31  ;;  %v561_v45 = vsel %vm14985_vm3, 0, %v560_v5  ;;  %v3248_v35 = vld [vmem:[#allocation2 + $0x14] sm:$0x1] }
 0x238   : > { %v3227_v59 = vsel %vm15122_vm15, %v3167_v43, %v3226_v4  ;;  %v15926_v48 = vsel %vm2588_vm7, %v2559_v20, -inf  ;;  %v3306_v0 = vrot.slane %v3304_v16, 1  ;;  %530 = vst [vmem:[#allocation2 + $0x40] sm:$0x1] %v529_v49  ;;  %562 = vst [vmem:[#allocation2 + $0x44] sm:$0x1] %v561_v45  ;;  %v944_v14 = vadd.f32 %v15673_v25, %v943_v44  ;;  %13602 = vmatpush3.bf16.msra.mxu1 %v14065_v39 }
 0x239   : > { %3228 = vst [vmem:[#allocation2 + $0x38] sm:$0xf] %v3227_v59  ;;  %v1495_v22 = vcombine.high %v983_v60, %v983_v60  ;;  %v1502_v6 = vrot.slane %v983_v60, %v15012_v37  ;;  %v1546_v29 = vcombine.high %v986_v21, %v986_v21  ;;  %v1553_v27 = vrot.slane %v986_v21, %v15012_v37  ;;  %v14067_v31 = vld [vmem:[%s18744_s3 + $0x48] sm:$0xff]  }
 0x23a   : > { %v3307_v5 = vor.u32 %v3306_v0, %v3302_v12  ;;  %v15934_v10 = vmax.f32 %v944_v14, 0.0  ;;  %v3496_v4 = vrot.slane %v14016_v38, 7  ;;  %v15936_v54 = vcombine.low %v3240_v24, %v3248_v35  ;;  %v14068_v44 = vld [vmem:[%s18744_s3 + $0x8] sm:$0xff]   ;;  %13603 = vmatprep.subr.bf16.mxu1 %v14067_v31 }
 0x23b   : > { %v1509_v25 = vrot.slane %v1495_v22, %v15012_v37  ;;  %v1510_v51 = vcombine.high %v1502_v6, %v1502_v6  ;;  %v2476_v26 = vsel %vm1691_vm6, %v1502_v6, -inf  ;;  %v1560_v57 = vrot.slane %v1546_v29, %v15012_v37 }
 0x23c   : > { %3352 = vrot.lane.b32.xlu1 %v3307_v5, %s14845_s29  ;;  %v2477_v43 = vrot.slane %v2476_v26, 4  ;;  %v1561_v20 = vcombine.high %v1553_v27, %v1553_v27  ;;  %v2560_v12 = vsel %vm1691_vm6, %v1553_v27, -inf  ;;  %3506 = vrot.lane.b32.xlu0 %v3496_v4, %s14845_s29 }
 0x23d   : > { %v1511_v38 = vcombine.high %v1509_v25, %v1509_v25  ;;  %v2483_v24 = vsel %vm1691_vm6, %v1510_v51, -inf  ;;  %v2490_v60 = vsel %vm1691_vm6, %v1509_v25, -inf  ;;  %v1562_v21 = vcombine.high %v1560_v57, %v1560_v57  ;;  %13604 = vmatpush3.bf16.msra.mxu1 %v14068_v44 }
 0x23e   : > { %v2478_v49 = vmax.f32 %v2476_v26, %v2477_v43  ;;  %v2484_v45 = vrot.slane %v2483_v24, 4  ;;  %v2491_v39 = vrot.slane %v2490_v60, 4  ;;  %v2561_v59 = vrot.slane %v2560_v12, 4 }
 0x23f   : > { %v2497_v0 = vsel %vm1691_vm6, %v1511_v38, -inf  ;;  %v2567_v14 = vsel %vm1691_vm6, %v1561_v20, -inf  ;;  %v2574_v22 = vsel %vm1691_vm6, %v1560_v57, -inf  ;;  %v2581_v6 = vsel %vm1691_vm6, %v1562_v21, -inf }
 0x240   : > { %v2479_v29 = vrot.slane %v2478_v49, 2  ;;  %v2485_v27 = vmax.f32 %v2483_v24, %v2484_v45  ;;  %v2492_v35 = vmax.f32 %v2490_v60, %v2491_v39  ;;  %v2498_v5 = vrot.slane %v2497_v0, 4 }
 0x241   : > { %v2562_v4 = vmax.f32 %v2560_v12, %v2561_v59  ;;  %v2568_v25 = vrot.slane %v2567_v14, 4  ;;  %v2575_v31 = vrot.slane %v2574_v22, 4  ;;  %v2582_v51 = vrot.slane %v2581_v6, 4 }
 0x242   : > { %v2480_v26 = vmax.f32 %v2478_v49, %v2479_v29  ;;  %v2486_v43 = vrot.slane %v2485_v27, 2  ;;  %v2493_v16 = vrot.slane %v2492_v35, 2  ;;  %v2499_v30 = vmax.f32 %v2497_v0, %v2498_v5 }
 0x243   : > { %v2563_v38 = vrot.slane %v2562_v4, 2  ;;  %v2569_v17 = vmax.f32 %v2567_v14, %v2568_v25  ;;  %v2576_v20 = vmax.f32 %v2574_v22, %v2575_v31  ;;  %v2583_v28 = vmax.f32 %v2581_v6, %v2582_v51 }
 0x244   : > { %v2481_v57 = vrot.slane %v2480_v26, 1  ;;  %v2487_v13 = vmax.f32 %v2485_v27, %v2486_v43  ;;  %v2494_v21 = vmax.f32 %v2492_v35, %v2493_v16  ;;  %v2500_v44 = vrot.slane %v2499_v30, 2 }
 0x245   : > { %v2564_v55 = vmax.f32 %v2562_v4, %v2563_v38  ;;  %v2570_v24 = vrot.slane %v2569_v17, 2  ;;  %v2577_v60 = vrot.slane %v2576_v20, 2  ;;  %v2584_v45 = vrot.slane %v2583_v28, 2 }
 0x246   : > { %v2482_v12 = vmax.f32 %v2480_v26, %v2481_v57  ;;  %v2488_v39 = vrot.slane %v2487_v13, 1  ;;  %v2495_v59 = vrot.slane %v2494_v21, 1  ;;  %v2501_v1 = vmax.f32 %v2499_v30, %v2500_v44 }
 0x247   : > { %v2565_v49 = vrot.slane %v2564_v55, 1  ;;  %v2571_v29 = vmax.f32 %v2569_v17, %v2570_v24  ;;  %v2578_v40 = vmax.f32 %v2576_v20, %v2577_v60  ;;  %v2585_v0 = vmax.f32 %v2583_v28, %v2584_v45 }
 0x248   : > { %v2489_v5 = vmax.f32 %v2487_v13, %v2488_v39  ;;  %v2496_v14 = vmax.f32 %v2494_v21, %v2495_v59  ;;  %v2502_v22 = vrot.slane %v2501_v1, 1  ;;  %v2757_v6 = vsel %vm2588_vm7, %v2482_v12, -inf }
 0x249   : > { %v2759_v16 = vmax.f32 %v2757_v6, %v15895_v32  ;;  %v2566_v27 = vmax.f32 %v2564_v55, %v2565_v49  ;;  %v2572_v35 = vrot.slane %v2571_v29, 1  ;;  %v2579_v4 = vrot.slane %v2578_v40, 1  ;;  %v14069_v32 = vld [vmem:[%s18744_s3 + $0x40] sm:$0xff]  }
 0x24a   : > { %v2503_v25 = vmax.f32 %v2501_v1, %v2502_v22  ;;  %v2760_v31 = vsel %vm2588_vm7, %v2489_v5, -inf  ;;  %v2763_v51 = vsel %vm2588_vm7, %v2496_v14, -inf  ;;  %v2586_v30 = vrot.slane %v2585_v0, 1  ;;  %v14070_v1 = vld [vmem:[%s18744_s3] sm:$0xff]   ;;  %13605 = vmatprep.subr.bf16.mxu1 %v14069_v32 }
 0x24b   : > { %v2762_v17 = vmax.f32 %v2760_v31, %v15898_v47  ;;  %v15961_v28 = vmax.f32 %v2763_v51, %v15901_v62  ;;  %v13525_v13 = vpack.c.bf16 %v2759_v16, %v2759_v16  ;;  %v2573_v26 = vmax.f32 %v2571_v29, %v2572_v35  ;;  %v14018_v47 = vld [vmem:[#allocation2 + $0x20] ss:$0 sps:$4 sm:$0xff]   ;;  %13606 = vmatpush3.bf16.msra.mxu1 %v14070_v1  ;;  %v4158_v51 = vld [vmem:[#allocation2 + $0x14] sm:$0x1] }
 0x24c   : > { %v2766_v55 = vsel %vm2588_vm7, %v2503_v25, -inf  ;;  %v2580_v43 = vmax.f32 %v2578_v40, %v2579_v4  ;;  %v2587_v38 = vmax.f32 %v2585_v0, %v2586_v30  ;;  %v15971_v20 = vsel %vm2588_vm7, %v2566_v27, -inf }
 0x24d   : > { %v15974_v62 = vmax.f32 %v2766_v55, %v15926_v48  ;;  %v13526_v57 = vpack.c.bf16 %v2762_v17, %v2762_v17  ;;  %v13527_v21 = vpack.c.bf16 %v15961_v28, %v15961_v28  ;;  %v3093_v44 = vunpack.c.l.b16 %v13525_v13 }
 0x24e   : > { %v15979_v24 = vsel %vm6713_vm0, %v2762_v17, %v2759_v16  ;;  %v15982_v60 = vsel %vm2588_vm7, %v2573_v26, -inf  ;;  %v15985_v40 = vsel %vm2588_vm7, %v2580_v43, -inf  ;;  %v15988_v45 = vsel %vm2588_vm7, %v2587_v38, -inf  ;;  %v4160_v26 = vld [vmem:[#allocation2 + $0x1c] sm:$0x1] }
 0x24f   : > { %v13528_v48 = vpack.c.bf16 %v15974_v62, %v15974_v62  ;;  %v3094_v12 = vunpack.c.l.b16 %v13526_v57  ;;  %v3095_v39 = vunpack.c.l.b16 %v13527_v21  ;;  %v1519_v59 = vrot.slane %v15934_v10, %v15012_v37  ;;  %v4159_v43 = vld [vmem:[#allocation2 + $0x18] sm:$0xe] }
 0x250   : > { %v18866_v49 = vcombine.high %v15934_v10, %v15934_v10  ;;  %v3309_v0 = vshrl.u32 %v15936_v54, 16  ;;  %v3311_v5 = vshll.u32 %v15936_v54, 16  ;;  %v3497_v14 = vrot.slane %v14018_v47, 7  ;;  %v4157_v10 = vld [vmem:[#allocation2 + $0x10] sm:$0xe] }
 0x251   : > { %v3096_v22 = vunpack.c.l.b16 %v13528_v48  ;;  %v3149_v6 = vsel %vm589_vm8, %v3094_v12, %v3093_v44  ;;  %v1527_v16 = vcombine.high %v1519_v59, %v1519_v59  ;;  %v2504_v27 = vsel %vm1691_vm6, %v1519_v59, -inf  ;;  %v16010_v21 = vld [vmem:[#allocation2 + $0x18] sm:$0xf]  ;;  %v14023_v44 = vld [vmem:[#allocation2 + $0x28] ss:$0 sps:$4 sm:$0xff]  }
 0x252   : > { %v1526_v29 = vrot.slane %v18866_v49, %v15012_v37  ;;  %v3150_v35 = vsel %vm3103_vm9, %v3095_v39, %v3149_v6  ;;  %v2505_v25 = vrot.slane %v2504_v27, 4  ;;  %3508 = vrot.lane.b32.xlu1 %v3497_v14, %s14845_s29  ;;  %v3313_v13 = vrot.slane %v3311_v5, 1  ;;  %v16018_v6 = vld [vmem:[#allocation2 + $0x30] ss:$0 sps:$4 sm:$0xff]  }
 0x253   : > { %v2511_v30 = vsel %vm1691_vm6, %v1527_v16, -inf  ;;  %v16007_v17 = vsel %vm3105_vm10, %v3096_v22, %v3150_v35  ;;  %v12668_v59 = vrot.slane %v4157_v10, 9  ;;  %v4191_v49 = vrot.slane %v4158_v51, 5 }
 0x254   : > { %v1528_v4 = vcombine.high %v1526_v29, %v1526_v29  ;;  %v2518_v31 = vsel %vm1691_vm6, %v1526_v29, -inf  ;;  %v2506_v32 = vmax.f32 %v2504_v27, %v2505_v25  ;;  %v2512_v1 = vrot.slane %v2511_v30, 4  ;;  %v3249_v29 = vld [vmem:[#allocation2 + $0x1c] sm:$0x1]  ;;  %v16023_v25 = vld [vmem:[#allocation2 + $0x20] sm:$0xf] }
 0x255   : > { %v2519_v54 = vrot.slane %v2518_v31, 4  ;;  %v3314_v57 = vor.u32 %v3313_v13, %v3309_v0  ;;  %v12669_v22 = vrot.slane %v4159_v43, 9  ;;  %v4195_v0 = vrot.slane %v4160_v26, 5 }
 0x256   : > { %v2525_v55 = vsel %vm1691_vm6, %v1528_v4, -inf  ;;  %v2507_v48 = vrot.slane %v2506_v32, 2  ;;  %v2513_v12 = vmax.f32 %v2511_v30, %v2512_v1  ;;  %v4192_v35 = vsel %vm16013_vm4, %v12668_v59, %v4191_v49 }
 0x257   : > { %v2520_v38 = vmax.f32 %v2518_v31, %v2519_v54  ;;  %v2526_v47 = vrot.slane %v2525_v55, 4  ;;  %3354 = vrot.lane.b32.xlu0 %v3314_v57, %s14845_s29  ;;  %v12583_v4 = vcombine.low %v16010_v21, %v3249_v29  ;;  %v4196_v51 = vsel %vm16013_vm4, %v12669_v22, %v4195_v0  ;;  %4229 = vst.msk [vmem:[#allocation3 + $0x10] sm:$0xf] %vm494_vm13, %v4192_v35  ;;  %v4161_v54 = vld [vmem:[#allocation2 + $0x20] sm:$0xe] }
 0x258   : > { %v2508_v16 = vmax.f32 %v2506_v32, %v2507_v48  ;;  %v2514_v27 = vrot.slane %v2513_v12, 2  ;;  %v3498_v30 = vrot.slane %v14023_v44, 7  ;;  %4230 = vst.msk [vmem:[#allocation3 + $0x24] sm:$0xf] %vm494_vm13, %v4196_v51  ;;  %v3499_v57 = vrot.slane %v16018_v6, 7 }
 0x259   : > { %v2521_v5 = vrot.slane %v2520_v38, 2  ;;  %v2527_v14 = vmax.f32 %v2525_v55, %v2526_v47  ;;  %v3316_v32 = vshrl.u32 %v12583_v4, 16  ;;  %v3318_v1 = vshll.u32 %v12583_v4, 16  ;;  %v3250_v55 = vld [vmem:[#allocation2 + $0x24] sm:$0x1] }
 0x25a   : > { %v2509_v13 = vrot.slane %v2508_v16, 1  ;;  %v2515_v26 = vmax.f32 %v2513_v12, %v2514_v27  ;;  %v4162_v48 = vld [vmem:[#allocation2 + $0x24] sm:$0x1]  ;;  %v12670_v29 = vrot.slane %v4161_v54, 9  ;;  %v4163_v27 = vld [vmem:[#allocation2 + $0x28] sm:$0xe] }
 0x25b   : > { %v2522_v31 = vmax.f32 %v2520_v38, %v2521_v5  ;;  %v2528_v10 = vrot.slane %v2527_v14, 2  ;;  %3510 = vrot.lane.b32.xlu0 %v3498_v30, %s14845_s29  ;;  %v12584_v38 = vcombine.low %v16023_v25, %v3250_v55  ;;  %v3320_v44 = vrot.slane %v3318_v1, 1  ;;  %v16033_v30 = vld [vmem:[#allocation2 + $0x28] sm:$0xf]  ;;  %v14030_v1 = vld [vmem:[#allocation2 + $0x38] ss:$0 sps:$4 sm:$0xff]  }
 0x25c   : > { %v2510_v59 = vmax.f32 %v2508_v16, %v2509_v13  ;;  %v2516_v49 = vrot.slane %v2515_v26, 1  ;;  %v4199_v51 = vrot.slane %v4162_v48, 5  ;;  %v3649_v55 = vld [vmem:[#allocation2 + $0x8] sm:$0xe]  ;;  %v3251_v13 = vld [vmem:[#allocation2 + $0x2c] sm:$0x1] }
 0x25d   : > { %v2523_v43 = vrot.slane %v2522_v31, 1  ;;  %v2529_v47 = vmax.f32 %v2527_v14, %v2528_v10  ;;  %v3323_v22 = vshrl.u32 %v12584_v38, 16  ;;  %v3325_v0 = vshll.u32 %v12584_v38, 16  ;;  %v4164_v10 = vld [vmem:[#allocation2 + $0x2c] sm:$0x1] }
 0x25e   : > { %v2517_v35 = vmax.f32 %v2515_v26, %v2516_v49  ;;  %v2769_v4 = vsel %vm2588_vm7, %v2510_v59, -inf  ;;  %v3321_v14 = vor.u32 %v3320_v44, %v3316_v32  ;;  %v4200_v32 = vsel %vm16013_vm4, %v12670_v29, %v4199_v51 }
 0x25f   : > { %v2524_v5 = vmax.f32 %v2522_v31, %v2523_v43  ;;  %v2530_v12 = vrot.slane %v2529_v47, 1  ;;  %v16036_v16 = vmax.f32 %v2769_v4, %v15971_v20  ;;  %v3327_v31 = vrot.slane %v3325_v0, 1  ;;  %v14081_v20 = vld [vmem:[%s18744_s3 + $0xf8] sm:$0xff]   ;;  %4231 = vst.msk [vmem:[#allocation3 + $0x38] sm:$0xf] %vm494_vm13, %v4200_v32 }
 0x260   : > { %v2772_v43 = vsel %vm2588_vm7, %v2517_v35, -inf  ;;  %3356 = vrot.lane.b32.xlu1 %v3321_v14, %s14845_s29  ;;  %v12671_v38 = vrot.slane %v4163_v27, 9  ;;  %v16064_v0 = vld [vmem:[#allocation2 + $0x30] sm:$0xf]  ;;  %13631 = vmatprep.subr.bf16.mxu1 %v14081_v20  ;;  %v3235_v35 = vld [vmem:[#allocation2 + $0x44] sm:$0x1] }
 0x261   : > { %v2531_v6 = vmax.f32 %v2529_v47, %v2530_v12  ;;  %v2775_v54 = vsel %vm2588_vm7, %v2524_v5, -inf  ;;  %v16050_v47 = vmax.f32 %v2772_v43, %v15982_v60  ;;  %v13529_v59 = vpack.c.bf16 %v16036_v16, %v16036_v16  ;;  %v16062_v60 = vld [vmem:[#allocation2 + $0xc] sm:$0x1]  ;;  %v4165_v14 = vld [vmem:[#allocation2 + $0x30] sm:$0xe] }
 0x262   : > { %v16041_v26 = vmax.f32 %v2775_v54, %v15985_v40  ;;  %v14020_v40 = vld [vmem:[#allocation3 + $0x10] ss:$20 sps:$4 sm:$0xff]   ;;  %v3328_v49 = vor.u32 %v3327_v31, %v3323_v22  ;;  %v4203_v5 = vrot.slane %v4164_v10, 5  ;;  %v12585_v12 = vcombine.low %v16033_v30, %v3251_v13  ;;  %v4167_v31 = vld [vmem:[#allocation2 + $0x38] sm:$0xe] }
 0x263   : > { %v2778_v48 = vsel %vm2588_vm7, %v2531_v6, -inf  ;;  %v13530_v27 = vpack.c.bf16 %v16050_v47, %v16050_v47  ;;  %v3097_v22 = vunpack.c.l.b16 %v13529_v59  ;;  %13943 = vmatprep.mubr.msk.bf16.mxu0 %vm2588_vm7, %v14020_v40  ;;  %v12636_v4 = vcombine.low %v3649_v55, %v16062_v60  ;;  %v4166_v54 = vld [vmem:[#allocation2 + $0x34] sm:$0x1]  ;;  %v4168_v59 = vld [vmem:[#allocation2 + $0x3c] sm:$0x1] }
 0x264   : > { %v16057_v44 = vmax.f32 %v2778_v48, %v15988_v45  ;;  %v13531_v29 = vpack.c.bf16 %v16041_v26, %v16041_v26  ;;  %3358 = vrot.lane.b32.xlu0 %v3328_v49, %s14845_s29  ;;  %v3500_v45 = vrot.slane %v14030_v1, 7  ;;  %3512 = vrot.lane.b32.xlu1 %v3499_v57, %s14845_s29  ;;  %v4204_v6 = vsel %vm16013_vm4, %v12671_v38, %v4203_v5  ;;  %v3252_v32 = vld [vmem:[#allocation2 + $0x34] sm:$0x1]  ;;  %v3651_v38 = vld [vmem:[#allocation2 + $0x18] sm:$0xe] }
 0x265   : > { %v3098_v13 = vunpack.c.l.b16 %v13530_v27  ;;  %v3152_v43 = vsel %vm3107_vm11, %v3097_v22, %v16007_v17  ;;  %4232 = vst.msk [vmem:[#allocation3 + $0x4c] sm:$0xf] %vm494_vm13, %v4204_v6  ;;  %v3330_v1 = vshrl.u32 %v12585_v12, 16  ;;  %v3332_v55 = vshll.u32 %v12585_v12, 16  ;;  %v16082_v49 = vld [vmem:[#allocation2 + $0x10] sm:$0xf] }
 0x266   : > { %v3099_v10 = vunpack.c.l.b16 %v13531_v29  ;;  %v13540_v51 = vpack.c.bf16 %v16057_v44, %v16057_v44  ;;  %v3724_v48 = vshll.u32 %v12636_v4, 16  ;;  %v12586_v57 = vcombine.low %v16064_v0, %v3252_v32  ;;  %v3232_v5 = vld [vmem:[#allocation2 + $0x40] sm:$0xf] }
 0x267   : > { %v12672_v40 = vrot.slane %v4165_v14, 9  ;;  %v3153_v29 = vsel %vm3109_vm12, %v3098_v13, %v3152_v43  ;;  %v3334_v17 = vrot.slane %v3332_v55, 1  ;;  %v4207_v12 = vrot.slane %v4166_v54, 5  ;;  %v3650_v13 = vld [vmem:[#allocation2 + $0x10] sm:$0xe] }
 0x268   : > { %v3236_v20 = vsel %vm14993_vm5, %v13540_v51, %v3235_v35  ;;  %3514 = vrot.lane.b32.xlu0 %v3500_v45, %s14845_s29  ;;  %v12673_v27 = vrot.slane %v4167_v31, 9  ;;  %v3154_v22 = vsel %vm3111_vm14, %v3099_v10, %v3153_v29  ;;  %v3722_v35 = vshrl.u32 %v12636_v4, 16  ;;  %v16093_v54 = vld [vmem:[#allocation2 + $0x14] sm:$0x1] }
 0x269   : > { %3237 = vst [vmem:[#allocation2 + $0x44] sm:$0x1] %v3236_v20  ;;  %v3726_v51 = vrot.slane %v3724_v48, 1  ;;  %v3339_v6 = vshll.u32 %v12586_v57, 16  ;;  %v3169_v32 = vpack.c.b16 %v3154_v22, %v3154_v22  ;;  %v3335_v37 = vor.u32 %v3334_v17, %v3330_v1  ;;  %v3997_v4 = vld [vmem:[#allocation2 + $0x14] sm:$0x1] }
 0x26a   : > { %v4208_v14 = vsel %vm16013_vm4, %v12672_v40, %v4207_v12  ;;  %v4211_v18 = vrot.slane %v4168_v59, 5  ;;  %v12638_v45 = vcombine.low %v3651_v38, %v16089_v36  ;;  %v3337_v31 = vshrl.u32 %v12586_v57, 16  ;;  %v563_v48 = vld [vmem:[#allocation2 + $0x4c] sm:$0x1]  ;;  %v3653_v59 = vld [vmem:[#allocation2 + $0x28] sm:$0xe] }
 0x26b   : > { %v3727_v43 = vor.u32 %v3726_v51, %v3722_v35  ;;  %v3341_v55 = vrot.slane %v3339_v6, 1  ;;  %4233 = vst.msk [vmem:[#allocation3 + $0x60] sm:$0xf] %vm494_vm13, %v4208_v14  ;;  %v3233_v10 = vsel %vm15122_vm15, %v3169_v32, %v3232_v5  ;;  %3360 = vrot.lane.b32.xlu1 %v3335_v37, %s14845_s29  ;;  %v12660_v20 = vcombine.low %v16082_v49, %v3997_v4  ;;  %v16104_v17 = vld [vmem:[#allocation2 + $0x38] sm:$0xf] }
 0x26c   : > { %v4212_v1 = vsel %vm16013_vm4, %v12673_v27, %v4211_v18  ;;  %3234 = vst [vmem:[#allocation2 + $0x40] sm:$0xf] %v3233_v10  ;;  %v14028_v40 = vld [vmem:[#allocation3 + $0x38] ss:$20 sps:$4 sm:$0xff]   ;;  %v3738_v38 = vshll.u32 %v12638_v45, 16  ;;  %v12637_v29 = vcombine.low %v3650_v13, %v16093_v54  ;;  %v564_v12 = vsel %vm14985_vm3, 0, %v563_v48 }
 0x26d   : > { %3777 = vrot.lane.b32.xlu0 %v3727_v43, %s14845_s29  ;;  %4234 = vst.msk [vmem:[#allocation3 + $0x74] sm:$0xf] %vm494_vm13, %v4212_v1  ;;  %v3342_v5 = vor.u32 %v3341_v55, %v3337_v31  ;;  %v16106_v37 = vld [vmem:[#allocation2 + $0x2c] sm:$0x1]  ;;  %13944 = vmatmul.mubr.msk.bf16.vlgmr.msra.gmra.mxu0 %vm2588_vm7, %v14028_v40  ;;  %v4048_v57 = vshll.u32 %v12660_v20, 16  ;;  %v3736_v51 = vshrl.u32 %v12638_v45, 16 }
 0x26e   : > { %v3740_v18 = vrot.slane %v3738_v38, 1  ;;  %v12640_v27 = vcombine.low %v3653_v59, %v16106_v37  ;;  %v3253_v22 = vld [vmem:[#allocation2 + $0x3c] sm:$0x1]  ;;  %565 = vst [vmem:[#allocation2 + $0x4c] sm:$0x1] %v564_v12  ;;  %v3731_v6 = vshll.u32 %v12637_v29, 16 }
 0x26f   : > { %v16112_v35 = vld [vmem:[#allocation2 + $0x20] sm:$0xf]  ;;  %v12587_v32 = vcombine.low %v16104_v17, %v3253_v22  ;;  %v3999_v13 = vld [vmem:[#allocation2 + $0x24] sm:$0x1]  ;;  %v4046_v43 = vshrl.u32 %v12660_v20, 16  ;;  %v4050_v10 = vrot.slane %v4048_v57, 1 }
 0x270   : > { %v3652_v14 = vld [vmem:[#allocation2 + $0x20] sm:$0xe]  ;;  %v4171_v55 = vld [vmem:[#allocation2 + $0x48] sm:$0xe]  ;;  %v16116_v4 = vld [vmem:[#allocation2 + $0x24] sm:$0x1]  ;;  %v3741_v19 = vor.u32 %v3740_v18, %v3736_v51  ;;  %v16119_v48 = vcombine.low %v16112_v35, %v3999_v13 }
 0x271   : > { %3362 = vrot.lane.b32.xlu0 %v3342_v5, %s14845_s29  ;;  %v4170_v31 = vld [vmem:[#allocation2 + $0x44] sm:$0x1]  ;;  %v3752_v1 = vshll.u32 %v12640_v27, 16  ;;  %v3655_v59 = vld [vmem:[#allocation2 + $0x38] sm:$0xe]  ;;  %v3733_v45 = vrot.slane %v3731_v6, 1  ;;  %v16123_v20 = vcombine.low %v3652_v14, %v16116_v4  ;;  %v4051_v13 = vor.u32 %v4050_v10, %v4046_v43 }
 0x272   : > { %v3346_v5 = vshll.u32 %v12587_v32, 16  ;;  %v4215_v18 = vrot.slane %v4170_v31, 5  ;;  %v12675_v57 = vrot.slane %v4171_v55, 9  ;;  %v16125_v51 = vld [vmem:[#allocation2 + $0x3c] sm:$0x1]  ;;  %v4062_v7 = vshll.u32 %v16119_v48, 16 }
 0x273   : > { %v14033_v40 = vld [vmem:[#allocation2 + $0x40] ss:$0 sps:$4 sm:$0xff]   ;;  %v4169_v12 = vld [vmem:[#allocation2 + $0x40] sm:$0xe]  ;;  %v3754_v42 = vrot.slane %v3752_v1, 1  ;;  %v12642_v33 = vcombine.low %v3655_v59, %v16125_v51  ;;  %v3729_v14 = vshrl.u32 %v12637_v29, 16 }
 0x274   : > { %v14034_v38 = vld [vmem:[#allocation3 + $0x60] ss:$20 sps:$4 sm:$0xff]   ;;  %v3501_v22 = vrot.slane %v14033_v40, 7  ;;  %v12674_v15 = vrot.slane %v4169_v12, 9  ;;  %v3998_v6 = vld [vmem:[#allocation2 + $0x1c] sm:$0x1] }
 0x275   : > { %3781 = vrot.lane.b32.xlu0 %v3741_v19, %s14845_s29  ;;  %13947 = vmatprep.mubr.msk.bf16.mxu0 %vm2588_vm7, %v14034_v38  ;;  %v4172_v52 = vld [vmem:[#allocation2 + $0x4c] sm:$0x1]  ;;  %v16129_v19 = vld [vmem:[#allocation2 + $0x18] sm:$0xf]  ;;  %v5957_v40 = vld [vmem:[#allocation2 + $0x48] sm:$0xe]  ;;  %v3734_v59 = vor.u32 %v3733_v45, %v3729_v14 }
 0x276   : > { %3516 = vrot.lane.b32.xlu1 %v3501_v22, %s14845_s29  ;;  %v4216_v55 = vsel %vm16013_vm4, %v12674_v15, %v4215_v18  ;;  %v4219_v31 = vrot.slane %v4172_v52, 5  ;;  %v16135_v12 = vld [vmem:[#allocation2 + $0x30] sm:$0xf]  ;;  %v3348_v43 = vrot.slane %v3346_v5, 1  ;;  %v5958_v10 = vld [vmem:[#allocation2 + $0x4c] sm:$0x1]  ;;  %v12661_v15 = vcombine.low %v16129_v19, %v3998_v6 }
 0x277   : > { %4235 = vst.msk [vmem:[#allocation3 + $0x88] sm:$0xf] %vm494_vm13, %v4216_v55  ;;  %v3750_v1 = vshrl.u32 %v12640_v27, 16  ;;  %v3745_v38 = vshll.u32 %v16123_v20, 16  ;;  %v3344_v63 = vshrl.u32 %v12587_v32, 16  ;;  %v4064_v18 = vrot.slane %v4062_v7, 1 }
 0x278   : > { %v4220_v29 = vsel %vm16013_vm4, %v12675_v57, %v4219_v31  ;;  %v4001_v52 = vld [vmem:[#allocation2 + $0x34] sm:$0x1]  ;;  %v3654_v5 = vld [vmem:[#allocation2 + $0x30] sm:$0xe]  ;;  %v16145_v56 = vld [vmem:[#allocation2 + $0x40] sm:$0xf] }
 0x279   : > { %4101 = vrot.lane.b32.xlu0 %v4051_v13, %s14845_s29  ;;  %4236 = vst.msk [vmem:[#allocation3 + $0x9c] sm:$0xf] %vm494_vm13, %v4220_v29  ;;  %v3755_v22 = vor.u32 %v3754_v42, %v3750_v1  ;;  %v3766_v13 = vshll.u32 %v12642_v33, 16  ;;  %v12664_v55 = vcombine.low %v16135_v12, %v4001_v52  ;;  %v12840_v27 = vrot.slane %v5957_v40, 9  ;;  %v16148_v45 = vld [vmem:[#allocation2 + $0x34] sm:$0x1] }
 0x27a   : > { %3779 = vrot.lane.b32.xlu1 %v3734_v59, %s14845_s29  ;;  %v6005_v32 = vrot.slane %v5958_v10, 5  ;;  %v531_v57 = vld [vmem:[#allocation2 + $0x48] sm:$0x1]  ;;  %v3349_v14 = vor.u32 %v3348_v43, %v3344_v63  ;;  %v3747_v6 = vrot.slane %v3745_v38, 1  ;;  %v4060_v42 = vshrl.u32 %v16119_v48, 16 }
 0x27b   : > { %v4003_v7 = vld [vmem:[#allocation2 + $0x44] sm:$0x1]  ;;  %v3743_v1 = vshrl.u32 %v16123_v20, 16  ;;  %v4055_v29 = vshll.u32 %v12661_v15, 16  ;;  %v12641_v52 = vcombine.low %v3654_v5, %v16148_v45  ;;  %v3768_v59 = vrot.slane %v3766_v13, 1 }
 0x27c   : > { %v14056_v31 = vld [vmem:[#allocation2] sm:$0x1e]   ;;  %v12666_v40 = vcombine.low %v16145_v56, %v4003_v7  ;;  %v4065_v10 = vor.u32 %v4064_v18, %v4060_v42  ;;  %v4076_v50 = vshll.u32 %v12664_v55, 16  ;;  %v532_v63 = vsel %vm14993_vm5, 0, %v531_v57  ;;  %v3503_v43 = vpop.permute.xlu0 %3502  ;;  %v4000_v20 = vld [vmem:[#allocation2 + $0x2c] sm:$0x1] }
 0x27d   : > { %3785 = vrot.lane.b32.xlu0 %v3755_v22, %s14845_s29  ;;  %v6006_v48 = vsel %vm16013_vm4, %v12840_v27, %v6005_v32  ;;  %533 = vst [vmem:[#allocation2 + $0x48] sm:$0x1] %v532_v63  ;;  %v3748_v38 = vor.u32 %v3747_v6, %v3743_v1  ;;  %v3764_v22 = vshrl.u32 %v12642_v33, 16  ;;  %v12663_v5 = vcombine.low %v16154_v46, %v4000_v20  ;;  %v3656_v32 = vld [vmem:[#allocation2 + $0x40] sm:$0xe] }
 0x27e   : > { %3364 = vrot.lane.b32.xlu1 %v3349_v14, %s14845_s29  ;;  %v3520_v18 = vsel %vm2588_vm7, %v14056_v31, %v3503_v43  ;;  %v4057_v42 = vrot.slane %v4055_v29, 1  ;;  %v3759_v7 = vshll.u32 %v12641_v52, 16  ;;  %v4078_v9 = vrot.slane %v4076_v50, 1 }
 0x27f   : > { %v12604_v57 = vcombine.low %v3520_v18, %v3520_v18  ;;  %v12605_v11 = vcombine.high %v3520_v18, %v3520_v18  ;;  %v3769_v14 = vor.u32 %v3768_v59, %v3764_v22  ;;  %v4090_v27 = vshll.u32 %v12666_v40, 16  ;;  %v16174_v22 = vld [vmem:[#allocation2 + $0x38] sm:$0xf]  ;;  %v4004_v18 = vld [vmem:[#allocation2 + $0x4c] sm:$0x1] }
 0x280   : > { %v14039_v13 = vld [vmem:[#allocation3 + $0x88] ss:$20 sps:$4 sm:$0xff]   ;;  %v4053_v33 = vshrl.u32 %v12661_v15, 16  ;;  %v4074_v31 = vshrl.u32 %v12664_v55, 16  ;;  %v4069_v29 = vshll.u32 %v12663_v5, 16  ;;  %v3761_v43 = vrot.slane %v3759_v7, 1 }
 0x281   : > { %4105 = vrot.lane.b32.xlu0 %v4065_v10, %s14845_s29  ;;  %6022 = vst.msk [vmem:[#allocation3 + $0x9c] sm:$0xf] %vm494_vm13, %v6006_v48  ;;  %13948 = vmatmul.mubr.msk.bf16.gmra.mxu0 %vm2588_vm7, %v14039_v13  ;;  %v12620_v6 = vrot.slane %v12604_v57, 9  ;;  %v3587_v1 = vrot.slane %v12605_v11, 5  ;;  %v16169_v10 = vld [vmem:[#allocation2 + $0x44] sm:$0x1] }
 0x282   : > { %3783 = vrot.lane.b32.xlu1 %v3748_v38, %s14845_s29  ;;  %v4058_v63 = vor.u32 %v4057_v42, %v4053_v33  ;;  %v12643_v59 = vcombine.low %v3656_v32, %v16169_v10  ;;  %v4079_v48 = vor.u32 %v4078_v9, %v4074_v31  ;;  %v4092_v20 = vrot.slane %v4090_v27, 1  ;;  %v4002_v15 = vld [vmem:[#allocation2 + $0x3c] sm:$0x1] }
 0x283   : > { %v3588_v50 = vsel %vm16013_vm4, %v12620_v6, %v3587_v1  ;;  %v3757_v11 = vshrl.u32 %v12641_v52, 16  ;;  %v4088_v55 = vshrl.u32 %v12666_v40, 16  ;;  %v4071_v42 = vrot.slane %v4069_v29, 1  ;;  %v14832_v6 = vld [vmem:[#allocation2] sm:$0xf] }
 0x284   : > { %3625 = vst [vmem:[#allocation3 + $0x4] sm:$0xf] %v3588_v50  ;;  %v16178_v38 = vld [vmem:[#allocation2 + $0x48] sm:$0xf]  ;;  %v3773_v7 = vshll.u32 %v12643_v59, 16  ;;  %v12665_v57 = vcombine.low %v16174_v22, %v4002_v15  ;;  %v3771_v31 = vshrl.u32 %v12643_v59, 16 }
 0x285   : > { %3789 = vrot.lane.b32.xlu0 %v3769_v14, %s14845_s29  ;;  %v3762_v13 = vor.u32 %v3761_v43, %v3757_v11  ;;  %v4093_v9 = vor.u32 %v4092_v20, %v4088_v55  ;;  %v4067_v14 = vshrl.u32 %v12663_v5, 16  ;;  %v12667_v27 = vcombine.low %v16178_v38, %v4004_v18 }
 0x286   : > { %4103 = vrot.lane.b32.xlu1 %v4058_v63, %s14845_s29  ;;  %v3775_v32 = vrot.slane %v3773_v7, 1  ;;  %v4083_v33 = vshll.u32 %v12665_v57, 16  ;;  %v6764_v5 = vsel %vm589_vm8, %v15961_v28, %v15979_v24  ;;  %v4081_v59 = vshrl.u32 %v12665_v57, 16 }
 0x287   : > { %v4072_v52 = vor.u32 %v4071_v42, %v4067_v14  ;;  %v4097_v29 = vshll.u32 %v12667_v27, 16  ;;  %v6765_v63 = vsel %vm3103_vm9, %v15974_v62, %v6764_v5  ;;  %v4095_v11 = vshrl.u32 %v12667_v27, 16  ;;  %v14833_v27 = vld [vmem:[#allocation2 + $0x8] sm:$0xf] }
 0x288   : > { %v3776_v43 = vor.u32 %v3775_v32, %v3771_v31  ;;  %v4085_v50 = vrot.slane %v4083_v33, 1  ;;  %vm3857_vm3 = vsmask.f32 3328  ;;  %vm3858_vm6 = vsmask.f32 7440 }
 0x289   : > { %4109 = vrot.lane.b32.xlu0 %v4079_v48, %s14845_s29  ;;  %v6766_v48 = vsel %vm3105_vm10, %v16036_v16, %v6765_v63  ;;  %v4099_v15 = vrot.slane %v4097_v29, 1  ;;  %v14061_v16 = vld [vmem:[#allocation2 + $0x8] sm:$0x1e]   ;;  %v14082_v29 = vld [vmem:[%s18744_s3 + $0xb8] sm:$0xff]   ;;  %vm16280_vm2 = vmor %vm3857_vm3, %vm3858_vm6 }
 0x28a   : > { %3787 = vrot.lane.b32.xlu1 %v3762_v13, %s14845_s29  ;;  %v6767_v20 = vsel %vm3107_vm11, %v16050_v47, %v6766_v48  ;;  %v4086_v62 = vor.u32 %v4085_v50, %v4081_v59  ;;  %v14087_v50 = vld [vmem:[%s18744_s3 + $0xb0] sm:$0xff]   ;;  %v14089_v48 = vld [vmem:[%s18744_s3 + $0xe8] sm:$0xff]   ;;  %v14091_v59 = vld [vmem:[%s18744_s3 + $0xe0] sm:$0xff]  }
 0x28b   : > { %v6768_v55 = vsel %vm3109_vm12, %v16041_v26, %v6767_v20  ;;  %v4100_v24 = vor.u32 %v4099_v15, %v4095_v11  ;;  %v14090_v20 = vld [vmem:[%s18744_s3 + $0xa8] sm:$0xff]   ;;  %v14071_v11 = vld [vmem:[#allocation2 + $0x18] sm:$0x1e]   ;;  %v14092_v15 = vld [vmem:[%s18744_s3 + $0xa0] sm:$0xff]  }
 0x28c   : > { %v16200_v28 = vsel %vm3111_vm14, %v16057_v44, %v6768_v55 }
 0x28d   : > { %4113 = vrot.lane.b32.xlu0 %v4093_v9, %s14845_s29  ;;  %v3351_v40 = vpop.permute.xlu1 %3350  ;;  %18869 = vst [vmem:[#allocation56_spill] sm:$0xff] %v16200_v28  ;;  %v14066_v9 = vld [vmem:[#allocation2 + $0x10] sm:$0x1e]  }
 0x28e   : > { %v3368_v1 = vsel %vm2588_vm7, %v14832_v6, %v3351_v40  ;;  %4107 = vrot.lane.b32.xlu1 %v4072_v52, %s14845_s29 }
 0x28f   : > { %3398 = vst [vmem:[#allocation3] sm:$0xf] %v3368_v1 }
 0x292   : > { %3791 = vrot.lane.b32.xlu1 %v3776_v43, %s14845_s29  ;;  %v14083_v43 = vld [vmem:[%s18744_s3 + $0xf0] sm:$0xff]  }
 0x296   : > { %4111 = vrot.lane.b32.xlu1 %v4086_v62, %s14845_s29  ;;  %v14094_v62 = vld [vmem:[%s18744_s3 + $0xd8] sm:$0xff]  }
 0x29a   : > { %4115 = vrot.lane.b32.xlu1 %v4100_v24, %s14845_s29 }
 0x2a9   : > { %v3505_v47 = vpop.permute.xlu0 %3504 }
 0x2aa   : > { %v3523_v18 = vsel %vm2588_vm7, %v14061_v16, %v3505_v47 }
 0x2ab   : > { %v12606_v13 = vcombine.low %v3523_v18, %v3523_v18  ;;  %v12607_v42 = vcombine.high %v3523_v18, %v3523_v18  ;;  %v14096_v18 = vld [vmem:[%s18744_s3 + $0x98] sm:$0xff]  }
 0x2ad   : > { %v12621_v7 = vrot.slane %v12606_v13, 9  ;;  %v3591_v57 = vrot.slane %v12607_v42, 5 }
 0x2ae   : > { %v3353_v26 = vpop.permute.xlu1 %3352  ;;  %v3507_v14 = vpop.permute.xlu0 %3506 }
 0x2af   : > { %v3372_v44 = vsel %vm2588_vm7, %v14833_v27, %v3353_v26  ;;  %v3592_v52 = vsel %vm16013_vm4, %v12621_v7, %v3591_v57  ;;  %v3526_v32 = vsel %vm2588_vm7, %v14066_v9, %v3507_v14  ;;  %v14097_v7 = vld [vmem:[%s18744_s3 + $0xd0] sm:$0xff]  }
 0x2b0   : > { %3399 = vst [vmem:[#allocation3 + $0x14] sm:$0xf] %v3372_v44  ;;  %3626 = vst [vmem:[#allocation3 + $0x18] sm:$0xf] %v3592_v52  ;;  %v12608_v33 = vcombine.low %v3526_v32, %v3526_v32  ;;  %v12609_v40 = vcombine.high %v3526_v32, %v3526_v32  ;;  %v14834_v9 = vld [vmem:[#allocation2 + $0x10] sm:$0xf] }
 0x2b1   : > { %v14098_v27 = vld [vmem:[%s18744_s3 + $0x90] sm:$0xff]   ;;  %v14075_v44 = vld [vmem:[#allocation2 + $0x20] sm:$0x1e]   ;;  %v14102_v52 = vld [vmem:[%s18744_s3 + $0xc8] sm:$0xff]  }
 0x2b2   : > { %v12622_v6 = vrot.slane %v12608_v33, 9  ;;  %v3595_v1 = vrot.slane %v12609_v40, 5 }
 0x2b4   : > { %v3596_v31 = vsel %vm16013_vm4, %v12622_v6, %v3595_v1  ;;  %v14105_v1 = vld [vmem:[%s18744_s3 + $0x88] sm:$0xff]  }
 0x2b5   : > { %3627 = vst [vmem:[#allocation3 + $0x2c] sm:$0xf] %v3596_v31  ;;  %v14106_v31 = vld [vmem:[%s18744_s3 + $0xc0] sm:$0xff]  }
 0x2b7   : > { %v14072_v5 = vld [vmem:[#allocation3 + $0x4] ss:$20 sps:$4 sm:$0xff]   ;;  %v14074_v63 = vld [vmem:[#allocation3] ss:$20 sps:$4 sm:$0xff]  }
 0x2b8   : > { %4700 = vmatprep.mubr.bf16.mxu1 %v14072_v5 }
 0x2b9   : > { %4701 = vmatmul.mubr.bf16.vlgmr.msra.gmra.mxu1 %v14074_v63 }
 0x2ba   : > { %13632 = vmatpush3.bf16.msra.mxu1 %v14082_v29 }
 0x2bb   : > { %13633 = vmatprep.subr.bf16.mxu1 %v14083_v43 }
 0x2be   : > { %13634 = vmatpush3.bf16.msra.mxu1 %v14087_v50 }
 0x2bf   : > { %13635 = vmatprep.subr.bf16.mxu1 %v14089_v48  ;;  %v14107_v48 = vld [vmem:[%s18744_s3 + $0x80] sm:$0xff]  }
 0x2c2   : > { %13636 = vmatpush3.bf16.msra.mxu1 %v14090_v20 }
 0x2c3   : > { %13637 = vmatprep.subr.bf16.mxu1 %v14091_v59  ;;  %v14076_v59 = vld [vmem:[#allocation2 + $0x28] sm:$0x1e]  }
 0x2c4   : > { %v3509_v55 = vpop.permute.xlu1 %3508 }
 0x2c5   : > { %v3529_v24 = vsel %vm2588_vm7, %v14071_v11, %v3509_v55 }
 0x2c6   : > { %v12610_v16 = vcombine.low %v3529_v24, %v3529_v24  ;;  %v12611_v47 = vcombine.high %v3529_v24, %v3529_v24  ;;  %13638 = vmatpush3.bf16.msra.mxu1 %v14092_v15  ;;  %v14080_v24 = vld [vmem:[#allocation2 + $0x30] sm:$0x1e]  }
 0x2c7   : > { %13639 = vmatprep.subr.bf16.mxu1 %v14094_v62 }
 0x2c8   : > { %v12623_v13 = vrot.slane %v12610_v16, 9  ;;  %v3599_v42 = vrot.slane %v12611_v47, 5 }
 0x2c9   : > { %v3355_v57 = vpop.permute.xlu0 %3354 }
 0x2ca   : > { %v3376_v26 = vsel %vm2588_vm7, %v14834_v9, %v3355_v57  ;;  %v3600_v14 = vsel %vm16013_vm4, %v12623_v13, %v3599_v42  ;;  %13640 = vmatpush3.bf16.msra.mxu1 %v14096_v18  ;;  %v3633_v42 = vld [vmem:[#allocation2 + $0x8] sm:$0xf] }
 0x2cb   : > { %3400 = vst [vmem:[#allocation3 + $0x28] sm:$0xf] %v3376_v26  ;;  %3628 = vst [vmem:[#allocation3 + $0x40] sm:$0xf] %v3600_v14  ;;  %13641 = vmatprep.subr.bf16.mxu1 %v14097_v7 }
 0x2cd   : > { %v3511_v32 = vpop.permute.xlu0 %3510 }
 0x2ce   : > { %v3532_v33 = vsel %vm2588_vm7, %v14075_v44, %v3511_v32  ;;  %13642 = vmatpush3.bf16.msra.mxu1 %v14098_v27 }
 0x2cf   : > { %v12612_v40 = vcombine.low %v3532_v33, %v3532_v33  ;;  %v12613_v6 = vcombine.high %v3532_v33, %v3532_v33  ;;  %13643 = vmatprep.subr.bf16.mxu1 %v14102_v52  ;;  %v12628_v52 = vcombine.low %v3633_v42, %v16062_v60  ;;  %v3635_v42 = vld [vmem:[#allocation2 + $0x10] sm:$0xf] }
 0x2d1   : > { %v12624_v29 = vrot.slane %v12612_v40, 9  ;;  %v3603_v5 = vrot.slane %v12613_v6, 5 }
 0x2d2   : > { %v3357_v63 = vpop.permute.xlu1 %3356  ;;  %13644 = vmatpush3.bf16.msra.mxu1 %v14105_v1  ;;  %v14077_v7 = vld [vmem:[#allocation3 + $0x2c] ss:$20 sps:$4 sm:$0xff]  }
 0x2d3   : > { %v3380_v43 = vsel %vm2588_vm7, %v16010_v21, %v3357_v63  ;;  %v3604_v50 = vsel %vm16013_vm4, %v12624_v29, %v3603_v5  ;;  %13645 = vmatprep.subr.bf16.mxu1 %v14106_v31  ;;  %4708 = vmatprep.mubr.bf16.mxu1 %v14077_v7 }
 0x2d4   : > { %3401 = vst [vmem:[#allocation3 + $0x3c] sm:$0xf] %v3380_v43  ;;  %3629 = vst [vmem:[#allocation3 + $0x54] sm:$0xf] %v3604_v50  ;;  %v3637_v43 = vld [vmem:[#allocation2 + $0x18] sm:$0xf] }
 0x2d6   : > { %v3359_v20 = vpop.permute.xlu0 %3358  ;;  %v3513_v15 = vpop.permute.xlu1 %3512  ;;  %13646 = vmatpush3.bf16.msra.mxu1 %v14107_v48 }
 0x2d7   : > { %v3384_v11 = vsel %vm2588_vm7, %v16023_v25, %v3359_v20  ;;  %v3535_v21 = vsel %vm2588_vm7, %v14076_v59, %v3513_v15  ;;  %v12630_v20 = vcombine.low %v3637_v43, %v16089_v36 }
 0x2d8   : > { %3402 = vst [vmem:[#allocation3 + $0x50] sm:$0xf] %v3384_v11  ;;  %v12614_v55 = vcombine.low %v3535_v21, %v3535_v21  ;;  %v12615_v62 = vcombine.high %v3535_v21, %v3535_v21 }
 0x2da   : > { %v3515_v16 = vpop.permute.xlu0 %3514  ;;  %v12625_v47 = vrot.slane %v12614_v55, 9  ;;  %v3607_v18 = vrot.slane %v12615_v62, 5  ;;  %v577_v55 = vld [vmem:[#allocation4 + $0x8] sm:$0x1] }
 0x2db   : > { %v3538_v13 = vsel %vm2588_vm7, %v14080_v24, %v3515_v16  ;;  %v14079_v57 = vld [vmem:[#allocation3 + $0x28] ss:$20 sps:$4 sm:$0xff]  }
 0x2dc   : > { %v12616_v9 = vcombine.low %v3538_v13, %v3538_v13  ;;  %v12617_v26 = vcombine.high %v3538_v13, %v3538_v13  ;;  %v3608_v25 = vsel %vm16013_vm4, %v12625_v47, %v3607_v18  ;;  %4709 = vmatmul.mubr.bf16.gmra.mxu1 %v14079_v57 }
 0x2dd   : > { %3630 = vst [vmem:[#allocation3 + $0x68] sm:$0xf] %v3608_v25  ;;  %v3361_v14 = vpop.permute.xlu1 %3360  ;;  %v3641_v25 = vld [vmem:[#allocation2 + $0x28] sm:$0xf] }
 0x2de   : > { %v12626_v27 = vrot.slane %v12616_v9, 9  ;;  %v3611_v44 = vrot.slane %v12617_v26, 5  ;;  %v3388_v32 = vsel %vm2588_vm7, %v16033_v30, %v3361_v14 }
 0x2df   : > { %v3778_v33 = vpop.permute.xlu0 %3777  ;;  %3403 = vst [vmem:[#allocation3 + $0x64] sm:$0xf] %v3388_v32 }
 0x2e0   : > { %v3612_v40 = vsel %vm16013_vm4, %v12626_v27, %v3611_v44  ;;  %v3795_v6 = vsel %vm2588_vm7, %v12628_v52, %v3778_v33 }
 0x2e1   : > { %3631 = vst [vmem:[#allocation3 + $0x7c] sm:$0xf] %v3612_v40  ;;  %v12644_v1 = vcombine.low %v3795_v6, %v3795_v6  ;;  %v12645_v31 = vcombine.high %v3795_v6, %v3795_v6  ;;  %v12629_v40 = vcombine.low %v3635_v42, %v16093_v54 }
 0x2e3   : > { %v3861_v29 = vshrl.u32 %v12644_v1, 16  ;;  %v3864_v5 = vshll.u32 %v12644_v1, 16  ;;  %v3363_v63 = vpop.permute.xlu0 %3362  ;;  %v3870_v48 = vshll.u32 %v12645_v31, 16 }
 0x2e4   : > { %v3392_v60 = vsel %vm2588_vm7, %v16064_v0, %v3363_v63  ;;  %v14085_v11 = vld [vmem:[#allocation3 + $0x54] ss:$20 sps:$4 sm:$0xff]  }
 0x2e5   : > { %v3863_v30 = vrot.slane %v3861_v29, 4  ;;  %v3866_v50 = vrot.slane %v3864_v5, 5  ;;  %3404 = vst [vmem:[#allocation3 + $0x78] sm:$0xf] %v3392_v60  ;;  %v3872_v16 = vrot.slane %v3870_v48, 5  ;;  %4716 = vmatprep.mubr.bf16.mxu1 %v14085_v11  ;;  %v12632_v29 = vcombine.low %v3641_v25, %v16106_v37 }
 0x2e6   : > { %v14088_v15 = vld [vmem:[#allocation3 + $0x50] ss:$20 sps:$4 sm:$0xff]   ;;  %v14084_v0 = vld [vmem:[#allocation2 + $0x38] sm:$0x1e]  }
 0x2e7   : > { %v3867_v59 = vor.u32 %v3866_v50, %v3863_v30  ;;  %v3782_v21 = vpop.permute.xlu0 %3781  ;;  %4717 = vmatmul.mubr.bf16.gmra.mxu1 %v14088_v15  ;;  %v3639_v11 = vld [vmem:[#allocation2 + $0x20] sm:$0xf] }
 0x2e8   : > { %v3801_v62 = vsel %vm2588_vm7, %v12630_v20, %v3782_v21  ;;  %v3517_v13 = vpop.permute.xlu1 %3516 }
 0x2e9   : > { %v3868_v24 = vrot.slane %v3867_v59, 4  ;;  %v12648_v47 = vcombine.low %v3801_v62, %v3801_v62  ;;  %v12649_v18 = vcombine.high %v3801_v62, %v3801_v62  ;;  %v3541_v7 = vsel %vm2588_vm7, %v14084_v0, %v3517_v13  ;;  %v3645_v13 = vld [vmem:[#allocation2 + $0x38] sm:$0xf] }
 0x2ea   : > { %v12618_v14 = vcombine.low %v3541_v7, %v3541_v7  ;;  %v12619_v27 = vcombine.high %v3541_v7, %v3541_v7  ;;  %v12631_v7 = vcombine.low %v3639_v11, %v16116_v4 }
 0x2eb   : > { %v3873_v36 = vsel %vm16280_vm2, %v3868_v24, %v3872_v16  ;;  %v3889_v57 = vshrl.u32 %v12648_v47, 16  ;;  %v3892_v9 = vshll.u32 %v12648_v47, 16  ;;  %v4102_v26 = vpop.permute.xlu0 %4101  ;;  %v3898_v33 = vshll.u32 %v12649_v18, 16 }
 0x2ec   : > { %3980 = vst [vmem:[#allocation3 + $0x8] sm:$0xf] %v3873_v36  ;;  %v4119_v44 = vsel %vm2588_vm7, %v16082_v49, %v4102_v26  ;;  %v12627_v6 = vrot.slane %v12618_v14, 9  ;;  %v3615_v1 = vrot.slane %v12619_v27, 5  ;;  %v3780_v31 = vpop.permute.xlu1 %3779 }
 0x2ed   : > { %v3891_v52 = vrot.slane %v3889_v57, 4  ;;  %v3894_v32 = vrot.slane %v3892_v9, 5  ;;  %4149 = vst [vmem:[#allocation3 + $0xc] sm:$0xf] %v4119_v44  ;;  %v3798_v63 = vsel %vm2588_vm7, %v12629_v40, %v3780_v31  ;;  %v3900_v54 = vrot.slane %v3898_v33, 5 }
 0x2ee   : > { %v3616_v60 = vsel %vm16013_vm4, %v12627_v6, %v3615_v1  ;;  %v12646_v30 = vcombine.low %v3798_v63, %v3798_v63  ;;  %v12647_v49 = vcombine.high %v3798_v63, %v3798_v63 }
 0x2ef   : > { %v3895_v5 = vor.u32 %v3894_v32, %v3891_v52  ;;  %v3786_v43 = vpop.permute.xlu0 %3785  ;;  %3632 = vst [vmem:[#allocation3 + $0x90] sm:$0xf] %v3616_v60 }
 0x2f0   : > { %v3807_v50 = vsel %vm2588_vm7, %v12632_v29, %v3786_v43  ;;  %v3875_v15 = vshrl.u32 %v12646_v30, 16  ;;  %v3878_v21 = vshll.u32 %v12646_v30, 16  ;;  %v3884_v37 = vshll.u32 %v12647_v49, 16  ;;  %v3365_v62 = vpop.permute.xlu1 %3364 }
 0x2f1   : > { %v3896_v48 = vrot.slane %v3895_v5, 4  ;;  %v12652_v20 = vcombine.low %v3807_v50, %v3807_v50  ;;  %v12653_v59 = vcombine.high %v3807_v50, %v3807_v50  ;;  %v3396_v16 = vsel %vm2588_vm7, %v16104_v17, %v3365_v62 }
 0x2f2   : > { %v3877_v42 = vrot.slane %v3875_v15, 4  ;;  %v3880_v36 = vrot.slane %v3878_v21, 5  ;;  %3405 = vst [vmem:[#allocation3 + $0x8c] sm:$0xf] %v3396_v16  ;;  %v12634_v17 = vcombine.low %v3645_v13, %v16125_v51  ;;  %v3886_v44 = vrot.slane %v3884_v37, 5 }
 0x2f3   : > { %v3901_v24 = vsel %vm16280_vm2, %v3896_v48, %v3900_v54  ;;  %v3917_v0 = vshrl.u32 %v12652_v20, 16  ;;  %v3920_v47 = vshll.u32 %v12652_v20, 16  ;;  %v4106_v18 = vpop.permute.xlu0 %4105  ;;  %v3926_v26 = vshll.u32 %v12653_v59, 16 }
 0x2f4   : > { %3982 = vst [vmem:[#allocation3 + $0x30] sm:$0xf] %v3901_v24  ;;  %v4127_v25 = vsel %vm2588_vm7, %v16112_v35, %v4106_v18  ;;  %v3881_v14 = vor.u32 %v3880_v36, %v3877_v42  ;;  %v3784_v27 = vpop.permute.xlu1 %3783  ;;  %v3643_v35 = vld [vmem:[#allocation2 + $0x30] sm:$0xf] }
 0x2f5   : > { %v3919_v57 = vrot.slane %v3917_v0, 4  ;;  %v3922_v9 = vrot.slane %v3920_v47, 5  ;;  %4151 = vst [vmem:[#allocation3 + $0x34] sm:$0xf] %v4127_v25  ;;  %v3804_v32 = vsel %vm2588_vm7, %v12631_v7, %v3784_v27  ;;  %v3928_v29 = vrot.slane %v3926_v26, 5 }
 0x2f6   : > { %v3882_v40 = vrot.slane %v3881_v14, 4  ;;  %v12650_v6 = vcombine.low %v3804_v32, %v3804_v32  ;;  %v12651_v1 = vcombine.high %v3804_v32, %v3804_v32  ;;  %v14100_v59 = vld [vmem:[#allocation3 + $0x7c] ss:$20 sps:$4 sm:$0xff]   ;;  %v12633_v37 = vcombine.low %v3643_v35, %v16148_v45 }
 0x2f7   : > { %v3923_v52 = vor.u32 %v3922_v9, %v3919_v57  ;;  %v3790_v33 = vpop.permute.xlu0 %3789  ;;  %4724 = vmatprep.mubr.bf16.mxu1 %v14100_v59 }
 0x2f8   : > { %v3813_v4 = vsel %vm2588_vm7, %v12634_v17, %v3790_v33  ;;  %v3887_v43 = vsel %vm16280_vm2, %v3882_v40, %v3886_v44  ;;  %v3903_v60 = vshrl.u32 %v12650_v6, 16  ;;  %v3906_v51 = vshll.u32 %v12650_v6, 16  ;;  %v4104_v49 = vpop.permute.xlu1 %4103 }
 0x2f9   : > { %v3924_v31 = vrot.slane %v3923_v52, 4  ;;  %v12656_v5 = vcombine.low %v3813_v4, %v3813_v4  ;;  %v12657_v63 = vcombine.high %v3813_v4, %v3813_v4  ;;  %v3912_v30 = vshll.u32 %v12651_v1, 16  ;;  %3981 = vst [vmem:[#allocation3 + $0x1c] sm:$0xf] %v3887_v43  ;;  %v14104_v62 = vld [vmem:[#allocation3 + $0x78] ss:$20 sps:$4 sm:$0xff]  }
 0x2fa   : > { %v4123_v48 = vsel %vm2588_vm7, %v16129_v19, %v4104_v49  ;;  %v3905_v15 = vrot.slane %v3903_v60, 4  ;;  %v3908_v21 = vrot.slane %v3906_v51, 5  ;;  %4725 = vmatmul.mubr.bf16.gmra.mxu1 %v14104_v62  ;;  %v3647_v52 = vld [vmem:[#allocation2 + $0x40] sm:$0xf] }
 0x2fb   : > { %v3929_v50 = vsel %vm16280_vm2, %v3924_v31, %v3928_v29  ;;  %v3945_v54 = vshrl.u32 %v12656_v5, 16  ;;  %v3948_v20 = vshll.u32 %v12656_v5, 16  ;;  %v4110_v11 = vpop.permute.xlu0 %4109  ;;  %4150 = vst [vmem:[#allocation3 + $0x20] sm:$0xf] %v4123_v48  ;;  %v3954_v0 = vshll.u32 %v12657_v63, 16 }
 0x2fc   : > { %3984 = vst [vmem:[#allocation3 + $0x58] sm:$0xf] %v3929_v50  ;;  %v4135_v47 = vsel %vm2588_vm7, %v16135_v12, %v4110_v11  ;;  %v3909_v18 = vor.u32 %v3908_v21, %v3905_v15  ;;  %v3788_v19 = vpop.permute.xlu1 %3787  ;;  %v3914_v13 = vrot.slane %v3912_v30, 5  ;;  %v12635_v31 = vcombine.low %v3647_v52, %v16169_v10 }
 0x2fd   : > { %v3947_v24 = vrot.slane %v3945_v54, 4  ;;  %v3950_v16 = vrot.slane %v3948_v20, 5  ;;  %4153 = vst [vmem:[#allocation3 + $0x5c] sm:$0xf] %v4135_v47  ;;  %v3810_v36 = vsel %vm2588_vm7, %v12633_v37, %v3788_v19  ;;  %v3956_v14 = vrot.slane %v3954_v0, 5 }
 0x2fe   : > { %v3910_v57 = vrot.slane %v3909_v18, 4  ;;  %v12654_v9 = vcombine.low %v3810_v36, %v3810_v36  ;;  %v12655_v45 = vcombine.high %v3810_v36, %v3810_v36  ;;  %v16334_v19 = vld [vmem:[#allocation2] sm:$0xf] }
 0x2ff   : > { %v3951_v42 = vor.u32 %v3950_v16, %v3947_v24  ;;  %v4114_v7 = vpop.permute.xlu0 %4113 }
 0x300   : > { %v4143_v26 = vsel %vm2588_vm7, %v16145_v56, %v4114_v7  ;;  %v3915_v12 = vsel %vm16280_vm2, %v3910_v57, %v3914_v13  ;;  %v3931_v27 = vshrl.u32 %v12654_v9, 16  ;;  %v3934_v17 = vshll.u32 %v12654_v9, 16  ;;  %v4108_v44 = vpop.permute.xlu1 %4107  ;;  %v14111_v6 = vld [vmem:[#allocation3 + $0x8] ss:$20 sps:$4 sm:$0xff]   ;;  %v5039_v13 = vld [vmem:[#allocation2 + $0x4] sm:$0x1] }
 0x301   : > { %v3952_v25 = vrot.slane %v3951_v42, 4  ;;  %4155 = vst [vmem:[#allocation3 + $0x84] sm:$0xf] %v4143_v26  ;;  %3983 = vst [vmem:[#allocation3 + $0x44] sm:$0xf] %v3915_v12  ;;  %v4131_v33 = vsel %vm2588_vm7, %v16154_v46, %v4108_v44  ;;  %v3940_v4 = vshll.u32 %v12655_v45, 16 }
 0x302   : > { %v14108_v40 = vld [vmem:[#allocation3 + $0xc] ss:$20 sps:$4 sm:$0xff]   ;;  %v3933_v56 = vrot.slane %v3931_v27, 4  ;;  %v3936_v1 = vrot.slane %v3934_v17, 5  ;;  %4152 = vst [vmem:[#allocation3 + $0x48] sm:$0xf] %v4131_v33 }
 0x303   : > { %v3957_v32 = vsel %vm16280_vm2, %v3952_v25, %v3956_v14  ;;  %4765 = vmatprep.mubr.bf16.mxu1 %v14108_v40  ;;  %v3942_v43 = vrot.slane %v3940_v4, 5  ;;  %v14153_v27 = vld [vmem:[%s18746_s5 + $0x78] sm:$0xff]   ;;  %v14155_v44 = vld [vmem:[%s18746_s5 + $0x70] sm:$0xff]   ;;  %v14157_v33 = vld [vmem:[%s18746_s5 + $0x68] sm:$0xff]  }
 0x304   : > { %3986 = vst [vmem:[#allocation3 + $0x80] sm:$0xf] %v3957_v32  ;;  %v3937_v29 = vor.u32 %v3936_v1, %v3933_v56  ;;  %v3792_v5 = vpop.permute.xlu1 %3791  ;;  %4766 = vmatmul.mubr.bf16.vlgmr.msra.gmra.mxu1 %v14111_v6  ;;  %v14154_v17 = vld [vmem:[%s18746_s5 + $0x38] sm:$0xff]   ;;  %13679 = vmatprep.subr.bf16.mxu1 %v14153_v27  ;;  %v14156_v32 = vld [vmem:[%s18746_s5 + $0x30] sm:$0xff]   ;;  %v14158_v56 = vld [vmem:[%s18746_s5 + $0x28] sm:$0xff]  }
 0x305   : > { %v3816_v63 = vsel %vm2588_vm7, %v12635_v31, %v3792_v5  ;;  %13680 = vmatpush3.bf16.msra.mxu1 %v14154_v17 }
 0x306   : > { %v3938_v35 = vrot.slane %v3937_v29, 4  ;;  %v12658_v60 = vcombine.low %v3816_v63, %v3816_v63  ;;  %v12659_v51 = vcombine.high %v3816_v63, %v3816_v63  ;;  %13681 = vmatprep.subr.bf16.mxu1 %v14155_v44 }
 0x308   : > { %v3943_v46 = vsel %vm16280_vm2, %v3938_v35, %v3942_v43  ;;  %v3959_v30 = vshrl.u32 %v12658_v60, 16  ;;  %v3962_v49 = vshll.u32 %v12658_v60, 16  ;;  %v4112_v50 = vpop.permute.xlu1 %4111  ;;  %v14114_v54 = vld [vmem:[#allocation3 + $0x30] ss:$20 sps:$4 sm:$0xff]   ;;  %v3968_v11 = vshll.u32 %v12659_v51, 16 }
 0x309   : > { %3985 = vst [vmem:[#allocation3 + $0x6c] sm:$0xf] %v3943_v46  ;;  %v4139_v48 = vsel %vm2588_vm7, %v16174_v22, %v4112_v50  ;;  %v14112_v10 = vld [vmem:[#allocation3 + $0x34] ss:$20 sps:$4 sm:$0xff]   ;;  %13682 = vmatpush3.bf16.msra.mxu1 %v14156_v32  ;;  %v16367_v51 = vld [vmem:[%s18745_s4] ss:$0 sm:$0xff] }
 0x30a   : > { %v3961_v20 = vrot.slane %v3959_v30, 4  ;;  %v3964_v59 = vrot.slane %v3962_v49, 5  ;;  %4154 = vst [vmem:[#allocation3 + $0x70] sm:$0xf] %v4139_v48  ;;  %4773 = vmatprep.mubr.bf16.mxu1 %v14112_v10  ;;  %v3970_v24 = vrot.slane %v3968_v11, 5  ;;  %13683 = vmatprep.subr.bf16.mxu1 %v14157_v33 }
 0x30c   : > { %v3965_v15 = vor.u32 %v3964_v59, %v3961_v20  ;;  %4774 = vmatmul.mubr.bf16.gmra.mxu1 %v14114_v54  ;;  %v4116_v21 = vpop.permute.xlu1 %4115 }
 0x30d   : > { %v4147_v37 = vsel %vm2588_vm7, %v16178_v38, %v4116_v21  ;;  %v12745_v38 = vcombine.low %v16334_v19, %v5039_v13  ;;  %13684 = vmatpush3.bf16.msra.mxu1 %v14158_v56 }
 0x30e   : > { %v3966_v62 = vrot.slane %v3965_v15, 4  ;;  %4156 = vst [vmem:[#allocation3 + $0x98] sm:$0xf] %v4147_v37 }
 0x30f   : > { %v5088_v42 = vshrl.u32 %v12745_v38, 16  ;;  %v5090_v36 = vshll.u32 %v12745_v38, 16 }
 0x310   : > { %v3971_v16 = vsel %vm16280_vm2, %v3966_v62, %v3970_v24  ;;  %v14117_v0 = vld [vmem:[#allocation3 + $0x58] ss:$20 sps:$4 sm:$0xff]  }
 0x311   : > { %3987 = vst [vmem:[#allocation3 + $0x94] sm:$0xf] %v3971_v16  ;;  %v14115_v22 = vld [vmem:[#allocation3 + $0x5c] ss:$20 sps:$4 sm:$0xff]   ;;  %v5092_v7 = vrot.slane %v5090_v36, 1 }
 0x312   : > { %4781 = vmatprep.mubr.bf16.mxu1 %v14115_v22 }
 0x313   : > { %v5093_v57 = vor.u32 %v5092_v7, %v5088_v42 }
 0x314   : > { %4782 = vmatmul.mubr.bf16.gmra.mxu1 %v14117_v0 }
 0x315   : > { %v14118_v47 = vld [vmem:[#allocation3 + $0x84] ss:$20 sps:$4 sm:$0xff]   ;;  %5143 = vrot.lane.b32.xlu0 %v5093_v57, %s14845_s29 }
 0x316   : > { %4789 = vmatprep.mubr.bf16.mxu1 %v14118_v47 }
 0x318   : > { %v14120_v18 = vld [vmem:[#allocation3 + $0x80] ss:$20 sps:$4 sm:$0xff]  }
 0x31c   : > { %4790 = vmatmul.mubr.bf16.gmra.mxu1 %v14120_v18 }
 0x32d   : > { %v13945_v35 = vpop.f32.mrf.mxu0 }
 0x32f   : > { %v4832_v30 = vpop.f32.mrf.mxu0 }
 0x331   : > { %v13946_v59 = vpop.f32.mrf.mxu0 }
 0x333   : > { %v4835_v0 = vpop.f32.mrf.mxu0 }
 0x379   : > { %v13607_v9 = vpop.f32.mrf.mxu1 }
 0x37b   : > { %v13608_v45 = vpop.f32.mrf.mxu1 }
 0x37c   : > { %v13609_v60 = vadd.f32 %v13608_v45, %v13607_v9 }
 0x37d   : > { %v13610_v26 = vpop.f32.mrf.mxu1 }
 0x37e   : > { %v4703_v50 = vadd.f32 %v13609_v60, %v16367_v51 }
 0x37f   : > { %v13611_v25 = vpop.f32.mrf.mxu1 }
 0x380   : > { %v13612_v48 = vadd.f32 %v13611_v25, %v13610_v26  ;;  %v16372_v26 = vpop.f32.mrf.mxu0 }
 0x382   : > { %v4706_v15 = vadd.f32 %v13612_v48, %v16367_v51  ;;  %v4986_v48 = vld [vmem:[#allocation2 + $0xc] sm:$0x1] }
 0x39c   : > { %v13613_v14 = vpop.f32.mrf.mxu1 }
 0x39e   : > { %v13614_v12 = vpop.f32.mrf.mxu1 }
 0x39f   : > { %v13615_v21 = vadd.f32 %v13614_v12, %v13613_v14 }
 0x3a0   : > { %v13616_v52 = vpop.f32.mrf.mxu1 }
 0x3a1   : > { %v4711_v18 = vadd.f32 %v13615_v21, %v16367_v51 }
 0x3a2   : > { %v13617_v40 = vpop.f32.mrf.mxu1 }
 0x3a3   : > { %v13618_v36 = vadd.f32 %v13617_v40, %v13616_v52  ;;  %v4848_v40 = vpop.f32.mrf.mxu0 }
 0x3a5   : > { %v4714_v33 = vadd.f32 %v13618_v36, %v16367_v51 }
 0x3a7   : > { %v13619_v6 = vpop.f32.mrf.mxu1 }
 0x3a9   : > { %v13620_v1 = vpop.f32.mrf.mxu1 }
 0x3aa   : > { %v13621_v25 = vadd.f32 %v13620_v1, %v13619_v6 }
 0x3ab   : > { %v13622_v4 = vpop.f32.mrf.mxu1 }
 0x3ad   : > { %v13623_v31 = vpop.f32.mrf.mxu1 }
 0x3ae   : > { %v13624_v60 = vadd.f32 %v13623_v31, %v13622_v4 }
 0x3ba   : > { %v16356_v29 = vpop.f32.mrf.mxu1 }
 0x3bc   : > { %v16358_v5 = vpop.f32.mrf.mxu1 }
 0x3be   : > { %v16360_v63 = vpop.f32.mrf.mxu1 }
 0x3c0   : > { %v16362_v43 = vpop.f32.mrf.mxu1 }
 0x3c4   : > { %v13647_v46 = vpop.f32.mrf.mxu1 }
 0x3c6   : > { %v13648_v49 = vpop.f32.mrf.mxu1 }
 0x3c7   : > { %v13649_v10 = vadd.f32 %v13648_v49, %v13647_v46  ;;  %v4719_v49 = vadd.f32 %v13621_v25, %v16367_v51 }
 0x3c8   : > { %v13650_v54 = vpop.f32.mrf.mxu1 }
 0x3c9   : > { %v4768_v20 = vadd.f32 %v13649_v10, %v4703_v50  ;;  %v4983_v50 = vld [vmem:[#allocation2 + $0x8] sm:$0xf] }
 0x3ca   : > { %v13651_v11 = vpop.f32.mrf.mxu1 }
 0x3cb   : > { %v4833_v37 = vadd.f32 %v4832_v30, %v4768_v20  ;;  %v13652_v62 = vadd.f32 %v13651_v11, %v13650_v54 }
 0x3cc   : > { %v13653_v24 = vpop.f32.mrf.mxu1 }
 0x3cd   : > { %v4863_v16 = vmax.f32 %v4833_v37, 0.0  ;;  %v4771_v22 = vadd.f32 %v13652_v62, %v4706_v15  ;;  %v4722_v37 = vadd.f32 %v13624_v60, %v16367_v51 }
 0x3ce   : > { %v13654_v47 = vpop.f32.mrf.mxu1 }
 0x3cf   : > { %v13541_v13 = vpack.c.bf16 %v4863_v16, %v4863_v16  ;;  %v4836_v38 = vadd.f32 %v4835_v0, %v4771_v22  ;;  %v13655_v42 = vadd.f32 %v13654_v47, %v13653_v24  ;;  %v16381_v22 = vpop.f32.mrf.mxu0  ;;  %v13627_v0 = vadd.f32 %v16358_v5, %v16356_v29 }
 0x3d0   : > { %v13656_v7 = vpop.f32.mrf.mxu1  ;;  %v13630_v47 = vadd.f32 %v16362_v43, %v16360_v63 }
 0x3d1   : > { %v4904_v57 = vshrl.u32 %v13541_v13, 16  ;;  %v4864_v9 = vmax.f32 %v4836_v38, 0.0  ;;  %v4776_v45 = vadd.f32 %v13655_v42, %v4711_v18  ;;  %v4907_v14 = vshll.u32 %v13541_v13, 16  ;;  %v4989_v18 = vld [vmem:[#allocation2 + $0x10] sm:$0xf] }
 0x3d2   : > { %v13657_v12 = vpop.f32.mrf.mxu1  ;;  %v4992_v13 = vld [vmem:[#allocation2 + $0x14] sm:$0x1] }
 0x3d3   : > { %v4906_v27 = vrot.slane %v4904_v57, 7  ;;  %v13542_v17 = vpack.c.bf16 %v4864_v9, %v4864_v9  ;;  %v4841_v44 = vadd.f32 %v13945_v35, %v4776_v45  ;;  %v13658_v32 = vadd.f32 %v13657_v12, %v13656_v7  ;;  %v14161_v12 = vld [vmem:[%s18746_s5 + $0x20] sm:$0xff]  }
 0x3d4   : > { %v13659_v56 = vpop.f32.mrf.mxu1 }
 0x3d5   : > { %v4909_v46 = vor.u32 %v4907_v14, %v4906_v27  ;;  %v4910_v30 = vrot.slane %v4906_v27, 4  ;;  %v4912_v52 = vshrl.u32 %v13542_v17, 16  ;;  %v4915_v10 = vshll.u32 %v13542_v17, 16  ;;  %v14160_v14 = vld [vmem:[%s18746_s5 + $0x60] sm:$0xff]   ;;  %v4851_v27 = vpop.f32.mrf.mxu0 }
 0x3d6   : > { %v4865_v6 = vmax.f32 %v4841_v44, 0.0  ;;  %v4779_v1 = vadd.f32 %v13658_v32, %v4714_v33  ;;  %v13660_v54 = vpop.f32.mrf.mxu1  ;;  %v4727_v17 = vadd.f32 %v13627_v0, %v16367_v51  ;;  %v4995_v33 = vld [vmem:[#allocation2 + $0x18] sm:$0xf]  ;;  %13685 = vmatprep.subr.bf16.mxu1 %v14160_v14 }
 0x3d7   : > { %v4984_v35 = vsel %vm15122_vm15, %v4909_v46, %v4983_v50  ;;  %v4987_v20 = vsel %vm14993_vm5, %v4910_v30, %v4986_v48  ;;  %v4914_v11 = vrot.slane %v4912_v52, 7  ;;  %v13661_v4 = vadd.f32 %v13660_v54, %v13659_v56  ;;  %v4998_v56 = vld [vmem:[#allocation2 + $0x1c] sm:$0x1]  ;;  %13686 = vmatpush3.bf16.msra.mxu1 %v14161_v12  ;;  %v5007_v12 = vld [vmem:[#allocation2 + $0x28] sm:$0xf] }
 0x3d8   : > { %4988 = vst [vmem:[#allocation2 + $0xc] sm:$0x1] %v4987_v20  ;;  %4985 = vst [vmem:[#allocation2 + $0x8] sm:$0xf] %v4984_v35  ;;  %v13543_v31 = vpack.c.bf16 %v4865_v6, %v4865_v6  ;;  %v4844_v15 = vadd.f32 %v13946_v59, %v4779_v1  ;;  %v13662_v21 = vpop.f32.mrf.mxu1  ;;  %v4730_v30 = vadd.f32 %v13630_v47, %v16367_v51  ;;  %v5001_v51 = vld [vmem:[#allocation2 + $0x20] sm:$0xf] }
 0x3d9   : > { %v4917_v62 = vor.u32 %v4915_v10, %v4914_v11  ;;  %v4918_v24 = vrot.slane %v4914_v11, 4  ;;  %v4784_v16 = vadd.f32 %v13661_v4, %v4719_v49  ;;  %v5004_v11 = vld [vmem:[#allocation2 + $0x24] sm:$0x1] }
 0x3da   : > { %v4920_v38 = vshrl.u32 %v13543_v31, 16  ;;  %v4866_v42 = vmax.f32 %v4844_v15, 0.0  ;;  %v13663_v36 = vpop.f32.mrf.mxu1  ;;  %v4923_v29 = vshll.u32 %v13543_v31, 16 }
 0x3db   : > { %v4990_v59 = vsel %vm15122_vm15, %v4917_v62, %v4989_v18  ;;  %v4993_v7 = vsel %vm14993_vm5, %v4918_v24, %v4992_v13  ;;  %v4849_v57 = vadd.f32 %v4848_v40, %v4784_v16  ;;  %v13664_v9 = vadd.f32 %v13663_v36, %v13662_v21 }
 0x3dc   : > { %4994 = vst [vmem:[#allocation2 + $0x14] sm:$0x1] %v4993_v7  ;;  %4991 = vst [vmem:[#allocation2 + $0x10] sm:$0xf] %v4990_v59  ;;  %v4922_v45 = vrot.slane %v4920_v38, 7  ;;  %v13544_v5 = vpack.c.bf16 %v4866_v42, %v4866_v42  ;;  %v13665_v25 = vpop.f32.mrf.mxu1 }
 0x3dd   : > { %v4867_v63 = vmax.f32 %v4849_v57, 0.0  ;;  %v4787_v43 = vadd.f32 %v13664_v9, %v4722_v37  ;;  %v5010_v57 = vld [vmem:[#allocation2 + $0x2c] sm:$0x1] }
 0x3de   : > { %v4925_v44 = vor.u32 %v4923_v29, %v4922_v45  ;;  %v4926_v32 = vrot.slane %v4922_v45, 4  ;;  %v4928_v60 = vshrl.u32 %v13544_v5, 16  ;;  %v13666_v46 = vpop.f32.mrf.mxu1  ;;  %v4931_v54 = vshll.u32 %v13544_v5, 16 }
 0x3df   : > { %v13545_v52 = vpack.c.bf16 %v4867_v63, %v4867_v63  ;;  %v4852_v40 = vadd.f32 %v4851_v27, %v4787_v43  ;;  %v13667_v49 = vadd.f32 %v13666_v46, %v13665_v25  ;;  %v14122_v50 = vld [vmem:[#allocation2 + $0x8] ss:$0 sps:$4 sm:$0xff]   ;;  %v16399_v48 = vld [vmem:[#allocation2 + $0xc] sm:$0x1]  ;;  %v5439_v20 = vld [vmem:[#allocation2 + $0x8] sm:$0xe] }
 0x3e0   : > { %v4996_v10 = vsel %vm15122_vm15, %v4925_v44, %v4995_v33  ;;  %v4999_v6 = vsel %vm14993_vm5, %v4926_v32, %v4998_v56  ;;  %v4930_v1 = vrot.slane %v4928_v60, 7  ;;  %v13668_v35 = vpop.f32.mrf.mxu1  ;;  %v5287_v16 = vrot.slane %v14122_v50, 7  ;;  %v16406_v47 = vld [vmem:[#allocation2 + $0x8] sm:$0xf]  ;;  %v5040_v29 = vld [vmem:[#allocation2 + $0xc] sm:$0x1] }
 0x3e1   : > { %5000 = vst [vmem:[#allocation2 + $0x1c] sm:$0x1] %v4999_v6  ;;  %4997 = vst [vmem:[#allocation2 + $0x18] sm:$0xf] %v4996_v10  ;;  %v4936_v4 = vshrl.u32 %v13545_v52, 16  ;;  %v4939_v31 = vshll.u32 %v13545_v52, 16  ;;  %v4792_v21 = vadd.f32 %v13667_v49, %v4727_v17  ;;  %v12801_v0 = vcombine.low %v5439_v20, %v16399_v48 }
 0x3e2   : > { %v4868_v15 = vmax.f32 %v4852_v40, 0.0  ;;  %v4933_v37 = vor.u32 %v4931_v54, %v4930_v1  ;;  %v4934_v62 = vrot.slane %v4930_v1, 4  ;;  %v13669_v24 = vpop.f32.mrf.mxu1  ;;  %5295 = vrot.lane.b32.xlu0 %v5287_v16, %s14845_s29  ;;  %v12746_v46 = vcombine.low %v16406_v47, %v5040_v29  ;;  %v5013_v40 = vld [vmem:[#allocation2 + $0x30] sm:$0xf]  ;;  %v5016_v49 = vld [vmem:[#allocation2 + $0x34] sm:$0x1] }
 0x3e3   : > { %v4938_v18 = vrot.slane %v4936_v4, 7  ;;  %v4857_v38 = vadd.f32 %v16372_v26, %v4792_v21  ;;  %v13670_v42 = vadd.f32 %v13669_v24, %v13668_v35  ;;  %v14123_v36 = vld [vmem:[#allocation2 + $0x10] ss:$0 sps:$4 sm:$0xff]   ;;  %v5512_v9 = vshrl.u32 %v12801_v0, 16  ;;  %v16414_v5 = vld [vmem:[#allocation2 + $0x14] sm:$0x1] }
 0x3e4   : > { %v13546_v13 = vpack.c.bf16 %v4868_v15, %v4868_v15  ;;  %v5002_v59 = vsel %vm15122_vm15, %v4933_v37, %v5001_v51  ;;  %v5005_v7 = vsel %vm14993_vm5, %v4934_v62, %v5004_v11  ;;  %v5514_v45 = vshll.u32 %v12801_v0, 16  ;;  %v5440_v14 = vld [vmem:[#allocation2 + $0x10] sm:$0xe]  ;;  %v5041_v54 = vld [vmem:[#allocation2 + $0x14] sm:$0x1]  ;;  %v14164_v4 = vld [vmem:[%s18746_s5 + $0x58] sm:$0xff]  }
 0x3e5   : > { %5006 = vst [vmem:[#allocation2 + $0x24] sm:$0x1] %v5005_v7  ;;  %5003 = vst [vmem:[#allocation2 + $0x20] sm:$0xf] %v5002_v59  ;;  %v4941_v25 = vor.u32 %v4939_v31, %v4938_v18  ;;  %v4942_v26 = vrot.slane %v4938_v18, 4  ;;  %v4869_v27 = vmax.f32 %v4857_v38, 0.0  ;;  %v4795_v17 = vadd.f32 %v13670_v42, %v4730_v30  ;;  %13687 = vmatprep.subr.bf16.mxu1 %v14164_v4 }
 0x3e6   : > { %v4944_v63 = vshrl.u32 %v13546_v13, 16  ;;  %v4947_v43 = vshll.u32 %v13546_v13, 16  ;;  %v5288_v44 = vrot.slane %v14123_v36, 7  ;;  %v5516_v32 = vrot.slane %v5514_v45, 1  ;;  %v16421_v52 = vld [vmem:[#allocation2 + $0x10] sm:$0xf] }
 0x3e7   : > { %v5008_v33 = vsel %vm15122_vm15, %v4941_v25, %v5007_v12  ;;  %v5011_v56 = vsel %vm14993_vm5, %v4942_v26, %v5010_v57  ;;  %v13547_v50 = vpack.c.bf16 %v4869_v27, %v4869_v27  ;;  %v4860_v30 = vadd.f32 %v16381_v22, %v4795_v17  ;;  %v5019_v36 = vld [vmem:[#allocation2 + $0x38] sm:$0xf]  ;;  %v5022_v59 = vld [vmem:[#allocation2 + $0x3c] sm:$0x1]  ;;  %v14167_v4 = vld [vmem:[%s18746_s5 + $0x50] sm:$0xff]  }
 0x3e8   : > { %v4946_v60 = vrot.slane %v4944_v63, 7  ;;  %5012 = vst [vmem:[#allocation2 + $0x2c] sm:$0x1] %v5011_v56  ;;  %5009 = vst [vmem:[#allocation2 + $0x28] sm:$0xf] %v5008_v33  ;;  %5297 = vrot.lane.b32.xlu1 %v5288_v44, %s14845_s29  ;;  %v5517_v10 = vor.u32 %v5516_v32, %v5512_v9  ;;  %v12802_v1 = vcombine.low %v5440_v14, %v16414_v5  ;;  %v5097_v51 = vshll.u32 %v12746_v46, 16 }
 0x3e9   : > { %v14126_v6 = vld [vmem:[#allocation2 + $0x18] ss:$0 sps:$4 sm:$0xff]   ;;  %v4952_v31 = vshrl.u32 %v13547_v50, 16  ;;  %v4870_v15 = vmax.f32 %v4860_v30, 0.0  ;;  %v5095_v22 = vshrl.u32 %v12746_v46, 16  ;;  %v4955_v16 = vshll.u32 %v13547_v50, 16 }
 0x3ea   : > { %v4949_v35 = vor.u32 %v4947_v43, %v4946_v60  ;;  %v4950_v20 = vrot.slane %v4946_v60, 4  ;;  %v16426_v11 = vld [vmem:[#allocation2 + $0x18] sm:$0xf]  ;;  %5567 = vrot.lane.b32.xlu0 %v5517_v10, %s14845_s29  ;;  %v5289_v21 = vrot.slane %v14126_v6, 7  ;;  %v5042_v37 = vld [vmem:[#allocation2 + $0x1c] sm:$0x1]  ;;  %v12747_v42 = vcombine.low %v16421_v52, %v5041_v54 }
 0x3eb   : > { %v5099_v0 = vrot.slane %v5097_v51, 1  ;;  %v4954_v18 = vrot.slane %v4952_v31, 7  ;;  %v13548_v13 = vpack.c.bf16 %v4870_v15, %v4870_v15  ;;  %v5521_v38 = vshll.u32 %v12802_v1, 16  ;;  %v14165_v63 = vld [vmem:[%s18746_s5 + $0x18] sm:$0xff]   ;;  %v5028_v56 = vld [vmem:[#allocation2 + $0x44] sm:$0x1] }
 0x3ec   : > { %v5014_v62 = vsel %vm15122_vm15, %v4949_v35, %v5013_v40  ;;  %v5017_v24 = vsel %vm14993_vm5, %v4950_v20, %v5016_v49  ;;  %v12748_v57 = vcombine.low %v16426_v11, %v5042_v37  ;;  %v16438_v9 = vld [vmem:[#allocation2 + $0x20] sm:$0xf]  ;;  %v5043_v26 = vld [vmem:[#allocation2 + $0x24] sm:$0x1]  ;;  %v5519_v14 = vshrl.u32 %v12802_v1, 16  ;;  %13688 = vmatpush3.bf16.msra.mxu1 %v14165_v63 }
 0x3ed   : > { %5018 = vst [vmem:[#allocation2 + $0x34] sm:$0x1] %v5017_v24  ;;  %5015 = vst [vmem:[#allocation2 + $0x30] sm:$0xf] %v5014_v62  ;;  %v5100_v7 = vor.u32 %v5099_v0, %v5095_v22  ;;  %v4957_v45 = vor.u32 %v4955_v16, %v4954_v18  ;;  %v4958_v29 = vrot.slane %v4954_v18, 4  ;;  %v4960_v25 = vshrl.u32 %v13548_v13, 16  ;;  %13689 = vmatprep.subr.bf16.mxu1 %v14167_v4 }
 0x3ee   : > { %5299 = vrot.lane.b32.xlu0 %v5289_v21, %s14845_s29  ;;  %v4963_v43 = vshll.u32 %v13548_v13, 16  ;;  %v5523_v12 = vrot.slane %v5521_v38, 1  ;;  %v5104_v27 = vshll.u32 %v12747_v42, 16  ;;  %v5102_v33 = vshrl.u32 %v12747_v42, 16  ;;  %v14129_v40 = vld [vmem:[#allocation2 + $0x20] ss:$0 sps:$4 sm:$0xff]  }
 0x3ef   : > { %5145 = vrot.lane.b32.xlu1 %v5100_v7, %s14845_s29  ;;  %v5020_v17 = vsel %vm15122_vm15, %v4957_v45, %v5019_v36  ;;  %v5023_v44 = vsel %vm14993_vm5, %v4958_v29, %v5022_v59  ;;  %v4962_v32 = vrot.slane %v4960_v25, 7  ;;  %v14130_v49 = vld [vmem:[#allocation2 + $0x28] ss:$0 sps:$4 sm:$0xff]   ;;  %v5111_v50 = vshll.u32 %v12748_v57, 16  ;;  %v5044_v54 = vld [vmem:[#allocation2 + $0x2c] sm:$0x1] }
 0x3f0   : > { %5024 = vst [vmem:[#allocation2 + $0x3c] sm:$0x1] %v5023_v44  ;;  %5021 = vst [vmem:[#allocation2 + $0x38] sm:$0xf] %v5020_v17  ;;  %v5524_v60 = vor.u32 %v5523_v12, %v5519_v14  ;;  %v5106_v46 = vrot.slane %v5104_v27, 1  ;;  %v12749_v30 = vcombine.low %v16438_v9, %v5043_v26  ;;  %v5290_v37 = vrot.slane %v14129_v40, 7 }
 0x3f1   : > { %v4965_v10 = vor.u32 %v4963_v43, %v4962_v32  ;;  %v4966_v6 = vrot.slane %v4962_v32, 4  ;;  %v16450_v1 = vld [vmem:[#allocation2 + $0x28] sm:$0xf]  ;;  %v5025_v35 = vld [vmem:[#allocation2 + $0x40] sm:$0xf]  ;;  %v5291_v62 = vrot.slane %v14130_v49, 7 }
 0x3f2   : > { %v5107_v20 = vor.u32 %v5106_v46, %v5102_v33  ;;  %v5118_v51 = vshll.u32 %v12749_v30, 16  ;;  %v16460_v22 = vld [vmem:[#allocation2 + $0x1c] sm:$0x1]  ;;  %v5441_v21 = vld [vmem:[#allocation2 + $0x18] sm:$0xe]  ;;  %v5113_v24 = vrot.slane %v5111_v50, 1  ;;  %v12750_v16 = vcombine.low %v16450_v1, %v5044_v54 }
 0x3f3   : > { %5569 = vrot.lane.b32.xlu1 %v5524_v60, %s14845_s29  ;;  %v5026_v31 = vsel %vm15122_vm15, %v4965_v10, %v5025_v35  ;;  %v5029_v15 = vsel %vm14993_vm5, %v4966_v6, %v5028_v56  ;;  %v14168_v0 = vld [vmem:[%s18746_s5 + $0x10] sm:$0xff]   ;;  %v5109_v18 = vshrl.u32 %v12748_v57, 16  ;;  %v16467_v13 = vld [vmem:[#allocation2 + $0x24] sm:$0x1]  ;;  %v16471_v42 = vcombine.low %v5441_v21, %v16460_v22  ;;  %v14170_v7 = vld [vmem:[%s18746_s5 + $0x48] sm:$0xff]  }
 0x3f4   : > { %5030 = vst [vmem:[#allocation2 + $0x44] sm:$0x1] %v5029_v15  ;;  %5027 = vst [vmem:[#allocation2 + $0x40] sm:$0xf] %v5026_v31  ;;  %5147 = vrot.lane.b32.xlu0 %v5107_v20, %s14845_s29  ;;  %v5120_v38 = vrot.slane %v5118_v51, 1  ;;  %13690 = vmatpush3.bf16.msra.mxu1 %v14168_v0  ;;  %v5116_v45 = vshrl.u32 %v12749_v30, 16 }
 0x3f5   : > { %v16473_v36 = vld [vmem:[#allocation2 + $0x30] sm:$0xf]  ;;  %v5045_v59 = vld [vmem:[#allocation2 + $0x34] sm:$0x1]  ;;  %v5442_v29 = vld [vmem:[#allocation2 + $0x20] sm:$0xe]  ;;  %v5114_v57 = vor.u32 %v5113_v24, %v5109_v18  ;;  %13691 = vmatprep.subr.bf16.mxu1 %v14170_v7 }
 0x3f6   : > { %v14133_v25 = vld [vmem:[#allocation2 + $0x30] ss:$0 sps:$4 sm:$0xff]   ;;  %v5125_v63 = vshll.u32 %v12750_v16, 16  ;;  %v14171_v43 = vld [vmem:[%s18746_s5 + $0x8] sm:$0xff]   ;;  %v16483_v14 = vcombine.low %v16473_v36, %v5045_v59  ;;  %v5783_v27 = vld [vmem:[#allocation2 + $0x14] sm:$0x1]  ;;  %v5121_v44 = vor.u32 %v5120_v38, %v5116_v45  ;;  %v16492_v33 = vcombine.low %v5442_v29, %v16467_v13 }
 0x3f7   : > { %5301 = vrot.lane.b32.xlu1 %v5290_v37, %s14845_s29  ;;  %v14134_v26 = vld [vmem:[#allocation2 + $0x38] ss:$0 sps:$4 sm:$0xff]   ;;  %v16485_v12 = vld [vmem:[#allocation2 + $0x10] sm:$0xf]  ;;  %v16487_v17 = vld [vmem:[#allocation2 + $0x2c] sm:$0x1]  ;;  %v5144_v37 = vpop.permute.xlu0 %5143 }
 0x3f8   : > { %5303 = vrot.lane.b32.xlu0 %v5291_v62, %s14845_s29  ;;  %v5528_v32 = vshll.u32 %v16471_v42, 16  ;;  %v5443_v56 = vld [vmem:[#allocation2 + $0x28] sm:$0xe]  ;;  %v16494_v60 = vld [vmem:[#allocation2 + $0x38] sm:$0xf]  ;;  %13692 = vmatpush3.bf16.msra.mxu1 %v14171_v43  ;;  %v14174_v46 = vld [vmem:[%s18746_s5 + $0x40] sm:$0xff]   ;;  %v16504_v6 = vcombine.low %v16485_v12, %v5783_v27  ;;  %v5161_v18 = vsel %vm2588_vm7, %v16334_v19, %v5144_v37 }
 0x3f9   : > { %v5046_v40 = vld [vmem:[#allocation2 + $0x3c] sm:$0x1]  ;;  %v14175_v49 = vld [vmem:[%s18746_s5] sm:$0xff]   ;;  %v5292_v50 = vrot.slane %v14133_v25, 7  ;;  %v5293_v30 = vrot.slane %v14134_v26, 7  ;;  %v5127_v10 = vrot.slane %v5125_v63, 1  ;;  %13693 = vmatprep.subr.bf16.mxu1 %v14174_v46  ;;  %v16511_v20 = vcombine.low %v5443_v56, %v16487_v17 }
 0x3fa   : > { %v14181_v54 = vld [vmem:[%s18746_s5 + $0xf8] sm:$0xff]   ;;  %v5132_v35 = vshll.u32 %v16483_v14, 16  ;;  %v5123_v4 = vshrl.u32 %v12750_v16, 16  ;;  %v5530_v31 = vrot.slane %v5528_v32, 1  ;;  %v5535_v15 = vshll.u32 %v16492_v33, 16 }
 0x3fb   : > { %5149 = vrot.lane.b32.xlu1 %v5114_v57, %s14845_s29  ;;  %v14182_v51 = vld [vmem:[%s18746_s5 + $0xb8] sm:$0xff]   ;;  %v16519_v21 = vcombine.low %v16494_v60, %v5046_v40  ;;  %v16521_v62 = vld [vmem:[#allocation2 + $0x20] sm:$0xf]  ;;  %13719 = vmatprep.subr.bf16.mxu0 %v14181_v54  ;;  %v5526_v38 = vshrl.u32 %v16471_v42, 16  ;;  %v5832_v7 = vshrl.u32 %v16504_v6, 16  ;;  %v5130_v29 = vshrl.u32 %v16483_v14, 16 }
 0x3fc   : > { %5151 = vrot.lane.b32.xlu0 %v5121_v44, %s14845_s29  ;;  %13694 = vmatpush3.bf16.msra.mxu1 %v14175_v49  ;;  %v16523_v24 = vld [vmem:[#allocation2 + $0x18] sm:$0xf]  ;;  %v5784_v0 = vld [vmem:[#allocation2 + $0x1c] sm:$0x1]  ;;  %v5128_v16 = vor.u32 %v5127_v10, %v5123_v4  ;;  %v14137_v59 = vld [vmem:[#allocation2 + $0x40] ss:$0 sps:$4 sm:$0xff]  }
 0x3fd   : > { %v5785_v45 = vld [vmem:[#allocation2 + $0x24] sm:$0x1]  ;;  %5191 = vst [vmem:[#allocation3] sm:$0xf] %v5161_v18  ;;  %13720 = vmatpush3.bf16.msra.mxu0 %v14182_v51  ;;  %v5134_v57 = vrot.slane %v5132_v35, 1  ;;  %v5834_v25 = vshll.u32 %v16504_v6, 16  ;;  %v5531_v42 = vor.u32 %v5530_v31, %v5526_v38  ;;  %v16540_v44 = vcombine.low %v16523_v24, %v5784_v0 }
 0x3fe   : > { %v5542_v26 = vshll.u32 %v16511_v20, 16  ;;  %v16533_v19 = vld [vmem:[#allocation2 + $0x3c] sm:$0x1]  ;;  %v16535_v63 = vld [vmem:[#allocation2 + $0x34] sm:$0x1]  ;;  %v5537_v43 = vrot.slane %v5535_v15, 1  ;;  %v16543_v56 = vcombine.low %v16521_v62, %v5785_v45 }
 0x3ff   : > { %5305 = vrot.lane.b32.xlu1 %v5292_v50, %s14845_s29  ;;  %v5139_v27 = vshll.u32 %v16519_v21, 16  ;;  %v5445_v32 = vld [vmem:[#allocation2 + $0x38] sm:$0xe]  ;;  %v5444_v14 = vld [vmem:[#allocation2 + $0x30] sm:$0xe]  ;;  %v5294_v49 = vrot.slane %v14137_v59, 7  ;;  %v5135_v4 = vor.u32 %v5134_v57, %v5130_v29 }
 0x400   : > { %5307 = vrot.lane.b32.xlu0 %v5293_v30, %s14845_s29  ;;  %v16545_v46 = vld [vmem:[#allocation2 + $0x30] sm:$0xf]  ;;  %v5787_v40 = vld [vmem:[#allocation2 + $0x34] sm:$0x1]  ;;  %v16548_v50 = vld [vmem:[#allocation2 + $0x28] sm:$0xf]  ;;  %v16557_v54 = vcombine.low %v5445_v32, %v16533_v19  ;;  %v16565_v37 = vcombine.low %v5444_v14, %v16535_v63 }
 0x401   : > { %v16550_v30 = vld [vmem:[#allocation2 + $0x48] sm:$0xf]  ;;  %v14184_v10 = vld [vmem:[%s18746_s5 + $0xf0] sm:$0xff]   ;;  %v5533_v6 = vshrl.u32 %v16492_v33, 16  ;;  %v5786_v35 = vld [vmem:[#allocation2 + $0x2c] sm:$0x1]  ;;  %v16575_v57 = vcombine.low %v16545_v46, %v5787_v40 }
 0x402   : > { %v14185_v51 = vld [vmem:[%s18746_s5 + $0xb0] sm:$0xff]   ;;  %v5836_v31 = vrot.slane %v5834_v25, 1  ;;  %v5841_v15 = vshll.u32 %v16540_v44, 16  ;;  %v5790_v0 = vld [vmem:[#allocation2 + $0x4c] sm:$0x1]  ;;  %13721 = vmatprep.subr.bf16.mxu0 %v14184_v10  ;;  %v5540_v18 = vshrl.u32 %v16511_v20, 16  ;;  %v16578_v25 = vcombine.low %v16548_v50, %v5786_v35 }
 0x403   : > { %5153 = vrot.lane.b32.xlu1 %v5128_v16, %s14845_s29  ;;  %v14189_v33 = vld [vmem:[%s18746_s5 + $0xe8] sm:$0xff]   ;;  %v5544_v16 = vrot.slane %v5542_v26, 1  ;;  %v5137_v38 = vshrl.u32 %v16519_v21, 16  ;;  %v5848_v59 = vshll.u32 %v16543_v56, 16  ;;  %13722 = vmatpush3.bf16.msra.mxu0 %v14185_v51  ;;  %v5538_v45 = vor.u32 %v5537_v43, %v5533_v6  ;;  %v5789_v32 = vld [vmem:[#allocation2 + $0x44] sm:$0x1] }
 0x404   : > { %5571 = vrot.lane.b32.xlu0 %v5531_v42, %s14845_s29  ;;  %v5141_v29 = vrot.slane %v5139_v27, 1  ;;  %v16580_v42 = vld [vmem:[#allocation2 + $0x40] sm:$0xf]  ;;  %13723 = vmatprep.subr.bf16.mxu0 %v14189_v33  ;;  %v14191_v20 = vld [vmem:[%s18746_s5 + $0xa8] sm:$0xff]   ;;  %v5556_v21 = vshll.u32 %v16557_v54, 16  ;;  %v16587_v26 = vcombine.low %v16550_v30, %v5790_v0  ;;  %v5837_v27 = vor.u32 %v5836_v31, %v5832_v7  ;;  %v14203_v7 = vld [vmem:[%s18746_s5 + $0x90] sm:$0xff]  }
 0x405   : > { %v14193_v43 = vld [vmem:[%s18746_s5 + $0xe0] sm:$0xff]   ;;  %v5843_v14 = vrot.slane %v5841_v15, 1  ;;  %v5549_v40 = vshll.u32 %v16565_v37, 16  ;;  %v5862_v6 = vshll.u32 %v16575_v57, 16  ;;  %v5855_v35 = vshll.u32 %v16578_v25, 16 }
 0x406   : > { %v5142_v10 = vor.u32 %v5141_v29, %v5137_v38  ;;  %v5446_v51 = vld [vmem:[#allocation2 + $0x40] sm:$0xe]  ;;  %v16601_v0 = vcombine.low %v16580_v42, %v5789_v32  ;;  %v5545_v31 = vor.u32 %v5544_v16, %v5540_v18  ;;  %v5850_v15 = vrot.slane %v5848_v59, 1 }
 0x407   : > { %5309 = vrot.lane.b32.xlu1 %v5294_v49, %s14845_s29  ;;  %v16594_v49 = vld [vmem:[#allocation2 + $0x44] sm:$0x1]  ;;  %13724 = vmatpush3.bf16.msra.mxu0 %v14191_v20  ;;  %v5839_v33 = vshrl.u32 %v16540_v44, 16  ;;  %v5554_v38 = vshrl.u32 %v16557_v54, 16  ;;  %v5558_v29 = vrot.slane %v5556_v21, 1  ;;  %v5547_v32 = vshrl.u32 %v16565_v37, 16 }
 0x408   : > { %5155 = vrot.lane.b32.xlu0 %v5135_v4, %s14845_s29  ;;  %13725 = vmatprep.subr.bf16.mxu0 %v14193_v43  ;;  %v5846_v4 = vshrl.u32 %v16543_v56, 16  ;;  %v16613_v56 = vld [vmem:[%s18746_s5 + $0x118] sm:$0xff]   ;;  %v5853_v18 = vshrl.u32 %v16578_v25, 16  ;;  %v16618_v16 = vcombine.low %v5446_v51, %v16594_v49  ;;  %v5551_v20 = vrot.slane %v5549_v40, 1  ;;  %v5943_v51 = vld [vmem:[#allocation2 + $0x10] sm:$0xe] }
 0x409   : > { %v16620_v44 = vld [vmem:[#allocation2 + $0x38] sm:$0xf]  ;;  %v5844_v59 = vor.u32 %v5843_v14, %v5839_v33  ;;  %v5864_v43 = vrot.slane %v5862_v6, 1  ;;  %v5788_v21 = vld [vmem:[#allocation2 + $0x3c] sm:$0x1]  ;;  %v5876_v25 = vshll.u32 %v16601_v0, 16  ;;  %13951 = vmatprep.subr.bf16.mxu1 %v16613_v56 }
 0x40a   : > { %v14199_v54 = vld [vmem:[%s18746_s5 + $0xd8] sm:$0xff]   ;;  %v5944_v14 = vld [vmem:[#allocation2 + $0x14] sm:$0x1]  ;;  %v5851_v40 = vor.u32 %v5850_v15, %v5846_v4  ;;  %v5947_v23 = vld [vmem:[#allocation2 + $0x20] sm:$0xe]  ;;  %v5552_v34 = vor.u32 %v5551_v20, %v5547_v32  ;;  %v16641_v4 = vcombine.low %v16620_v44, %v5788_v21  ;;  %v5559_v20 = vor.u32 %v5558_v29, %v5554_v38 }
 0x40b   : > { %5573 = vrot.lane.b32.xlu1 %v5538_v45, %s14845_s29  ;;  %v14194_v45 = vld [vmem:[%s18746_s5 + $0xa0] sm:$0xff]   ;;  %v14201_v37 = vld [vmem:[%s18746_s5 + $0x98] sm:$0xff]   ;;  %v5977_v33 = vrot.slane %v5944_v14, 5  ;;  %v5950_v14 = vld [vmem:[#allocation2 + $0x2c] sm:$0x1] }
 0x40c   : > { %5887 = vrot.lane.b32.xlu0 %v5837_v27, %s14845_s29  ;;  %v5857_v27 = vrot.slane %v5855_v35, 1  ;;  %13726 = vmatpush3.bf16.msra.mxu0 %v14194_v45  ;;  %v5945_v6 = vld [vmem:[#allocation2 + $0x18] sm:$0xe]  ;;  %v5946_v35 = vld [vmem:[#allocation2 + $0x1c] sm:$0x1]  ;;  %v5563_v45 = vshll.u32 %v16618_v16, 16 }
 0x40d   : > { %13727 = vmatprep.subr.bf16.mxu0 %v14199_v54  ;;  %v12834_v54 = vrot.slane %v5945_v6, 9  ;;  %v5981_v28 = vrot.slane %v5946_v35, 5  ;;  %v12835_v6 = vrot.slane %v5947_v23, 9  ;;  %v5951_v32 = vld [vmem:[#allocation2 + $0x30] sm:$0xe]  ;;  %v5989_v21 = vrot.slane %v5950_v14, 5 }
 0x40e   : > { %v5565_v38 = vrot.slane %v5563_v45, 1  ;;  %v5955_v45 = vld [vmem:[#allocation2 + $0x40] sm:$0xe]  ;;  %v5956_v14 = vld [vmem:[#allocation2 + $0x44] sm:$0x1] }
 0x40f   : > { %5157 = vrot.lane.b32.xlu1 %v5142_v10, %s14845_s29  ;;  %v14202_v10 = vld [vmem:[%s18746_s5 + $0xd0] sm:$0xff]   ;;  %v5982_v41 = vsel %vm16013_vm4, %v12834_v54, %v5981_v28  ;;  %v14207_v28 = vld [vmem:[%s18746_s5 + $0xc8] sm:$0xff]  }
 0x410   : > { %5575 = vrot.lane.b32.xlu0 %v5545_v31, %s14845_s29  ;;  %v12833_v31 = vrot.slane %v5943_v51, 9  ;;  %13728 = vmatpush3.bf16.msra.mxu0 %v14201_v37  ;;  %v5949_v51 = vld [vmem:[#allocation2 + $0x28] sm:$0xe]  ;;  %6016 = vst.msk [vmem:[#allocation3 + $0x24] sm:$0xf] %vm494_vm13, %v5982_v41  ;;  %v5869_v41 = vshll.u32 %v16641_v4, 16 }
 0x411   : > { %13729 = vmatprep.subr.bf16.mxu0 %v14202_v10  ;;  %v5952_v37 = vld [vmem:[#allocation2 + $0x34] sm:$0x1]  ;;  %v5860_v10 = vshrl.u32 %v16575_v57, 16  ;;  %v14208_v57 = vld [vmem:[%s18746_s5 + $0x88] sm:$0xff]  }
 0x412   : > { %v5978_v15 = vsel %vm16013_vm4, %v12833_v31, %v5977_v33  ;;  %v5953_v31 = vld [vmem:[#allocation2 + $0x38] sm:$0xe]  ;;  %v12837_v33 = vrot.slane %v5951_v32, 9  ;;  %v5993_v54 = vrot.slane %v5952_v37, 5  ;;  %v5871_v37 = vrot.slane %v5869_v41, 1 }
 0x413   : > { %5889 = vrot.lane.b32.xlu1 %v5844_v59, %s14845_s29  ;;  %v5948_v59 = vld [vmem:[#allocation2 + $0x24] sm:$0x1]  ;;  %6015 = vst.msk [vmem:[#allocation3 + $0x10] sm:$0xf] %vm494_vm13, %v5978_v15  ;;  %v12838_v15 = vrot.slane %v5953_v31, 9  ;;  %v5881_v31 = vshrl.u32 %v16587_v26, 16 }
 0x414   : > { %5891 = vrot.lane.b32.xlu0 %v5851_v40, %s14845_s29  ;;  %v5985_v35 = vrot.slane %v5948_v59, 5  ;;  %v12836_v40 = vrot.slane %v5949_v51, 9  ;;  %13730 = vmatpush3.bf16.msra.mxu0 %v14203_v7  ;;  %v5954_v59 = vld [vmem:[#allocation2 + $0x3c] sm:$0x1]  ;;  %v5865_v51 = vor.u32 %v5864_v43, %v5860_v10  ;;  %v5994_v7 = vsel %vm16013_vm4, %v12837_v33, %v5993_v54  ;;  %v7881_v54 = vld [vmem:[#allocation2 + $0x4c] sm:$0x1] }
 0x415   : > { %13731 = vmatprep.subr.bf16.mxu0 %v14207_v28  ;;  %6019 = vst.msk [vmem:[#allocation3 + $0x60] sm:$0xf] %vm494_vm13, %v5994_v7  ;;  %v12839_v43 = vrot.slane %v5955_v45, 9  ;;  %v18872_v10 = vshll.u32 %v16587_v26, 16  ;;  %v14159_v26 = vld [vmem:[#allocation2] sm:$0x1e]  }
 0x416   : > { %v5986_v23 = vsel %vm16013_vm4, %v12835_v6, %v5985_v35  ;;  %v5990_v29 = vsel %vm16013_vm4, %v12836_v40, %v5989_v21  ;;  %v5878_v6 = vrot.slane %v5876_v25, 1  ;;  %v5561_v35 = vshrl.u32 %v16618_v16, 16  ;;  %v14214_v25 = vld [vmem:[%s18746_s5 + $0x80] sm:$0xff]   ;;  %v5423_v7 = vld [vmem:[#allocation2 + $0x8] sm:$0xf] }
 0x417   : > { %5577 = vrot.lane.b32.xlu1 %v5552_v34, %s14845_s29  ;;  %v5858_v34 = vor.u32 %v5857_v27, %v5853_v18  ;;  %6017 = vst.msk [vmem:[#allocation3 + $0x38] sm:$0xf] %vm494_vm13, %v5986_v23  ;;  %v14212_v18 = vld [vmem:[%s18746_s5 + $0xc0] sm:$0xff]   ;;  %6018 = vst.msk [vmem:[#allocation3 + $0x4c] sm:$0xf] %vm494_vm13, %v5990_v29  ;;  %v5997_v27 = vrot.slane %v5954_v59, 5 }
 0x418   : > { %5579 = vrot.lane.b32.xlu0 %v5559_v20, %s14845_s29  ;;  %v6001_v40 = vrot.slane %v5956_v14, 5  ;;  %v5874_v20 = vshrl.u32 %v16601_v0, 16  ;;  %v5566_v21 = vor.u32 %v5565_v38, %v5561_v35  ;;  %13732 = vmatpush3.bf16.msra.mxu0 %v14208_v57  ;;  %v5867_v0 = vshrl.u32 %v16641_v4, 16  ;;  %v7880_v23 = vld [vmem:[#allocation2 + $0x48] sm:$0xe] }
 0x419   : > { %v5998_v32 = vsel %vm16013_vm4, %v12838_v15, %v5997_v27  ;;  %13733 = vmatprep.subr.bf16.mxu0 %v14212_v18  ;;  %v5885_v28 = vrot.slane %v18872_v10, 1  ;;  %v13005_v15 = vrot.slane %v7880_v23, 9  ;;  %v14163_v27 = vld [vmem:[#allocation2 + $0x8] sm:$0x1e]   ;;  %v12793_v35 = vcombine.low %v5423_v7, %v16399_v48 }
 0x41a   : > { %6020 = vst.msk [vmem:[#allocation3 + $0x74] sm:$0xf] %vm494_vm13, %v5998_v32  ;;  %v6002_v16 = vsel %vm16013_vm4, %v12839_v43, %v6001_v40  ;;  %v5879_v33 = vor.u32 %v5878_v6, %v5874_v20  ;;  %v5872_v38 = vor.u32 %v5871_v37, %v5867_v0  ;;  %v14166_v0 = vld [vmem:[#allocation2 + $0x10] sm:$0x1e]  }
 0x41b   : > { %5893 = vrot.lane.b32.xlu1 %v5858_v34, %s14845_s29  ;;  %6021 = vst.msk [vmem:[#allocation3 + $0x88] sm:$0xf] %vm494_vm13, %v6002_v16  ;;  %v7928_v34 = vrot.slane %v7881_v54, 5  ;;  %v5886_v41 = vor.u32 %v5885_v28, %v5881_v31 }
 0x41c   : > { %5895 = vrot.lane.b32.xlu0 %v5865_v51, %s14845_s29  ;;  %13734 = vmatpush3.bf16.msra.mxu0 %v14214_v25 }
 0x41d   : > { %v7929_v57 = vsel %vm16013_vm4, %v13005_v15, %v7928_v34  ;;  %v5425_v34 = vld [vmem:[#allocation2 + $0x10] sm:$0xf] }
 0x41e   : > { %v12794_v7 = vcombine.low %v5425_v34, %v16414_v5  ;;  %v14173_v5 = vld [vmem:[#allocation2 + $0x18] sm:$0x1e]  }
 0x41f   : > { %5581 = vrot.lane.b32.xlu1 %v5566_v21, %s14845_s29 }
 0x420   : > { %5899 = vrot.lane.b32.xlu0 %v5879_v33, %s14845_s29 }
 0x422   : > { %v16693_v29 = vld [vmem:[#allocation3 + $0x88] ss:$20 sps:$4 sm:$0xff]  }
 0x423   : > { %5897 = vrot.lane.b32.xlu1 %v5872_v38, %s14845_s29  ;;  %7945 = vst.msk [vmem:[#allocation3 + $0x9c] sm:$0xf] %vm494_vm13, %v7929_v57 }
 0x427   : > { %5901 = vrot.lane.b32.xlu1 %v5886_v41, %s14845_s29 }
 0x454   : > { %v5296_v4 = vpop.permute.xlu0 %5295 }
 0x455   : > { %v5313_v59 = vsel %vm2588_vm7, %v14159_v26, %v5296_v4 }
 0x456   : > { %v12769_v51 = vcombine.low %v5313_v59, %v5313_v59  ;;  %v12770_v18 = vcombine.high %v5313_v59, %v5313_v59 }
 0x458   : > { %v12785_v45 = vrot.slane %v12769_v51, 9  ;;  %v5377_v14 = vrot.slane %v12770_v18, 5 }
 0x45a   : > { %v5298_v6 = vpop.permute.xlu1 %5297  ;;  %v5378_v40 = vsel %vm16013_vm4, %v12785_v45, %v5377_v14 }
 0x45b   : > { %v5316_v43 = vsel %vm2588_vm7, %v14163_v27, %v5298_v6  ;;  %5415 = vst [vmem:[#allocation3 + $0x4] sm:$0xf] %v5378_v40 }
 0x45c   : > { %v5568_v32 = vpop.permute.xlu0 %5567  ;;  %v12771_v20 = vcombine.low %v5316_v43, %v5316_v43  ;;  %v12772_v21 = vcombine.high %v5316_v43, %v5316_v43 }
 0x45d   : > { %v5585_v37 = vsel %vm2588_vm7, %v12793_v35, %v5568_v32 }
 0x45e   : > { %v12809_v25 = vcombine.low %v5585_v37, %v5585_v37  ;;  %v12810_v16 = vcombine.high %v5585_v37, %v5585_v37  ;;  %v12786_v31 = vrot.slane %v12771_v20, 9  ;;  %v5381_v33 = vrot.slane %v12772_v21, 5 }
 0x460   : > { %v5648_v10 = vshrl.u32 %v12809_v25, 16  ;;  %v5651_v28 = vshll.u32 %v12809_v25, 16  ;;  %v5382_v48 = vsel %vm16013_vm4, %v12786_v31, %v5381_v33  ;;  %v5300_v23 = vpop.permute.xlu0 %5299  ;;  %v5657_v57 = vshll.u32 %v12810_v16, 16  ;;  %v14172_v31 = vld [vmem:[#allocation2 + $0x20] sm:$0x1e]  }
 0x461   : > { %5416 = vst [vmem:[#allocation3 + $0x18] sm:$0xf] %v5382_v48  ;;  %v5319_v54 = vsel %vm2588_vm7, %v14166_v0, %v5300_v23  ;;  %v5146_v15 = vpop.permute.xlu1 %5145 }
 0x462   : > { %v5650_v38 = vrot.slane %v5648_v10, 4  ;;  %v5653_v41 = vrot.slane %v5651_v28, 5  ;;  %v12773_v26 = vcombine.low %v5319_v54, %v5319_v54  ;;  %v12774_v4 = vcombine.high %v5319_v54, %v5319_v54 }
 0x463   : > { %v5165_v59 = vsel %vm2588_vm7, %v16406_v47, %v5146_v15  ;;  %v5659_v6 = vrot.slane %v5657_v57, 5 }
 0x464   : > { %v5654_v51 = vor.u32 %v5653_v41, %v5650_v38  ;;  %v12787_v18 = vrot.slane %v12773_v26, 9  ;;  %5192 = vst [vmem:[#allocation3 + $0x14] sm:$0xf] %v5165_v59  ;;  %v5385_v27 = vrot.slane %v12774_v4, 5 }
 0x465   : > { %v5570_v45 = vpop.permute.xlu1 %5569 }
 0x466   : > { %v5655_v14 = vrot.slane %v5654_v51, 4  ;;  %v5588_v35 = vsel %vm2588_vm7, %v12794_v7, %v5570_v45  ;;  %v5386_v43 = vsel %vm16013_vm4, %v12787_v18, %v5385_v27  ;;  %v5148_v40 = vpop.permute.xlu0 %5147 }
 0x467   : > { %v12811_v32 = vcombine.low %v5588_v35, %v5588_v35  ;;  %v12812_v20 = vcombine.high %v5588_v35, %v5588_v35  ;;  %5417 = vst [vmem:[#allocation3 + $0x2c] sm:$0xf] %v5386_v43  ;;  %v5169_v21 = vsel %vm2588_vm7, %v16421_v52, %v5148_v40  ;;  %v14204_v52 = vld [vmem:[%s18746_s5 + $0x110] sm:$0xff]   ;;  %v14180_v40 = vld [vmem:[#allocation2 + $0x28] sm:$0x1e]  }
 0x468   : > { %v5660_v47 = vsel %vm16280_vm2, %v5655_v14, %v5659_v6  ;;  %5193 = vst [vmem:[#allocation3 + $0x28] sm:$0xf] %v5169_v21  ;;  %v14176_v54 = vld [vmem:[#allocation3 + $0x4] ss:$20 sps:$4 sm:$0xff]  }
 0x469   : > { %5767 = vst [vmem:[#allocation3 + $0x8] sm:$0xf] %v5660_v47  ;;  %v5662_v37 = vshrl.u32 %v12811_v32, 16  ;;  %v5665_v25 = vshll.u32 %v12811_v32, 16  ;;  %v5302_v16 = vpop.permute.xlu1 %5301  ;;  %v5671_v28 = vshll.u32 %v12812_v20, 16  ;;  %6486 = vmatprep.mubr.bf16.mxu1 %v14176_v54 }
 0x46a   : > { %v5322_v33 = vsel %vm2588_vm7, %v14173_v5, %v5302_v16  ;;  %v5304_v48 = vpop.permute.xlu0 %5303  ;;  %v14179_v47 = vld [vmem:[#allocation2 + $0x30] sm:$0x1e]  }
 0x46b   : > { %v5664_v0 = vrot.slane %v5662_v37, 4  ;;  %v5667_v10 = vrot.slane %v5665_v25, 5  ;;  %v12775_v23 = vcombine.low %v5322_v33, %v5322_v33  ;;  %v5325_v15 = vsel %vm2588_vm7, %v14172_v31, %v5304_v48  ;;  %v14178_v38 = vld [vmem:[#allocation3] ss:$20 sps:$4 sm:$0xff]   ;;  %v5427_v25 = vld [vmem:[#allocation2 + $0x18] sm:$0xf] }
 0x46c   : > { %v12776_v34 = vcombine.high %v5322_v33, %v5322_v33  ;;  %v12777_v57 = vcombine.low %v5325_v15, %v5325_v15  ;;  %v12778_v26 = vcombine.high %v5325_v15, %v5325_v15  ;;  %6487 = vmatmul.mubr.bf16.vlgmr.msra.gmra.mxu1 %v14178_v38  ;;  %v5673_v27 = vrot.slane %v5671_v28, 5  ;;  %v14219_v31 = vld [vmem:[%s18746_s5 + $0x100] sm:$0xff]  }
 0x46d   : > { %v5668_v41 = vor.u32 %v5667_v10, %v5664_v0  ;;  %v12788_v4 = vrot.slane %v12775_v23, 9  ;;  %v5150_v59 = vpop.permute.xlu1 %5149  ;;  %13952 = vmatpush3.bf16.msra.mxu1 %v16613_v56  ;;  %v12795_v23 = vcombine.low %v5427_v25, %v16460_v22 }
 0x46e   : > { %v5389_v51 = vrot.slane %v12776_v34, 5  ;;  %v5173_v18 = vsel %vm2588_vm7, %v16426_v11, %v5150_v59  ;;  %v12789_v45 = vrot.slane %v12777_v57, 9  ;;  %v5393_v14 = vrot.slane %v12778_v26, 5  ;;  %v5152_v6 = vpop.permute.xlu0 %5151  ;;  %13953 = vmatprep.subr.bf16.mxu1 %v14204_v52  ;;  %v14213_v11 = vld [vmem:[%s18746_s5 + $0x108] sm:$0xff]  }
 0x46f   : > { %v5669_v7 = vrot.slane %v5668_v41, 4  ;;  %5194 = vst [vmem:[#allocation3 + $0x3c] sm:$0xf] %v5173_v18  ;;  %v5177_v43 = vsel %vm2588_vm7, %v16438_v9, %v5152_v6  ;;  %v14186_v41 = vld [vmem:[#allocation2 + $0x38] sm:$0x1e]  }
 0x470   : > { %v5390_v35 = vsel %vm16013_vm4, %v12788_v4, %v5389_v51  ;;  %v5394_v20 = vsel %vm16013_vm4, %v12789_v45, %v5393_v14  ;;  %5195 = vst [vmem:[#allocation3 + $0x50] sm:$0xf] %v5177_v43  ;;  %v5429_v18 = vld [vmem:[#allocation2 + $0x20] sm:$0xf] }
 0x471   : > { %v5674_v32 = vsel %vm16280_vm2, %v5669_v7, %v5673_v27  ;;  %5418 = vst [vmem:[#allocation3 + $0x40] sm:$0xf] %v5390_v35  ;;  %v5306_v56 = vpop.permute.xlu1 %5305  ;;  %5419 = vst [vmem:[#allocation3 + $0x54] sm:$0xf] %v5394_v20  ;;  %13954 = vmatpush3.bf16.msra.mxu1 %v14204_v52 }
 0x472   : > { %5768 = vst [vmem:[#allocation3 + $0x1c] sm:$0xf] %v5674_v32  ;;  %v5328_v9 = vsel %vm2588_vm7, %v14180_v40, %v5306_v56  ;;  %v5308_v21 = vpop.permute.xlu0 %5307  ;;  %13955 = vmatprep.subr.bf16.mxu1 %v14213_v11  ;;  %v12796_v40 = vcombine.low %v5429_v18, %v16467_v13 }
 0x473   : > { %v12779_v5 = vcombine.low %v5328_v9, %v5328_v9  ;;  %v12780_v37 = vcombine.high %v5328_v9, %v5328_v9  ;;  %v5331_v16 = vsel %vm2588_vm7, %v14179_v47, %v5308_v21 }
 0x474   : > { %v12781_v33 = vcombine.low %v5331_v16, %v5331_v16  ;;  %v12782_v0 = vcombine.high %v5331_v16, %v5331_v16 }
 0x475   : > { %v12790_v10 = vrot.slane %v12779_v5, 9  ;;  %v5397_v28 = vrot.slane %v12780_v37, 5  ;;  %v5154_v48 = vpop.permute.xlu1 %5153  ;;  %13956 = vmatpush3.bf16.msra.mxu1 %v14213_v11  ;;  %v5431_v5 = vld [vmem:[#allocation2 + $0x28] sm:$0xf] }
 0x476   : > { %v5181_v54 = vsel %vm2588_vm7, %v16450_v1, %v5154_v48  ;;  %v12791_v15 = vrot.slane %v12781_v33, 9  ;;  %v5401_v34 = vrot.slane %v12782_v0, 5  ;;  %v5572_v52 = vpop.permute.xlu0 %5571  ;;  %v14190_v4 = vld [vmem:[#allocation3 + $0x28] ss:$20 sps:$4 sm:$0xff]   ;;  %13957 = vmatprep.subr.bf16.mxu1 %v14219_v31 }
 0x477   : > { %v5398_v38 = vsel %vm16013_vm4, %v12790_v10, %v5397_v28  ;;  %5196 = vst [vmem:[#allocation3 + $0x64] sm:$0xf] %v5181_v54  ;;  %v5591_v57 = vsel %vm2588_vm7, %v12795_v23, %v5572_v52 }
 0x478   : > { %5420 = vst [vmem:[#allocation3 + $0x68] sm:$0xf] %v5398_v38  ;;  %v14187_v26 = vld [vmem:[#allocation3 + $0x2c] ss:$20 sps:$4 sm:$0xff]   ;;  %v5402_v22 = vsel %vm16013_vm4, %v12791_v15, %v5401_v34  ;;  %v12813_v59 = vcombine.low %v5591_v57, %v5591_v57  ;;  %v12814_v1 = vcombine.high %v5591_v57, %v5591_v57  ;;  %v12797_v15 = vcombine.low %v5431_v5, %v16487_v17 }
 0x479   : > { %v5310_v51 = vpop.permute.xlu1 %5309  ;;  %5421 = vst [vmem:[#allocation3 + $0x7c] sm:$0xf] %v5402_v22  ;;  %6494 = vmatprep.mubr.bf16.mxu1 %v14187_v26  ;;  %13958 = vmatpush3.bf16.msra.mxu1 %v14219_v31  ;;  %v5433_v17 = vld [vmem:[#allocation2 + $0x30] sm:$0xf] }
 0x47a   : > { %v5334_v7 = vsel %vm2588_vm7, %v14186_v41, %v5310_v51  ;;  %v5676_v27 = vshrl.u32 %v12813_v59, 16  ;;  %v5679_v45 = vshll.u32 %v12813_v59, 16  ;;  %v5156_v14 = vpop.permute.xlu0 %5155  ;;  %6495 = vmatmul.mubr.bf16.gmra.mxu1 %v14190_v4  ;;  %v5685_v20 = vshll.u32 %v12814_v1, 16 }
 0x47b   : > { %v12783_v6 = vcombine.low %v5334_v7, %v5334_v7  ;;  %v5185_v35 = vsel %vm2588_vm7, %v16473_v36, %v5156_v14  ;;  %v12784_v43 = vcombine.high %v5334_v7, %v5334_v7  ;;  %v5435_v14 = vld [vmem:[#allocation2 + $0x38] sm:$0xf] }
 0x47c   : > { %v5678_v11 = vrot.slane %v5676_v27, 4  ;;  %v5681_v32 = vrot.slane %v5679_v45, 5  ;;  %5197 = vst [vmem:[#allocation3 + $0x78] sm:$0xf] %v5185_v35  ;;  %v5687_v28 = vrot.slane %v5685_v20, 5  ;;  %v12799_v20 = vcombine.low %v5435_v14, %v16533_v19 }
 0x47d   : > { %v12792_v56 = vrot.slane %v12783_v6, 9  ;;  %v5574_v47 = vpop.permute.xlu1 %5573  ;;  %v5405_v9 = vrot.slane %v12784_v43, 5  ;;  %v12798_v43 = vcombine.low %v5433_v17, %v16535_v63  ;;  %v14221_v14 = vld [vmem:[#allocation3 + $0x60] ss:$20 sps:$4 sm:$0xff]  }
 0x47e   : > { %v5594_v21 = vsel %vm2588_vm7, %v12796_v40, %v5574_v47  ;;  %v5682_v37 = vor.u32 %v5681_v32, %v5678_v11  ;;  %v5888_v25 = vpop.permute.xlu0 %5887  ;;  %v14200_v36 = vld [vmem:[#allocation3 + $0x50] ss:$20 sps:$4 sm:$0xff]  }
 0x47f   : > { %v12815_v16 = vcombine.low %v5594_v21, %v5594_v21  ;;  %v12816_v33 = vcombine.high %v5594_v21, %v5594_v21  ;;  %v14197_v0 = vld [vmem:[#allocation3 + $0x54] ss:$20 sps:$4 sm:$0xff]   ;;  %v5406_v13 = vsel %vm16013_vm4, %v12792_v56, %v5405_v9  ;;  %v5905_v31 = vsel %vm2588_vm7, %v16485_v12, %v5888_v25 }
 0x480   : > { %v5683_v10 = vrot.slane %v5682_v37, 4  ;;  %5422 = vst [vmem:[#allocation3 + $0x90] sm:$0xf] %v5406_v13  ;;  %5935 = vst [vmem:[#allocation3 + $0xc] sm:$0xf] %v5905_v31  ;;  %6502 = vmatprep.mubr.bf16.mxu1 %v14197_v0 }
 0x481   : > { %v5690_v48 = vshrl.u32 %v12815_v16, 16  ;;  %v5693_v23 = vshll.u32 %v12815_v16, 16  ;;  %v5158_v54 = vpop.permute.xlu1 %5157  ;;  %v5699_v57 = vshll.u32 %v12816_v33, 16  ;;  %v14215_v16 = vld [vmem:[#allocation3 + $0x10] ss:$20 sps:$4 sm:$0xff]  }
 0x482   : > { %v5189_v34 = vsel %vm2588_vm7, %v16494_v60, %v5158_v54  ;;  %v5688_v38 = vsel %vm16280_vm2, %v5683_v10, %v5687_v28  ;;  %v5576_v12 = vpop.permute.xlu0 %5575  ;;  %6503 = vmatmul.mubr.bf16.gmra.mxu1 %v14200_v36  ;;  %v5437_v33 = vld [vmem:[#allocation2 + $0x40] sm:$0xf] }
 0x483   : > { %v5692_v52 = vrot.slane %v5690_v48, 4  ;;  %v5695_v41 = vrot.slane %v5693_v23, 5  ;;  %5198 = vst [vmem:[#allocation3 + $0x8c] sm:$0xf] %v5189_v34  ;;  %5769 = vst [vmem:[#allocation3 + $0x30] sm:$0xf] %v5688_v38  ;;  %v5597_v26 = vsel %vm2588_vm7, %v12797_v15, %v5576_v12  ;;  %v12800_v38 = vcombine.low %v5437_v33, %v16594_v49 }
 0x484   : > { %v12817_v22 = vcombine.low %v5597_v26, %v5597_v26  ;;  %v12818_v59 = vcombine.high %v5597_v26, %v5597_v26  ;;  %v5701_v18 = vrot.slane %v5699_v57, 5 }
 0x485   : > { %v5696_v4 = vor.u32 %v5695_v41, %v5692_v52  ;;  %v5890_v1 = vpop.permute.xlu1 %5889  ;;  %v14218_v52 = vld [vmem:[#allocation3 + $0x8] ss:$20 sps:$4 sm:$0xff]  }
 0x486   : > { %v5909_v60 = vsel %vm2588_vm7, %v16523_v24, %v5890_v1  ;;  %v5704_v7 = vshrl.u32 %v12817_v22, 16  ;;  %v5707_v27 = vshll.u32 %v12817_v22, 16  ;;  %v5892_v45 = vpop.permute.xlu0 %5891  ;;  %v5713_v6 = vshll.u32 %v12818_v59, 16 }
 0x487   : > { %v5697_v51 = vrot.slane %v5696_v4, 4  ;;  %5936 = vst [vmem:[#allocation3 + $0x20] sm:$0xf] %v5909_v60  ;;  %v5913_v35 = vsel %vm2588_vm7, %v16521_v62, %v5892_v45  ;;  %v14209_v47 = vld [vmem:[#allocation3 + $0x7c] ss:$20 sps:$4 sm:$0xff]  }
 0x488   : > { %v5706_v11 = vrot.slane %v5704_v7, 4  ;;  %v5709_v32 = vrot.slane %v5707_v27, 5  ;;  %5937 = vst [vmem:[#allocation3 + $0x34] sm:$0xf] %v5913_v35  ;;  %v5715_v62 = vrot.slane %v5713_v6, 5  ;;  %6510 = vmatprep.mubr.bf16.mxu1 %v14209_v47 }
 0x489   : > { %v5702_v40 = vsel %vm16280_vm2, %v5697_v51, %v5701_v18  ;;  %v5578_v24 = vpop.permute.xlu1 %5577  ;;  %v14220_v7 = vld [vmem:[#allocation3 + $0x38] ss:$20 sps:$4 sm:$0xff]  }
 0x48a   : > { %5770 = vst [vmem:[#allocation3 + $0x44] sm:$0xf] %v5702_v40  ;;  %v5600_v56 = vsel %vm2588_vm7, %v12798_v43, %v5578_v24  ;;  %v14211_v9 = vld [vmem:[#allocation3 + $0x78] ss:$20 sps:$4 sm:$0xff]   ;;  %v5710_v21 = vor.u32 %v5709_v32, %v5706_v11  ;;  %v5580_v5 = vpop.permute.xlu0 %5579 }
 0x48b   : > { %v12819_v37 = vcombine.low %v5600_v56, %v5600_v56  ;;  %v5603_v63 = vsel %vm2588_vm7, %v12799_v20, %v5580_v5  ;;  %v12820_v25 = vcombine.high %v5600_v56, %v5600_v56  ;;  %6511 = vmatmul.mubr.bf16.gmra.mxu1 %v14211_v9 }
 0x48c   : > { %v5711_v0 = vrot.slane %v5710_v21, 4  ;;  %v12821_v36 = vcombine.low %v5603_v63, %v5603_v63  ;;  %v12822_v13 = vcombine.high %v5603_v63, %v5603_v63  ;;  %13959 = vmatprep.mubr.msk.bf16.mxu1 %vm2588_vm7, %v14215_v16 }
 0x48d   : > { %v5718_v31 = vshrl.u32 %v12819_v37, 16  ;;  %v5894_v10 = vpop.permute.xlu1 %5893  ;;  %v5721_v19 = vshll.u32 %v12819_v37, 16  ;;  %v5727_v12 = vshll.u32 %v12820_v25, 16 }
 0x48e   : > { %v5917_v28 = vsel %vm2588_vm7, %v16548_v50, %v5894_v10  ;;  %v14216_v48 = vld [vmem:[#allocation3 + $0xc] ss:$20 sps:$4 sm:$0xff]   ;;  %v5716_v23 = vsel %vm16280_vm2, %v5711_v0, %v5715_v62  ;;  %v5732_v54 = vshrl.u32 %v12821_v36, 16  ;;  %v5735_v15 = vshll.u32 %v12821_v36, 16  ;;  %v5896_v34 = vpop.permute.xlu0 %5895 }
 0x48f   : > { %5938 = vst [vmem:[#allocation3 + $0x48] sm:$0xf] %v5917_v28  ;;  %5771 = vst [vmem:[#allocation3 + $0x58] sm:$0xf] %v5716_v23  ;;  %v5720_v41 = vrot.slane %v5718_v31, 4  ;;  %v5723_v57 = vrot.slane %v5721_v19, 5  ;;  %v5921_v50 = vsel %vm2588_vm7, %v16545_v46, %v5896_v34  ;;  %6551 = vmatprep.mubr.bf16.mxu0 %v14216_v48 }
 0x490   : > { %v5734_v26 = vrot.slane %v5732_v54, 4  ;;  %v5737_v4 = vrot.slane %v5735_v15, 5  ;;  %v5741_v22 = vshll.u32 %v12822_v13, 16  ;;  %5939 = vst [vmem:[#allocation3 + $0x5c] sm:$0xf] %v5921_v50  ;;  %6552 = vmatmul.mubr.bf16.vlgmr.msra.gmra.mxu0 %v14218_v52  ;;  %v5729_v45 = vrot.slane %v5727_v12, 5 }
 0x491   : > { %v5582_v59 = vpop.permute.xlu1 %5581  ;;  %v5724_v1 = vor.u32 %v5723_v57, %v5720_v41  ;;  %v14224_v56 = vld [vmem:[#allocation3 + $0x30] ss:$20 sps:$4 sm:$0xff]   ;;  %v14265_v52 = vld [vmem:[%s18748_s7 + $0x38] sm:$0xff]  }
 0x492   : > { %v5606_v17 = vsel %vm2588_vm7, %v12800_v38, %v5582_v59  ;;  %v5738_v60 = vor.u32 %v5737_v4, %v5734_v26  ;;  %v5900_v49 = vpop.permute.xlu0 %5899  ;;  %v5743_v35 = vrot.slane %v5741_v22, 5  ;;  %v16798_v13 = vld [vmem:[#allocation2] sm:$0xf]  ;;  %v14264_v38 = vld [vmem:[%s18748_s7 + $0x78] sm:$0xff]   ;;  %v6714_v22 = vsel %vm6713_vm0, %v15053_v8, %v15045_v2 }
 0x493   : > { %v12823_v51 = vcombine.low %v5606_v17, %v5606_v17  ;;  %v12824_v18 = vcombine.high %v5606_v17, %v5606_v17  ;;  %v5725_v27 = vrot.slane %v5724_v1, 4  ;;  %v5929_v46 = vsel %vm2588_vm7, %v16580_v42, %v5900_v49  ;;  %13960 = vmatmul.mubr.msk.bf16.vlgmr.msra.gmra.mxu1 %vm2588_vm7, %v14220_v7  ;;  %13767 = vmatprep.subr.bf16.mxu0 %v14264_v38 }
 0x494   : > { %v5739_v6 = vrot.slane %v5738_v60, 4  ;;  %5941 = vst [vmem:[#allocation3 + $0x84] sm:$0xf] %v5929_v46  ;;  %13963 = vmatprep.mubr.msk.bf16.mxu1 %vm2588_vm7, %v14221_v14  ;;  %13768 = vmatpush3.bf16.msra.mxu0 %v14265_v52  ;;  %v6715_v59 = vsel %vm589_vm8, %v15047_v3, %v6714_v22  ;;  %v6721_v1 = vsel %vm6713_vm0, %v15150_v53, %v15147_v61  ;;  %v18873_v60 = vld [vmem:[#allocation22_spill] sm:$0xff]  ;;  %v18876_v3 = vld [vmem:[#allocation23_spill] sm:$0xff]  ;;  %v18878_v14 = vld [vmem:[#allocation17_spill] sm:$0xff] }
 0x495   : > { %v5746_v43 = vshrl.u32 %v12823_v51, 16  ;;  %v5749_v40 = vshll.u32 %v12823_v51, 16  ;;  %v5898_v11 = vpop.permute.xlu1 %5897  ;;  %v5730_v32 = vsel %vm16280_vm2, %v5725_v27, %v5729_v45  ;;  %v5755_v21 = vshll.u32 %v12824_v18, 16  ;;  %v18874_v18 = vld [vmem:[#allocation10_spill] sm:$0xff]  ;;  %v18875_v27 = vld [vmem:[#allocation16_spill] sm:$0xff]  ;;  %v18877_v53 = vld [vmem:[#allocation11_spill] sm:$0xff] }
 0x496   : > { %v5925_v24 = vsel %vm2588_vm7, %v16620_v44, %v5898_v11  ;;  %v14222_v20 = vld [vmem:[#allocation3 + $0x34] ss:$20 sps:$4 sm:$0xff]   ;;  %v5744_v42 = vsel %vm16280_vm2, %v5739_v6, %v5743_v35  ;;  %5772 = vst [vmem:[#allocation3 + $0x6c] sm:$0xf] %v5730_v32  ;;  %v6729_v49 = vsel %vm589_vm8, %v18873_v60, %v15291_v58  ;;  %v6716_v7 = vsel %vm3103_vm9, %v18874_v18, %v6715_v59  ;;  %v18879_v6 = vld [vmem:[#allocation30_spill] sm:$0xff] }
 0x497   : > { %v5748_v47 = vrot.slane %v5746_v43, 4  ;;  %v5751_v9 = vrot.slane %v5749_v40, 5  ;;  %5940 = vst [vmem:[#allocation3 + $0x70] sm:$0xf] %v5925_v24  ;;  %5773 = vst [vmem:[#allocation3 + $0x80] sm:$0xf] %v5744_v42  ;;  %6559 = vmatprep.mubr.bf16.mxu0 %v14222_v20  ;;  %v6722_v2 = vsel %vm589_vm8, %v18875_v27, %v6721_v1  ;;  %v6730_v45 = vsel %vm3103_vm9, %v18876_v3, %v6729_v49 }
 0x498   : > { %6560 = vmatmul.mubr.bf16.gmra.mxu0 %v14224_v56  ;;  %v5757_v63 = vrot.slane %v5755_v21, 5  ;;  %v6717_v46 = vsel %vm3105_vm10, %v18877_v53, %v6716_v7  ;;  %v6723_v58 = vsel %vm3103_vm9, %v18878_v14, %v6722_v2  ;;  %v18880_v35 = vld [vmem:[#allocation28_spill] sm:$0xff]  ;;  %v18881_v24 = vld [vmem:[#allocation37_spill] sm:$0xff]  ;;  %v18882_v20 = vld [vmem:[#allocation35_spill] sm:$0xff] }
 0x499   : > { %v5752_v5 = vor.u32 %v5751_v9, %v5748_v47  ;;  %v5902_v37 = vpop.permute.xlu1 %5901  ;;  %v6736_v43 = vsel %vm589_vm8, %v18880_v35, %v18879_v6  ;;  %v16851_v40 = vld [vmem:[%s18747_s6] ss:$0 sm:$0xff]  ;;  %v6743_v56 = vsel %vm589_vm8, %v18882_v20, %v18881_v24  ;;  %v18890_v22 = vld [vmem:[#allocation19_spill] sm:$0xff]  ;;  %v18894_v18 = vld [vmem:[#allocation42_spill] sm:$0xff] }
 0x49a   : > { %v5933_v44 = vsel %vm2588_vm7, %v16550_v30, %v5902_v37  ;;  %v6962_v30 = vld [vmem:[#allocation2 + $0x4] sm:$0x1]  ;;  %v18883_v9 = vld [vmem:[#allocation12_spill] sm:$0xff]  ;;  %v18891_v1 = vld [vmem:[#allocation31_spill] sm:$0xff] }
 0x49b   : > { %v5753_v62 = vrot.slane %v5752_v5, 4  ;;  %5942 = vst [vmem:[#allocation3 + $0x98] sm:$0xf] %v5933_v44  ;;  %13964 = vmatmul.mubr.msk.bf16.gmra.mxu1 %vm2588_vm7, %v16693_v29  ;;  %v12910_v31 = vcombine.low %v16798_v13, %v6962_v30  ;;  %v6718_v21 = vsel %vm3107_vm11, %v18883_v9, %v6717_v46  ;;  %v18884_v5 = vld [vmem:[#allocation24_spill] sm:$0xff]  ;;  %v18885_v44 = vld [vmem:[#allocation18_spill] sm:$0xff] }
 0x49c   : > { %v6731_v37 = vsel %vm3105_vm10, %v18884_v5, %v6730_v45  ;;  %v18893_v49 = vld [vmem:[#allocation44_spill] sm:$0xff] }
 0x49d   : > { %v5758_v25 = vsel %vm16280_vm2, %v5753_v62, %v5757_v63  ;;  %v14228_v33 = vld [vmem:[#allocation3 + $0x58] ss:$20 sps:$4 sm:$0xff]   ;;  %v7011_v10 = vshrl.u32 %v12910_v31, 16  ;;  %v7013_v19 = vshll.u32 %v12910_v31, 16  ;;  %v6724_v62 = vsel %vm3105_vm10, %v18885_v44, %v6723_v58 }
 0x49e   : > { %5774 = vst [vmem:[#allocation3 + $0x94] sm:$0xf] %v5758_v25  ;;  %v14226_v16 = vld [vmem:[#allocation3 + $0x5c] ss:$20 sps:$4 sm:$0xff]   ;;  %v6725_v59 = vsel %vm3107_vm11, %v18890_v22, %v6724_v62  ;;  %v6750_v7 = vsel %vm589_vm8, %v18894_v18, %v18893_v49 }
 0x49f   : > { %6567 = vmatprep.mubr.bf16.mxu0 %v14226_v16  ;;  %v7015_v28 = vrot.slane %v7013_v19, 1  ;;  %v18886_v63 = vld [vmem:[#allocation29_spill] sm:$0xff]  ;;  %v18896_v35 = vld [vmem:[#allocation20_spill] sm:$0xff] }
 0x4a0   : > { %6568 = vmatmul.mubr.bf16.gmra.mxu0 %v14228_v33  ;;  %v6737_v25 = vsel %vm3103_vm9, %v18886_v63, %v6736_v43  ;;  %v6726_v43 = vsel %vm3109_vm12, %v18896_v35, %v6725_v59 }
 0x4a1   : > { %v7016_v48 = vor.u32 %v7015_v28, %v7011_v10  ;;  %v18888_v28 = vld [vmem:[#allocation13_spill] sm:$0xff] }
 0x4a2   : > { %v14229_v0 = vld [vmem:[#allocation3 + $0x84] ss:$20 sps:$4 sm:$0xff]  }
 0x4a3   : > { %6575 = vmatprep.mubr.bf16.mxu0 %v14229_v0  ;;  %7066 = vrot.lane.b32.xlu0 %v7016_v48, %s14845_s29  ;;  %v6719_v48 = vsel %vm3109_vm12, %v18888_v28, %v6718_v21  ;;  %v18900_v21 = vld [vmem:[#allocation43_spill] sm:$0xff] }
 0x4a4   : > { %v6751_v5 = vsel %vm3103_vm9, %v18900_v21, %v6750_v7  ;;  %v18908_v7 = vld [vmem:[#allocation50_spill] sm:$0xff] }
 0x4a5   : > { %v14231_v36 = vld [vmem:[#allocation3 + $0x80] ss:$20 sps:$4 sm:$0xff]  }
 0x4a8   : > { %6576 = vmatmul.mubr.bf16.gmra.mxu0 %v14231_v36  ;;  %v18887_v36 = vld [vmem:[#allocation36_spill] sm:$0xff] }
 0x4a9   : > { %v6744_v30 = vsel %vm3103_vm9, %v18887_v36, %v6743_v56  ;;  %v18898_v56 = vld [vmem:[#allocation26_spill] sm:$0xff]  ;;  %v18902_v36 = vld [vmem:[#allocation33_spill] sm:$0xff] }
 0x52c   : > { %v13695_v29 = vpop.f32.mrf.mxu1 }
 0x52e   : > { %v13696_v23 = vpop.f32.mrf.mxu1 }
 0x52f   : > { %v13697_v61 = vadd.f32 %v13696_v23, %v13695_v29  ;;  %v18889_v29 = vld [vmem:[#allocation25_spill] sm:$0xff] }
 0x530   : > { %v13698_v54 = vpop.f32.mrf.mxu1  ;;  %v6732_v23 = vsel %vm3107_vm11, %v18889_v29, %v6731_v37 }
 0x531   : > { %v6489_v16 = vadd.f32 %v13697_v61, %v16851_v40  ;;  %v18895_v61 = vld [vmem:[#allocation14_spill] sm:$0xff] }
 0x532   : > { %v13699_v15 = vpop.f32.mrf.mxu1  ;;  %v6720_v53 = vsel %vm3111_vm14, %v18895_v61, %v6719_v48  ;;  %v18910_v61 = vld [vmem:[#allocation46_spill] sm:$0xff] }
 0x533   : > { %v13700_v33 = vadd.f32 %v13699_v15, %v13698_v54  ;;  %v6738_v54 = vsel %vm3105_vm10, %v18891_v1, %v6737_v25  ;;  %v18892_v15 = vld [vmem:[#allocation38_spill] sm:$0xff]  ;;  %v18907_v1 = vld [vmem:[#allocation40_spill] sm:$0xff] }
 0x534   : > { %v6745_v60 = vsel %vm3105_vm10, %v18892_v15, %v6744_v30 }
 0x535   : > { %v6492_v27 = vadd.f32 %v13700_v33, %v16851_v40 }
 0x53a   : > { %v13701_v34 = vpop.f32.mrf.mxu1 }
 0x53c   : > { %v13702_v41 = vpop.f32.mrf.mxu1 }
 0x53d   : > { %v13703_v2 = vadd.f32 %v13702_v41, %v13701_v34  ;;  %v18899_v41 = vld [vmem:[#allocation39_spill] sm:$0xff] }
 0x53e   : > { %v16808_v57 = vpop.f32.mrf.mxu1  ;;  %v6746_v9 = vsel %vm3107_vm11, %v18899_v41, %v6745_v60 }
 0x53f   : > { %v6497_v37 = vadd.f32 %v13703_v2, %v16851_v40 }
 0x540   : > { %v16810_v12 = vpop.f32.mrf.mxu1 }
 0x541   : > { %v13706_v25 = vadd.f32 %v16810_v12, %v16808_v57  ;;  %v18906_v12 = vld [vmem:[#allocation27_spill] sm:$0xff] }
 0x542   : > { %v16812_v50 = vpop.f32.mrf.mxu1 }
 0x543   : > { %v6500_v2 = vadd.f32 %v13706_v25, %v16851_v40 }
 0x544   : > { %v16814_v26 = vpop.f32.mrf.mxu1 }
 0x545   : > { %v13709_v57 = vadd.f32 %v16814_v26, %v16812_v50 }
 0x546   : > { %v16816_v4 = vpop.f32.mrf.mxu1 }
 0x547   : > { %v6505_v35 = vadd.f32 %v13709_v57, %v16851_v40 }
 0x548   : > { %v16826_v17 = vpop.f32.mrf.mxu1 }
 0x54b   : > { %v16831_v51 = vpop.f32.mrf.mxu1 }
 0x54d   : > { %v16837_v8 = vpop.f32.mrf.mxu1 }
 0x54f   : > { %v16853_v11 = vpop.f32.mrf.mxu1 }
 0x550   : > { %v13735_v32 = vpop.f32.mrf.mxu0 }
 0x551   : > { %v16858_v42 = vpop.f32.mrf.mxu1 }
 0x552   : > { %v13736_v47 = vpop.f32.mrf.mxu0 }
 0x553   : > { %v13737_v0 = vadd.f32 %v13736_v47, %v13735_v32  ;;  %v13961_v10 = vpop.f32.mrf.mxu1  ;;  %v18897_v32 = vld [vmem:[#allocation32_spill] sm:$0xff]  ;;  %v6733_v47 = vsel %vm3109_vm12, %v18898_v56, %v6732_v23 }
 0x554   : > { %v13738_v31 = vpop.f32.mrf.mxu0  ;;  %v6739_v24 = vsel %vm3107_vm11, %v18897_v32, %v6738_v54  ;;  %v6734_v22 = vsel %vm3111_vm14, %v18906_v12, %v6733_v47  ;;  %v6747_v54 = vsel %vm3109_vm12, %v18907_v1, %v6746_v9  ;;  %v18912_v56 = vld [vmem:[#allocation52_spill] sm:$0xff] }
 0x555   : > { %v6554_v19 = vadd.f32 %v13737_v0, %v6489_v16  ;;  %v6618_v52 = vpop.f32.mrf.mxu1  ;;  %v18901_v16 = vld [vmem:[#allocation21_spill] sm:$0xff]  ;;  %v6740_v30 = vsel %vm3109_vm12, %v18902_v36, %v6739_v24 }
 0x556   : > { %v13739_v38 = vpop.f32.mrf.mxu0  ;;  %v6727_v33 = vsel %vm3111_vm14, %v18901_v16, %v6726_v43  ;;  %v18911_v24 = vld [vmem:[#allocation41_spill] sm:$0xff] }
 0x557   : > { %v13740_v3 = vadd.f32 %v13739_v38, %v13738_v31  ;;  %v6619_v45 = vadd.f32 %v6618_v52, %v6554_v19  ;;  %v13962_v14 = vpop.f32.mrf.mxu1  ;;  %v18903_v31 = vld [vmem:[#allocation51_spill] sm:$0xff]  ;;  %v18904_v19 = vld [vmem:[#allocation49_spill] sm:$0xff] }
 0x558   : > { %v13741_v46 = vpop.f32.mrf.mxu0  ;;  %v6757_v28 = vsel %vm589_vm8, %v18904_v19, %v18903_v31  ;;  %v18905_v38 = vld [vmem:[#allocation45_spill] sm:$0xff] }
 0x559   : > { %v6778_v58 = vadd.f32 %v6720_v53, %v6619_v45  ;;  %v6557_v6 = vadd.f32 %v13740_v3, %v6492_v27  ;;  %v6621_v34 = vpop.f32.mrf.mxu1  ;;  %v6752_v52 = vsel %vm3105_vm10, %v18905_v38, %v6751_v5  ;;  %v6758_v27 = vsel %vm3103_vm9, %v18908_v7, %v6757_v28  ;;  %v18909_v45 = vld [vmem:[#allocation34_spill] sm:$0xff] }
 0x55a   : > { %v13742_v20 = vpop.f32.mrf.mxu0  ;;  %v6741_v50 = vsel %vm3111_vm14, %v18909_v45, %v6740_v30  ;;  %v6753_v53 = vsel %vm3107_vm11, %v18910_v61, %v6752_v52  ;;  %v6759_v47 = vsel %vm3105_vm10, %v18912_v56, %v6758_v27  ;;  %v14274_v30 = vld [vmem:[%s18748_s7 + $0x60] sm:$0xff]  }
 0x55b   : > { %v6786_v44 = vmax.f32 %v6778_v58, 0.0  ;;  %v13743_v62 = vadd.f32 %v13742_v20, %v13741_v46  ;;  %v6622_v63 = vadd.f32 %v6621_v34, %v6557_v6  ;;  %v16915_v18 = vpop.f32.mrf.mxu1  ;;  %v6748_v20 = vsel %vm3111_vm14, %v18911_v24, %v6747_v54  ;;  %v6912_v54 = vld [vmem:[#allocation2 + $0x10] sm:$0xf] }
 0x55c   : > { %v13744_v0 = vpop.f32.mrf.mxu0 }
 0x55d   : > { %v13549_v48 = vpack.c.bf16 %v6786_v44, %v6786_v44  ;;  %v6562_v29 = vadd.f32 %v13743_v62, %v6497_v37  ;;  %v6779_v23 = vadd.f32 %v6727_v33, %v6622_v63  ;;  %v6634_v5 = vpop.f32.mrf.mxu1  ;;  %v13712_v37 = vadd.f32 %v16826_v17, %v16816_v4  ;;  %v6906_v44 = vld [vmem:[#allocation2 + $0x8] sm:$0xf]  ;;  %v6909_v62 = vld [vmem:[#allocation2 + $0xc] sm:$0x1] }
 0x55e   : > { %v13745_v59 = vpop.f32.mrf.mxu0 }
 0x55f   : > { %v6827_v15 = vshrl.u32 %v13549_v48, 16  ;;  %v6627_v60 = vadd.f32 %v13961_v10, %v6562_v29  ;;  %v6787_v49 = vmax.f32 %v6779_v23, 0.0  ;;  %v13746_v3 = vadd.f32 %v13745_v59, %v13744_v0  ;;  %v18915_v23 = vld [vmem:[#allocation47_spill] sm:$0xff]  ;;  %v16939_v12 = vpop.f32.mrf.mxu1 }
 0x560   : > { %v13747_v26 = vpop.f32.mrf.mxu0  ;;  %v6830_v58 = vshll.u32 %v13549_v48, 16  ;;  %v13715_v48 = vadd.f32 %v16837_v8, %v16831_v51  ;;  %v6508_v1 = vadd.f32 %v13712_v37, %v16851_v40  ;;  %v6915_v51 = vld [vmem:[#allocation2 + $0x14] sm:$0x1] }
 0x561   : > { %v6829_v46 = vrot.slane %v6827_v15, 7  ;;  %v6780_v6 = vadd.f32 %v6734_v22, %v6627_v60  ;;  %v13550_v10 = vpack.c.bf16 %v6787_v49, %v6787_v49  ;;  %v6565_v43 = vadd.f32 %v13746_v3, %v6500_v2  ;;  %v18916_v22 = vld [vmem:[#allocation53_spill] sm:$0xff] }
 0x562   : > { %v13748_v32 = vpop.f32.mrf.mxu0  ;;  %v6760_v59 = vsel %vm3107_vm11, %v18916_v22, %v6759_v47  ;;  %v6513_v45 = vadd.f32 %v13715_v48, %v16851_v40  ;;  %v6927_v48 = vld [vmem:[#allocation2 + $0x24] sm:$0x1] }
 0x563   : > { %v6832_v34 = vor.u32 %v6830_v58, %v6829_v46  ;;  %v6833_v41 = vrot.slane %v6829_v46, 4  ;;  %v6788_v9 = vmax.f32 %v6780_v6, 0.0  ;;  %v6835_v21 = vshrl.u32 %v13550_v10, 16 }
 0x564   : > { %v6838_v63 = vshll.u32 %v13550_v10, 16  ;;  %v6630_v25 = vadd.f32 %v13962_v14, %v6565_v43  ;;  %v13749_v16 = vadd.f32 %v13748_v32, %v13747_v26  ;;  %v13750_v33 = vpop.f32.mrf.mxu0  ;;  %v6754_v14 = vsel %vm3109_vm12, %v18915_v23, %v6753_v53  ;;  %v6637_v10 = vpop.f32.mrf.mxu1  ;;  %v6918_v43 = vld [vmem:[#allocation2 + $0x18] sm:$0xf]  ;;  %v6921_v32 = vld [vmem:[#allocation2 + $0x1c] sm:$0x1] }
 0x565   : > { %v6907_v36 = vsel %vm15122_vm15, %v6832_v34, %v6906_v44  ;;  %v6910_v31 = vsel %vm14993_vm5, %v6833_v41, %v6909_v62  ;;  %v13551_v19 = vpack.c.bf16 %v6788_v9, %v6788_v9  ;;  %v6837_v28 = vrot.slane %v6835_v21, 7  ;;  %v18917_v34 = vld [vmem:[#allocation48_spill] sm:$0xff] }
 0x566   : > { %6908 = vst [vmem:[#allocation2 + $0x8] sm:$0xf] %v6907_v36  ;;  %6911 = vst [vmem:[#allocation2 + $0xc] sm:$0x1] %v6910_v31  ;;  %v6781_v4 = vadd.f32 %v6741_v50, %v6630_v25  ;;  %v6570_v17 = vadd.f32 %v13749_v16, %v6505_v35  ;;  %v13751_v29 = vpop.f32.mrf.mxu0  ;;  %v13718_v46 = vadd.f32 %v16858_v42, %v16853_v11  ;;  %v18918_v42 = vld [vmem:[#allocation54_spill] sm:$0xff] }
 0x567   : > { %v6843_v38 = vshrl.u32 %v13551_v19, 16  ;;  %v6840_v52 = vor.u32 %v6838_v63, %v6837_v28  ;;  %v6841_v57 = vrot.slane %v6837_v28, 4  ;;  %v13752_v60 = vadd.f32 %v13751_v29, %v13750_v33  ;;  %v6924_v33 = vld [vmem:[#allocation2 + $0x20] sm:$0xf] }
 0x568   : > { %v6789_v8 = vmax.f32 %v6781_v4, 0.0  ;;  %v6635_v15 = vadd.f32 %v6634_v5, %v6570_v17  ;;  %v13753_v49 = vpop.f32.mrf.mxu0  ;;  %v6846_v27 = vshll.u32 %v13551_v19, 16  ;;  %v6755_v41 = vsel %vm3111_vm14, %v18917_v34, %v6754_v14  ;;  %v18919_v17 = vld [vmem:[#allocation55_spill] sm:$0xff] }
 0x569   : > { %v6845_v7 = vrot.slane %v6843_v38, 7  ;;  %v6913_v2 = vsel %vm15122_vm15, %v6840_v52, %v6912_v54  ;;  %v6916_v3 = vsel %vm14993_vm5, %v6841_v57, %v6915_v51  ;;  %v6573_v61 = vadd.f32 %v13752_v60, %v6508_v1 }
 0x56a   : > { %6914 = vst [vmem:[#allocation2 + $0x10] sm:$0xf] %v6913_v2  ;;  %6917 = vst [vmem:[#allocation2 + $0x14] sm:$0x1] %v6916_v3  ;;  %v13552_v50 = vpack.c.bf16 %v6789_v8, %v6789_v8  ;;  %v6782_v26 = vadd.f32 %v6748_v20, %v6635_v15  ;;  %v13754_v53 = vpop.f32.mrf.mxu0  ;;  %v6761_v5 = vsel %vm3109_vm12, %v18918_v42, %v6760_v59  ;;  %v18920_v3 = vld [vmem:[#allocation56_spill] sm:$0xff] }
 0x56b   : > { %v6848_v58 = vor.u32 %v6846_v27, %v6845_v7  ;;  %v6849_v6 = vrot.slane %v6845_v7, 4  ;;  %v13755_v35 = vadd.f32 %v13754_v53, %v13753_v49  ;;  %v6638_v47 = vadd.f32 %v6637_v10, %v6573_v61  ;;  %v6930_v49 = vld [vmem:[#allocation2 + $0x28] sm:$0xf]  ;;  %v6933_v7 = vld [vmem:[#allocation2 + $0x2c] sm:$0x1] }
 0x56c   : > { %v6851_v24 = vshrl.u32 %v13552_v50, 16  ;;  %v6790_v56 = vmax.f32 %v6782_v26, 0.0  ;;  %v13756_v9 = vpop.f32.mrf.mxu0  ;;  %v6854_v44 = vshll.u32 %v13552_v50, 16  ;;  %v6516_v16 = vadd.f32 %v13718_v46, %v16851_v40 }
 0x56d   : > { %v6919_v20 = vsel %vm15122_vm15, %v6848_v58, %v6918_v43  ;;  %v6922_v21 = vsel %vm14993_vm5, %v6849_v6, %v6921_v32  ;;  %v6578_v11 = vadd.f32 %v13755_v35, %v6513_v45  ;;  %v6783_v63 = vadd.f32 %v6755_v41, %v6638_v47  ;;  %v16963_v52 = vld [vmem:[#allocation2 + $0x8] ss:$0 sps:$4 sm:$0xff]   ;;  %v16970_v51 = vld [vmem:[#allocation2 + $0xc] sm:$0x1]  ;;  %v7362_v8 = vld [vmem:[#allocation2 + $0x8] sm:$0xe] }
 0x56e   : > { %6920 = vst [vmem:[#allocation2 + $0x18] sm:$0xf] %v6919_v20  ;;  %6923 = vst [vmem:[#allocation2 + $0x1c] sm:$0x1] %v6922_v21  ;;  %v6853_v37 = vrot.slane %v6851_v24, 7  ;;  %v13553_v62 = vpack.c.bf16 %v6790_v56, %v6790_v56  ;;  %v13757_v25 = vpop.f32.mrf.mxu0  ;;  %v6762_v29 = vsel %vm3111_vm14, %v18919_v17, %v6761_v5  ;;  %v7210_v26 = vrot.slane %v16963_v52, 7 }
 0x56f   : > { %v6643_v36 = vadd.f32 %v16915_v18, %v6578_v11  ;;  %v13758_v31 = vadd.f32 %v13757_v25, %v13756_v9  ;;  %v6791_v23 = vmax.f32 %v6783_v63, 0.0  ;;  %v16983_v6 = vcombine.low %v7362_v8, %v16970_v51  ;;  %v6936_v56 = vld [vmem:[#allocation2 + $0x30] sm:$0xf]  ;;  %v6939_v47 = vld [vmem:[#allocation2 + $0x34] sm:$0x1] }
 0x570   : > { %v6856_v19 = vor.u32 %v6854_v44, %v6853_v37  ;;  %v6857_v28 = vrot.slane %v6853_v37, 4  ;;  %v6859_v4 = vshrl.u32 %v13553_v62, 16  ;;  %v6862_v22 = vshll.u32 %v13553_v62, 16  ;;  %v16987_v21 = vld [vmem:[#allocation2 + $0x8] sm:$0xf] }
 0x571   : > { %v6784_v14 = vadd.f32 %v6762_v29, %v6643_v36  ;;  %v6581_v38 = vadd.f32 %v13758_v31, %v6516_v16  ;;  %v13554_v59 = vpack.c.bf16 %v6791_v23, %v6791_v23  ;;  %v6963_v11 = vld [vmem:[#allocation2 + $0xc] sm:$0x1]  ;;  %v6942_v62 = vld [vmem:[#allocation2 + $0x38] sm:$0xf]  ;;  %v6945_v63 = vld [vmem:[#allocation2 + $0x3c] sm:$0x1] }
 0x572   : > { %v6925_v57 = vsel %vm15122_vm15, %v6856_v19, %v6924_v33  ;;  %v6928_v40 = vsel %vm14993_vm5, %v6857_v28, %v6927_v48  ;;  %v6861_v18 = vrot.slane %v6859_v4, 7  ;;  %v7437_v33 = vshll.u32 %v16983_v6, 16  ;;  %v16991_v36 = vld [vmem:[#allocation2 + $0x10] sm:$0xf] }
 0x573   : > { %6926 = vst [vmem:[#allocation2 + $0x20] sm:$0xf] %v6925_v57  ;;  %6929 = vst [vmem:[#allocation2 + $0x24] sm:$0x1] %v6928_v40  ;;  %v6792_v1 = vmax.f32 %v6784_v14, 0.0  ;;  %v6646_v54 = vadd.f32 %v16939_v12, %v6581_v38  ;;  %v6867_v27 = vshrl.u32 %v13554_v59, 16  ;;  %v17003_v52 = vcombine.low %v16987_v21, %v6963_v11 }
 0x574   : > { %v6864_v15 = vor.u32 %v6862_v22, %v6861_v18  ;;  %v6865_v60 = vrot.slane %v6861_v18, 4  ;;  %v6870_v35 = vshll.u32 %v13554_v59, 16  ;;  %v14267_v29 = vld [vmem:[%s18748_s7 + $0x70] sm:$0xff]  }
 0x575   : > { %v13555_v2 = vpack.c.bf16 %v6792_v1, %v6792_v1  ;;  %v6785_v45 = vadd.f32 %v18920_v3, %v6646_v54  ;;  %v14233_v50 = vld [vmem:[#allocation2 + $0x18] ss:$0 sps:$4 sm:$0xff]   ;;  %v16978_v53 = vld [vmem:[#allocation2 + $0x1c] sm:$0x1]  ;;  %v7364_v46 = vld [vmem:[#allocation2 + $0x18] sm:$0xe]  ;;  %13769 = vmatprep.subr.bf16.mxu0 %v14267_v29 }
 0x576   : > { %v6931_v61 = vsel %vm15122_vm15, %v6864_v15, %v6930_v49  ;;  %v6934_v12 = vsel %vm14993_vm5, %v6865_v60, %v6933_v7  ;;  %v16980_v58 = vld [vmem:[#allocation2 + $0x18] sm:$0xf]  ;;  %v6869_v10 = vrot.slane %v6867_v27, 7  ;;  %v6965_v24 = vld [vmem:[#allocation2 + $0x1c] sm:$0x1]  ;;  %v7212_v41 = vrot.slane %v14233_v50, 7 }
 0x577   : > { %6932 = vst [vmem:[#allocation2 + $0x28] sm:$0xf] %v6931_v61  ;;  %6935 = vst [vmem:[#allocation2 + $0x2c] sm:$0x1] %v6934_v12  ;;  %v6875_v43 = vshrl.u32 %v13555_v2, 16  ;;  %v6793_v32 = vmax.f32 %v6785_v45, 0.0  ;;  %v12968_v9 = vcombine.low %v7364_v46, %v16978_v53  ;;  %v12913_v20 = vcombine.low %v16980_v58, %v6965_v24 }
 0x578   : > { %v6878_v34 = vshll.u32 %v13555_v2, 16  ;;  %v6872_v42 = vor.u32 %v6870_v35, %v6869_v10  ;;  %v6873_v5 = vrot.slane %v6869_v10, 4  ;;  %7222 = vrot.lane.b32.xlu0 %v7212_v41, %s14845_s29  ;;  %v6964_v57 = vld [vmem:[#allocation2 + $0x14] sm:$0x1]  ;;  %v7439_v27 = vrot.slane %v7437_v33, 1 }
 0x579   : > { %v6877_v37 = vrot.slane %v6875_v43, 7  ;;  %v13556_v44 = vpack.c.bf16 %v6793_v32, %v6793_v32  ;;  %v7451_v16 = vshll.u32 %v12968_v9, 16  ;;  %v7449_v22 = vshrl.u32 %v12968_v9, 16  ;;  %v14268_v3 = vld [vmem:[%s18748_s7 + $0x30] sm:$0xff]   ;;  %v6948_v61 = vld [vmem:[#allocation2 + $0x40] sm:$0xf] }
 0x57a   : > { %v14234_v25 = vld [vmem:[#allocation2 + $0x20] ss:$0 sps:$4 sm:$0xff]   ;;  %v6937_v31 = vsel %vm15122_vm15, %v6872_v42, %v6936_v56  ;;  %v6940_v19 = vsel %vm14993_vm5, %v6873_v5, %v6939_v47  ;;  %v6966_v17 = vld [vmem:[#allocation2 + $0x24] sm:$0x1]  ;;  %v7034_v59 = vshll.u32 %v12913_v20, 16  ;;  %v7032_v49 = vshrl.u32 %v12913_v20, 16  ;;  %13770 = vmatpush3.bf16.msra.mxu0 %v14268_v3 }
 0x57b   : > { %v6880_v28 = vor.u32 %v6878_v34, %v6877_v37  ;;  %v6881_v48 = vrot.slane %v6877_v37, 4  ;;  %v16997_v4 = vld [vmem:[#allocation2 + $0x20] sm:$0xf]  ;;  %6938 = vst [vmem:[#allocation2 + $0x30] sm:$0xf] %v6937_v31  ;;  %v6883_v23 = vshrl.u32 %v13556_v44, 16  ;;  %v17015_v2 = vcombine.low %v16991_v36, %v6964_v57 }
 0x57c   : > { %6941 = vst [vmem:[#allocation2 + $0x34] sm:$0x1] %v6940_v19  ;;  %v7213_v14 = vrot.slane %v14234_v25, 7  ;;  %v7453_v38 = vrot.slane %v7451_v16, 1  ;;  %v17009_v1 = vld [vmem:[#allocation2 + $0x24] sm:$0x1]  ;;  %7218 = vrot.lane.b32.xlu0 %v7210_v26, %s14845_s29  ;;  %v12914_v15 = vcombine.low %v16997_v4, %v6966_v17 }
 0x57d   : > { %v6943_v40 = vsel %vm15122_vm15, %v6880_v28, %v6942_v62  ;;  %v6946_v18 = vsel %vm14993_vm5, %v6881_v48, %v6945_v63  ;;  %v6885_v54 = vrot.slane %v6883_v23, 7  ;;  %v6886_v8 = vshll.u32 %v13556_v44, 16  ;;  %v7365_v60 = vld [vmem:[#allocation2 + $0x20] sm:$0xe]  ;;  %v14271_v26 = vld [vmem:[%s18748_s7 + $0x68] sm:$0xff]   ;;  %v14278_v31 = vld [vmem:[%s18748_s7 + $0x58] sm:$0xff]  }
 0x57e   : > { %6944 = vst [vmem:[#allocation2 + $0x38] sm:$0xf] %v6943_v40  ;;  %6947 = vst [vmem:[#allocation2 + $0x3c] sm:$0x1] %v6946_v18  ;;  %7224 = vrot.lane.b32.xlu1 %v7213_v14, %s14845_s29  ;;  %v7036_v7 = vrot.slane %v7034_v59, 1  ;;  %v7454_v12 = vor.u32 %v7453_v38, %v7449_v22  ;;  %v7041_v46 = vshll.u32 %v12914_v15, 16  ;;  %v12969_v24 = vcombine.low %v7365_v60, %v17009_v1 }
 0x57f   : > { %v6888_v45 = vor.u32 %v6886_v8, %v6885_v54  ;;  %v6889_v50 = vrot.slane %v6885_v54, 4  ;;  %v6951_v10 = vld [vmem:[#allocation2 + $0x44] sm:$0x1]  ;;  %v14239_v43 = vld [vmem:[#allocation2 + $0x10] ss:$0 sps:$4 sm:$0xff]   ;;  %v7020_v32 = vshll.u32 %v17003_v52, 16  ;;  %13771 = vmatprep.subr.bf16.mxu0 %v14271_v26 }
 0x580   : > { %v7037_v35 = vor.u32 %v7036_v7, %v7032_v49  ;;  %v14272_v56 = vld [vmem:[%s18748_s7 + $0x28] sm:$0xff]   ;;  %7494 = vrot.lane.b32.xlu0 %v7454_v12, %s14845_s29  ;;  %v7435_v41 = vshrl.u32 %v16983_v6, 16  ;;  %v17034_v9 = vld [vmem:[#allocation2 + $0x14] sm:$0x1]  ;;  %v7363_v20 = vld [vmem:[#allocation2 + $0x10] sm:$0xe] }
 0x581   : > { %v6949_v47 = vsel %vm15122_vm15, %v6888_v45, %v6948_v61  ;;  %v6952_v34 = vsel %vm14993_vm5, %v6889_v50, %v6951_v10  ;;  %v7043_v42 = vrot.slane %v7041_v46, 1  ;;  %v7027_v0 = vshll.u32 %v17015_v2, 16  ;;  %13772 = vmatpush3.bf16.msra.mxu0 %v14272_v56  ;;  %v14275_v63 = vld [vmem:[%s18748_s7 + $0x20] sm:$0xff]   ;;  %v17048_v16 = vld [vmem:[#allocation2 + $0x10] sm:$0xf]  ;;  %v14280_v8 = vld [vmem:[%s18748_s7 + $0xf8] sm:$0xff]   ;;  %v7067_v61 = vpop.permute.xlu0 %7066 }
 0x582   : > { %6950 = vst [vmem:[#allocation2 + $0x40] sm:$0xf] %v6949_v47  ;;  %6953 = vst [vmem:[#allocation2 + $0x44] sm:$0x1] %v6952_v34  ;;  %7072 = vrot.lane.b32.xlu1 %v7037_v35, %s14845_s29  ;;  %v7440_v11 = vor.u32 %v7439_v27, %v7435_v41  ;;  %v7211_v5 = vrot.slane %v14239_v43, 7  ;;  %v7022_v37 = vrot.slane %v7020_v32, 1  ;;  %v12967_v6 = vcombine.low %v7363_v20, %v17034_v9 }
 0x583   : > { %v7458_v44 = vshll.u32 %v12969_v24, 16  ;;  %v7039_v62 = vshrl.u32 %v12914_v15, 16  ;;  %13773 = vmatprep.subr.bf16.mxu0 %v14274_v30  ;;  %v7018_v25 = vshrl.u32 %v17003_v52, 16  ;;  %v7706_v33 = vld [vmem:[#allocation2 + $0x14] sm:$0x1]  ;;  %v7029_v28 = vrot.slane %v7027_v0, 1  ;;  %13807 = vmatprep.subr.bf16.mxu1 %v14280_v8 }
 0x584   : > { %7490 = vrot.lane.b32.xlu0 %v7440_v11, %s14845_s29  ;;  %v17053_v48 = vld [vmem:[#allocation2 + $0x18] sm:$0xf]  ;;  %v7707_v17 = vld [vmem:[#allocation2 + $0x1c] sm:$0x1]  ;;  %v7025_v23 = vshrl.u32 %v17015_v2, 16  ;;  %v7444_v38 = vshll.u32 %v12967_v6, 16  ;;  %v17061_v57 = vcombine.low %v17048_v16, %v7706_v33  ;;  %v7084_v35 = vsel %vm2588_vm7, %v16798_v13, %v7067_v61 }
 0x585   : > { %v7044_v19 = vor.u32 %v7043_v42, %v7039_v62  ;;  %v7023_v29 = vor.u32 %v7022_v37, %v7018_v25  ;;  %v7460_v14 = vrot.slane %v7458_v44, 1  ;;  %13774 = vmatpush3.bf16.msra.mxu0 %v14275_v63  ;;  %v14279_v52 = vld [vmem:[%s18748_s7 + $0x18] sm:$0xff]   ;;  %v17063_v40 = vld [vmem:[#allocation2 + $0x2c] sm:$0x1]  ;;  %v7366_v18 = vld [vmem:[#allocation2 + $0x28] sm:$0xe]  ;;  %v17067_v54 = vcombine.low %v17053_v48, %v7707_v17 }
 0x586   : > { %7220 = vrot.lane.b32.xlu1 %v7211_v5, %s14845_s29  ;;  %13775 = vmatprep.subr.bf16.mxu0 %v14278_v31  ;;  %v7456_v22 = vshrl.u32 %v12969_v24, 16  ;;  %v14245_v59 = vld [vmem:[#allocation2 + $0x28] ss:$0 sps:$4 sm:$0xff]   ;;  %v7030_v15 = vor.u32 %v7029_v28, %v7025_v23  ;;  %v6967_v49 = vld [vmem:[#allocation2 + $0x2c] sm:$0x1]  ;;  %v14281_v7 = vld [vmem:[%s18748_s7 + $0x50] sm:$0xff]   ;;  %v17080_v45 = vcombine.low %v7366_v18, %v17063_v40 }
 0x587   : > { %v17072_v60 = vld [vmem:[#allocation2 + $0x28] sm:$0xf]  ;;  %v7446_v2 = vrot.slane %v7444_v38, 1  ;;  %v17077_v3 = vld [vmem:[#allocation2 + $0x30] ss:$0 sps:$4 sm:$0xff]   ;;  %v7442_v12 = vshrl.u32 %v12967_v6, 16 }
 0x588   : > { %7074 = vrot.lane.b32.xlu0 %v7044_v19, %s14845_s29  ;;  %v7461_v27 = vor.u32 %v7460_v14, %v7456_v22  ;;  %v17082_v50 = vld [vmem:[#allocation2 + $0x20] sm:$0xf]  ;;  %v14247_v46 = vld [vmem:[#allocation2 + $0x38] ss:$0 sps:$4 sm:$0xff]   ;;  %v7757_v26 = vshll.u32 %v17061_v57, 16  ;;  %v7764_v43 = vshll.u32 %v17067_v54, 16  ;;  %v17091_v32 = vcombine.low %v17072_v60, %v6967_v49 }
 0x589   : > { %13776 = vmatpush3.bf16.msra.mxu0 %v14279_v52  ;;  %v7708_v10 = vld [vmem:[#allocation2 + $0x24] sm:$0x1]  ;;  %v17093_v24 = vld [vmem:[#allocation2 + $0x30] sm:$0xf]  ;;  %v6968_v56 = vld [vmem:[#allocation2 + $0x34] sm:$0x1]  ;;  %v7447_v13 = vor.u32 %v7446_v2, %v7442_v12 }
 0x58a   : > { %7068 = vrot.lane.b32.xlu1 %v7023_v29, %s14845_s29  ;;  %7114 = vst [vmem:[#allocation3] sm:$0xf] %v7084_v35  ;;  %13777 = vmatprep.subr.bf16.mxu0 %v14281_v7  ;;  %v14282_v47 = vld [vmem:[%s18748_s7 + $0xb8] sm:$0xff]   ;;  %v7214_v34 = vrot.slane %v14245_v59, 7  ;;  %v7755_v41 = vshrl.u32 %v17061_v57, 16  ;;  %v7215_v11 = vrot.slane %v17077_v3, 7  ;;  %v17102_v0 = vcombine.low %v17082_v50, %v7708_v10 }
 0x58b   : > { %v14246_v20 = vld [vmem:[#allocation2 + $0x40] ss:$0 sps:$4 sm:$0xff]   ;;  %v7465_v42 = vshll.u32 %v17080_v45, 16  ;;  %13808 = vmatpush3.bf16.msra.mxu1 %v14282_v47  ;;  %v14283_v30 = vld [vmem:[%s18748_s7 + $0x10] sm:$0xff]   ;;  %v7216_v5 = vrot.slane %v14247_v46, 7  ;;  %v7759_v37 = vrot.slane %v7757_v26, 1  ;;  %v17110_v6 = vcombine.low %v17093_v24, %v6968_v56 }
 0x58c   : > { %7070 = vrot.lane.b32.xlu0 %v7030_v15, %s14845_s29  ;;  %v7762_v44 = vshrl.u32 %v17067_v54, 16  ;;  %v7766_v62 = vrot.slane %v7764_v43, 1  ;;  %v7463_v63 = vshrl.u32 %v17080_v45, 16  ;;  %v7046_v25 = vshrl.u32 %v17091_v32, 16  ;;  %v14285_v31 = vld [vmem:[%s18748_s7 + $0xf0] sm:$0xff]   ;;  %v14286_v59 = vld [vmem:[%s18748_s7 + $0x48] sm:$0xff]  }
 0x58d   : > { %v7048_v33 = vshll.u32 %v17091_v32, 16  ;;  %13778 = vmatpush3.bf16.msra.mxu0 %v14283_v30  ;;  %v17119_v19 = vld [vmem:[#allocation2 + $0x38] sm:$0xf]  ;;  %v6969_v28 = vld [vmem:[#allocation2 + $0x3c] sm:$0x1]  ;;  %v7217_v23 = vrot.slane %v14246_v20, 7  ;;  %13809 = vmatprep.subr.bf16.mxu1 %v14285_v31  ;;  %v7760_v7 = vor.u32 %v7759_v37, %v7755_v41 }
 0x58e   : > { %7496 = vrot.lane.b32.xlu1 %v7461_v27, %s14845_s29  ;;  %v17121_v17 = vld [vmem:[#allocation2 + $0x3c] sm:$0x1]  ;;  %v7368_v29 = vld [vmem:[#allocation2 + $0x38] sm:$0xe]  ;;  %v7467_v14 = vrot.slane %v7465_v42, 1  ;;  %v7055_v18 = vshll.u32 %v17110_v6, 16  ;;  %13779 = vmatprep.subr.bf16.mxu0 %v14286_v59  ;;  %v17144_v45 = vcombine.low %v17119_v19, %v6969_v28  ;;  %v7767_v30 = vor.u32 %v7766_v62, %v7762_v44 }
 0x58f   : > { %v17123_v38 = vld [vmem:[#allocation2 + $0x34] sm:$0x1]  ;;  %v7367_v52 = vld [vmem:[#allocation2 + $0x30] sm:$0xe]  ;;  %v7771_v54 = vshll.u32 %v17102_v0, 16  ;;  %v7050_v27 = vrot.slane %v7048_v33, 1  ;;  %v17147_v61 = vcombine.low %v7368_v29, %v17121_v17 }
 0x590   : > { %7226 = vrot.lane.b32.xlu0 %v7214_v34, %s14845_s29  ;;  %v17125_v57 = vld [vmem:[#allocation2 + $0x30] sm:$0xf]  ;;  %v7710_v22 = vld [vmem:[#allocation2 + $0x34] sm:$0x1]  ;;  %v17134_v8 = vld [vmem:[#allocation2 + $0x28] sm:$0xf]  ;;  %v17156_v35 = vcombine.low %v7367_v52, %v17123_v38  ;;  %v7468_v20 = vor.u32 %v7467_v14, %v7463_v63 }
 0x591   : > { %v7709_v15 = vld [vmem:[#allocation2 + $0x2c] sm:$0x1]  ;;  %v14287_v49 = vld [vmem:[%s18748_s7 + $0xb0] sm:$0xff]   ;;  %v7053_v3 = vshrl.u32 %v17110_v6, 16  ;;  %v17149_v12 = vld [vmem:[#allocation2 + $0x40] sm:$0xf]  ;;  %v17159_v43 = vcombine.low %v17125_v57, %v7710_v22  ;;  %v7051_v14 = vor.u32 %v7050_v27, %v7046_v25 }
 0x592   : > { %7492 = vrot.lane.b32.xlu1 %v7447_v13, %s14845_s29  ;;  %v14288_v2 = vld [vmem:[%s18748_s7 + $0x8] sm:$0xff]   ;;  %v7712_v46 = vld [vmem:[#allocation2 + $0x44] sm:$0x1]  ;;  %13810 = vmatpush3.bf16.msra.mxu1 %v14287_v49  ;;  %v7057_v10 = vrot.slane %v7055_v18, 1  ;;  %v17162_v56 = vcombine.low %v17134_v8, %v7709_v15  ;;  %v7369_v42 = vld [vmem:[#allocation2 + $0x40] sm:$0xe] }
 0x593   : > { %v14291_v26 = vld [vmem:[%s18748_s7 + $0xe8] sm:$0xff]   ;;  %13780 = vmatpush3.bf16.msra.mxu0 %v14288_v2  ;;  %v14292_v47 = vld [vmem:[%s18748_s7 + $0x40] sm:$0xff]   ;;  %v7479_v37 = vshll.u32 %v17147_v61, 16  ;;  %v7472_v63 = vshll.u32 %v17156_v35, 16  ;;  %v7785_v33 = vshll.u32 %v17159_v43, 16  ;;  %v17189_v62 = vcombine.low %v17149_v12, %v7712_v46  ;;  %v14305_v31 = vld [vmem:[%s18748_s7 + $0xd8] sm:$0xff]  }
 0x594   : > { %7230 = vrot.lane.b32.xlu0 %v7216_v5, %s14845_s29  ;;  %v14293_v34 = vld [vmem:[%s18748_s7 + $0xa8] sm:$0xff]   ;;  %v14294_v41 = vld [vmem:[%s18748_s7] sm:$0xff]   ;;  %13811 = vmatprep.subr.bf16.mxu1 %v14291_v26  ;;  %v7062_v5 = vshll.u32 %v17144_v45, 16  ;;  %v7778_v44 = vshll.u32 %v17162_v56, 16  ;;  %v7769_v28 = vshrl.u32 %v17102_v0, 16  ;;  %v7058_v52 = vor.u32 %v7057_v10, %v7053_v3  ;;  %v14309_v2 = vld [vmem:[%s18748_s7 + $0xd0] sm:$0xff]  }
 0x595   : > { %v17174_v13 = vld [vmem:[#allocation2 + $0x44] sm:$0x1]  ;;  %13781 = vmatprep.subr.bf16.mxu0 %v14292_v47  ;;  %v7773_v18 = vrot.slane %v7771_v54, 1  ;;  %v7060_v22 = vshrl.u32 %v17144_v45, 16  ;;  %v7477_v15 = vshrl.u32 %v17147_v61, 16  ;;  %v7481_v0 = vrot.slane %v7479_v37, 1 }
 0x596   : > { %7232 = vrot.lane.b32.xlu1 %v7217_v23, %s14845_s29  ;;  %13812 = vmatpush3.bf16.msra.mxu1 %v14293_v34  ;;  %v14300_v6 = vld [vmem:[%s18748_s7 + $0xe0] sm:$0xff]   ;;  %v17197_v29 = vcombine.low %v7369_v42, %v17174_v13  ;;  %v17202_v23 = vld [vmem:[%s18748_s7 + $0x118] sm:$0xff]   ;;  %v7064_v59 = vrot.slane %v7062_v5, 1  ;;  %v7470_v49 = vshrl.u32 %v17156_v35, 16  ;;  %v7474_v32 = vrot.slane %v7472_v63, 1  ;;  %v14311_v45 = vld [vmem:[%s18748_s7 + $0x90] sm:$0xff]  }
 0x597   : > { %13782 = vmatpush3.bf16.msra.mxu0 %v14294_v41  ;;  %13813 = vmatprep.subr.bf16.mxu1 %v14300_v6  ;;  %v17214_v25 = vrot.slane %v7785_v33, 1  ;;  %v17216_v54 = vrot.slane %v7778_v44, 1  ;;  %v7799_v27 = vshll.u32 %v17189_v62, 16  ;;  %v7866_v61 = vld [vmem:[#allocation2 + $0x10] sm:$0xe]  ;;  %v7774_v26 = vor.u32 %v7773_v18, %v7769_v28  ;;  %v14312_v47 = vld [vmem:[%s18748_s7 + $0xc8] sm:$0xff]  }
 0x598   : > { %7810 = vrot.lane.b32.xlu0 %v7760_v7, %s14845_s29  ;;  %v14306_v7 = vld [vmem:[%s18748_s7 + $0x98] sm:$0xff]   ;;  %13967 = vmatprep.subr.bf16.mxu0 %v17202_v23  ;;  %v7486_v3 = vshll.u32 %v17197_v29, 16  ;;  %v7867_v46 = vld [vmem:[#allocation2 + $0x14] sm:$0x1]  ;;  %v7870_v6 = vld [vmem:[#allocation2 + $0x20] sm:$0xe]  ;;  %v7482_v18 = vor.u32 %v7481_v0, %v7477_v15 }
 0x599   : > { %v17227_v10 = vld [vmem:[#allocation2 + $0x38] sm:$0xf]  ;;  %v7711_v35 = vld [vmem:[#allocation2 + $0x3c] sm:$0x1]  ;;  %v7900_v42 = vrot.slane %v7867_v46, 5  ;;  %vm8756_vm15 = vcmask 1041408  }
 0x59a   : > { %7228 = vrot.lane.b32.xlu1 %v7215_v11, %s14845_s29  ;;  %v14301_v11 = vld [vmem:[%s18748_s7 + $0xa0] sm:$0xff]   ;;  %v7868_v34 = vld [vmem:[#allocation2 + $0x18] sm:$0xe]  ;;  %v7869_v41 = vld [vmem:[#allocation2 + $0x1c] sm:$0x1] }
 0x59b   : > { %13814 = vmatpush3.bf16.msra.mxu1 %v14301_v11  ;;  %v12999_v5 = vrot.slane %v7868_v34, 9  ;;  %v7904_v37 = vrot.slane %v7869_v41, 5  ;;  %v7871_v11 = vld [vmem:[#allocation2 + $0x24] sm:$0x1]  ;;  %v17233_v63 = vld [vmem:[#allocation2 + $0x48] sm:$0xf] }
 0x59c   : > { %7498 = vrot.lane.b32.xlu0 %v7468_v20, %s14845_s29  ;;  %13815 = vmatprep.subr.bf16.mxu1 %v14305_v31  ;;  %v12998_v20 = vrot.slane %v7866_v61, 9  ;;  %v7713_v33 = vld [vmem:[#allocation2 + $0x4c] sm:$0x1]  ;;  %v7872_v31 = vld [vmem:[#allocation2 + $0x28] sm:$0xe] }
 0x59d   : > { %v7873_v28 = vld [vmem:[#allocation2 + $0x2c] sm:$0x1]  ;;  %v7874_v61 = vld [vmem:[#allocation2 + $0x30] sm:$0xe]  ;;  %v7875_v46 = vld [vmem:[#allocation2 + $0x34] sm:$0x1] }
 0x59e   : > { %7812 = vrot.lane.b32.xlu1 %v7767_v30, %s14845_s29  ;;  %v7065_v30 = vor.u32 %v7064_v59, %v7060_v22  ;;  %v7901_v44 = vsel %vm16013_vm4, %v12998_v20, %v7900_v42  ;;  %v14313_v22 = vld [vmem:[%s18748_s7 + $0x88] sm:$0xff]   ;;  %v7905_v59 = vsel %vm16013_vm4, %v12999_v5, %v7904_v37  ;;  %v7876_v15 = vld [vmem:[#allocation2 + $0x38] sm:$0xe]  ;;  %v7877_v0 = vld [vmem:[#allocation2 + $0x3c] sm:$0x1]  ;;  %v13002_v41 = vrot.slane %v7874_v61, 9 }
 0x59f   : > { %13816 = vmatpush3.bf16.msra.mxu1 %v14306_v7  ;;  %7938 = vst.msk [vmem:[#allocation3 + $0x10] sm:$0xf] %vm494_vm13, %v7901_v44  ;;  %v13001_v7 = vrot.slane %v7872_v31, 9  ;;  %7939 = vst.msk [vmem:[#allocation3 + $0x24] sm:$0xf] %vm494_vm13, %v7905_v59  ;;  %v7916_v20 = vrot.slane %v7875_v46, 5  ;;  %v12995_v42 = vcombine.low %v17227_v10, %v7711_v35 }
 0x5a0   : > { %7078 = vrot.lane.b32.xlu0 %v7058_v52, %s14845_s29  ;;  %13817 = vmatprep.subr.bf16.mxu1 %v14309_v2  ;;  %v7908_v52 = vrot.slane %v7871_v11, 5  ;;  %v7912_v2 = vrot.slane %v7873_v28, 5  ;;  %v13003_v5 = vrot.slane %v7876_v15, 9  ;;  %v7920_v37 = vrot.slane %v7877_v0, 5  ;;  %v14315_v11 = vld [vmem:[%s18748_s7 + $0xc0] sm:$0xff]  }
 0x5a1   : > { %v7776_v31 = vshrl.u32 %v17162_v56, 16  ;;  %v12997_v28 = vcombine.low %v17233_v63, %v7713_v33  ;;  %v7488_v56 = vrot.slane %v7486_v3, 1  ;;  %v7792_v33 = vshll.u32 %v12995_v42, 16  ;;  %v14316_v59 = vld [vmem:[%s18748_s7 + $0x80] sm:$0xff]  }
 0x5a2   : > { %7076 = vrot.lane.b32.xlu1 %v7051_v14, %s14845_s29  ;;  %v13000_v14 = vrot.slane %v7870_v6, 9  ;;  %v7783_v6 = vshrl.u32 %v17159_v43, 16  ;;  %v7921_v43 = vsel %vm16013_vm4, %v13003_v5, %v7920_v37  ;;  %v14269_v0 = vld [vmem:[#allocation2] sm:$0x1e]   ;;  %vm18921_vm5 = vsmask.f32 256 }
 0x5a3   : > { %13818 = vmatpush3.bf16.msra.mxu1 %v14311_v45  ;;  %v7917_v45 = vsel %vm16013_vm4, %v13002_v41, %v7916_v20  ;;  %7943 = vst.msk [vmem:[#allocation3 + $0x74] sm:$0xf] %vm494_vm13, %v7921_v43  ;;  %v7804_v61 = vshrl.u32 %v12997_v28, 16 }
 0x5a4   : > { %7814 = vrot.lane.b32.xlu0 %v7774_v26, %s14845_s29  ;;  %v7475_v26 = vor.u32 %v7474_v32, %v7470_v49  ;;  %v7909_v34 = vsel %vm16013_vm4, %v13000_v14, %v7908_v52  ;;  %v7878_v49 = vld [vmem:[#allocation2 + $0x40] sm:$0xe]  ;;  %v7879_v32 = vld [vmem:[#allocation2 + $0x44] sm:$0x1]  ;;  %13819 = vmatprep.subr.bf16.mxu1 %v14312_v47  ;;  %7942 = vst.msk [vmem:[#allocation3 + $0x60] sm:$0xf] %vm494_vm13, %v7917_v45 }
 0x5a5   : > { %7940 = vst.msk [vmem:[#allocation3 + $0x38] sm:$0xf] %vm494_vm13, %v7909_v34  ;;  %v13004_v35 = vrot.slane %v7878_v49, 9  ;;  %v7924_v44 = vrot.slane %v7879_v32, 5  ;;  %v7788_v47 = vor.u32 %v17214_v25, %v7783_v6  ;;  %v7801_v14 = vrot.slane %v7799_v27, 1 }
 0x5a6   : > { %7080 = vrot.lane.b32.xlu1 %v7065_v30, %s14845_s29  ;;  %v7913_v30 = vsel %vm16013_vm4, %v13001_v7, %v7912_v2  ;;  %v7797_v25 = vshrl.u32 %v17189_v62, 16  ;;  %v7806_v27 = vshll.u32 %v12997_v28, 16  ;;  %v7794_v2 = vrot.slane %v7792_v33, 1  ;;  %v14266_v34 = vld [vmem:[#allocation2 + $0x10] sm:$0x1e]  }
 0x5a7   : > { %7941 = vst.msk [vmem:[#allocation3 + $0x4c] sm:$0xf] %vm494_vm13, %v7913_v30  ;;  %v7925_v52 = vsel %vm16013_vm4, %v13004_v35, %v7924_v44  ;;  %13820 = vmatpush3.bf16.msra.mxu1 %v14313_v22  ;;  %v7790_v22 = vshrl.u32 %v12995_v42, 16  ;;  %v14270_v30 = vld [vmem:[#allocation2 + $0x18] sm:$0x1e]  }
 0x5a8   : > { %7502 = vrot.lane.b32.xlu0 %v7482_v18, %s14845_s29  ;;  %v7781_v18 = vor.u32 %v17216_v54, %v7776_v31  ;;  %7944 = vst.msk [vmem:[#allocation3 + $0x88] sm:$0xf] %vm494_vm13, %v7925_v52  ;;  %13821 = vmatprep.subr.bf16.mxu1 %v14315_v11  ;;  %v7484_v54 = vshrl.u32 %v17197_v29, 16  ;;  %v7802_v7 = vor.u32 %v7801_v14, %v7797_v25  ;;  %v7808_v46 = vrot.slane %v7806_v27, 1  ;;  %v7350_v32 = vld [vmem:[#allocation2 + $0x18] sm:$0xf] }
 0x5a9   : > { %v12960_v43 = vcombine.low %v7350_v32, %v16978_v53  ;;  %vm590_vm13 = vsmask.f32 7946 }
 0x5aa   : > { %7500 = vrot.lane.b32.xlu1 %v7475_v26, %s14845_s29  ;;  %v7489_v3 = vor.u32 %v7488_v56, %v7484_v54  ;;  %v7795_v26 = vor.u32 %v7794_v2, %v7790_v22  ;;  %v7809_v62 = vor.u32 %v7808_v46, %v7804_v61  ;;  %v7346_v56 = vld [vmem:[#allocation2 + $0x8] sm:$0xf] }
 0x5ab   : > { %13822 = vmatpush3.bf16.msra.mxu1 %v14316_v59  ;;  %v12958_v2 = vcombine.low %v7346_v56, %v16970_v51 }
 0x5ac   : > { %7818 = vrot.lane.b32.xlu0 %v7788_v47, %s14845_s29 }
 0x5ae   : > { %7816 = vrot.lane.b32.xlu1 %v7781_v18, %s14845_s29 }
 0x5b0   : > { %7822 = vrot.lane.b32.xlu0 %v7802_v7, %s14845_s29 }
 0x5b2   : > { %7504 = vrot.lane.b32.xlu1 %v7489_v3, %s14845_s29 }
 0x5b6   : > { %7820 = vrot.lane.b32.xlu1 %v7795_v26, %s14845_s29 }
 0x5ba   : > { %7824 = vrot.lane.b32.xlu1 %v7809_v62, %s14845_s29 }
 0x5ea   : > { %v7223_v29 = vpop.permute.xlu0 %7222 }
 0x5eb   : > { %v7242_v15 = vsel %vm2588_vm7, %v14266_v34, %v7223_v29  ;;  %v14277_v34 = vld [vmem:[#allocation2 + $0x8] sm:$0x1e]  }
 0x5ec   : > { %v12938_v41 = vcombine.low %v7242_v15, %v7242_v15  ;;  %v12939_v20 = vcombine.high %v7242_v15, %v7242_v15 }
 0x5ee   : > { %v12952_v5 = vrot.slane %v12938_v41, 9  ;;  %v7308_v37 = vrot.slane %v12939_v20, 5  ;;  %v7219_v49 = vpop.permute.xlu0 %7218 }
 0x5ef   : > { %v7236_v6 = vsel %vm2588_vm7, %v14269_v0, %v7219_v49 }
 0x5f0   : > { %v7225_v42 = vpop.permute.xlu1 %7224  ;;  %v7309_v45 = vsel %vm16013_vm4, %v12952_v5, %v7308_v37  ;;  %v12934_v35 = vcombine.low %v7236_v6, %v7236_v6  ;;  %v12935_v44 = vcombine.high %v7236_v6, %v7236_v6 }
 0x5f1   : > { %v7245_v11 = vsel %vm2588_vm7, %v14270_v30, %v7225_v42  ;;  %7340 = vst [vmem:[#allocation3 + $0x2c] sm:$0xf] %v7309_v45 }
 0x5f2   : > { %v12940_v31 = vcombine.low %v7245_v11, %v7245_v11  ;;  %v12941_v28 = vcombine.high %v7245_v11, %v7245_v11  ;;  %v12950_v47 = vrot.slane %v12934_v35, 9  ;;  %v7300_v14 = vrot.slane %v12935_v44, 5  ;;  %v7495_v18 = vpop.permute.xlu0 %7494  ;;  %v7352_v35 = vld [vmem:[#allocation2 + $0x20] sm:$0xf] }
 0x5f3   : > { %v7514_v59 = vsel %vm2588_vm7, %v12960_v43, %v7495_v18 }
 0x5f4   : > { %v12953_v52 = vrot.slane %v12940_v31, 9  ;;  %v7312_v33 = vrot.slane %v12941_v28, 5  ;;  %v7073_v25 = vpop.permute.xlu1 %7072  ;;  %v7301_v54 = vsel %vm16013_vm4, %v12950_v47, %v7300_v14  ;;  %v12978_v27 = vcombine.low %v7514_v59, %v7514_v59 }
 0x5f5   : > { %v12979_v7 = vcombine.high %v7514_v59, %v7514_v59  ;;  %v7096_v3 = vsel %vm2588_vm7, %v16980_v58, %v7073_v25  ;;  %7338 = vst [vmem:[#allocation3 + $0x4] sm:$0xf] %v7301_v54  ;;  %v7348_v54 = vld [vmem:[#allocation2 + $0x10] sm:$0xf] }
 0x5f6   : > { %v7313_v53 = vsel %vm16013_vm4, %v12953_v52, %v7312_v33  ;;  %7117 = vst [vmem:[#allocation3 + $0x3c] sm:$0xf] %v7096_v3  ;;  %v7599_v22 = vshrl.u32 %v12978_v27, 16  ;;  %v7602_v61 = vshll.u32 %v12978_v27, 16  ;;  %v7491_v46 = vpop.permute.xlu0 %7490  ;;  %v12961_v33 = vcombine.low %v7352_v35, %v17009_v1 }
 0x5f7   : > { %7341 = vst [vmem:[#allocation3 + $0x40] sm:$0xf] %v7313_v53  ;;  %v7608_v26 = vshll.u32 %v12979_v7, 16  ;;  %v7508_v62 = vsel %vm2588_vm7, %v12958_v2, %v7491_v46  ;;  %v14289_v2 = vld [vmem:[#allocation2 + $0x20] sm:$0x1e]  }
 0x5f8   : > { %v7221_v29 = vpop.permute.xlu1 %7220  ;;  %v7601_v15 = vrot.slane %v7599_v22, 4  ;;  %v7604_v0 = vrot.slane %v7602_v61, 5  ;;  %v12974_v41 = vcombine.low %v7508_v62, %v7508_v62  ;;  %v12975_v58 = vcombine.high %v7508_v62, %v7508_v62 }
 0x5f9   : > { %v7239_v20 = vsel %vm2588_vm7, %v14277_v34, %v7221_v29  ;;  %v7610_v42 = vrot.slane %v7608_v26, 5  ;;  %v12959_v61 = vcombine.low %v7348_v54, %v17034_v9 }
 0x5fa   : > { %v7605_v30 = vor.u32 %v7604_v0, %v7601_v15  ;;  %v7571_v5 = vshrl.u32 %v12974_v41, 16  ;;  %v7574_v37 = vshll.u32 %v12974_v41, 16  ;;  %v12936_v49 = vcombine.low %v7239_v20, %v7239_v20  ;;  %v7075_v51 = vpop.permute.xlu0 %7074 }
 0x5fb   : > { %v7580_v32 = vshll.u32 %v12975_v58, 16  ;;  %v12937_v6 = vcombine.high %v7239_v20, %v7239_v20  ;;  %v7100_v11 = vsel %vm2588_vm7, %v16997_v4, %v7075_v51 }
 0x5fc   : > { %v7069_v45 = vpop.permute.xlu1 %7068  ;;  %v7606_v44 = vrot.slane %v7605_v30, 4  ;;  %v7573_v31 = vrot.slane %v7571_v5, 4  ;;  %v7576_v28 = vrot.slane %v7574_v37, 5  ;;  %v12951_v43 = vrot.slane %v12936_v49, 9  ;;  %7118 = vst [vmem:[#allocation3 + $0x50] sm:$0xf] %v7100_v11 }
 0x5fd   : > { %v7304_v47 = vrot.slane %v12937_v6, 5  ;;  %v7088_v14 = vsel %vm2588_vm7, %v16987_v21, %v7069_v45  ;;  %v7582_v7 = vrot.slane %v7580_v32, 5  ;;  %v14295_v30 = vld [vmem:[#allocation2 + $0x30] sm:$0x1e]  }
 0x5fe   : > { %v7611_v52 = vsel %vm16280_vm2, %v7606_v44, %v7610_v42  ;;  %v7577_v18 = vor.u32 %v7576_v28, %v7573_v31  ;;  %7115 = vst [vmem:[#allocation3 + $0x14] sm:$0xf] %v7088_v14  ;;  %v7071_v56 = vpop.permute.xlu0 %7070  ;;  %v14296_v42 = vld [vmem:[#allocation2 + $0x38] sm:$0x1e]  }
 0x5ff   : > { %7692 = vst [vmem:[#allocation3 + $0x30] sm:$0xf] %v7611_v52  ;;  %v7305_v4 = vsel %vm16013_vm4, %v12951_v43, %v7304_v47  ;;  %v7092_v59 = vsel %vm2588_vm7, %v16991_v36, %v7071_v56  ;;  %v14302_v52 = vld [vmem:[#allocation3 + $0x2c] ss:$20 sps:$4 sm:$0xff]  }
 0x600   : > { %v7497_v25 = vpop.permute.xlu1 %7496  ;;  %v7578_v27 = vrot.slane %v7577_v18, 4  ;;  %7339 = vst [vmem:[#allocation3 + $0x18] sm:$0xf] %v7305_v4  ;;  %7116 = vst [vmem:[#allocation3 + $0x28] sm:$0xf] %v7092_v59  ;;  %v14314_v59 = vld [vmem:[%s18748_s7 + $0x110] sm:$0xff]  }
 0x601   : > { %v7517_v21 = vsel %vm2588_vm7, %v12961_v33, %v7497_v25 }
 0x602   : > { %v12980_v3 = vcombine.low %v7517_v21, %v7517_v21  ;;  %v12981_v53 = vcombine.high %v7517_v21, %v7517_v21  ;;  %v7583_v1 = vsel %vm16280_vm2, %v7578_v27, %v7582_v7  ;;  %v7227_v22 = vpop.permute.xlu0 %7226  ;;  %v14304_v21 = vld [vmem:[#allocation2 + $0x28] sm:$0x1e]  }
 0x603   : > { %7690 = vst [vmem:[#allocation3 + $0x8] sm:$0xf] %v7583_v1  ;;  %v7248_v62 = vsel %vm2588_vm7, %v14289_v2, %v7227_v22 }
 0x604   : > { %v7613_v46 = vshrl.u32 %v12980_v3, 16  ;;  %v7616_v36 = vshll.u32 %v12980_v3, 16  ;;  %v7622_v26 = vshll.u32 %v12981_v53, 16  ;;  %v7493_v34 = vpop.permute.xlu1 %7492  ;;  %v12942_v29 = vcombine.low %v7248_v62, %v7248_v62 }
 0x605   : > { %v12943_v15 = vcombine.high %v7248_v62, %v7248_v62  ;;  %v7511_v0 = vsel %vm2588_vm7, %v12959_v61, %v7493_v34  ;;  %v14297_v44 = vld [vmem:[#allocation3] ss:$20 sps:$4 sm:$0xff]   ;;  %v7354_v61 = vld [vmem:[#allocation2 + $0x28] sm:$0xf] }
 0x606   : > { %v7615_v41 = vrot.slane %v7613_v46, 4  ;;  %v7618_v58 = vrot.slane %v7616_v36, 5  ;;  %v12976_v20 = vcombine.low %v7511_v0, %v7511_v0  ;;  %v7624_v5 = vrot.slane %v7622_v26, 5  ;;  %v7231_v9 = vpop.permute.xlu0 %7230 }
 0x607   : > { %v12954_v37 = vrot.slane %v12942_v29, 9  ;;  %v7316_v49 = vrot.slane %v12943_v15, 5  ;;  %v12977_v51 = vcombine.high %v7511_v0, %v7511_v0  ;;  %v7254_v45 = vsel %vm2588_vm7, %v14295_v30, %v7231_v9  ;;  %v14299_v14 = vld [vmem:[#allocation3 + $0x4] ss:$20 sps:$4 sm:$0xff]  }
 0x608   : > { %v7619_v32 = vor.u32 %v7618_v58, %v7615_v41  ;;  %v7585_v6 = vshrl.u32 %v12976_v20, 16  ;;  %v7588_v11 = vshll.u32 %v12976_v20, 16  ;;  %v7233_v35 = vpop.permute.xlu1 %7232  ;;  %v12946_v43 = vcombine.low %v7254_v45, %v7254_v45  ;;  %8409 = vmatprep.mubr.bf16.mxu0 %v14299_v14  ;;  %v7358_v14 = vld [vmem:[#allocation2 + $0x38] sm:$0xf] }
 0x609   : > { %v7317_v31 = vsel %vm16013_vm4, %v12954_v37, %v7316_v49  ;;  %v7594_v28 = vshll.u32 %v12977_v51, 16  ;;  %v12947_v47 = vcombine.high %v7254_v45, %v7254_v45  ;;  %v7257_v4 = vsel %vm2588_vm7, %v14296_v42, %v7233_v35  ;;  %8410 = vmatmul.mubr.bf16.vlgmr.msra.gmra.mxu0 %v14297_v44 }
 0x60a   : > { %v7620_v18 = vrot.slane %v7619_v32, 4  ;;  %7342 = vst [vmem:[#allocation3 + $0x54] sm:$0xf] %v7317_v31  ;;  %v7587_v56 = vrot.slane %v7585_v6, 4  ;;  %v7590_v33 = vrot.slane %v7588_v11, 5  ;;  %v12956_v25 = vrot.slane %v12946_v43, 9  ;;  %v7811_v7 = vpop.permute.xlu0 %7810  ;;  %8417 = vmatprep.mubr.bf16.mxu0 %v14302_v52  ;;  %13968 = vmatpush3.bf16.msra.mxu0 %v17202_v23 }
 0x60b   : > { %v7324_v54 = vrot.slane %v12947_v47, 5  ;;  %v12948_v27 = vcombine.low %v7257_v4, %v7257_v4  ;;  %v12949_v2 = vcombine.high %v7257_v4, %v7257_v4  ;;  %v7828_v1 = vsel %vm2588_vm7, %v17048_v16, %v7811_v7  ;;  %13969 = vmatprep.subr.bf16.mxu0 %v14314_v59  ;;  %v14324_v16 = vld [vmem:[%s18748_s7 + $0x108] sm:$0xff]   ;;  %v14329_v6 = vld [vmem:[%s18748_s7 + $0x100] sm:$0xff]  }
 0x60c   : > { %v7625_v3 = vsel %vm16280_vm2, %v7620_v18, %v7624_v5  ;;  %v7591_v53 = vor.u32 %v7590_v33, %v7587_v56  ;;  %v7229_v22 = vpop.permute.xlu1 %7228  ;;  %v7596_v46 = vrot.slane %v7594_v28, 5  ;;  %7858 = vst [vmem:[#allocation3 + $0xc] sm:$0xf] %v7828_v1  ;;  %v12962_v41 = vcombine.low %v7354_v61, %v17063_v40  ;;  %v14310_v32 = vld [vmem:[#allocation3 + $0x28] ss:$20 sps:$4 sm:$0xff]  }
 0x60d   : > { %7693 = vst [vmem:[#allocation3 + $0x44] sm:$0xf] %v7625_v3  ;;  %v7325_v36 = vsel %vm16013_vm4, %v12956_v25, %v7324_v54  ;;  %v12957_v26 = vrot.slane %v12948_v27, 9  ;;  %v7251_v62 = vsel %vm2588_vm7, %v14304_v21, %v7229_v22  ;;  %v7328_v29 = vrot.slane %v12949_v2, 5  ;;  %v7356_v33 = vld [vmem:[#allocation2 + $0x30] sm:$0xf] }
 0x60e   : > { %v7592_v34 = vrot.slane %v7591_v53, 4  ;;  %7344 = vst [vmem:[#allocation3 + $0x7c] sm:$0xf] %v7325_v36  ;;  %v12944_v15 = vcombine.low %v7251_v62, %v7251_v62  ;;  %v12945_v0 = vcombine.high %v7251_v62, %v7251_v62  ;;  %v7499_v58 = vpop.permute.xlu0 %7498  ;;  %13970 = vmatpush3.bf16.msra.mxu0 %v14314_v59  ;;  %v12964_v54 = vcombine.low %v7358_v14, %v17121_v17 }
 0x60f   : > { %v7329_v30 = vsel %vm16013_vm4, %v12957_v26, %v7328_v29  ;;  %v7520_v49 = vsel %vm2588_vm7, %v12962_v41, %v7499_v58  ;;  %13971 = vmatprep.subr.bf16.mxu0 %v14324_v16  ;;  %v12963_v7 = vcombine.low %v7356_v33, %v17123_v38 }
 0x610   : > { %v7597_v20 = vsel %vm16280_vm2, %v7592_v34, %v7596_v46  ;;  %v12955_v23 = vrot.slane %v12944_v15, 9  ;;  %v7320_v5 = vrot.slane %v12945_v0, 5  ;;  %v7813_v37 = vpop.permute.xlu1 %7812  ;;  %7345 = vst [vmem:[#allocation3 + $0x90] sm:$0xf] %v7329_v30  ;;  %v12982_v9 = vcombine.low %v7520_v49, %v7520_v49  ;;  %v7360_v0 = vld [vmem:[#allocation2 + $0x40] sm:$0xf] }
 0x611   : > { %7691 = vst [vmem:[#allocation3 + $0x1c] sm:$0xf] %v7597_v20  ;;  %v7832_v51 = vsel %vm2588_vm7, %v17053_v48, %v7813_v37  ;;  %v12983_v42 = vcombine.high %v7520_v49, %v7520_v49  ;;  %8418 = vmatmul.mubr.bf16.gmra.mxu0 %v14310_v32 }
 0x612   : > { %v7321_v40 = vsel %vm16013_vm4, %v12955_v23, %v7320_v5  ;;  %7859 = vst [vmem:[#allocation3 + $0x20] sm:$0xf] %v7832_v51  ;;  %v7079_v11 = vpop.permute.xlu0 %7078  ;;  %v7627_v45 = vshrl.u32 %v12982_v9, 16  ;;  %v7630_v35 = vshll.u32 %v12982_v9, 16  ;;  %13972 = vmatpush3.bf16.msra.mxu0 %v14324_v16  ;;  %vm569_vm4 = vcmask 1040384  }
 0x613   : > { %7343 = vst [vmem:[#allocation3 + $0x68] sm:$0xf] %v7321_v40  ;;  %v7108_v48 = vsel %vm2588_vm7, %v17093_v24, %v7079_v11  ;;  %v7636_v43 = vshll.u32 %v12983_v42, 16  ;;  %13973 = vmatprep.subr.bf16.mxu0 %v14329_v6  ;;  %vm17388_vm11 = vmand %vm569_vm4, %vm18921_vm5  ;;  %vm9185_vm5 = vsmask.f32 7448 }
 0x614   : > { %v7077_v44 = vpop.permute.xlu1 %7076  ;;  %7120 = vst [vmem:[#allocation3 + $0x78] sm:$0xf] %v7108_v48  ;;  %v7629_v31 = vrot.slane %v7627_v45, 4  ;;  %v7632_v28 = vrot.slane %v7630_v35, 5  ;;  %vm17539_vm14 = vmor %vm569_vm4, %vm589_vm8  ;;  %vm9183_vm4 = vsmask.f32 5392 }
 0x615   : > { %v7104_v39 = vsel %vm2588_vm7, %v17072_v60, %v7077_v44  ;;  %v7638_v25 = vrot.slane %v7636_v43, 5  ;;  %vm17559_vm0 = vmor %vm17539_vm14, %vm3105_vm10 }
 0x616   : > { %7119 = vst [vmem:[#allocation3 + $0x64] sm:$0xf] %v7104_v39  ;;  %v7815_v47 = vpop.permute.xlu0 %7814  ;;  %v7633_v52 = vor.u32 %v7632_v28, %v7629_v31  ;;  %13974 = vmatpush3.bf16.msra.mxu0 %v14329_v6  ;;  %vm17581_vm3 = vmor %vm17559_vm0, %vm3109_vm12  ;;  %vm9098_vm12 = vsmask.f32 2306 }
 0x617   : > { %v7836_v18 = vsel %vm2588_vm7, %v17082_v50, %v7815_v47  ;;  %v14326_v30 = vld [vmem:[#allocation3 + $0x7c] ss:$20 sps:$4 sm:$0xff]   ;;  %vm17766_vm6 = vmand %vm3582_vm1, %vm9098_vm12  ;;  %vm9180_vm1 = vsmask.f32 1280 }
 0x618   : > { %v7081_v56 = vpop.permute.xlu1 %7080  ;;  %7860 = vst [vmem:[#allocation3 + $0x34] sm:$0xf] %v7836_v18  ;;  %v14318_v4 = vld [vmem:[#allocation3 + $0x8] ss:$20 sps:$4 sm:$0xff]   ;;  %v7634_v59 = vrot.slane %v7633_v52, 4 }
 0x619   : > { %v7112_v24 = vsel %vm2588_vm7, %v17119_v19, %v7081_v56  ;;  %v14320_v60 = vld [vmem:[#allocation3 + $0xc] ss:$20 sps:$4 sm:$0xff]   ;;  %v14333_v18 = vld [vmem:[#allocation3 + $0x30] ss:$20 sps:$4 sm:$0xff]  }
 0x61a   : > { %7121 = vst [vmem:[#allocation3 + $0x8c] sm:$0xf] %v7112_v24  ;;  %v7503_v27 = vpop.permute.xlu0 %7502  ;;  %8474 = vmatprep.mubr.bf16.mxu1 %v14320_v60  ;;  %v7639_v50 = vsel %vm16280_vm2, %v7634_v59, %v7638_v25  ;;  %v14322_v1 = vld [vmem:[#allocation3 + $0x54] ss:$20 sps:$4 sm:$0xff]  }
 0x61b   : > { %v7526_v21 = vsel %vm2588_vm7, %v12964_v54, %v7503_v27  ;;  %8475 = vmatmul.mubr.bf16.vlgmr.msra.gmra.mxu1 %v14318_v4  ;;  %7694 = vst [vmem:[#allocation3 + $0x58] sm:$0xf] %v7639_v50  ;;  %8425 = vmatprep.mubr.bf16.mxu0 %v14322_v1  ;;  %v14334_v27 = vld [vmem:[#allocation3 + $0x38] ss:$20 sps:$4 sm:$0xff]   ;;  %v586_v1 = vld [vmem:[#allocation4 + $0x14] sm:$0x1] }
 0x61c   : > { %v7501_v3 = vpop.permute.xlu1 %7500  ;;  %v12986_v19 = vcombine.low %v7526_v21, %v7526_v21  ;;  %v12987_v53 = vcombine.high %v7526_v21, %v7526_v21 }
 0x61d   : > { %v7523_v2 = vsel %vm2588_vm7, %v12963_v7, %v7501_v3  ;;  %v14325_v22 = vld [vmem:[#allocation3 + $0x50] ss:$20 sps:$4 sm:$0xff]   ;;  %v14339_v3 = vld [vmem:[#allocation3 + $0x88] ss:$20 sps:$4 sm:$0xff]  }
 0x61e   : > { %v12984_v61 = vcombine.low %v7523_v2, %v7523_v2  ;;  %v12985_v17 = vcombine.high %v7523_v2, %v7523_v2  ;;  %v7655_v46 = vshrl.u32 %v12986_v19, 16  ;;  %v7658_v36 = vshll.u32 %v12986_v19, 16  ;;  %v7819_v26 = vpop.permute.xlu0 %7818  ;;  %8426 = vmatmul.mubr.bf16.gmra.mxu0 %v14325_v22  ;;  %v592_v22 = vld [vmem:[#allocation4] sm:$0x4] }
 0x61f   : > { %v7664_v38 = vshll.u32 %v12987_v53, 16  ;;  %v7844_v29 = vsel %vm2588_vm7, %v17125_v57, %v7819_v26  ;;  %8433 = vmatprep.mubr.bf16.mxu0 %v14326_v30  ;;  %v12965_v57 = vcombine.low %v7360_v0, %v17174_v13  ;;  %v14330_v13 = vld [vmem:[#allocation3 + $0x10] ss:$20 sps:$4 sm:$0xff]   ;;  %v571_v53 = vld [vmem:[#allocation4] sm:$0x1] }
 0x620   : > { %v7641_v62 = vshrl.u32 %v12984_v61, 16  ;;  %v7644_v34 = vshll.u32 %v12984_v61, 16  ;;  %v7817_v15 = vpop.permute.xlu1 %7816  ;;  %v7657_v16 = vrot.slane %v7655_v46, 4  ;;  %v7660_v41 = vrot.slane %v7658_v36, 5  ;;  %7862 = vst [vmem:[#allocation3 + $0x5c] sm:$0xf] %v7844_v29 }
 0x621   : > { %v7650_v58 = vshll.u32 %v12985_v17, 16  ;;  %v7840_v20 = vsel %vm2588_vm7, %v17134_v8, %v7817_v15  ;;  %v7967_v51 = vld [vmem:[#allocation3 + $0x8c] sm:$0xff]  ;;  %v7666_v6 = vrot.slane %v7664_v38, 5  ;;  %v7964_v8 = vld [vmem:[#allocation3 + $0x78] sm:$0xff]  ;;  %v572_v61 = vsel %vm17388_vm11, 0, %v571_v53 }
 0x622   : > { %v7643_v23 = vrot.slane %v7641_v62, 4  ;;  %v7646_v5 = vrot.slane %v7644_v34, 5  ;;  %7861 = vst [vmem:[#allocation3 + $0x48] sm:$0xf] %v7840_v20  ;;  %v7661_v37 = vor.u32 %v7660_v41, %v7657_v16  ;;  %v7823_v49 = vpop.permute.xlu0 %7822  ;;  %v13022_v39 = vcombine.low %v7964_v8, %v7967_v51  ;;  %v598_v26 = vld [vmem:[#allocation4 + $0x8] sm:$0x4] }
 0x623   : > { %v7852_v9 = vsel %vm2588_vm7, %v17149_v12, %v7823_v49  ;;  %v7652_v11 = vrot.slane %v7650_v58, 5  ;;  %v578_v17 = vsel %vm17388_vm11, 0, %v577_v55  ;;  %v587_v46 = vsel %vm17388_vm11, 0, %v586_v1  ;;  %573 = vst [vmem:[#allocation4] sm:$0x1] %v572_v61 }
 0x624   : > { %v7647_v40 = vor.u32 %v7646_v5, %v7643_v23  ;;  %v7505_v42 = vpop.permute.xlu1 %7504  ;;  %v7662_v32 = vrot.slane %v7661_v37, 4  ;;  %7864 = vst [vmem:[#allocation3 + $0x84] sm:$0xf] %v7852_v9  ;;  %579 = vst [vmem:[#allocation4 + $0x8] sm:$0x1] %v578_v17 }
 0x625   : > { %v7529_v45 = vsel %vm2588_vm7, %v12965_v57, %v7505_v42  ;;  %588 = vst [vmem:[#allocation4 + $0x14] sm:$0x1] %v587_v46  ;;  %v607_v34 = vld [vmem:[#allocation4 + $0x14] sm:$0x4]  ;;  %v574_v15 = vld [vmem:[#allocation4 + $0x4] sm:$0x1] }
 0x626   : > { %v7648_v35 = vrot.slane %v7647_v40, 4  ;;  %v12988_v48 = vcombine.low %v7529_v45, %v7529_v45  ;;  %v12989_v44 = vcombine.high %v7529_v45, %v7529_v45  ;;  %v7667_v31 = vsel %vm16280_vm2, %v7662_v32, %v7666_v6  ;;  %8434 = vmatmul.mubr.bf16.gmra.mxu0 %v13022_v39  ;;  %v595_v0 = vld [vmem:[#allocation4 + $0x4] sm:$0x4]  ;;  %v14343_v58 = vld [vmem:[%s18750_s9 + $0x2e0] ss:$16 sps:$4 sm:$0xff]  }
 0x627   : > { %7696 = vst [vmem:[#allocation3 + $0x80] sm:$0xf] %v7667_v31  ;;  %13975 = vmatprep.mubr.msk.bf16.mxu0 %vm2588_vm7, %v14330_v13  ;;  %v575_v16 = vsel %vm17388_vm11, 0, %v574_v15  ;;  %v14345_v20 = vld [vmem:[%s18750_s9 + $0x2e4] ss:$16 sps:$4 sm:$0xff]  }
 0x628   : > { %v7653_v12 = vsel %vm16280_vm2, %v7648_v35, %v7652_v11  ;;  %v7669_v28 = vshrl.u32 %v12988_v48, 16  ;;  %v7672_v43 = vshll.u32 %v12988_v48, 16  ;;  %v7821_v47 = vpop.permute.xlu1 %7820  ;;  %v7678_v24 = vshll.u32 %v12989_v44, 16  ;;  %576 = vst [vmem:[#allocation4 + $0x4] sm:$0x1] %v575_v16  ;;  %11634 = vmatprep.subr.bf16.mxu0 %v14345_v20 }
 0x629   : > { %7695 = vst [vmem:[#allocation3 + $0x6c] sm:$0xf] %v7653_v12  ;;  %v7848_v14 = vsel %vm2588_vm7, %v17227_v10, %v7821_v47  ;;  %v14331_v52 = vld [vmem:[#allocation3 + $0x34] ss:$20 sps:$4 sm:$0xff]   ;;  %v14346_v30 = vld [vmem:[%s18750_s9 + $0xe0] ss:$16 sps:$4 sm:$0xff]  }
 0x62a   : > { %v7671_v56 = vrot.slane %v7669_v28, 4  ;;  %v7674_v33 = vrot.slane %v7672_v43, 5  ;;  %7863 = vst [vmem:[#allocation3 + $0x70] sm:$0xf] %v7848_v14  ;;  %8482 = vmatprep.mubr.bf16.mxu1 %v14331_v52  ;;  %v7680_v54 = vrot.slane %v7678_v24, 5 }
 0x62b   : > { %8483 = vmatmul.mubr.bf16.gmra.mxu1 %v14333_v18  ;;  %v14335_v10 = vld [vmem:[#allocation3 + $0x60] ss:$20 sps:$4 sm:$0xff]   ;;  %v580_v5 = vld [vmem:[#allocation4 + $0xc] sm:$0x1]  ;;  %v601_v37 = vld [vmem:[#allocation4 + $0xc] sm:$0x4] }
 0x62c   : > { %v7675_v4 = vor.u32 %v7674_v33, %v7671_v56  ;;  %v7825_v60 = vpop.permute.xlu1 %7824  ;;  %v14348_v23 = vld [vmem:[%s18750_s9 + $0xe4] ss:$16 sps:$4 sm:$0xff]   ;;  %v581_v49 = vsel %vm17388_vm11, 0, %v580_v5  ;;  %v14349_v9 = vld [vmem:[%s18750_s9 + $0x2c0] ss:$16 sps:$4 sm:$0xff]  }
 0x62d   : > { %v7856_v59 = vsel %vm2588_vm7, %v17233_v63, %v7825_v60  ;;  %11591 = vmatprep.subr.bf16.mxu1 %v14348_v23  ;;  %582 = vst [vmem:[#allocation4 + $0xc] sm:$0x1] %v581_v49  ;;  %v14351_v42 = vld [vmem:[%s18750_s9 + $0x2c4] ss:$16 sps:$4 sm:$0xff]   ;;  %v14352_v32 = vld [vmem:[%s18750_s9 + $0xc0] ss:$16 sps:$4 sm:$0xff]  }
 0x62e   : > { %v7676_v25 = vrot.slane %v7675_v4, 4  ;;  %7865 = vst [vmem:[#allocation3 + $0x98] sm:$0xf] %v7856_v59  ;;  %13976 = vmatmul.mubr.msk.bf16.vlgmr.msra.gmra.mxu0 %vm2588_vm7, %v14334_v27  ;;  %11592 = vmatpush1.bf16.msra.mxu1 %v14346_v30  ;;  %v14354_v11 = vld [vmem:[%s18750_s9 + $0xc4] ss:$16 sps:$4 sm:$0xff]  }
 0x62f   : > { %13979 = vmatprep.mubr.msk.bf16.mxu0 %vm2588_vm7, %v14335_v10  ;;  %11635 = vmatpush1.bf16.msra.mxu0 %v14343_v58  ;;  %v583_v8 = vld [vmem:[#allocation4 + $0x10] sm:$0x1]  ;;  %v604_v45 = vld [vmem:[#allocation4 + $0x10] sm:$0x4]  ;;  %v14357_v13 = vld [vmem:[%s18750_s9 + $0x2a4] ss:$16 sps:$4 sm:$0xff]  }
 0x630   : > { %v7681_v7 = vsel %vm16280_vm2, %v7676_v25, %v7680_v54  ;;  %v14338_v21 = vld [vmem:[#allocation3 + $0x58] ss:$20 sps:$4 sm:$0xff]   ;;  %11636 = vmatprep.subr.bf16.mxu0 %v14351_v42  ;;  %v584_v35 = vsel %vm17388_vm11, 0, %v583_v8  ;;  %11593 = vmatprep.subr.bf16.mxu1 %v14354_v11  ;;  %v14355_v12 = vld [vmem:[%s18750_s9 + $0x2a0] ss:$16 sps:$4 sm:$0xff]  }
 0x631   : > { %7697 = vst [vmem:[#allocation3 + $0x94] sm:$0xf] %v7681_v7  ;;  %v14336_v50 = vld [vmem:[#allocation3 + $0x5c] ss:$20 sps:$4 sm:$0xff]   ;;  %585 = vst [vmem:[#allocation4 + $0x10] sm:$0x1] %v584_v35 }
 0x632   : > { %8490 = vmatprep.mubr.bf16.mxu1 %v14336_v50  ;;  %11594 = vmatpush1.bf16.msra.mxu1 %v14352_v32  ;;  %v14360_v28 = vld [vmem:[%s18750_s9 + $0xa4] ss:$16 sps:$4 sm:$0xff]   ;;  %v14358_v47 = vld [vmem:[%s18750_s9 + $0xa0] ss:$16 sps:$4 sm:$0xff]   ;;  %vm9181_vm2 = vsmask.f32 3336 }
 0x633   : > { %8491 = vmatmul.mubr.bf16.gmra.mxu1 %v14338_v21  ;;  %11637 = vmatpush1.bf16.msra.mxu0 %v14349_v9  ;;  %v14363_v14 = vld [vmem:[%s18750_s9 + $0x284] ss:$16 sps:$4 sm:$0xff]   ;;  %v14361_v52 = vld [vmem:[%s18750_s9 + $0x280] ss:$16 sps:$4 sm:$0xff]   ;;  %vm9182_vm11 = vmor %vm9180_vm1, %vm9181_vm2 }
 0x634   : > { %11638 = vmatprep.subr.bf16.mxu0 %v14357_v13  ;;  %11595 = vmatprep.subr.bf16.mxu1 %v14360_v28  ;;  %v14366_v18 = vld [vmem:[%s18750_s9 + $0x84] ss:$16 sps:$4 sm:$0xff]   ;;  %v14364_v24 = vld [vmem:[%s18750_s9 + $0x80] ss:$16 sps:$4 sm:$0xff]  }
 0x635   : > { %v14340_v63 = vld [vmem:[#allocation3 + $0x84] ss:$20 sps:$4 sm:$0xff]   ;;  %v14367_v4 = vld [vmem:[%s18750_s9 + $0x260] ss:$16 sps:$4 sm:$0xff]  }
 0x636   : > { %13980 = vmatmul.mubr.msk.bf16.gmra.mxu0 %vm2588_vm7, %v14339_v3  ;;  %8498 = vmatprep.mubr.bf16.mxu1 %v14340_v63  ;;  %vm17399_vm7 = vmand %vm589_vm8, %vm590_vm13  ;;  %v14369_v60 = vld [vmem:[%s18750_s9 + $0x264] ss:$16 sps:$4 sm:$0xff]   ;;  %v14370_v54 = vld [vmem:[%s18750_s9 + $0x60] ss:$16 sps:$4 sm:$0xff]  }
 0x637   : > { %v593_v38 = vsel %vm17399_vm7, 0, %v592_v22  ;;  %v599_v62 = vsel %vm17399_vm7, 0, %v598_v26  ;;  %v608_v29 = vsel %vm17399_vm7, 0, %v607_v34  ;;  %v596_v41 = vsel %vm17399_vm7, 0, %v595_v0  ;;  %11639 = vmatpush1.bf16.msra.mxu0 %v14355_v12  ;;  %11596 = vmatpush1.bf16.msra.mxu1 %v14358_v47  ;;  %v14372_v59 = vld [vmem:[%s18750_s9 + $0x64] ss:$16 sps:$4 sm:$0xff]   ;;  %vm9184_vm13 = vmor %vm9182_vm11, %vm9183_vm4 }
 0x638   : > { %v14342_v19 = vld [vmem:[#allocation3 + $0x80] ss:$20 sps:$4 sm:$0xff]   ;;  %594 = vst [vmem:[#allocation4] sm:$0x4] %v593_v38  ;;  %600 = vst [vmem:[#allocation4 + $0x8] sm:$0x4] %v599_v62  ;;  %11640 = vmatprep.subr.bf16.mxu0 %v14363_v14  ;;  %11597 = vmatprep.subr.bf16.mxu1 %v14366_v18 }
 0x639   : > { %609 = vst [vmem:[#allocation4 + $0x14] sm:$0x4] %v608_v29  ;;  %597 = vst [vmem:[#allocation4 + $0x4] sm:$0x4] %v596_v41  ;;  %v602_v51 = vsel %vm17399_vm7, 0, %v601_v37  ;;  %v605_v48 = vsel %vm17399_vm7, 0, %v604_v45 }
 0x63a   : > { %603 = vst [vmem:[#allocation4 + $0xc] sm:$0x4] %v602_v51  ;;  %606 = vst [vmem:[#allocation4 + $0x10] sm:$0x4] %v605_v48  ;;  %v14375_v27 = vld [vmem:[%s18750_s9 + $0x244] ss:$16 sps:$4 sm:$0xff]  }
 0x63b   : > { %8499 = vmatmul.mubr.bf16.gmra.mxu1 %v14342_v19  ;;  %11641 = vmatpush1.bf16.msra.mxu0 %v14361_v52  ;;  %v14378_v10 = vld [vmem:[%s18750_s9 + $0x44] ss:$16 sps:$4 sm:$0xff]   ;;  %v14373_v21 = vld [vmem:[%s18750_s9 + $0x240] ss:$16 sps:$4 sm:$0xff]   ;;  %vm17852_vm7 = vmor %vm9184_vm13, %vm9185_vm5 }
 0x63c   : > { %11598 = vmatpush1.bf16.msra.mxu1 %v14364_v24  ;;  %11642 = vmatprep.subr.bf16.mxu0 %v14369_v60  ;;  %v14381_v3 = vld [vmem:[%s18750_s9 + $0x224] ss:$16 sps:$4 sm:$0xff]   ;;  %v14376_v19 = vld [vmem:[%s18750_s9 + $0x40] ss:$16 sps:$4 sm:$0xff]  }
 0x63d   : > { %11599 = vmatprep.subr.bf16.mxu1 %v14372_v59  ;;  %v14384_v53 = vld [vmem:[%s18750_s9 + $0x24] ss:$16 sps:$4 sm:$0xff]   ;;  %v14379_v1 = vld [vmem:[%s18750_s9 + $0x220] ss:$16 sps:$4 sm:$0xff]  }
 0x63e   : > { %v14387_v22 = vld [vmem:[%s18750_s9 + $0x204] ss:$16 sps:$4 sm:$0xff]   ;;  %v14382_v17 = vld [vmem:[%s18750_s9 + $0x20] ss:$16 sps:$4 sm:$0xff]  }
 0x63f   : > { %11643 = vmatpush1.bf16.msra.mxu0 %v14367_v4  ;;  %v14390_v46 = vld [vmem:[%s18750_s9 + $0x4] ss:$16 sps:$4 sm:$0xff]   ;;  %v14385_v62 = vld [vmem:[%s18750_s9 + $0x200] ss:$16 sps:$4 sm:$0xff]  }
 0x640   : > { %11644 = vmatprep.subr.bf16.mxu0 %v14375_v27  ;;  %11600 = vmatpush1.bf16.msra.mxu1 %v14370_v54  ;;  %v17527_v34 = vld [vmem:[%s18749_s8] ss:$0 sm:$0xff]  ;;  %v14393_v15 = vld [vmem:[%s18750_s9 + $0x3e4] ss:$16 sps:$4 sm:$0xff]  }
 0x641   : > { %11601 = vmatprep.subr.bf16.mxu1 %v14378_v10  ;;  %v14388_v20 = vld [vmem:[%s18750_s9] ss:$16 sps:$4 sm:$0xff]   ;;  %v14396_v37 = vld [vmem:[%s18750_s9 + $0x1e4] ss:$16 sps:$4 sm:$0xff]  }
 0x642   : > { %v14391_v9 = vld [vmem:[%s18750_s9 + $0x3e0] ss:$16 sps:$4 sm:$0xff]   ;;  %v14399_v8 = vld [vmem:[%s18750_s9 + $0x3c4] ss:$16 sps:$4 sm:$0xff]  }
 0x643   : > { %11645 = vmatpush1.bf16.msra.mxu0 %v14373_v21  ;;  %v13091_v42 = vld.sshfl [vmem:[#allocation4] sm:$0x12 pattern:$0x76325410]  ;;  %v14402_v52 = vld [vmem:[%s18750_s9 + $0x1c4] ss:$16 sps:$4 sm:$0xff]  }
 0x644   : > { %11646 = vmatprep.subr.bf16.mxu0 %v14381_v3  ;;  %11602 = vmatpush1.bf16.msra.mxu1 %v14376_v19  ;;  %v9278_v45 = vcombine.high %v13091_v42, %v13091_v42  ;;  %v14394_v12 = vld [vmem:[%s18750_s9 + $0x1e0] ss:$16 sps:$4 sm:$0xff]   ;;  %v13095_v60 = vrot.slane %v13091_v42, 9  ;;  %v14405_v21 = vld [vmem:[%s18750_s9 + $0x3a4] ss:$16 sps:$4 sm:$0xff]  }
 0x645   : > { %11603 = vmatprep.subr.bf16.mxu1 %v14384_v53  ;;  %v13085_v18 = vld.sshfl [vmem:[#allocation4] sm:$0x13 pattern:$0x76325410] }
 0x646   : > { %v14397_v4 = vld [vmem:[%s18750_s9 + $0x3c0] ss:$16 sps:$4 sm:$0xff]   ;;  %v9310_v59 = vrot.slane %v9278_v45, 7 }
 0x647   : > { %11647 = vmatpush1.bf16.msra.mxu0 %v14379_v1  ;;  %v14400_v53 = vld [vmem:[%s18750_s9 + $0x1c0] ss:$16 sps:$4 sm:$0xff]  }
 0x648   : > { %11648 = vmatprep.subr.bf16.mxu0 %v14387_v22  ;;  %11604 = vmatpush1.bf16.msra.mxu1 %v14382_v17 }
 0x649   : > { %11605 = vmatprep.subr.bf16.mxu1 %v14390_v46 }
 0x64b   : > { %11649 = vmatpush1.bf16.msra.mxu0 %v14385_v62  ;;  %v14403_v62 = vld [vmem:[%s18750_s9 + $0x3a0] ss:$16 sps:$4 sm:$0xff]  }
 0x64c   : > { %11650 = vmatprep.subr.bf16.mxu0 %v14393_v15  ;;  %11606 = vmatpush1.bf16.msra.mxu1 %v14388_v20 }
 0x64d   : > { %11607 = vmatprep.subr.bf16.mxu1 %v14396_v37 }
 0x64f   : > { %11651 = vmatpush2.bf16.msra.mxu0 %v14391_v9 }
 0x650   : > { %11652 = vmatprep.subr.bf16.mxu0 %v14399_v8  ;;  %11608 = vmatpush2.bf16.msra.mxu1 %v14394_v12  ;;  %v14417_v12 = vld [vmem:[%s18750_s9 + $0x364] ss:$16 sps:$4 sm:$0xff]  }
 0x651   : > { %11609 = vmatprep.subr.bf16.mxu1 %v14402_v52 }
 0x653   : > { %11653 = vmatpush2.bf16.msra.mxu0 %v14397_v4 }
 0x654   : > { %11654 = vmatprep.subr.bf16.mxu0 %v14405_v21  ;;  %11610 = vmatpush2.bf16.msra.mxu1 %v14400_v53  ;;  %v14415_v21 = vld [vmem:[%s18750_s9 + $0x360] ss:$16 sps:$4 sm:$0xff]  }
 0x657   : > { %11655 = vmatpush2.bf16.msra.mxu0 %v14403_v62 }
 0x6c9   : > { %v17429_v57 = vpop.f32.mrf.mxu0 }
 0x6cb   : > { %v17431_v40 = vpop.f32.mrf.mxu0 }
 0x6cc   : > { %v13785_v36 = vadd.f32 %v17431_v40, %v17429_v57 }
 0x6cd   : > { %v17442_v6 = vpop.f32.mrf.mxu0 }
 0x6ce   : > { %v8412_v49 = vadd.f32 %v13785_v36, %v17527_v34  ;;  %v14408_v36 = vld [vmem:[%s18750_s9 + $0x1a4] ss:$16 sps:$4 sm:$0xff]  }
 0x6cf   : > { %v17451_v44 = vpop.f32.mrf.mxu0  ;;  %11611 = vmatprep.subr.bf16.mxu1 %v14408_v36 }
 0x6d0   : > { %v13788_v0 = vadd.f32 %v17451_v44, %v17442_v6 }
 0x6d1   : > { %v13789_v39 = vpop.f32.mrf.mxu0 }
 0x6d2   : > { %v8415_v35 = vadd.f32 %v13788_v0, %v17527_v34 }
 0x6d3   : > { %v13790_v31 = vpop.f32.mrf.mxu0 }
 0x6d4   : > { %v13791_v29 = vadd.f32 %v13790_v31, %v13789_v39 }
 0x6d5   : > { %v13792_v43 = vpop.f32.mrf.mxu0 }
 0x6d6   : > { %v8420_v32 = vadd.f32 %v13791_v29, %v17527_v34  ;;  %v17607_v29 = vsel %vm17581_vm3, %v13095_v60, %v9310_v59  ;;  %v14420_v59 = vld [vmem:[%s18750_s9 + $0x164] ss:$16 sps:$4 sm:$0xff]  }
 0x6d7   : > { %v13793_v56 = vpop.f32.mrf.mxu0 }
 0x6d8   : > { %v13794_v16 = vadd.f32 %v13793_v56, %v13792_v43 }
 0x6da   : > { %v8423_v48 = vadd.f32 %v13794_v16, %v17527_v34 }
 0x6db   : > { %v13823_v33 = vpop.f32.mrf.mxu1 }
 0x6dd   : > { %v13824_v7 = vpop.f32.mrf.mxu1 }
 0x6de   : > { %v13795_v25 = vpop.f32.mrf.mxu0  ;;  %v13825_v30 = vadd.f32 %v13824_v7, %v13823_v33 }
 0x6df   : > { %v13826_v55 = vpop.f32.mrf.mxu1 }
 0x6e0   : > { %v13796_v50 = vpop.f32.mrf.mxu0  ;;  %v8477_v14 = vadd.f32 %v13825_v30, %v8412_v49 }
 0x6e1   : > { %v13827_v26 = vpop.f32.mrf.mxu1  ;;  %v13797_v23 = vadd.f32 %v13796_v50, %v13795_v25  ;;  %v9155_v25 = vcombine.high %v13085_v18, %v13085_v18  ;;  %v14457_v50 = vld [vmem:[%s18750_s9 + $0x6c4] ss:$16 sps:$4 sm:$0xff]  }
 0x6e2   : > { %v13798_v63 = vpop.f32.mrf.mxu0  ;;  %v13828_v51 = vadd.f32 %v13827_v26, %v13826_v55  ;;  %v9188_v55 = vshrl.u32 %v13085_v18, 16 }
 0x6e3   : > { %v17567_v28 = vadd.f32 %v13797_v23, %v17527_v34  ;;  %v17594_v1 = vshll.u32 %v9155_v25, 16  ;;  %v14411_v23 = vld [vmem:[%s18750_s9 + $0x384] ss:$16 sps:$4 sm:$0xff]  }
 0x6e4   : > { %v13799_v2 = vpop.f32.mrf.mxu0  ;;  %v8480_v24 = vadd.f32 %v13828_v51, %v8415_v35  ;;  %v14406_v51 = vld [vmem:[%s18750_s9 + $0x1a0] ss:$16 sps:$4 sm:$0xff]   ;;  %11656 = vmatprep.subr.bf16.mxu0 %v14411_v23 }
 0x6e5   : > { %v13800_v6 = vadd.f32 %v13799_v2, %v13798_v63  ;;  %v9191_v2 = vshll.u32 %v13085_v18, 16  ;;  %v9199_v0 = vrot.slane %v17594_v1, 7  ;;  %11612 = vmatpush2.bf16.msra.mxu1 %v14406_v51  ;;  %v14412_v18 = vld [vmem:[%s18750_s9 + $0x180] ss:$16 sps:$4 sm:$0xff]  }
 0x6e6   : > { %v13801_v61 = vpop.f32.mrf.mxu0 }
 0x6e7   : > { %v17576_v54 = vadd.f32 %v13800_v6, %v17527_v34  ;;  %v17611_v15 = vrot.slane %v9191_v2, 7  ;;  %v14414_v6 = vld [vmem:[%s18750_s9 + $0x184] ss:$16 sps:$4 sm:$0xff]  }
 0x6e8   : > { %v13802_v38 = vpop.f32.mrf.mxu0  ;;  %11613 = vmatprep.subr.bf16.mxu1 %v14414_v6  ;;  %v14423_v2 = vld [vmem:[%s18750_s9 + $0x344] ss:$16 sps:$4 sm:$0xff]  }
 0x6e9   : > { %v13803_v44 = vadd.f32 %v13802_v38, %v13801_v61  ;;  %11614 = vmatpush2.bf16.msra.mxu1 %v14412_v18 }
 0x6ea   : > { %v13804_v41 = vpop.f32.mrf.mxu0  ;;  %11615 = vmatprep.subr.bf16.mxu1 %v14420_v59 }
 0x6eb   : > { %v13829_v58 = vpop.f32.mrf.mxu1  ;;  %v17589_v3 = vadd.f32 %v13803_v44, %v17527_v34 }
 0x6ec   : > { %v13805_v57 = vpop.f32.mrf.mxu0 }
 0x6ed   : > { %v13830_v40 = vpop.f32.mrf.mxu1  ;;  %v13806_v43 = vadd.f32 %v13805_v57, %v13804_v41  ;;  %v18932_v41 = vld [vmem:[#allocation9_spill] sm:$0xff] }
 0x6ee   : > { %v13831_v11 = vadd.f32 %v13830_v40, %v13829_v58  ;;  %v13977_v31 = vpop.f32.mrf.mxu0 }
 0x6ef   : > { %v13832_v39 = vpop.f32.mrf.mxu1  ;;  %v17597_v22 = vadd.f32 %v13806_v43, %v17527_v34  ;;  %v17609_v34 = vrot.slane %v9188_v55, 6 }
 0x6f0   : > { %v8485_v47 = vadd.f32 %v13831_v11, %v8420_v32  ;;  %v8541_v33 = vpop.f32.mrf.mxu0 }
 0x6f1   : > { %v13833_v56 = vpop.f32.mrf.mxu1  ;;  %v8542_v7 = vadd.f32 %v8541_v33, %v8477_v14  ;;  %v9194_v57 = vor.u32 %v17611_v15, %v17609_v34 }
 0x6f2   : > { %v8550_v27 = vadd.f32 %v13977_v31, %v8485_v47  ;;  %v13834_v10 = vadd.f32 %v13833_v56, %v13832_v39  ;;  %v13978_v19 = vpop.f32.mrf.mxu0 }
 0x6f3   : > { %v13835_v63 = vpop.f32.mrf.mxu1  ;;  %v8572_v17 = vmax.f32 %v8542_v7, 0.0 }
 0x6f4   : > { %v8574_v61 = vmax.f32 %v8550_v27, 0.0  ;;  %v8488_v46 = vadd.f32 %v13834_v10, %v8423_v48  ;;  %v8544_v38 = vpop.f32.mrf.mxu0  ;;  %v14409_v48 = vld [vmem:[%s18750_s9 + $0x380] ss:$16 sps:$4 sm:$0xff]  }
 0x6f5   : > { %v13836_v26 = vpop.f32.mrf.mxu1  ;;  %v8588_v20 = vcombine.high %v8572_v17, %v8572_v17  ;;  %v8595_v30 = vrot.slane %v8572_v17, %v18932_v41  ;;  %v17621_v49 = vadd.f32 %v8544_v38, %v8480_v24  ;;  %11657 = vmatpush2.bf16.msra.mxu0 %v14409_v48 }
 0x6f6   : > { %v8622_v16 = vcombine.high %v8574_v61, %v8574_v61  ;;  %v8629_v58 = vrot.slane %v8574_v61, %v18932_v41  ;;  %v8553_v5 = vadd.f32 %v13978_v19, %v8488_v46  ;;  %v17619_v37 = vadd.f32 %v13836_v26, %v13835_v63  ;;  %11658 = vmatprep.subr.bf16.mxu0 %v14417_v12  ;;  %v14418_v26 = vld [vmem:[%s18750_s9 + $0x160] ss:$16 sps:$4 sm:$0xff]  }
 0x6f7   : > { %v8602_v32 = vrot.slane %v8588_v20, %v18932_v41  ;;  %v8603_v8 = vcombine.high %v8595_v30, %v8595_v30  ;;  %v8757_v45 = vsel %vm8756_vm15, %v8595_v30, -inf  ;;  %v17652_v60 = vpop.f32.mrf.mxu1  ;;  %v14426_v30 = vld [vmem:[%s18750_s9 + $0x144] ss:$16 sps:$4 sm:$0xff]   ;;  %11616 = vmatpush2.bf16.msra.mxu1 %v14418_v26 }
 0x6f8   : > { %v8636_v40 = vrot.slane %v8622_v16, %v18932_v41  ;;  %v8637_v9 = vcombine.high %v8629_v58, %v8629_v58  ;;  %v8813_v42 = vsel %vm8756_vm15, %v8629_v58, -inf  ;;  %v17635_v35 = vmax.f32 %v8553_v5, 0.0  ;;  %11617 = vmatprep.subr.bf16.mxu1 %v14426_v30 }
 0x6f9   : > { %v8814_v11 = vrot.slane %v8813_v42, 4  ;;  %v8604_v13 = vcombine.high %v8602_v32, %v8602_v32  ;;  %v8758_v52 = vrot.slane %v8757_v45, 4  ;;  %v8764_v33 = vsel %vm8756_vm15, %v8603_v8, -inf  ;;  %v13839_v20 = vpop.f32.mrf.mxu1  ;;  %11659 = vmatpush2.bf16.msra.mxu0 %v14415_v21  ;;  %v14429_v8 = vld [vmem:[%s18750_s9 + $0x324] ss:$16 sps:$4 sm:$0xff]  }
 0x6fa   : > { %v8638_v44 = vcombine.high %v8636_v40, %v8636_v40  ;;  %v8820_v39 = vsel %vm8756_vm15, %v8637_v9, -inf  ;;  %v8827_v31 = vsel %vm8756_vm15, %v8636_v40, -inf  ;;  %v8771_v24 = vsel %vm8756_vm15, %v8602_v32, -inf  ;;  %v14421_v9 = vld [vmem:[%s18750_s9 + $0x340] ss:$16 sps:$4 sm:$0xff]   ;;  %11660 = vmatprep.subr.bf16.mxu0 %v14423_v2 }
 0x6fb   : > { %v8815_v43 = vmax.f32 %v8813_v42, %v8814_v11  ;;  %v8821_v47 = vrot.slane %v8820_v39, 4  ;;  %v8828_v14 = vrot.slane %v8827_v31, 4  ;;  %v8778_v4 = vsel %vm8756_vm15, %v8604_v13, -inf  ;;  %v14435_v21 = vld [vmem:[%s18750_s9 + $0x304] ss:$16 sps:$4 sm:$0xff]  }
 0x6fc   : > { %v8834_v56 = vsel %vm8756_vm15, %v8638_v44, -inf  ;;  %v8759_v63 = vmax.f32 %v8757_v45, %v8758_v52  ;;  %v8765_v19 = vrot.slane %v8764_v33, 4  ;;  %v8772_v53 = vrot.slane %v8771_v24, 4  ;;  %v14432_v52 = vld [vmem:[%s18750_s9 + $0x124] ss:$16 sps:$4 sm:$0xff]  }
 0x6fd   : > { %v8816_v25 = vrot.slane %v8815_v43, 2  ;;  %v8822_v27 = vmax.f32 %v8820_v39, %v8821_v47  ;;  %v8829_v10 = vmax.f32 %v8827_v31, %v8828_v14  ;;  %v8835_v7 = vrot.slane %v8834_v56, 4  ;;  %v14424_v31 = vld [vmem:[%s18750_s9 + $0x140] ss:$16 sps:$4 sm:$0xff]   ;;  %v13841_v14 = vpop.f32.mrf.mxu1  ;;  %11661 = vmatpush2.bf16.msra.mxu0 %v14421_v9 }
 0x6fe   : > { %v8779_v55 = vrot.slane %v8778_v4, 4  ;;  %v8760_v38 = vrot.slane %v8759_v63, 2  ;;  %v8766_v62 = vmax.f32 %v8764_v33, %v8765_v19  ;;  %v8773_v16 = vmax.f32 %v8771_v24, %v8772_v53  ;;  %11662 = vmatprep.subr.bf16.mxu0 %v14429_v8  ;;  %11618 = vmatpush2.bf16.msra.mxu1 %v14424_v31  ;;  %v14430_v2 = vld [vmem:[%s18750_s9 + $0x120] ss:$16 sps:$4 sm:$0xff]  }
 0x6ff   : > { %v8817_v61 = vmax.f32 %v8815_v43, %v8816_v25  ;;  %v8823_v17 = vrot.slane %v8822_v27, 2  ;;  %v8830_v46 = vrot.slane %v8829_v10, 2  ;;  %v8836_v36 = vmax.f32 %v8834_v56, %v8835_v7  ;;  %v17694_v7 = vpop.f32.mrf.mxu0  ;;  %v13842_v26 = vpop.f32.mrf.mxu1  ;;  %11619 = vmatprep.subr.bf16.mxu1 %v14432_v52 }
 0x700   : > { %v8780_v58 = vmax.f32 %v8778_v4, %v8779_v55  ;;  %v8761_v42 = vmax.f32 %v8759_v63, %v8760_v38  ;;  %v8767_v32 = vrot.slane %v8766_v62, 2  ;;  %v8774_v6 = vrot.slane %v8773_v16, 2  ;;  %v14427_v4 = vld [vmem:[%s18750_s9 + $0x320] ss:$16 sps:$4 sm:$0xff]  }
 0x701   : > { %v8818_v23 = vrot.slane %v8817_v61, 1  ;;  %v8824_v5 = vmax.f32 %v8822_v27, %v8823_v17  ;;  %v8831_v51 = vmax.f32 %v8829_v10, %v8830_v46  ;;  %v8837_v40 = vrot.slane %v8836_v36, 2  ;;  %11663 = vmatpush2.bf16.msra.mxu0 %v14427_v4 }
 0x702   : > { %v8781_v11 = vrot.slane %v8780_v58, 2  ;;  %v8762_v13 = vrot.slane %v8761_v42, 1  ;;  %v8768_v12 = vmax.f32 %v8766_v62, %v8767_v32  ;;  %v8775_v43 = vmax.f32 %v8773_v16, %v8774_v6  ;;  %11664 = vmatprep.subr.bf16.mxu0 %v14435_v21  ;;  %11620 = vmatpush2.bf16.msra.mxu1 %v14430_v2  ;;  %v14436_v6 = vld [vmem:[%s18750_s9 + $0x100] ss:$16 sps:$4 sm:$0xff]  }
 0x703   : > { %v17675_v45 = vmax.f32 %v8817_v61, %v8818_v23  ;;  %v8825_v48 = vrot.slane %v8824_v5, 1  ;;  %v8832_v44 = vrot.slane %v8831_v51, 1  ;;  %v8838_v39 = vmax.f32 %v8836_v36, %v8837_v40 }
 0x704   : > { %v8782_v47 = vmax.f32 %v8780_v58, %v8781_v11  ;;  %v8639_v24 = vcombine.high %v17635_v35, %v17635_v35  ;;  %v17692_v59 = vmax.f32 %v8761_v42, %v8762_v13  ;;  %v8769_v25 = vrot.slane %v8768_v12, 1  ;;  %v14433_v58 = vld [vmem:[%s18750_s9 + $0x300] ss:$16 sps:$4 sm:$0xff]  }
 0x705   : > { %v17683_v18 = vmax.f32 %v8824_v5, %v8825_v48  ;;  %v17685_v56 = vmax.f32 %v8831_v51, %v8832_v44  ;;  %v8839_v33 = vrot.slane %v8838_v39, 1  ;;  %v8776_v27 = vrot.slane %v8775_v43, 1  ;;  %v8557_v5 = vpop.f32.mrf.mxu0  ;;  %v14446_v51 = vld [vmem:[%s18750_s9 + $0x6e4] ss:$16 sps:$4 sm:$0xff]   ;;  %11665 = vmatpush2.bf16.msra.mxu0 %v14433_v58 }
 0x706   : > { %v8783_v10 = vrot.slane %v8782_v47, 1  ;;  %v8646_v19 = vrot.slane %v17635_v35, %v18932_v41  ;;  %v8653_v53 = vrot.slane %v8639_v24, %v18932_v41  ;;  %v8573_v55 = vmax.f32 %v17621_v49, 0.0  ;;  %v14438_v49 = vld [vmem:[%s18750_s9 + $0x104] ss:$16 sps:$4 sm:$0xff]   ;;  %11720 = vmatprep.subr.bf16.mxu0 %v14446_v51 }
 0x707   : > { %v17699_v63 = vmax.f32 %v8838_v39, %v8839_v33  ;;  %v17708_v61 = vmax.f32 %v8768_v12, %v8769_v25  ;;  %v17710_v17 = vmax.f32 %v8775_v43, %v8776_v27  ;;  %v17715_v36 = vadd.f32 %v13839_v20, %v17652_v60  ;;  %11621 = vmatprep.subr.bf16.mxu1 %v14438_v49  ;;  %v14454_v39 = vld [vmem:[%s18750_s9 + $0x4e4] ss:$16 sps:$4 sm:$0xff]  }
 0x708   : > { %v17712_v46 = vmax.f32 %v8782_v47, %v8783_v10  ;;  %v8654_v35 = vcombine.high %v8646_v19, %v8646_v19  ;;  %v8655_v38 = vcombine.high %v8653_v53, %v8653_v53  ;;  %v8841_v62 = vsel %vm8756_vm15, %v8646_v19, -inf  ;;  %11622 = vmatpush2.bf16.msra.mxu1 %v14436_v6 }
 0x709   : > { %v8855_v16 = vsel %vm8756_vm15, %v8653_v53, -inf  ;;  %v8842_v30 = vrot.slane %v8841_v62, 4  ;;  %v8605_v20 = vcombine.high %v8573_v55, %v8573_v55  ;;  %v8612_v23 = vrot.slane %v8573_v55, %v18932_v41  ;;  %11677 = vmatprep.subr.bf16.mxu1 %v14454_v39 }
 0x70a   : > { %v8856_v60 = vrot.slane %v8855_v16, 4  ;;  %v8848_v40 = vsel %vm8756_vm15, %v8654_v35, -inf  ;;  %v8862_v9 = vsel %vm8756_vm15, %v8655_v38, -inf  ;;  %v8493_v42 = vadd.f32 %v17619_v37, %v17567_v28 }
 0x70b   : > { %v17733_v32 = vadd.f32 %v13842_v26, %v13841_v14  ;;  %v8843_v11 = vmax.f32 %v8841_v62, %v8842_v30  ;;  %v8849_v8 = vrot.slane %v8848_v40, 4  ;;  %v8863_v44 = vrot.slane %v8862_v9, 4 }
 0x70c   : > { %v8857_v48 = vmax.f32 %v8855_v16, %v8856_v60  ;;  %v8619_v31 = vrot.slane %v8605_v20, %v18932_v41  ;;  %v8620_v13 = vcombine.high %v8612_v23, %v8612_v23  ;;  %v8785_v28 = vsel %vm8756_vm15, %v8612_v23, -inf }
 0x70d   : > { %v17743_v37 = vadd.f32 %v8557_v5, %v8493_v42  ;;  %v8844_v12 = vrot.slane %v8843_v11, 2  ;;  %v8850_v43 = vmax.f32 %v8848_v40, %v8849_v8  ;;  %v8864_v14 = vmax.f32 %v8862_v9, %v8863_v44 }
 0x70e   : > { %v8858_v47 = vrot.slane %v8857_v48, 2  ;;  %v8621_v52 = vcombine.high %v8619_v31, %v8619_v31  ;;  %v8786_v33 = vrot.slane %v8785_v28, 4  ;;  %v8792_v24 = vsel %vm8756_vm15, %v8620_v13, -inf }
 0x70f   : > { %v8799_v4 = vsel %vm8756_vm15, %v8619_v31, -inf  ;;  %v8845_v25 = vmax.f32 %v8843_v11, %v8844_v12  ;;  %v8851_v27 = vrot.slane %v8850_v43, 2  ;;  %v8865_v21 = vrot.slane %v8864_v14, 2 }
 0x710   : > { %v8859_v10 = vmax.f32 %v8857_v48, %v8858_v47  ;;  %v8787_v19 = vmax.f32 %v8785_v28, %v8786_v33  ;;  %v8793_v53 = vrot.slane %v8792_v24, 4  ;;  %v8800_v55 = vrot.slane %v8799_v4, 4 }
 0x711   : > { %v8806_v2 = vsel %vm8756_vm15, %v8621_v52, -inf  ;;  %v8846_v26 = vrot.slane %v8845_v25, 1  ;;  %v8852_v49 = vmax.f32 %v8850_v43, %v8851_v27  ;;  %v8866_v38 = vmax.f32 %v8864_v14, %v8865_v21 }
 0x712   : > { %v8860_v35 = vrot.slane %v8859_v10, 1  ;;  %v8788_v62 = vrot.slane %v8787_v19, 2  ;;  %v8794_v16 = vmax.f32 %v8792_v24, %v8793_v53  ;;  %v8801_v58 = vmax.f32 %v8799_v4, %v8800_v55 }
 0x713   : > { %v8807_v30 = vrot.slane %v8806_v2, 4  ;;  %v8847_v60 = vmax.f32 %v8845_v25, %v8846_v26  ;;  %v8853_v20 = vrot.slane %v8852_v49, 1  ;;  %v8867_v5 = vrot.slane %v8866_v38, 1 }
 0x714   : > { %v8861_v23 = vmax.f32 %v8859_v10, %v8860_v35  ;;  %v8789_v51 = vmax.f32 %v8787_v19, %v8788_v62  ;;  %v8795_v40 = vrot.slane %v8794_v16, 2  ;;  %v8802_v9 = vrot.slane %v8801_v58, 2 }
 0x715   : > { %v8808_v42 = vmax.f32 %v8806_v2, %v8807_v30  ;;  %v8854_v6 = vmax.f32 %v8852_v49, %v8853_v20  ;;  %v8868_v11 = vmax.f32 %v8866_v38, %v8867_v5  ;;  %v8985_v8 = vmax.f32 %v17675_v45, %v8847_v60 }
 0x716   : > { %v8987_v48 = vmax.f32 %v17685_v56, %v8861_v23  ;;  %v8790_v44 = vrot.slane %v8789_v51, 1  ;;  %v8796_v39 = vmax.f32 %v8794_v16, %v8795_v40  ;;  %v8803_v31 = vmax.f32 %v8801_v58, %v8802_v9 }
 0x717   : > { %v8809_v13 = vrot.slane %v8808_v42, 2  ;;  %v8986_v28 = vmax.f32 %v17683_v18, %v8854_v6  ;;  %v8988_v12 = vmax.f32 %v17699_v63, %v8868_v11  ;;  %v13561_v43 = vpack.c.bf16 %v8985_v8, %v8985_v8 }
 0x718   : > { %v13563_v47 = vpack.c.bf16 %v8987_v48, %v8987_v48  ;;  %v8791_v14 = vmax.f32 %v8789_v51, %v8790_v44  ;;  %v8797_v52 = vrot.slane %v8796_v39, 1  ;;  %v8804_v33 = vrot.slane %v8803_v31, 1 }
 0x719   : > { %v8810_v24 = vmax.f32 %v8808_v42, %v8809_v13  ;;  %v13562_v4 = vpack.c.bf16 %v8986_v28, %v8986_v28  ;;  %v13564_v25 = vpack.c.bf16 %v8988_v12, %v8988_v12  ;;  %v9065_v27 = vunpack.c.l.b16 %v13561_v43 }
 0x71a   : > { %v9067_v45 = vunpack.c.l.b16 %v13563_v47  ;;  %v8798_v10 = vmax.f32 %v8796_v39, %v8797_v52  ;;  %v8805_v56 = vmax.f32 %v8803_v31, %v8804_v33  ;;  %v8981_v19 = vmax.f32 %v17692_v59, %v8791_v14  ;;  %v9100_v47 = vld [vmem:[#allocation4 + $0x4] sm:$0x7] }
 0x71b   : > { %v8811_v21 = vrot.slane %v8810_v24, 1  ;;  %v9066_v53 = vunpack.c.l.b16 %v13562_v4  ;;  %v9068_v55 = vunpack.c.l.b16 %v13564_v25  ;;  %v8576_v18 = vmax.f32 %v17743_v37, 0.0 }
 0x71c   : > { %v8501_v63 = vadd.f32 %v17733_v32, %v17589_v3  ;;  %v8982_v26 = vmax.f32 %v17708_v61, %v8798_v10  ;;  %v8983_v49 = vmax.f32 %v17710_v17, %v8805_v56  ;;  %v13557_v35 = vpack.c.bf16 %v8981_v19, %v8981_v19  ;;  %v9103_v17 = vld [vmem:[#allocation4 + $0x8] sm:$0x7] }
 0x71d   : > { %v8812_v2 = vmax.f32 %v8810_v24, %v8811_v21  ;;  %v9080_v38 = vsel %vm589_vm8, %v9066_v53, %v9065_v27  ;;  %v8656_v62 = vcombine.high %v8576_v18, %v8576_v18  ;;  %v8663_v16 = vrot.slane %v8576_v18, %v18932_v41 }
 0x71e   : > { %v8566_v59 = vadd.f32 %v17694_v7, %v8501_v63  ;;  %v9081_v58 = vsel %vm3103_vm9, %v9067_v45, %v9080_v38  ;;  %v13558_v30 = vpack.c.bf16 %v8982_v26, %v8982_v26  ;;  %v13559_v60 = vpack.c.bf16 %v8983_v49, %v8983_v49  ;;  %v13844_v38 = vpop.f32.mrf.mxu1 }
 0x71f   : > { %v8984_v37 = vmax.f32 %v17712_v46, %v8812_v2  ;;  %v9082_v3 = vsel %vm3105_vm10, %v9068_v55, %v9081_v58  ;;  %v9061_v32 = vunpack.c.l.b16 %v13557_v35  ;;  %v8670_v20 = vrot.slane %v8656_v62, %v18932_v41  ;;  %v17771_v46 = vpop.f32.mrf.mxu0 }
 0x720   : > { %v8671_v23 = vcombine.high %v8663_v16, %v8663_v16  ;;  %v9090_v7 = vpack.c.b16 %v9082_v3, %v9082_v3  ;;  %v9062_v51 = vunpack.c.l.b16 %v13558_v30  ;;  %v9063_v40 = vunpack.c.l.b16 %v13559_v60 }
 0x721   : > { %v13560_v5 = vpack.c.bf16 %v8984_v37, %v8984_v37  ;;  %v8672_v9 = vcombine.high %v8670_v20, %v8670_v20  ;;  %v8869_v42 = vsel %vm8756_vm15, %v8663_v16, -inf  ;;  %v8883_v11 = vsel %vm8756_vm15, %v8670_v20, -inf  ;;  %v8560_v24 = vpop.f32.mrf.mxu0 }
 0x722   : > { %v8876_v6 = vsel %vm8756_vm15, %v8671_v23, -inf  ;;  %v9104_v8 = vsel %vm17766_vm6, %v9090_v7, %v9103_v17  ;;  %v9077_v44 = vsel %vm589_vm8, %v9062_v51, %v9061_v32  ;;  %v8870_v39 = vrot.slane %v8869_v42, 4  ;;  %v13845_v51 = vpop.f32.mrf.mxu1 }
 0x723   : > { %v9064_v48 = vunpack.c.l.b16 %v13560_v5  ;;  %9105 = vst [vmem:[#allocation4 + $0x8] sm:$0x7] %v9104_v8  ;;  %v9078_v31 = vsel %vm3103_vm9, %v9063_v40, %v9077_v44  ;;  %v8877_v13 = vrot.slane %v8876_v6, 4  ;;  %v8884_v28 = vrot.slane %v8883_v11, 4 }
 0x724   : > { %v8890_v12 = vsel %vm8756_vm15, %v8672_v9, -inf  ;;  %v8871_v14 = vmax.f32 %v8869_v42, %v8870_v39  ;;  %v8578_v33 = vmax.f32 %v8566_v59, 0.0  ;;  %v8496_v45 = vadd.f32 %v17715_v36, %v17576_v54 }
 0x725   : > { %v9079_v43 = vsel %vm3105_vm10, %v9064_v48, %v9078_v31  ;;  %v8891_v52 = vrot.slane %v8890_v12, 4  ;;  %v8878_v25 = vmax.f32 %v8876_v6, %v8877_v13  ;;  %v8885_v27 = vmax.f32 %v8883_v11, %v8884_v28 }
 0x726   : > { %v9089_v4 = vpack.c.b16 %v9079_v43, %v9079_v43  ;;  %v8872_v10 = vrot.slane %v8871_v14, 2  ;;  %v8690_v21 = vcombine.high %v8578_v33, %v8578_v33  ;;  %v8697_v19 = vrot.slane %v8578_v33, %v18932_v41 }
 0x727   : > { %v8892_v56 = vmax.f32 %v8890_v12, %v8891_v52  ;;  %v8879_v55 = vrot.slane %v8878_v25, 2  ;;  %v8886_v18 = vrot.slane %v8885_v27, 2  ;;  %v8561_v63 = vadd.f32 %v8560_v24, %v8496_v45 }
 0x728   : > { %v9101_v53 = vsel %vm17766_vm6, %v9089_v4, %v9100_v47  ;;  %v8873_v2 = vmax.f32 %v8871_v14, %v8872_v10  ;;  %v8704_v49 = vrot.slane %v8690_v21, %v18932_v41  ;;  %v8705_v35 = vcombine.high %v8697_v19, %v8697_v19 }
 0x729   : > { %9102 = vst [vmem:[#allocation4 + $0x4] sm:$0x7] %v9101_v53  ;;  %v8893_v26 = vrot.slane %v8892_v56, 2  ;;  %v8880_v62 = vmax.f32 %v8878_v25, %v8879_v55  ;;  %v8887_v54 = vmax.f32 %v8885_v27, %v8886_v18  ;;  %v8925_v36 = vsel %vm8756_vm15, %v8697_v19, -inf }
 0x72a   : > { %v8577_v16 = vmax.f32 %v8561_v63, 0.0  ;;  %v8874_v59 = vrot.slane %v8873_v2, 1  ;;  %v8706_v37 = vcombine.high %v8704_v49, %v8704_v49  ;;  %v8926_v30 = vrot.slane %v8925_v36, 4 }
 0x72b   : > { %v8894_v58 = vmax.f32 %v8892_v56, %v8893_v26  ;;  %v8881_v60 = vrot.slane %v8880_v62, 1  ;;  %v8888_v3 = vrot.slane %v8887_v54, 1  ;;  %v8932_v17 = vsel %vm8756_vm15, %v8705_v35, -inf }
 0x72c   : > { %v8939_v32 = vsel %vm8756_vm15, %v8704_v49, -inf  ;;  %v17791_v20 = vmax.f32 %v8873_v2, %v8874_v59  ;;  %v8927_v7 = vmax.f32 %v8925_v36, %v8926_v30  ;;  %v8933_v5 = vrot.slane %v8932_v17, 4 }
 0x72d   : > { %v8895_v23 = vrot.slane %v8894_v58, 1  ;;  %v17793_v40 = vmax.f32 %v8880_v62, %v8881_v60  ;;  %v17795_v9 = vmax.f32 %v8887_v54, %v8888_v3  ;;  %v8940_v42 = vrot.slane %v8939_v32, 4 }
 0x72e   : > { %v8946_v6 = vsel %vm8756_vm15, %v8706_v37, -inf  ;;  %v8928_v8 = vrot.slane %v8927_v7, 2  ;;  %v8934_v48 = vmax.f32 %v8932_v17, %v8933_v5  ;;  %v8673_v31 = vcombine.high %v8577_v16, %v8577_v16 }
 0x72f   : > { %v17798_v11 = vmax.f32 %v8894_v58, %v8895_v23  ;;  %v8947_v44 = vrot.slane %v8946_v6, 4  ;;  %v8941_v39 = vmax.f32 %v8939_v32, %v8940_v42  ;;  %v8680_v13 = vrot.slane %v8577_v16, %v18932_v41 }
 0x730   : > { %v13846_v28 = vadd.f32 %v13845_v51, %v13844_v38  ;;  %v17801_v12 = vld.sshfl [vmem:[#allocation4 + $0x4] sm:$0x12 pattern:$0x76325410]  ;;  %v8929_v43 = vmax.f32 %v8927_v7, %v8928_v8  ;;  %v8935_v47 = vrot.slane %v8934_v48, 2  ;;  %v8687_v4 = vrot.slane %v8673_v31, %v18932_v41 }
 0x731   : > { %v8948_v14 = vmax.f32 %v8946_v6, %v8947_v44  ;;  %v9286_v52 = vcombine.high %v17801_v12, %v17801_v12  ;;  %v14439_v33 = vld [vmem:[#allocation4 + $0x4] sm:$0x33]   ;;  %v8942_v24 = vrot.slane %v8941_v39, 2  ;;  %v8688_v25 = vcombine.high %v8680_v13, %v8680_v13 }
 0x732   : > { %v8897_v27 = vsel %vm8756_vm15, %v8680_v13, -inf  ;;  %v14447_v45 = vld [vmem:[#allocation4] sm:$0x33]   ;;  %v8930_v10 = vrot.slane %v8929_v43, 1  ;;  %v8936_v56 = vmax.f32 %v8934_v48, %v8935_v47  ;;  %v8689_v55 = vcombine.high %v8687_v4, %v8687_v4 }
 0x733   : > { %v8949_v21 = vrot.slane %v8948_v14, 2  ;;  %v8898_v19 = vrot.slane %v8897_v27, 4  ;;  %13101 = vst.sshfl [vmem:[#allocation5 + $0xc] sm:$0x33 pattern:$0x76325410] %v14439_v33  ;;  %v8943_v53 = vmax.f32 %v8941_v39, %v8942_v24  ;;  %v8504_v32 = vadd.f32 %v13846_v28, %v17597_v22 }
 0x734   : > { %v8904_v18 = vsel %vm8756_vm15, %v8688_v25, -inf  ;;  %v8911_v63 = vsel %vm8756_vm15, %v8687_v4, -inf  ;;  %13083 = vst.sshfl [vmem:[#allocation5] sm:$0x33 pattern:$0x76325410] %v14447_v45  ;;  %v17809_v2 = vmax.f32 %v8929_v43, %v8930_v10 }
 0x735   : > { %v8937_v26 = vrot.slane %v8936_v56, 1  ;;  %v8950_v49 = vmax.f32 %v8948_v14, %v8949_v21  ;;  %v8899_v35 = vmax.f32 %v8897_v27, %v8898_v19  ;;  %v13093_v38 = vld.sshfl [vmem:[#allocation4 + $0x8] sm:$0x12 pattern:$0x76325410]  ;;  %v8944_v62 = vrot.slane %v8943_v53, 1 }
 0x736   : > { %v8905_v54 = vrot.slane %v8904_v18, 4  ;;  %v8912_v36 = vrot.slane %v8911_v63, 4  ;;  %v8918_v16 = vsel %vm8756_vm15, %v8689_v55, -inf  ;;  %v9294_v51 = vcombine.high %v13093_v38, %v13093_v38 }
 0x737   : > { %v17812_v59 = vmax.f32 %v8936_v56, %v8937_v26  ;;  %v8951_v58 = vrot.slane %v8950_v49, 1  ;;  %v8900_v37 = vrot.slane %v8899_v35, 2  ;;  %v8919_v30 = vrot.slane %v8918_v16, 4 }
 0x738   : > { %v17814_v60 = vmax.f32 %v8943_v53, %v8944_v62  ;;  %v8906_v3 = vmax.f32 %v8904_v18, %v8905_v54  ;;  %v8913_v17 = vmax.f32 %v8911_v63, %v8912_v36  ;;  %v17819_v42 = vld.sshfl [vmem:[#allocation4 + $0x4] sm:$0x13 pattern:$0x76325410]  ;;  %v8569_v48 = vadd.f32 %v17771_v46, %v8504_v32  ;;  %v14455_v32 = vld [vmem:[%s18750_s9 + $0x6c0] ss:$16 sps:$4 sm:$0xff]  }
 0x739   : > { %v17817_v23 = vmax.f32 %v8950_v49, %v8951_v58  ;;  %v8901_v7 = vmax.f32 %v8899_v35, %v8900_v37  ;;  %v8920_v5 = vmax.f32 %v8918_v16, %v8919_v30  ;;  %v13096_v44 = vrot.slane %v17801_v12, 9 }
 0x73a   : > { %v8907_v6 = vrot.slane %v8906_v3, 2  ;;  %v8914_v8 = vrot.slane %v8913_v17, 2  ;;  %v9314_v13 = vrot.slane %v9286_v52, 7  ;;  %v13097_v43 = vrot.slane %v13093_v38, 9 }
 0x73b   : > { %v8902_v39 = vrot.slane %v8901_v7, 1  ;;  %v8921_v31 = vrot.slane %v8920_v5, 2  ;;  %v8579_v28 = vmax.f32 %v8569_v48, 0.0  ;;  %v9318_v14 = vrot.slane %v9294_v51, 7 }
 0x73c   : > { %v8908_v47 = vmax.f32 %v8906_v3, %v8907_v6  ;;  %v8915_v22 = vmax.f32 %v8913_v17, %v8914_v8  ;;  %v17825_v4 = vsel %vm17581_vm3, %v13096_v44, %v9314_v13  ;;  %v9163_v25 = vcombine.high %v17819_v42, %v17819_v42  ;;  %v17830_v52 = vld.sshfl [vmem:[#allocation4 + $0x8] sm:$0x13 pattern:$0x76325410] }
 0x73d   : > { %v8903_v33 = vmax.f32 %v8901_v7, %v8902_v39  ;;  %v8922_v24 = vmax.f32 %v8920_v5, %v8921_v31  ;;  %v8707_v12 = vcombine.high %v8579_v28, %v8579_v28  ;;  %v8714_v45 = vrot.slane %v8579_v28, %v18932_v41 }
 0x73e   : > { %v8909_v46 = vrot.slane %v8908_v47, 1  ;;  %v8916_v27 = vrot.slane %v8915_v22, 1  ;;  %v17837_v21 = vsel %vm17581_vm3, %v13097_v43, %v9318_v14  ;;  %v9324_v19 = vcombine.low %v17607_v29, %v17825_v4 }
 0x73f   : > { %v8923_v10 = vrot.slane %v8922_v24, 1  ;;  %v8989_v56 = vmax.f32 %v17791_v20, %v8903_v33  ;;  %v8721_v18 = vrot.slane %v8707_v12, %v18932_v41  ;;  %v8722_v63 = vcombine.high %v8714_v45, %v8714_v45  ;;  %v9106_v33 = vld [vmem:[#allocation4 + $0xc] sm:$0x7] }
 0x740   : > { %v8910_v53 = vmax.f32 %v8908_v47, %v8909_v46  ;;  %v8917_v55 = vmax.f32 %v8915_v22, %v8916_v27  ;;  %v8953_v35 = vsel %vm8756_vm15, %v8714_v45, -inf  ;;  %13099 = vst.sshfl [vmem:[#allocation5 + $0x8] sm:$0x33 pattern:$0x76325410] %v9324_v19  ;;  %v9171_v20 = vcombine.high %v17830_v52, %v17830_v52 }
 0x741   : > { %v8924_v26 = vmax.f32 %v8922_v24, %v8923_v10  ;;  %v13565_v49 = vpack.c.bf16 %v8989_v56, %v8989_v56  ;;  %v8723_v29 = vcombine.high %v8721_v18, %v8721_v18  ;;  %v8954_v54 = vrot.slane %v8953_v35, 4 }
 0x742   : > { %v8990_v38 = vmax.f32 %v17793_v40, %v8910_v53  ;;  %v8991_v62 = vmax.f32 %v17795_v9, %v8917_v55  ;;  %v8960_v16 = vsel %vm8756_vm15, %v8722_v63, -inf  ;;  %v8967_v58 = vsel %vm8756_vm15, %v8721_v18, -inf }
 0x743   : > { %v8992_v36 = vmax.f32 %v17798_v11, %v8924_v26  ;;  %v9069_v41 = vunpack.c.l.b16 %v13565_v49  ;;  %v8955_v3 = vmax.f32 %v8953_v35, %v8954_v54  ;;  %v8961_v17 = vrot.slane %v8960_v16, 4 }
 0x744   : > { %v13566_v37 = vpack.c.bf16 %v8990_v38, %v8990_v38  ;;  %v13567_v30 = vpack.c.bf16 %v8991_v62, %v8991_v62  ;;  %v8968_v9 = vrot.slane %v8967_v58, 4  ;;  %v8974_v7 = vsel %vm8756_vm15, %v8723_v29, -inf }
 0x745   : > { %v13568_v40 = vpack.c.bf16 %v8992_v36, %v8992_v36  ;;  %v9195_v11 = vrot.slane %v9194_v57, 2  ;;  %v8956_v6 = vrot.slane %v8955_v3, 2  ;;  %v8962_v8 = vmax.f32 %v8960_v16, %v8961_v17 }
 0x746   : > { %v9070_v5 = vunpack.c.l.b16 %v13566_v37  ;;  %v9071_v51 = vunpack.c.l.b16 %v13567_v30  ;;  %v8969_v44 = vmax.f32 %v8967_v58, %v8968_v9  ;;  %v8975_v39 = vrot.slane %v8974_v7, 4 }
 0x747   : > { %v9072_v48 = vunpack.c.l.b16 %v13568_v40  ;;  %v9200_v31 = vsel %vm17852_vm7, %v9195_v11, %v9199_v0  ;;  %v8957_v43 = vmax.f32 %v8955_v3, %v8956_v6  ;;  %v8963_v47 = vrot.slane %v8962_v8, 2 }
 0x748   : > { %v9083_v13 = vsel %vm589_vm8, %v9070_v5, %v9069_v41  ;;  %v9202_v22 = vshrl.u32 %v17819_v42, 16  ;;  %v8970_v15 = vrot.slane %v8969_v44, 2  ;;  %v8976_v57 = vmax.f32 %v8974_v7, %v8975_v39  ;;  %v13127_v5 = vld.sshfl [vmem:[#allocation4 + $0x8] sm:$0x12 pattern:$0x76325410] }
 0x749   : > { %v9084_v34 = vsel %vm3103_vm9, %v9071_v51, %v9083_v13  ;;  %v9205_v28 = vshll.u32 %v17819_v42, 16  ;;  %v8958_v24 = vrot.slane %v8957_v43, 1  ;;  %v8964_v1 = vmax.f32 %v8962_v8, %v8963_v47  ;;  %v9109_v47 = vld [vmem:[#allocation4 + $0x10] sm:$0x7] }
 0x74a   : > { %v9085_v14 = vsel %vm3105_vm10, %v9072_v48, %v9084_v34  ;;  %v9204_v46 = vrot.slane %v9202_v22, 6  ;;  %v8971_v0 = vmax.f32 %v8969_v44, %v8970_v15  ;;  %v8977_v12 = vrot.slane %v8976_v57, 2 }
 0x74b   : > { %v9091_v27 = vpack.c.b16 %v9085_v14, %v9085_v14  ;;  %v9207_v45 = vrot.slane %v9205_v28, 7  ;;  %v8959_v10 = vmax.f32 %v8957_v43, %v8958_v24  ;;  %v8965_v56 = vrot.slane %v8964_v1, 1 }
 0x74c   : > { %v9211_v19 = vshll.u32 %v9163_v25, 16  ;;  %v9216_v53 = vshrl.u32 %v17830_v52, 16  ;;  %v8972_v18 = vrot.slane %v8971_v0, 1  ;;  %v8978_v63 = vmax.f32 %v8976_v57, %v8977_v12 }
 0x74d   : > { %v9107_v55 = vsel %vm17766_vm6, %v9091_v27, %v9106_v33  ;;  %v9208_v26 = vor.u32 %v9207_v45, %v9204_v46  ;;  %v8966_v49 = vmax.f32 %v8964_v1, %v8965_v56  ;;  %v8993_v35 = vmax.f32 %v17809_v2, %v8959_v10  ;;  %v13130_v10 = vld.sshfl [vmem:[#allocation4 + $0x14] sm:$0x12 pattern:$0x76325410] }
 0x74e   : > { %9108 = vst [vmem:[#allocation4 + $0xc] sm:$0x7] %v9107_v55  ;;  %v9213_v38 = vrot.slane %v9211_v19, 7  ;;  %v9218_v62 = vrot.slane %v9216_v53, 6  ;;  %v8973_v29 = vmax.f32 %v8971_v0, %v8972_v18  ;;  %v8979_v54 = vrot.slane %v8978_v63, 1 }
 0x74f   : > { %v9209_v36 = vrot.slane %v9208_v26, 2  ;;  %v9219_v42 = vshll.u32 %v17830_v52, 16  ;;  %v8994_v25 = vmax.f32 %v17812_v59, %v8966_v49  ;;  %v13569_v41 = vpack.c.bf16 %v8993_v35, %v8993_v35 }
 0x750   : > { %v9225_v16 = vshll.u32 %v9171_v20, 16  ;;  %v9544_v58 = vcombine.low %v17825_v4, %v17837_v21  ;;  %v8980_v37 = vmax.f32 %v8978_v63, %v8979_v54  ;;  %v8995_v2 = vmax.f32 %v17814_v60, %v8973_v29  ;;  %v13124_v60 = vld.sshfl [vmem:[#allocation4 + $0x14] sm:$0x13 pattern:$0x76325410] }
 0x751   : > { %v9214_v30 = vsel %vm17852_vm7, %v9209_v36, %v9213_v38  ;;  %v9221_v3 = vrot.slane %v9219_v42, 7  ;;  %v13570_v17 = vpack.c.bf16 %v8994_v25, %v8994_v25  ;;  %v9073_v11 = vunpack.c.l.b16 %v13569_v41 }
 0x752   : > { %v9243_v40 = vcombine.low %v9200_v31, %v9214_v30  ;;  %13117 = vst.sshfl [vmem:[#allocation5 + $0x14] sm:$0x33 pattern:$0x76325410] %v9544_v58  ;;  %v8996_v59 = vmax.f32 %v17817_v23, %v8980_v37  ;;  %v13571_v9 = vpack.c.bf16 %v8995_v2, %v8995_v2  ;;  %v9227_v20 = vrot.slane %v9225_v16, 7 }
 0x753   : > { %v9222_v7 = vor.u32 %v9221_v3, %v9218_v62  ;;  %v9074_v52 = vunpack.c.l.b16 %v13570_v17  ;;  %v9724_v46 = vcombine.high %v13127_v5, %v13127_v5  ;;  %v9676_v45 = vshrl.u32 %v13124_v60, 16 }
 0x754   : > { %13089 = vst.sshfl [vmem:[#allocation5 + $0x4] sm:$0x33 pattern:$0x76325410] %v9243_v40  ;;  %v13572_v4 = vpack.c.bf16 %v8996_v59, %v8996_v59  ;;  %v9075_v51 = vunpack.c.l.b16 %v13571_v9  ;;  %v9679_v55 = vshll.u32 %v13124_v60, 16  ;;  %v9632_v49 = vcombine.high %v13124_v60, %v13124_v60 }
 0x755   : > { %v13094_v6 = vld.sshfl [vmem:[#allocation4 + $0xc] sm:$0x12 pattern:$0x76325410]  ;;  %v9086_v8 = vsel %vm589_vm8, %v9074_v52, %v9073_v11  ;;  %v9223_v31 = vrot.slane %v9222_v7, 2  ;;  %v9751_v35 = vrot.slane %v9724_v46, 7  ;;  %v9748_v38 = vcombine.high %v13130_v10, %v13130_v10 }
 0x756   : > { %v9302_v48 = vcombine.high %v13094_v6, %v13094_v6  ;;  %v13098_v44 = vrot.slane %v13094_v6, 9  ;;  %v14448_v39 = vld [vmem:[#allocation4 + $0x8] sm:$0x33]   ;;  %v9076_v13 = vunpack.c.l.b16 %v13572_v4  ;;  %v9087_v23 = vsel %vm3103_vm9, %v9075_v51, %v9086_v8 }
 0x757   : > { %v13088_v43 = vld.sshfl [vmem:[#allocation4 + $0xc] sm:$0x13 pattern:$0x76325410]  ;;  %v9228_v15 = vsel %vm17852_vm7, %v9223_v31, %v9227_v20  ;;  %v13131_v62 = vrot.slane %v13127_v5, 9  ;;  %v9681_v25 = vrot.slane %v9679_v55, 7 }
 0x758   : > { %v9322_v22 = vrot.slane %v9302_v48, 7  ;;  %13084 = vst.sshfl [vmem:[#allocation5 + $0x24] sm:$0x33 pattern:$0x76325410] %v14448_v39  ;;  %v9179_v34 = vcombine.high %v13088_v43, %v13088_v43  ;;  %v9230_v57 = vshrl.u32 %v13088_v43, 16  ;;  %v9088_v14 = vsel %vm3105_vm10, %v9076_v13, %v9087_v23 }
 0x759   : > { %v14470_v28 = vld [vmem:[#allocation4 + $0x8] sm:$0x33]   ;;  %v9233_v33 = vshll.u32 %v13088_v43, 16  ;;  %v9468_v24 = vcombine.low %v9214_v30, %v9228_v15  ;;  %v9092_v27 = vpack.c.b16 %v9088_v14, %v9088_v14  ;;  %v9752_v41 = vsel %vm17581_vm3, %v13131_v62, %v9751_v35  ;;  %v14452_v31 = vld [vmem:[%s18750_s9 + $0x4e0] ss:$16 sps:$4 sm:$0xff]  }
 0x75a   : > { %v13128_v1 = vld.sshfl [vmem:[#allocation4 + $0xc] sm:$0x12 pattern:$0x76325410]  ;;  %v17894_v0 = vsel %vm17581_vm3, %v13098_v44, %v9322_v22  ;;  %v9232_v12 = vrot.slane %v9230_v57, 6  ;;  %v9239_v53 = vshll.u32 %v9179_v34, 16 }
 0x75b   : > { %13119 = vst.sshfl [vmem:[#allocation5 + $0x18] sm:$0x33 pattern:$0x76325410] %v14470_v28  ;;  %v9332_v56 = vcombine.low %v17837_v21, %v17894_v0  ;;  %v9235_v19 = vrot.slane %v9233_v33, 7  ;;  %v9110_v18 = vsel %vm17766_vm6, %v9092_v27, %v9109_v47  ;;  %v9732_v63 = vcombine.high %v13128_v1, %v13128_v1 }
 0x75c   : > { %13107 = vst.sshfl [vmem:[#allocation5 + $0x10] sm:$0x33 pattern:$0x76325410] %v9468_v24  ;;  %9111 = vst [vmem:[#allocation4 + $0x10] sm:$0x7] %v9110_v18 }
 0x75d   : > { %13100 = vst.sshfl [vmem:[#allocation5 + $0x2c] sm:$0x33 pattern:$0x76325410] %v9332_v56  ;;  %v9236_v26 = vor.u32 %v9235_v19, %v9232_v12  ;;  %v13132_v29 = vrot.slane %v13128_v1, 9  ;;  %v9755_v54 = vrot.slane %v9732_v63, 7 }
 0x75e   : > { %v9241_v42 = vrot.slane %v9239_v53, 7  ;;  %v9678_v21 = vrot.slane %v9676_v45, 6  ;;  %v9685_v30 = vshll.u32 %v9632_v49, 16  ;;  %v13134_v3 = vrot.slane %v13130_v10, 9  ;;  %v14444_v23 = vld [vmem:[%s18750_s9 + $0x6e0] ss:$16 sps:$4 sm:$0xff]  }
 0x75f   : > { %v9237_v36 = vrot.slane %v9236_v26, 2  ;;  %v9756_v61 = vsel %vm17581_vm3, %v13132_v29, %v9755_v54  ;;  %v9763_v17 = vrot.slane %v9748_v38, 7  ;;  %v17914_v43 = vld [vmem:[#allocation5] ss:$36 sps:$4 sm:$0xff]   ;;  %v14458_v27 = vld [vmem:[%s18750_s9 + $0x4c0] ss:$16 sps:$4 sm:$0xff]  }
 0x760   : > { %v9765_v58 = vcombine.low %v9752_v41, %v9756_v61  ;;  %v9682_v2 = vor.u32 %v9681_v25, %v9678_v21  ;;  %v9687_v51 = vrot.slane %v9685_v30, 7  ;;  %v14466_v45 = vld [vmem:[%s18750_s9 + $0x4a4] ss:$16 sps:$4 sm:$0xff]   ;;  %v14464_v56 = vld [vmem:[%s18750_s9 + $0x4a0] ss:$16 sps:$4 sm:$0xff]   ;;  %vm12405_vm8 = vcmask 253952  }
 0x761   : > { %v9242_v16 = vsel %vm17852_vm7, %v9237_v36, %v9241_v42  ;;  %v9764_v39 = vsel %vm17581_vm3, %v13134_v3, %v9763_v17  ;;  %v14463_v10 = vld [vmem:[%s18750_s9 + $0x6a4] ss:$16 sps:$4 sm:$0xff]   ;;  %v14461_v53 = vld [vmem:[%s18750_s9 + $0x6a0] ss:$16 sps:$4 sm:$0xff]   ;;  %vm12417_vm9 = vcmask 0  }
 0x762   : > { %v9251_v37 = vcombine.low %v9228_v15, %v9242_v16  ;;  %13135 = vst.sshfl [vmem:[#allocation5 + $0x20] sm:$0x33 pattern:$0x76325410] %v9765_v58  ;;  %v9683_v4 = vrot.slane %v9682_v2, 2 }
 0x763   : > { %v14440_v40 = vld [vmem:[#allocation4 + $0xc] sm:$0x33]   ;;  %v14460_v15 = vld [vmem:[%s18750_s9 + $0x4c4] ss:$16 sps:$4 sm:$0xff]  }
 0x764   : > { %13090 = vst.sshfl [vmem:[#allocation5 + $0x28] sm:$0x33 pattern:$0x76325410] %v9251_v37  ;;  %v14471_v9 = vld [vmem:[#allocation4 + $0x10] sm:$0x33]   ;;  %v9688_v34 = vsel %vm17852_vm7, %v9683_v4, %v9687_v51 }
 0x765   : > { %13125 = vst.sshfl [vmem:[#allocation5 + $0x1c] sm:$0x33 pattern:$0x76325410] %v9251_v37  ;;  %v17926_v24 = vld [vmem:[#allocation5 + $0x8] ss:$36 sps:$4 sm:$0xff]  }
 0x766   : > { %v13106_v59 = vld.sshfl [vmem:[#allocation4 + $0x10] sm:$0x13 pattern:$0x76325410]  ;;  %v14480_v19 = vld [vmem:[%s18750_s9 + $0x484] ss:$16 sps:$4 sm:$0xff]  }
 0x767   : > { %13102 = vst.sshfl [vmem:[#allocation5 + $0x30] sm:$0x33 pattern:$0x76325410] %v14440_v40  ;;  %v9411_v7 = vcombine.high %v13106_v59, %v13106_v59  ;;  %v9455_v11 = vshrl.u32 %v13106_v59, 16  ;;  %v9458_v52 = vshll.u32 %v13106_v59, 16 }
 0x768   : > { %v13112_v20 = vld.sshfl [vmem:[#allocation4 + $0x10] sm:$0x12 pattern:$0x76325410]  ;;  %v14477_v55 = vld [vmem:[%s18750_s9 + $0x684] ss:$16 sps:$4 sm:$0xff]  }
 0x769   : > { %v9527_v5 = vcombine.high %v13112_v20, %v13112_v20  ;;  %13120 = vst.sshfl [vmem:[#allocation5 + $0x3c] sm:$0x33 pattern:$0x76325410] %v14471_v9  ;;  %v9457_v6 = vrot.slane %v9455_v11, 6  ;;  %v9460_v60 = vrot.slane %v9458_v52, 7 }
 0x76a   : > { %v9464_v8 = vshll.u32 %v9411_v7, 16  ;;  %v13116_v48 = vrot.slane %v13112_v20, 9  ;;  %v14478_v18 = vld [vmem:[%s18750_s9 + $0x480] ss:$16 sps:$4 sm:$0xff]   ;;  %v14486_v26 = vld [vmem:[%s18750_s9 + $0x464] ss:$16 sps:$4 sm:$0xff]  }
 0x76b   : > { %v9542_v44 = vrot.slane %v9527_v5, 7  ;;  %v9461_v13 = vor.u32 %v9460_v60, %v9457_v6  ;;  %v17916_v47 = vld [vmem:[#allocation5 + $0x4] ss:$36 sps:$4 sm:$0xff]   ;;  %v14483_v38 = vld [vmem:[%s18750_s9 + $0x664] ss:$16 sps:$4 sm:$0xff]  }
 0x76c   : > { %v9466_v28 = vrot.slane %v9464_v8, 7  ;;  %11623 = vmatprep.mubr.bf16.mxu1 %v17916_v47  ;;  %v14475_v35 = vld [vmem:[%s18750_s9 + $0x680] ss:$16 sps:$4 sm:$0xff]   ;;  %v14492_v29 = vld [vmem:[%s18750_s9 + $0x444] ss:$16 sps:$4 sm:$0xff]  }
 0x76d   : > { %v9543_v22 = vsel %vm17581_vm3, %v13116_v48, %v9542_v44  ;;  %v9462_v57 = vrot.slane %v9461_v13, 2  ;;  %11624 = vmatmul.mubr.bf16.vlgmr.msra.gmra.mxu1 %v17914_v43  ;;  %v14484_v62 = vld [vmem:[%s18750_s9 + $0x460] ss:$16 sps:$4 sm:$0xff]   ;;  %v14489_v36 = vld [vmem:[%s18750_s9 + $0x644] ss:$16 sps:$4 sm:$0xff]  }
 0x76e   : > { %v9552_v14 = vcombine.low %v17894_v0, %v9543_v22  ;;  %v9773_v33 = vcombine.low %v9543_v22, %v9764_v39  ;;  %v17928_v1 = vld [vmem:[#allocation5 + $0xc] ss:$36 sps:$4 sm:$0xff]   ;;  %11678 = vmatpush1.bf16.msra.mxu1 %v14452_v31  ;;  %v14481_v54 = vld [vmem:[%s18750_s9 + $0x660] ss:$16 sps:$4 sm:$0xff]  }
 0x76f   : > { %v9467_v46 = vsel %vm17852_vm7, %v9462_v57, %v9466_v28  ;;  %11666 = vmatprep.mubr.bf16.mxu0 %v17928_v1  ;;  %11679 = vmatprep.subr.bf16.mxu1 %v14460_v15  ;;  %v14490_v42 = vld [vmem:[%s18750_s9 + $0x440] ss:$16 sps:$4 sm:$0xff]   ;;  %v14498_v21 = vld [vmem:[%s18750_s9 + $0x424] ss:$16 sps:$4 sm:$0xff]  }
 0x770   : > { %13118 = vst.sshfl [vmem:[#allocation5 + $0x38] sm:$0x33 pattern:$0x76325410] %v9552_v14  ;;  %v9476_v0 = vcombine.low %v9242_v16, %v9467_v46  ;;  %v9697_v12 = vcombine.low %v9467_v46, %v9688_v34  ;;  %11667 = vmatmul.mubr.bf16.vlgmr.msra.gmra.mxu0 %v17926_v24  ;;  %v14487_v25 = vld [vmem:[%s18750_s9 + $0x640] ss:$16 sps:$4 sm:$0xff]  }
 0x771   : > { %13136 = vst.sshfl [vmem:[#allocation5 + $0x44] sm:$0x33 pattern:$0x76325410] %v9773_v33  ;;  %11721 = vmatpush1.bf16.msra.mxu0 %v14444_v23  ;;  %v14495_v41 = vld [vmem:[%s18750_s9 + $0x624] ss:$16 sps:$4 sm:$0xff]  }
 0x772   : > { %13108 = vst.sshfl [vmem:[#allocation5 + $0x34] sm:$0x33 pattern:$0x76325410] %v9476_v0  ;;  %11722 = vmatprep.subr.bf16.mxu0 %v14457_v50  ;;  %11680 = vmatpush1.bf16.msra.mxu1 %v14458_v27  ;;  %v14496_v61 = vld [vmem:[%s18750_s9 + $0x420] ss:$16 sps:$4 sm:$0xff]  }
 0x773   : > { %13126 = vst.sshfl [vmem:[#allocation5 + $0x40] sm:$0x33 pattern:$0x76325410] %v9697_v12  ;;  %11681 = vmatprep.subr.bf16.mxu1 %v14466_v45  ;;  %v14504_v16 = vld [vmem:[%s18750_s9 + $0x404] ss:$16 sps:$4 sm:$0xff]  }
 0x774   : > { %v14493_v58 = vld [vmem:[%s18750_s9 + $0x620] ss:$16 sps:$4 sm:$0xff]   ;;  %v14501_v37 = vld [vmem:[%s18750_s9 + $0x604] ss:$16 sps:$4 sm:$0xff]   ;;  %v14555_v45 = vld [vmem:[%s18750_s9 + $0xec] ss:$16 sps:$4 sm:$0xff]  }
 0x775   : > { %11723 = vmatpush1.bf16.msra.mxu0 %v14455_v32  ;;  %v14502_v2 = vld [vmem:[%s18750_s9 + $0x400] ss:$16 sps:$4 sm:$0xff]   ;;  %v14510_v30 = vld [vmem:[%s18750_s9 + $0x5e4] ss:$16 sps:$4 sm:$0xff]  }
 0x776   : > { %11724 = vmatprep.subr.bf16.mxu0 %v14463_v10  ;;  %11682 = vmatpush1.bf16.msra.mxu1 %v14464_v56  ;;  %v14499_v3 = vld [vmem:[%s18750_s9 + $0x600] ss:$16 sps:$4 sm:$0xff]   ;;  %v14507_v17 = vld [vmem:[%s18750_s9 + $0x7e4] ss:$16 sps:$4 sm:$0xff]  }
 0x777   : > { %v17966_v63 = vld [vmem:[#allocation5 + $0x14] ss:$36 sps:$4 sm:$0xff]   ;;  %11683 = vmatprep.subr.bf16.mxu1 %v14480_v19  ;;  %v14516_v59 = vld [vmem:[%s18750_s9 + $0x5c4] ss:$16 sps:$4 sm:$0xff]   ;;  %v14553_v19 = vld [vmem:[%s18750_s9 + $0xe8] ss:$16 sps:$4 sm:$0xff]  }
 0x778   : > { %11709 = vmatprep.mubr.bf16.mxu1 %v17966_v63  ;;  %v14508_v40 = vld [vmem:[%s18750_s9 + $0x5e0] ss:$16 sps:$4 sm:$0xff]   ;;  %v14513_v7 = vld [vmem:[%s18750_s9 + $0x7c4] ss:$16 sps:$4 sm:$0xff]  }
 0x779   : > { %11725 = vmatpush1.bf16.msra.mxu0 %v14461_v53  ;;  %v14505_v9 = vld [vmem:[%s18750_s9 + $0x7e0] ss:$16 sps:$4 sm:$0xff]   ;;  %v14522_v52 = vld [vmem:[%s18750_s9 + $0x5a4] ss:$16 sps:$4 sm:$0xff]   ;;  %v18128_v10 = vld [vmem:[#allocation5 + $0x10] ss:$36 sps:$4 sm:$0xff]  }
 0x77a   : > { %v17971_v49 = vld [vmem:[#allocation5 + $0x1c] ss:$36 sps:$4 sm:$0xff]   ;;  %11726 = vmatprep.subr.bf16.mxu0 %v14477_v55  ;;  %11684 = vmatpush1.bf16.msra.mxu1 %v14478_v18  ;;  %v14514_v11 = vld [vmem:[%s18750_s9 + $0x5c0] ss:$16 sps:$4 sm:$0xff]   ;;  %v14561_v55 = vld [vmem:[%s18750_s9 + $0xcc] ss:$16 sps:$4 sm:$0xff]  }
 0x77b   : > { %11752 = vmatprep.mubr.bf16.mxu0 %v17971_v49  ;;  %11685 = vmatprep.subr.bf16.mxu1 %v14486_v26  ;;  %v14511_v20 = vld [vmem:[%s18750_s9 + $0x7c0] ss:$16 sps:$4 sm:$0xff]   ;;  %v14519_v5 = vld [vmem:[%s18750_s9 + $0x7a4] ss:$16 sps:$4 sm:$0xff]   ;;  %v18937_v26 = vmov 0  }
 0x77c   : > { %v14520_v4 = vld [vmem:[%s18750_s9 + $0x5a0] ss:$16 sps:$4 sm:$0xff]   ;;  %v14528_v51 = vld [vmem:[%s18750_s9 + $0x584] ss:$16 sps:$4 sm:$0xff]  }
 0x77d   : > { %11727 = vmatpush1.bf16.msra.mxu0 %v14475_v35  ;;  %v14517_v6 = vld [vmem:[%s18750_s9 + $0x7a0] ss:$16 sps:$4 sm:$0xff]   ;;  %v14525_v60 = vld [vmem:[%s18750_s9 + $0x784] ss:$16 sps:$4 sm:$0xff]  }
 0x77e   : > { %11728 = vmatprep.subr.bf16.mxu0 %v14483_v38  ;;  %11686 = vmatpush1.bf16.msra.mxu1 %v14484_v62  ;;  %v14526_v8 = vld [vmem:[%s18750_s9 + $0x580] ss:$16 sps:$4 sm:$0xff]   ;;  %v14534_v48 = vld [vmem:[%s18750_s9 + $0x564] ss:$16 sps:$4 sm:$0xff]   ;;  %v14559_v38 = vld [vmem:[%s18750_s9 + $0xc8] ss:$16 sps:$4 sm:$0xff]  }
 0x77f   : > { %11687 = vmatprep.subr.bf16.mxu1 %v14492_v29  ;;  %v14523_v44 = vld [vmem:[%s18750_s9 + $0x780] ss:$16 sps:$4 sm:$0xff]   ;;  %v14531_v39 = vld [vmem:[%s18750_s9 + $0x764] ss:$16 sps:$4 sm:$0xff]   ;;  %v14567_v62 = vld [vmem:[%s18750_s9 + $0xac] ss:$16 sps:$4 sm:$0xff]  }
 0x780   : > { %v14532_v31 = vld [vmem:[%s18750_s9 + $0x560] ss:$16 sps:$4 sm:$0xff]   ;;  %v14540_v13 = vld [vmem:[%s18750_s9 + $0x544] ss:$16 sps:$4 sm:$0xff]  }
 0x781   : > { %11729 = vmatpush1.bf16.msra.mxu0 %v14481_v54  ;;  %v14529_v23 = vld [vmem:[%s18750_s9 + $0x760] ss:$16 sps:$4 sm:$0xff]   ;;  %v14537_v22 = vld [vmem:[%s18750_s9 + $0x744] ss:$16 sps:$4 sm:$0xff]  }
 0x782   : > { %11730 = vmatprep.subr.bf16.mxu0 %v14489_v36  ;;  %11688 = vmatpush1.bf16.msra.mxu1 %v14490_v42  ;;  %v14538_v34 = vld [vmem:[%s18750_s9 + $0x540] ss:$16 sps:$4 sm:$0xff]   ;;  %v14546_v15 = vld [vmem:[%s18750_s9 + $0x524] ss:$16 sps:$4 sm:$0xff]   ;;  %v14573_v36 = vld [vmem:[%s18750_s9 + $0x8c] ss:$16 sps:$4 sm:$0xff]  }
 0x783   : > { %11689 = vmatprep.subr.bf16.mxu1 %v14498_v21  ;;  %v14535_v57 = vld [vmem:[%s18750_s9 + $0x740] ss:$16 sps:$4 sm:$0xff]   ;;  %v14543_v28 = vld [vmem:[%s18750_s9 + $0x724] ss:$16 sps:$4 sm:$0xff]  }
 0x784   : > { %v14544_v14 = vld [vmem:[%s18750_s9 + $0x520] ss:$16 sps:$4 sm:$0xff]   ;;  %v14552_v33 = vld [vmem:[%s18750_s9 + $0x504] ss:$16 sps:$4 sm:$0xff]  }
 0x785   : > { %11731 = vmatpush1.bf16.msra.mxu0 %v14487_v25  ;;  %v14541_v50 = vld [vmem:[%s18750_s9 + $0x720] ss:$16 sps:$4 sm:$0xff]   ;;  %v14549_v46 = vld [vmem:[%s18750_s9 + $0x704] ss:$16 sps:$4 sm:$0xff]   ;;  %v14571_v25 = vld [vmem:[%s18750_s9 + $0x88] ss:$16 sps:$4 sm:$0xff]  }
 0x786   : > { %11732 = vmatprep.subr.bf16.mxu0 %v14495_v41  ;;  %11690 = vmatpush1.bf16.msra.mxu1 %v14496_v61  ;;  %v14550_v27 = vld [vmem:[%s18750_s9 + $0x500] ss:$16 sps:$4 sm:$0xff]   ;;  %v14558_v0 = vld [vmem:[%s18750_s9 + $0x8e4] ss:$16 sps:$4 sm:$0xff]   ;;  %v14579_v41 = vld [vmem:[%s18750_s9 + $0x6c] ss:$16 sps:$4 sm:$0xff]  }
 0x787   : > { %11691 = vmatprep.subr.bf16.mxu1 %v14504_v16  ;;  %v14547_v12 = vld [vmem:[%s18750_s9 + $0x700] ss:$16 sps:$4 sm:$0xff]   ;;  %v14564_v56 = vld [vmem:[%s18750_s9 + $0x8c4] ss:$16 sps:$4 sm:$0xff]  }
 0x788   : > { %v14556_v32 = vld [vmem:[%s18750_s9 + $0x8e0] ss:$16 sps:$4 sm:$0xff]   ;;  %v14570_v35 = vld [vmem:[%s18750_s9 + $0x8a4] ss:$16 sps:$4 sm:$0xff]  }
 0x789   : > { %11733 = vmatpush1.bf16.msra.mxu0 %v14493_v58  ;;  %v18136_v53 = vld [vmem:[#allocation5 + $0x18] ss:$36 sps:$4 sm:$0xff]   ;;  %v14577_v58 = vld [vmem:[%s18750_s9 + $0x68] ss:$16 sps:$4 sm:$0xff]  }
 0x78a   : > { %11734 = vmatprep.subr.bf16.mxu0 %v14501_v37  ;;  %11692 = vmatpush1.bf16.msra.mxu1 %v14502_v2  ;;  %v14562_v18 = vld [vmem:[%s18750_s9 + $0x8c0] ss:$16 sps:$4 sm:$0xff]   ;;  %v14576_v54 = vld [vmem:[%s18750_s9 + $0x884] ss:$16 sps:$4 sm:$0xff]   ;;  %v14585_v37 = vld [vmem:[%s18750_s9 + $0x4c] ss:$16 sps:$4 sm:$0xff]  }
 0x78b   : > { %11693 = vmatprep.subr.bf16.mxu1 %v14510_v30  ;;  %v14568_v29 = vld [vmem:[%s18750_s9 + $0x8a0] ss:$16 sps:$4 sm:$0xff]   ;;  %v14582_v21 = vld [vmem:[%s18750_s9 + $0x864] ss:$16 sps:$4 sm:$0xff]  }
 0x78c   : > { %v14574_v42 = vld [vmem:[%s18750_s9 + $0x880] ss:$16 sps:$4 sm:$0xff]   ;;  %v14588_v16 = vld [vmem:[%s18750_s9 + $0x844] ss:$16 sps:$4 sm:$0xff]  }
 0x78d   : > { %11735 = vmatpush1.bf16.msra.mxu0 %v14499_v3  ;;  %v14580_v61 = vld [vmem:[%s18750_s9 + $0x860] ss:$16 sps:$4 sm:$0xff]   ;;  %v14594_v30 = vld [vmem:[%s18750_s9 + $0x824] ss:$16 sps:$4 sm:$0xff]   ;;  %v14583_v3 = vld [vmem:[%s18750_s9 + $0x48] ss:$16 sps:$4 sm:$0xff]  }
 0x78e   : > { %11736 = vmatprep.subr.bf16.mxu0 %v14507_v17  ;;  %11694 = vmatpush2.bf16.msra.mxu1 %v14508_v40  ;;  %v14586_v2 = vld [vmem:[%s18750_s9 + $0x840] ss:$16 sps:$4 sm:$0xff]   ;;  %v14591_v17 = vld [vmem:[%s18750_s9 + $0x2c] ss:$16 sps:$4 sm:$0xff]  }
 0x78f   : > { %11695 = vmatprep.subr.bf16.mxu1 %v14516_v59  ;;  %v14592_v40 = vld [vmem:[%s18750_s9 + $0x820] ss:$16 sps:$4 sm:$0xff]   ;;  %v14600_v59 = vld [vmem:[%s18750_s9 + $0x804] ss:$16 sps:$4 sm:$0xff]  }
 0x791   : > { %11737 = vmatpush2.bf16.msra.mxu0 %v14505_v9  ;;  %v14589_v9 = vld [vmem:[%s18750_s9 + $0x28] ss:$16 sps:$4 sm:$0xff]  }
 0x792   : > { %11738 = vmatprep.subr.bf16.mxu0 %v14513_v7  ;;  %11696 = vmatpush2.bf16.msra.mxu1 %v14514_v11  ;;  %v14597_v7 = vld [vmem:[%s18750_s9 + $0xc] ss:$16 sps:$4 sm:$0xff]   ;;  %v14598_v11 = vld [vmem:[%s18750_s9 + $0x800] ss:$16 sps:$4 sm:$0xff]  }
 0x793   : > { %11697 = vmatprep.subr.bf16.mxu1 %v14522_v52  ;;  %v14607_v52 = vld [vmem:[%s18750_s9 + $0x2ec] ss:$16 sps:$4 sm:$0xff]  }
 0x795   : > { %11739 = vmatpush2.bf16.msra.mxu0 %v14511_v20  ;;  %v14595_v20 = vld [vmem:[%s18750_s9 + $0x8] ss:$16 sps:$4 sm:$0xff]  }
 0x796   : > { %11740 = vmatprep.subr.bf16.mxu0 %v14519_v5  ;;  %11698 = vmatpush2.bf16.msra.mxu1 %v14520_v4  ;;  %v14603_v5 = vld [vmem:[%s18750_s9 + $0x1ec] ss:$16 sps:$4 sm:$0xff]   ;;  %v14605_v4 = vld [vmem:[%s18750_s9 + $0x2e8] ss:$16 sps:$4 sm:$0xff]  }
 0x797   : > { %11699 = vmatprep.subr.bf16.mxu1 %v14528_v51  ;;  %v18232_v51 = vld [vmem:[#allocation5 + $0x20] ss:$36 sps:$4 sm:$0xff]  }
 0x799   : > { %11741 = vmatpush2.bf16.msra.mxu0 %v14517_v6  ;;  %v14613_v6 = vld [vmem:[%s18750_s9 + $0x2cc] ss:$16 sps:$4 sm:$0xff]  }
 0x79a   : > { %11742 = vmatprep.subr.bf16.mxu0 %v14525_v60  ;;  %11700 = vmatpush2.bf16.msra.mxu1 %v14526_v8  ;;  %v14601_v60 = vld [vmem:[%s18750_s9 + $0x1e8] ss:$16 sps:$4 sm:$0xff]   ;;  %v14610_v8 = vld [vmem:[%s18750_s9 + $0x1cc] ss:$16 sps:$4 sm:$0xff]  }
 0x79b   : > { %11701 = vmatprep.subr.bf16.mxu1 %v14534_v48  ;;  %v14611_v48 = vld [vmem:[%s18750_s9 + $0x2c8] ss:$16 sps:$4 sm:$0xff]  }
 0x79d   : > { %11743 = vmatpush2.bf16.msra.mxu0 %v14523_v44  ;;  %v14619_v44 = vld [vmem:[%s18750_s9 + $0x2ac] ss:$16 sps:$4 sm:$0xff]  }
 0x79e   : > { %11744 = vmatprep.subr.bf16.mxu0 %v14531_v39  ;;  %11702 = vmatpush2.bf16.msra.mxu1 %v14532_v31  ;;  %v14608_v39 = vld [vmem:[%s18750_s9 + $0x1c8] ss:$16 sps:$4 sm:$0xff]   ;;  %v14616_v31 = vld [vmem:[%s18750_s9 + $0x1ac] ss:$16 sps:$4 sm:$0xff]  }
 0x79f   : > { %11703 = vmatprep.subr.bf16.mxu1 %v14540_v13  ;;  %v14625_v13 = vld [vmem:[%s18750_s9 + $0x28c] ss:$16 sps:$4 sm:$0xff]  }
 0x7a1   : > { %11745 = vmatpush2.bf16.msra.mxu0 %v14529_v23  ;;  %v14614_v23 = vld [vmem:[%s18750_s9 + $0x1a8] ss:$16 sps:$4 sm:$0xff]  }
 0x7a2   : > { %11746 = vmatprep.subr.bf16.mxu0 %v14537_v22  ;;  %11704 = vmatpush2.bf16.msra.mxu1 %v14538_v34  ;;  %v14622_v22 = vld [vmem:[%s18750_s9 + $0x18c] ss:$16 sps:$4 sm:$0xff]   ;;  %v14623_v34 = vld [vmem:[%s18750_s9 + $0x288] ss:$16 sps:$4 sm:$0xff]  }
 0x7a3   : > { %11705 = vmatprep.subr.bf16.mxu1 %v14546_v15  ;;  %v14631_v15 = vld [vmem:[%s18750_s9 + $0x26c] ss:$16 sps:$4 sm:$0xff]  }
 0x7a5   : > { %11747 = vmatpush2.bf16.msra.mxu0 %v14535_v57  ;;  %v14620_v57 = vld [vmem:[%s18750_s9 + $0x188] ss:$16 sps:$4 sm:$0xff]  }
 0x7a6   : > { %11748 = vmatprep.subr.bf16.mxu0 %v14543_v28  ;;  %11706 = vmatpush2.bf16.msra.mxu1 %v14544_v14  ;;  %v14628_v28 = vld [vmem:[%s18750_s9 + $0x16c] ss:$16 sps:$4 sm:$0xff]   ;;  %v14629_v14 = vld [vmem:[%s18750_s9 + $0x268] ss:$16 sps:$4 sm:$0xff]  }
 0x7a7   : > { %11707 = vmatprep.subr.bf16.mxu1 %v14552_v33  ;;  %v14637_v33 = vld [vmem:[%s18750_s9 + $0x24c] ss:$16 sps:$4 sm:$0xff]  }
 0x7a9   : > { %11749 = vmatpush2.bf16.msra.mxu0 %v14541_v50  ;;  %v14626_v50 = vld [vmem:[%s18750_s9 + $0x168] ss:$16 sps:$4 sm:$0xff]  }
 0x7aa   : > { %11750 = vmatprep.subr.bf16.mxu0 %v14549_v46  ;;  %11708 = vmatpush2.bf16.msra.mxu1 %v14550_v27  ;;  %v14634_v46 = vld [vmem:[%s18750_s9 + $0x14c] ss:$16 sps:$4 sm:$0xff]   ;;  %v14635_v27 = vld [vmem:[%s18750_s9 + $0x248] ss:$16 sps:$4 sm:$0xff]  }
 0x7ab   : > { %11763 = vmatprep.subr.bf16.mxu1 %v14558_v0  ;;  %v14643_v0 = vld [vmem:[%s18750_s9 + $0x22c] ss:$16 sps:$4 sm:$0xff]  }
 0x7ad   : > { %11751 = vmatpush2.bf16.msra.mxu0 %v14547_v12  ;;  %11710 = vmatmul.mubr.bf16.vlgmr.msra.gmra.mxu1 %v18128_v10  ;;  %v14632_v12 = vld [vmem:[%s18750_s9 + $0x148] ss:$16 sps:$4 sm:$0xff]  }
 0x7ae   : > { %11806 = vmatprep.subr.bf16.mxu0 %v14555_v45  ;;  %11764 = vmatpush1.bf16.msra.mxu1 %v14556_v32  ;;  %v14640_v45 = vld [vmem:[%s18750_s9 + $0x12c] ss:$16 sps:$4 sm:$0xff]   ;;  %v14641_v32 = vld [vmem:[%s18750_s9 + $0x228] ss:$16 sps:$4 sm:$0xff]  }
 0x7af   : > { %11795 = vmatprep.mubr.bf16.mxu1 %v18937_v26  ;;  %11765 = vmatprep.subr.bf16.mxu1 %v14564_v56  ;;  %v14649_v56 = vld [vmem:[%s18750_s9 + $0x20c] ss:$16 sps:$4 sm:$0xff]  }
 0x7b0   : > { %11753 = vmatmul.mubr.bf16.vlgmr.msra.gmra.mxu0 %v18136_v53 }
 0x7b1   : > { %11807 = vmatpush1.bf16.msra.mxu0 %v14553_v19  ;;  %11838 = vmatprep.mubr.bf16.mxu0 %v17916_v47  ;;  %v14565_v47 = vld [vmem:[%s18750_s9 + $0xa8] ss:$16 sps:$4 sm:$0xff]  }
 0x7b2   : > { %11808 = vmatprep.subr.bf16.mxu0 %v14561_v55  ;;  %11766 = vmatpush1.bf16.msra.mxu1 %v14562_v18  ;;  %v14638_v19 = vld [vmem:[%s18750_s9 + $0x128] ss:$16 sps:$4 sm:$0xff]   ;;  %v14646_v55 = vld [vmem:[%s18750_s9 + $0x10c] ss:$16 sps:$4 sm:$0xff]  }
 0x7b3   : > { %11767 = vmatprep.subr.bf16.mxu1 %v14570_v35  ;;  %v14647_v18 = vld [vmem:[%s18750_s9 + $0x208] ss:$16 sps:$4 sm:$0xff]   ;;  %v14655_v35 = vld [vmem:[%s18750_s9 + $0x3ec] ss:$16 sps:$4 sm:$0xff]  }
 0x7b5   : > { %11809 = vmatpush1.bf16.msra.mxu0 %v14559_v38  ;;  %v14644_v38 = vld [vmem:[%s18750_s9 + $0x108] ss:$16 sps:$4 sm:$0xff]  }
 0x7b6   : > { %11810 = vmatprep.subr.bf16.mxu0 %v14567_v62  ;;  %11768 = vmatpush1.bf16.msra.mxu1 %v14568_v29  ;;  %v14652_v62 = vld [vmem:[%s18750_s9 + $0x4ec] ss:$16 sps:$4 sm:$0xff]   ;;  %v14653_v29 = vld [vmem:[%s18750_s9 + $0x3e8] ss:$16 sps:$4 sm:$0xff]  }
 0x7b7   : > { %11769 = vmatprep.subr.bf16.mxu1 %v14576_v54  ;;  %v14661_v54 = vld [vmem:[%s18750_s9 + $0x3cc] ss:$16 sps:$4 sm:$0xff]  }
 0x7b9   : > { %11811 = vmatpush1.bf16.msra.mxu0 %v14565_v47  ;;  %v14650_v47 = vld [vmem:[%s18750_s9 + $0x4e8] ss:$16 sps:$4 sm:$0xff]  }
 0x7ba   : > { %11812 = vmatprep.subr.bf16.mxu0 %v14573_v36  ;;  %11770 = vmatpush1.bf16.msra.mxu1 %v14574_v42  ;;  %v14658_v36 = vld [vmem:[%s18750_s9 + $0x4cc] ss:$16 sps:$4 sm:$0xff]   ;;  %v14659_v42 = vld [vmem:[%s18750_s9 + $0x3c8] ss:$16 sps:$4 sm:$0xff]  }
 0x7bb   : > { %11771 = vmatprep.subr.bf16.mxu1 %v14582_v21  ;;  %v14667_v21 = vld [vmem:[%s18750_s9 + $0x3ac] ss:$16 sps:$4 sm:$0xff]  }
 0x7bd   : > { %11813 = vmatpush1.bf16.msra.mxu0 %v14571_v25  ;;  %v14656_v25 = vld [vmem:[%s18750_s9 + $0x4c8] ss:$16 sps:$4 sm:$0xff]  }
 0x7be   : > { %11814 = vmatprep.subr.bf16.mxu0 %v14579_v41  ;;  %11772 = vmatpush1.bf16.msra.mxu1 %v14580_v61  ;;  %v14664_v41 = vld [vmem:[%s18750_s9 + $0x4ac] ss:$16 sps:$4 sm:$0xff]  }
 0x7bf   : > { %11773 = vmatprep.subr.bf16.mxu1 %v14588_v16  ;;  %v14673_v61 = vld [vmem:[%s18750_s9 + $0x38c] ss:$16 sps:$4 sm:$0xff]  }
 0x7c0   : > { %v14670_v16 = vld [vmem:[%s18750_s9 + $0x48c] ss:$16 sps:$4 sm:$0xff]  }
 0x7c1   : > { %11815 = vmatpush1.bf16.msra.mxu0 %v14577_v58  ;;  %v14671_v58 = vld [vmem:[%s18750_s9 + $0x388] ss:$16 sps:$4 sm:$0xff]  }
 0x7c2   : > { %11816 = vmatprep.subr.bf16.mxu0 %v14585_v37  ;;  %11774 = vmatpush1.bf16.msra.mxu1 %v14586_v2  ;;  %v14679_v37 = vld [vmem:[%s18750_s9 + $0x36c] ss:$16 sps:$4 sm:$0xff]   ;;  %v14668_v2 = vld [vmem:[%s18750_s9 + $0x488] ss:$16 sps:$4 sm:$0xff]  }
 0x7c3   : > { %11775 = vmatprep.subr.bf16.mxu1 %v14594_v30  ;;  %v14676_v30 = vld [vmem:[%s18750_s9 + $0x46c] ss:$16 sps:$4 sm:$0xff]  }
 0x7c5   : > { %11817 = vmatpush1.bf16.msra.mxu0 %v14583_v3  ;;  %v14677_v3 = vld [vmem:[%s18750_s9 + $0x368] ss:$16 sps:$4 sm:$0xff]  }
 0x7c6   : > { %11818 = vmatprep.subr.bf16.mxu0 %v14591_v17  ;;  %11776 = vmatpush1.bf16.msra.mxu1 %v14592_v40  ;;  %v14685_v17 = vld [vmem:[%s18750_s9 + $0x34c] ss:$16 sps:$4 sm:$0xff]   ;;  %v14674_v40 = vld [vmem:[%s18750_s9 + $0x468] ss:$16 sps:$4 sm:$0xff]  }
 0x7c7   : > { %11777 = vmatprep.subr.bf16.mxu1 %v14600_v59  ;;  %v14682_v59 = vld [vmem:[%s18750_s9 + $0x44c] ss:$16 sps:$4 sm:$0xff]  }
 0x7c9   : > { %11819 = vmatpush1.bf16.msra.mxu0 %v14589_v9  ;;  %v14683_v9 = vld [vmem:[%s18750_s9 + $0x348] ss:$16 sps:$4 sm:$0xff]  }
 0x7ca   : > { %11820 = vmatprep.subr.bf16.mxu0 %v14597_v7  ;;  %11778 = vmatpush1.bf16.msra.mxu1 %v14598_v11  ;;  %v14691_v7 = vld [vmem:[%s18750_s9 + $0x32c] ss:$16 sps:$4 sm:$0xff]   ;;  %v14680_v11 = vld [vmem:[%s18750_s9 + $0x448] ss:$16 sps:$4 sm:$0xff]  }
 0x7cb   : > { %11849 = vmatprep.subr.bf16.mxu1 %v14607_v52  ;;  %v14688_v52 = vld [vmem:[%s18750_s9 + $0x42c] ss:$16 sps:$4 sm:$0xff]  }
 0x7cd   : > { %11821 = vmatpush1.bf16.msra.mxu0 %v14595_v20  ;;  %11796 = vmatmul.mubr.bf16.vlgmr.msra.gmra.mxu1 %v18232_v51  ;;  %v14689_v20 = vld [vmem:[%s18750_s9 + $0x328] ss:$16 sps:$4 sm:$0xff]  }
 0x7ce   : > { %11822 = vmatprep.subr.bf16.mxu0 %v14603_v5  ;;  %11850 = vmatpush1.bf16.msra.mxu1 %v14605_v4  ;;  %v14697_v5 = vld [vmem:[%s18750_s9 + $0x30c] ss:$16 sps:$4 sm:$0xff]   ;;  %v14686_v4 = vld [vmem:[%s18750_s9 + $0x428] ss:$16 sps:$4 sm:$0xff]  }
 0x7cf   : > { %11881 = vmatprep.mubr.bf16.mxu1 %v17928_v1  ;;  %11851 = vmatprep.subr.bf16.mxu1 %v14613_v6  ;;  %v14617_v1 = vld [vmem:[%s18750_s9 + $0x2a8] ss:$16 sps:$4 sm:$0xff]   ;;  %v14694_v6 = vld [vmem:[%s18750_s9 + $0x40c] ss:$16 sps:$4 sm:$0xff]  }
 0x7d1   : > { %11823 = vmatpush2.bf16.msra.mxu0 %v14601_v60  ;;  %v14695_v60 = vld [vmem:[%s18750_s9 + $0x308] ss:$16 sps:$4 sm:$0xff]  }
 0x7d2   : > { %11824 = vmatprep.subr.bf16.mxu0 %v14610_v8  ;;  %11852 = vmatpush1.bf16.msra.mxu1 %v14611_v48  ;;  %v14703_v8 = vld [vmem:[%s18750_s9 + $0x6ec] ss:$16 sps:$4 sm:$0xff]   ;;  %v14692_v48 = vld [vmem:[%s18750_s9 + $0x408] ss:$16 sps:$4 sm:$0xff]  }
 0x7d3   : > { %11853 = vmatprep.subr.bf16.mxu1 %v14619_v44  ;;  %v14700_v44 = vld [vmem:[%s18750_s9 + $0x5ec] ss:$16 sps:$4 sm:$0xff]  }
 0x7d5   : > { %11825 = vmatpush2.bf16.msra.mxu0 %v14608_v39  ;;  %v14701_v39 = vld [vmem:[%s18750_s9 + $0x6e8] ss:$16 sps:$4 sm:$0xff]  }
 0x7d6   : > { %11826 = vmatprep.subr.bf16.mxu0 %v14616_v31  ;;  %11854 = vmatpush1.bf16.msra.mxu1 %v14617_v1  ;;  %v14709_v31 = vld [vmem:[%s18750_s9 + $0x6cc] ss:$16 sps:$4 sm:$0xff]   ;;  %v14698_v1 = vld [vmem:[%s18750_s9 + $0x5e8] ss:$16 sps:$4 sm:$0xff]  }
 0x7d7   : > { %11855 = vmatprep.subr.bf16.mxu1 %v14625_v13  ;;  %v14706_v13 = vld [vmem:[%s18750_s9 + $0x5cc] ss:$16 sps:$4 sm:$0xff]  }
 0x7d9   : > { %11827 = vmatpush2.bf16.msra.mxu0 %v14614_v23  ;;  %v14707_v23 = vld [vmem:[%s18750_s9 + $0x6c8] ss:$16 sps:$4 sm:$0xff]  }
 0x7da   : > { %11828 = vmatprep.subr.bf16.mxu0 %v14622_v22  ;;  %11856 = vmatpush1.bf16.msra.mxu1 %v14623_v34  ;;  %v14715_v22 = vld [vmem:[%s18750_s9 + $0x6ac] ss:$16 sps:$4 sm:$0xff]  }
 0x7db   : > { %11857 = vmatprep.subr.bf16.mxu1 %v14631_v15  ;;  %v14712_v34 = vld [vmem:[%s18750_s9 + $0x5ac] ss:$16 sps:$4 sm:$0xff]  }
 0x7dc   : > { %v14721_v15 = vld [vmem:[%s18750_s9 + $0x68c] ss:$16 sps:$4 sm:$0xff]  }
 0x7dd   : > { %11829 = vmatpush2.bf16.msra.mxu0 %v14620_v57  ;;  %v14710_v57 = vld [vmem:[%s18750_s9 + $0x5a8] ss:$16 sps:$4 sm:$0xff]  }
 0x7de   : > { %11830 = vmatprep.subr.bf16.mxu0 %v14628_v28  ;;  %11858 = vmatpush1.bf16.msra.mxu1 %v14629_v14  ;;  %v14718_v28 = vld [vmem:[%s18750_s9 + $0x58c] ss:$16 sps:$4 sm:$0xff]   ;;  %v14719_v14 = vld [vmem:[%s18750_s9 + $0x688] ss:$16 sps:$4 sm:$0xff]  }
 0x7df   : > { %11859 = vmatprep.subr.bf16.mxu1 %v14637_v33  ;;  %v14727_v33 = vld [vmem:[%s18750_s9 + $0x66c] ss:$16 sps:$4 sm:$0xff]  }
 0x7e1   : > { %11831 = vmatpush2.bf16.msra.mxu0 %v14626_v50  ;;  %v14716_v50 = vld [vmem:[%s18750_s9 + $0x588] ss:$16 sps:$4 sm:$0xff]  }
 0x7e2   : > { %11832 = vmatprep.subr.bf16.mxu0 %v14634_v46  ;;  %11860 = vmatpush1.bf16.msra.mxu1 %v14635_v27  ;;  %v14724_v46 = vld [vmem:[%s18750_s9 + $0x56c] ss:$16 sps:$4 sm:$0xff]   ;;  %v14725_v27 = vld [vmem:[%s18750_s9 + $0x668] ss:$16 sps:$4 sm:$0xff]  }
 0x7e3   : > { %11861 = vmatprep.subr.bf16.mxu1 %v14643_v0  ;;  %v14733_v0 = vld [vmem:[%s18750_s9 + $0x64c] ss:$16 sps:$4 sm:$0xff]  }
 0x7e5   : > { %11833 = vmatpush2.bf16.msra.mxu0 %v14632_v12  ;;  %v14722_v12 = vld [vmem:[%s18750_s9 + $0x568] ss:$16 sps:$4 sm:$0xff]  }
 0x7e6   : > { %11834 = vmatprep.subr.bf16.mxu0 %v14640_v45  ;;  %11862 = vmatpush1.bf16.msra.mxu1 %v14641_v32  ;;  %v14730_v45 = vld [vmem:[%s18750_s9 + $0x54c] ss:$16 sps:$4 sm:$0xff]   ;;  %v14731_v32 = vld [vmem:[%s18750_s9 + $0x648] ss:$16 sps:$4 sm:$0xff]  }
 0x7e7   : > { %11863 = vmatprep.subr.bf16.mxu1 %v14649_v56  ;;  %v14739_v56 = vld [vmem:[%s18750_s9 + $0x62c] ss:$16 sps:$4 sm:$0xff]  }
 0x7e9   : > { %11835 = vmatpush2.bf16.msra.mxu0 %v14638_v19  ;;  %v14728_v19 = vld [vmem:[%s18750_s9 + $0x548] ss:$16 sps:$4 sm:$0xff]  }
 0x7ea   : > { %11836 = vmatprep.subr.bf16.mxu0 %v14646_v55  ;;  %11864 = vmatpush1.bf16.msra.mxu1 %v14647_v18  ;;  %v14736_v55 = vld [vmem:[%s18750_s9 + $0x52c] ss:$16 sps:$4 sm:$0xff]   ;;  %v14737_v18 = vld [vmem:[%s18750_s9 + $0x628] ss:$16 sps:$4 sm:$0xff]  }
 0x7eb   : > { %11865 = vmatprep.subr.bf16.mxu1 %v14655_v35  ;;  %v14745_v35 = vld [vmem:[%s18750_s9 + $0x60c] ss:$16 sps:$4 sm:$0xff]  }
 0x7ed   : > { %11837 = vmatpush2.bf16.msra.mxu0 %v14644_v38  ;;  %v14734_v38 = vld [vmem:[%s18750_s9 + $0x528] ss:$16 sps:$4 sm:$0xff]  }
 0x7ee   : > { %11892 = vmatprep.subr.bf16.mxu0 %v14652_v62  ;;  %11866 = vmatpush2.bf16.msra.mxu1 %v14653_v29  ;;  %v14742_v62 = vld [vmem:[%s18750_s9 + $0x50c] ss:$16 sps:$4 sm:$0xff]   ;;  %v14743_v29 = vld [vmem:[%s18750_s9 + $0x608] ss:$16 sps:$4 sm:$0xff]  }
 0x7ef   : > { %11867 = vmatprep.subr.bf16.mxu1 %v14661_v54  ;;  %v14751_v54 = vld [vmem:[%s18750_s9 + $0x7ec] ss:$16 sps:$4 sm:$0xff]  }
 0x7f0   : > { %11839 = vmatmul.mubr.bf16.vlgmr.msra.gmra.mxu0 %v17914_v43  ;;  %v14665_v43 = vld [vmem:[%s18750_s9 + $0x3a8] ss:$16 sps:$4 sm:$0xff]  }
 0x7f1   : > { %11893 = vmatpush1.bf16.msra.mxu0 %v14650_v47  ;;  %11924 = vmatprep.mubr.bf16.mxu0 %v17966_v63  ;;  %v14662_v63 = vld [vmem:[%s18750_s9 + $0x4a8] ss:$16 sps:$4 sm:$0xff]  }
 0x7f2   : > { %11894 = vmatprep.subr.bf16.mxu0 %v14658_v36  ;;  %11868 = vmatpush2.bf16.msra.mxu1 %v14659_v42  ;;  %v14740_v47 = vld [vmem:[%s18750_s9 + $0x508] ss:$16 sps:$4 sm:$0xff]   ;;  %v14748_v36 = vld [vmem:[%s18750_s9 + $0x8ec] ss:$16 sps:$4 sm:$0xff]  }
 0x7f3   : > { %11869 = vmatprep.subr.bf16.mxu1 %v14667_v21  ;;  %v14749_v42 = vld [vmem:[%s18750_s9 + $0x7e8] ss:$16 sps:$4 sm:$0xff]   ;;  %v14757_v21 = vld [vmem:[%s18750_s9 + $0x7cc] ss:$16 sps:$4 sm:$0xff]  }
 0x7f5   : > { %11895 = vmatpush1.bf16.msra.mxu0 %v14656_v25  ;;  %v14746_v25 = vld [vmem:[%s18750_s9 + $0x8e8] ss:$16 sps:$4 sm:$0xff]  }
 0x7f6   : > { %11896 = vmatprep.subr.bf16.mxu0 %v14664_v41  ;;  %11870 = vmatpush2.bf16.msra.mxu1 %v14665_v43  ;;  %v14754_v41 = vld [vmem:[%s18750_s9 + $0x8cc] ss:$16 sps:$4 sm:$0xff]   ;;  %v14755_v43 = vld [vmem:[%s18750_s9 + $0x7c8] ss:$16 sps:$4 sm:$0xff]  }
 0x7f7   : > { %11871 = vmatprep.subr.bf16.mxu1 %v14673_v61  ;;  %v14763_v61 = vld [vmem:[%s18750_s9 + $0x7ac] ss:$16 sps:$4 sm:$0xff]  }
 0x7f9   : > { %11897 = vmatpush1.bf16.msra.mxu0 %v14662_v63  ;;  %v14752_v63 = vld [vmem:[%s18750_s9 + $0x8c8] ss:$16 sps:$4 sm:$0xff]  }
 0x7fa   : > { %11898 = vmatprep.subr.bf16.mxu0 %v14670_v16  ;;  %11872 = vmatpush2.bf16.msra.mxu1 %v14671_v58  ;;  %v14760_v16 = vld [vmem:[%s18750_s9 + $0x8ac] ss:$16 sps:$4 sm:$0xff]  }
 0x7fb   : > { %11873 = vmatprep.subr.bf16.mxu1 %v14679_v37  ;;  %v14769_v58 = vld [vmem:[%s18750_s9 + $0x78c] ss:$16 sps:$4 sm:$0xff]  }
 0x7fc   : > { %v14766_v37 = vld [vmem:[%s18750_s9 + $0x88c] ss:$16 sps:$4 sm:$0xff]  }
 0x7fd   : > { %11899 = vmatpush1.bf16.msra.mxu0 %v14668_v2  ;;  %v14767_v2 = vld [vmem:[%s18750_s9 + $0x788] ss:$16 sps:$4 sm:$0xff]  }
 0x7fe   : > { %11900 = vmatprep.subr.bf16.mxu0 %v14676_v30  ;;  %11874 = vmatpush2.bf16.msra.mxu1 %v14677_v3  ;;  %v14775_v30 = vld [vmem:[%s18750_s9 + $0x76c] ss:$16 sps:$4 sm:$0xff]   ;;  %v14764_v3 = vld [vmem:[%s18750_s9 + $0x888] ss:$16 sps:$4 sm:$0xff]  }
 0x7ff   : > { %11875 = vmatprep.subr.bf16.mxu1 %v14685_v17  ;;  %v14772_v17 = vld [vmem:[%s18750_s9 + $0x86c] ss:$16 sps:$4 sm:$0xff]  }
 0x801   : > { %11901 = vmatpush1.bf16.msra.mxu0 %v14674_v40  ;;  %v14773_v40 = vld [vmem:[%s18750_s9 + $0x768] ss:$16 sps:$4 sm:$0xff]  }
 0x802   : > { %11902 = vmatprep.subr.bf16.mxu0 %v14682_v59  ;;  %11876 = vmatpush2.bf16.msra.mxu1 %v14683_v9  ;;  %v14781_v59 = vld [vmem:[%s18750_s9 + $0x74c] ss:$16 sps:$4 sm:$0xff]   ;;  %v14770_v9 = vld [vmem:[%s18750_s9 + $0x868] ss:$16 sps:$4 sm:$0xff]  }
 0x803   : > { %11877 = vmatprep.subr.bf16.mxu1 %v14691_v7  ;;  %v14778_v7 = vld [vmem:[%s18750_s9 + $0x84c] ss:$16 sps:$4 sm:$0xff]  }
 0x805   : > { %11903 = vmatpush1.bf16.msra.mxu0 %v14680_v11  ;;  %v14779_v11 = vld [vmem:[%s18750_s9 + $0x748] ss:$16 sps:$4 sm:$0xff]  }
 0x806   : > { %11904 = vmatprep.subr.bf16.mxu0 %v14688_v52  ;;  %11878 = vmatpush2.bf16.msra.mxu1 %v14689_v20  ;;  %v14787_v52 = vld [vmem:[%s18750_s9 + $0x72c] ss:$16 sps:$4 sm:$0xff]   ;;  %v14776_v20 = vld [vmem:[%s18750_s9 + $0x848] ss:$16 sps:$4 sm:$0xff]  }
 0x807   : > { %11879 = vmatprep.subr.bf16.mxu1 %v14697_v5  ;;  %v14784_v5 = vld [vmem:[%s18750_s9 + $0x82c] ss:$16 sps:$4 sm:$0xff]  }
 0x809   : > { %11905 = vmatpush1.bf16.msra.mxu0 %v14686_v4  ;;  %v14785_v4 = vld [vmem:[%s18750_s9 + $0x728] ss:$16 sps:$4 sm:$0xff]  }
 0x80a   : > { %11906 = vmatprep.subr.bf16.mxu0 %v14694_v6  ;;  %11880 = vmatpush2.bf16.msra.mxu1 %v14695_v60  ;;  %v14793_v6 = vld [vmem:[%s18750_s9 + $0x70c] ss:$16 sps:$4 sm:$0xff]   ;;  %v14782_v60 = vld [vmem:[%s18750_s9 + $0x828] ss:$16 sps:$4 sm:$0xff]  }
 0x80b   : > { %11935 = vmatprep.subr.bf16.mxu1 %v14703_v8  ;;  %v14790_v8 = vld [vmem:[%s18750_s9 + $0x80c] ss:$16 sps:$4 sm:$0xff]  }
 0x80d   : > { %11907 = vmatpush1.bf16.msra.mxu0 %v14692_v48  ;;  %11882 = vmatmul.mubr.bf16.vlgmr.msra.gmra.mxu1 %v17926_v24  ;;  %v14704_v24 = vld [vmem:[%s18750_s9 + $0x5c8] ss:$16 sps:$4 sm:$0xff]  }
 0x80e   : > { %11908 = vmatprep.subr.bf16.mxu0 %v14700_v44  ;;  %11936 = vmatpush1.bf16.msra.mxu1 %v14701_v39  ;;  %v14791_v48 = vld [vmem:[%s18750_s9 + $0x708] ss:$16 sps:$4 sm:$0xff]  }
 0x80f   : > { %11967 = vmatprep.mubr.bf16.mxu1 %v17971_v49  ;;  %11937 = vmatprep.subr.bf16.mxu1 %v14709_v31  ;;  %v14713_v49 = vld [vmem:[%s18750_s9 + $0x6a8] ss:$16 sps:$4 sm:$0xff]  }
 0x810   : > { %v14794_v44 = vld [vmem:[%s18752_s11 + $0x78] sm:$0xff]  }
 0x811   : > { %11909 = vmatpush2.bf16.msra.mxu0 %v14698_v1  ;;  %v14788_v39 = vld [vmem:[%s18750_s9 + $0x808] ss:$16 sps:$4 sm:$0xff]   ;;  %v14796_v1 = vld [vmem:[%s18752_s11 + $0x70] sm:$0xff]  }
 0x812   : > { %11910 = vmatprep.subr.bf16.mxu0 %v14706_v13  ;;  %11938 = vmatpush1.bf16.msra.mxu1 %v14707_v23  ;;  %v14795_v31 = vld [vmem:[%s18752_s11 + $0x38] sm:$0xff]   ;;  %v14797_v13 = vld [vmem:[%s18752_s11 + $0x30] sm:$0xff]   ;;  %v14798_v23 = vld [vmem:[%s18752_s11 + $0x68] sm:$0xff]  }
 0x813   : > { %11939 = vmatprep.subr.bf16.mxu1 %v14715_v22  ;;  %v14799_v22 = vld [vmem:[%s18752_s11 + $0x28] sm:$0xff]  }
 0x815   : > { %11911 = vmatpush2.bf16.msra.mxu0 %v14704_v24  ;;  %v14802_v24 = vld [vmem:[%s18752_s11 + $0x58] sm:$0xff]  }
 0x816   : > { %11912 = vmatprep.subr.bf16.mxu0 %v14712_v34  ;;  %11940 = vmatpush1.bf16.msra.mxu1 %v14713_v49  ;;  %v14803_v34 = vld [vmem:[%s18752_s11 + $0x18] sm:$0xff]   ;;  %v14804_v49 = vld [vmem:[%s18752_s11 + $0x50] sm:$0xff]  }
 0x817   : > { %11941 = vmatprep.subr.bf16.mxu1 %v14721_v15  ;;  %v14805_v15 = vld [vmem:[%s18752_s11 + $0x10] sm:$0xff]  }
 0x819   : > { %11913 = vmatpush2.bf16.msra.mxu0 %v14710_v57  ;;  %v14806_v57 = vld [vmem:[%s18752_s11 + $0x48] sm:$0xff]  }
 0x81a   : > { %11914 = vmatprep.subr.bf16.mxu0 %v14718_v28  ;;  %11942 = vmatpush1.bf16.msra.mxu1 %v14719_v14  ;;  %v14807_v28 = vld [vmem:[%s18752_s11 + $0x8] sm:$0xff]   ;;  %v14808_v14 = vld [vmem:[%s18752_s11 + $0x40] sm:$0xff]  }
 0x81b   : > { %11943 = vmatprep.subr.bf16.mxu1 %v14727_v33  ;;  %v14809_v33 = vld [vmem:[%s18752_s11] sm:$0xff]  }
 0x81d   : > { %11915 = vmatpush2.bf16.msra.mxu0 %v14716_v50 }
 0x81e   : > { %11916 = vmatprep.subr.bf16.mxu0 %v14724_v46  ;;  %11944 = vmatpush1.bf16.msra.mxu1 %v14725_v27 }
 0x81f   : > { %11945 = vmatprep.subr.bf16.mxu1 %v14733_v0 }
 0x821   : > { %11917 = vmatpush2.bf16.msra.mxu0 %v14722_v12 }
 0x822   : > { %11918 = vmatprep.subr.bf16.mxu0 %v14730_v45  ;;  %11946 = vmatpush1.bf16.msra.mxu1 %v14731_v32  ;;  %v18938_v45 = vld [vmem:[#allocation8_spill] sm:$0xff] }
 0x823   : > { %11947 = vmatprep.subr.bf16.mxu1 %v14739_v56  ;;  %v10087_v32 = vsub.s32 0, %v18938_v45  ;;  %v18671_v56 = vld [vmem:[%s18751_s10] sm:$0xf] }
 0x825   : > { %11919 = vmatpush2.bf16.msra.mxu0 %v14728_v19 }
 0x826   : > { %11920 = vmatprep.subr.bf16.mxu0 %v14736_v55  ;;  %11948 = vmatpush1.bf16.msra.mxu1 %v14737_v18  ;;  %v10091_v55 = vsub.s32 1, %v18938_v45 }
 0x827   : > { %11949 = vmatprep.subr.bf16.mxu1 %v14745_v35 }
 0x829   : > { %11921 = vmatpush2.bf16.msra.mxu0 %v14734_v38  ;;  %v10088_v38 = vrot.slane %v18671_v56, %v10087_v32 }
 0x82a   : > { %11922 = vmatprep.subr.bf16.mxu0 %v14742_v62  ;;  %11950 = vmatpush1.bf16.msra.mxu1 %v14743_v29  ;;  %v10092_v62 = vrot.slane %v18671_v56, %v10091_v55 }
 0x82b   : > { %11951 = vmatprep.subr.bf16.mxu1 %v14751_v54 }
 0x82d   : > { %11923 = vmatpush2.bf16.msra.mxu0 %v14740_v47  ;;  %v11625_v50 = vpop.f32.mrf.mxu1 }
 0x82e   : > { %11978 = vmatprep.subr.bf16.mxu0 %v14748_v36  ;;  %11952 = vmatpush2.bf16.msra.mxu1 %v14749_v42  ;;  %v11626_v47 = vadd.f32 %v11625_v50, %v10088_v38  ;;  %v14813_v50 = vld [vmem:[%s18752_s11 + $0xb0] sm:$0xff]  }
 0x82f   : > { %11953 = vmatprep.subr.bf16.mxu1 %v14757_v21  ;;  %v11627_v46 = vpop.f32.mrf.mxu1 }
 0x830   : > { %11925 = vmatmul.mubr.bf16.vlgmr.msra.gmra.mxu0 %v18128_v10  ;;  %v14761_v10 = vld [vmem:[%s18750_s9 + $0x7a8] ss:$16 sps:$4 sm:$0xff]   ;;  %v11668_v27 = vpop.f32.mrf.mxu0  ;;  %v11628_v42 = vadd.f32 %v11627_v46, %v10092_v62 }
 0x831   : > { %11979 = vmatpush1.bf16.msra.mxu0 %v14746_v25  ;;  %12010 = vmatprep.mubr.bf16.mxu0 %v18937_v26  ;;  %v14758_v26 = vld [vmem:[%s18750_s9 + $0x8a8] ss:$16 sps:$4 sm:$0xff]   ;;  %v11629_v0 = vpop.f32.mrf.mxu1 }
 0x832   : > { %11980 = vmatprep.subr.bf16.mxu0 %v14754_v41  ;;  %11954 = vmatpush2.bf16.msra.mxu1 %v14755_v43  ;;  %v11670_v12 = vpop.f32.mrf.mxu0  ;;  %v11630_v21 = vadd.f32 %v11629_v0, %v10088_v38  ;;  %v11669_v43 = vadd.f32 %v11668_v27, %v11626_v47  ;;  %v14814_v46 = vld [vmem:[%s18752_s11 + $0xe8] sm:$0xff]   ;;  %v14820_v47 = vld [vmem:[%s18752_s11 + $0xd0] sm:$0xff]  }
 0x833   : > { %11955 = vmatprep.subr.bf16.mxu1 %v14763_v61  ;;  %v11631_v19 = vpop.f32.mrf.mxu1 }
 0x834   : > { %v11672_v18 = vpop.f32.mrf.mxu0  ;;  %v11632_v41 = vadd.f32 %v11631_v19, %v10092_v62  ;;  %v14816_v19 = vld [vmem:[%s18752_s11 + $0xe0] sm:$0xff]   ;;  %v14818_v62 = vld [vmem:[%s18752_s11 + $0xd8] sm:$0xff]  }
 0x835   : > { %11981 = vmatpush1.bf16.msra.mxu0 %v14752_v63 }
 0x836   : > { %11982 = vmatprep.subr.bf16.mxu0 %v14760_v16  ;;  %11956 = vmatpush2.bf16.msra.mxu1 %v14761_v10  ;;  %v11674_v29 = vpop.f32.mrf.mxu0  ;;  %v11671_v16 = vadd.f32 %v11670_v12, %v11628_v42  ;;  %v11673_v10 = vadd.f32 %v11672_v18, %v11630_v21  ;;  %v14815_v12 = vld [vmem:[%s18752_s11 + $0xa8] sm:$0xff]  }
 0x837   : > { %11957 = vmatprep.subr.bf16.mxu1 %v14769_v58  ;;  %v14822_v42 = vld [vmem:[%s18752_s11 + $0xc8] sm:$0xff]  }
 0x838   : > { %v14823_v21 = vld [vmem:[%s18752_s11 + $0x88] sm:$0xff]  }
 0x839   : > { %11983 = vmatpush1.bf16.msra.mxu0 %v14758_v26 }
 0x83a   : > { %11984 = vmatprep.subr.bf16.mxu0 %v14766_v37  ;;  %11958 = vmatpush2.bf16.msra.mxu1 %v14767_v2  ;;  %v11675_v2 = vadd.f32 %v11674_v29, %v11632_v41  ;;  %v14825_v41 = vld [vmem:[%s18752_s11 + $0x80] sm:$0xff]  }
 0x83b   : > { %11959 = vmatprep.subr.bf16.mxu1 %v14775_v30 }
 0x83d   : > { %11985 = vmatpush1.bf16.msra.mxu0 %v14764_v3 }
 0x83e   : > { %11986 = vmatprep.subr.bf16.mxu0 %v14772_v17  ;;  %11960 = vmatpush2.bf16.msra.mxu1 %v14773_v40 }
 0x83f   : > { %11961 = vmatprep.subr.bf16.mxu1 %v14781_v59 }
 0x841   : > { %11987 = vmatpush1.bf16.msra.mxu0 %v14770_v9 }
 0x842   : > { %11988 = vmatprep.subr.bf16.mxu0 %v14778_v7  ;;  %11962 = vmatpush2.bf16.msra.mxu1 %v14779_v11 }
 0x843   : > { %11963 = vmatprep.subr.bf16.mxu1 %v14787_v52 }
 0x845   : > { %11989 = vmatpush1.bf16.msra.mxu0 %v14776_v20 }
 0x846   : > { %11990 = vmatprep.subr.bf16.mxu0 %v14784_v5  ;;  %11964 = vmatpush2.bf16.msra.mxu1 %v14785_v4 }
 0x847   : > { %11965 = vmatprep.subr.bf16.mxu1 %v14793_v6 }
 0x849   : > { %11991 = vmatpush1.bf16.msra.mxu0 %v14782_v60  ;;  %v14810_v60 = vld [vmem:[%s18752_s11 + $0xf8] sm:$0xff]  }
 0x84a   : > { %11992 = vmatprep.subr.bf16.mxu0 %v14790_v8  ;;  %11966 = vmatpush2.bf16.msra.mxu1 %v14791_v48  ;;  %v14811_v8 = vld [vmem:[%s18752_s11 + $0xb8] sm:$0xff]  }
 0x84b   : > { %13855 = vmatprep.subr.bf16.mxu1 %v14794_v44 }
 0x84d   : > { %11993 = vmatpush1.bf16.msra.mxu0 %v14788_v39  ;;  %11968 = vmatmul.mubr.bf16.vlgmr.msra.gmra.mxu1 %v18136_v53  ;;  %v14800_v53 = vld [vmem:[%s18752_s11 + $0x60] sm:$0xff]  }
 0x84e   : > { %13856 = vmatpush3.bf16.msra.mxu1 %v14795_v31  ;;  %13877 = vmatprep.subr.bf16.mxu0 %v14810_v60 }
 0x84f   : > { %13857 = vmatprep.subr.bf16.mxu1 %v14796_v1 }
 0x850   : > { %12011 = vmatmul.mubr.bf16.vlgmr.msra.gmra.mxu0 %v18232_v51  ;;  %v14801_v51 = vld [vmem:[%s18752_s11 + $0x20] sm:$0xff]  }
 0x851   : > { %13878 = vmatpush3.bf16.msra.mxu0 %v14811_v8 }
 0x852   : > { %13858 = vmatpush3.bf16.msra.mxu1 %v14797_v13 }
 0x853   : > { %13859 = vmatprep.subr.bf16.mxu1 %v14798_v23 }
 0x856   : > { %13860 = vmatpush3.bf16.msra.mxu1 %v14799_v22 }
 0x857   : > { %13861 = vmatprep.subr.bf16.mxu1 %v14800_v53 }
 0x85a   : > { %13862 = vmatpush3.bf16.msra.mxu1 %v14801_v51 }
 0x85b   : > { %13863 = vmatprep.subr.bf16.mxu1 %v14802_v24 }
 0x85e   : > { %13864 = vmatpush3.bf16.msra.mxu1 %v14803_v34 }
 0x85f   : > { %13865 = vmatprep.subr.bf16.mxu1 %v14804_v49 }
 0x862   : > { %13866 = vmatpush3.bf16.msra.mxu1 %v14805_v15 }
 0x863   : > { %13867 = vmatprep.subr.bf16.mxu1 %v14806_v57 }
 0x866   : > { %13868 = vmatpush3.bf16.msra.mxu1 %v14807_v28 }
 0x867   : > { %13869 = vmatprep.subr.bf16.mxu1 %v14808_v14 }
 0x86a   : > { %13870 = vmatpush3.bf16.msra.mxu1 %v14809_v33  ;;  %v14812_v33 = vld [vmem:[%s18752_s11 + $0xf0] sm:$0xff]  }
 0x86b   : > { %13879 = vmatprep.subr.bf16.mxu0 %v14812_v33 }
 0x86c   : > { %13880 = vmatpush3.bf16.msra.mxu0 %v14813_v50 }
 0x86d   : > { %v11711_v35 = vpop.f32.mrf.mxu1  ;;  %13881 = vmatprep.subr.bf16.mxu0 %v14814_v46 }
 0x86e   : > { %v11712_v63 = vadd.f32 %v11711_v35, %v11669_v43  ;;  %v14817_v35 = vld [vmem:[%s18752_s11 + $0xa0] sm:$0xff]  }
 0x86f   : > { %v11713_v54 = vpop.f32.mrf.mxu1 }
 0x870   : > { %v11754_v36 = vpop.f32.mrf.mxu0  ;;  %v11714_v26 = vadd.f32 %v11713_v54, %v11671_v16  ;;  %13882 = vmatpush3.bf16.msra.mxu0 %v14815_v12  ;;  %v14819_v54 = vld [vmem:[%s18752_s11 + $0x98] sm:$0xff]  }
 0x871   : > { %v11715_v25 = vpop.f32.mrf.mxu1  ;;  %v11755_v40 = vadd.f32 %v11754_v36, %v11712_v63  ;;  %13883 = vmatprep.subr.bf16.mxu0 %v14816_v19  ;;  %v14821_v36 = vld [vmem:[%s18752_s11 + $0x90] sm:$0xff]  }
 0x872   : > { %v11756_v61 = vpop.f32.mrf.mxu0  ;;  %v11716_v37 = vadd.f32 %v11715_v25, %v11673_v10  ;;  %v14824_v25 = vld [vmem:[%s18752_s11 + $0xc0] sm:$0xff]  }
 0x873   : > { %v11717_v58 = vpop.f32.mrf.mxu1  ;;  %v11757_v7 = vadd.f32 %v11756_v61, %v11714_v26 }
 0x874   : > { %v11758_v30 = vpop.f32.mrf.mxu0  ;;  %v11718_v17 = vadd.f32 %v11717_v58, %v11675_v2  ;;  %13884 = vmatpush3.bf16.msra.mxu0 %v14817_v35  ;;  %v10095_v58 = vsub.s32 2, %v18938_v45 }
 0x875   : > { %v11759_v11 = vadd.f32 %v11758_v30, %v11716_v37  ;;  %13885 = vmatprep.subr.bf16.mxu0 %v14818_v62  ;;  %v10099_v37 = vsub.s32 3, %v18938_v45 }
 0x876   : > { %v11760_v52 = vpop.f32.mrf.mxu0  ;;  %v10096_v30 = vrot.slane %v18671_v56, %v10095_v58 }
 0x877   : > { %v11761_v6 = vadd.f32 %v11760_v52, %v11718_v17  ;;  %v10100_v17 = vrot.slane %v18671_v56, %v10099_v37  ;;  %v12129_v37 = vld [vmem:[%s18753_s12] sm:$0x1] }
 0x878   : > { %13886 = vmatpush3.bf16.msra.mxu0 %v14819_v54 }
 0x879   : > { %13887 = vmatprep.subr.bf16.mxu0 %v14820_v47 }
 0x87c   : > { %13888 = vmatpush3.bf16.msra.mxu0 %v14821_v36 }
 0x87d   : > { %13889 = vmatprep.subr.bf16.mxu0 %v14822_v42 }
 0x880   : > { %13890 = vmatpush3.bf16.msra.mxu0 %v14823_v21 }
 0x881   : > { %13891 = vmatprep.subr.bf16.mxu0 %v14824_v25 }
 0x884   : > { %13892 = vmatpush3.bf16.msra.mxu0 %v14825_v41 }
 0x88d   : > { %v11797_v3 = vpop.f32.mrf.mxu1 }
 0x88e   : > { %v11798_v9 = vadd.f32 %v11797_v3, %v11755_v40 }
 0x88f   : > { %v11799_v59 = vpop.f32.mrf.mxu1 }
 0x890   : > { %v11800_v5 = vadd.f32 %v11799_v59, %v11757_v7  ;;  %v12021_v44 = vmax.f32 %v11798_v9, 0.0 }
 0x891   : > { %v11801_v20 = vpop.f32.mrf.mxu1 }
 0x892   : > { %v11802_v4 = vadd.f32 %v11801_v20, %v11759_v11  ;;  %v12022_v1 = vmax.f32 %v11800_v5, 0.0 }
 0x893   : > { %v11803_v48 = vpop.f32.mrf.mxu1 }
 0x894   : > { %v12025_v39 = vmax.f32 %v11802_v4, 0.0  ;;  %v11804_v31 = vadd.f32 %v11803_v48, %v11761_v6 }
 0x896   : > { %v12029_v13 = vadd.f32 %v12025_v39, %v12021_v44  ;;  %v12026_v23 = vmax.f32 %v11804_v31, 0.0 }
 0x898   : > { %v12030_v22 = vrot.slane %v12029_v13, 4  ;;  %v12036_v53 = vadd.f32 %v12026_v23, %v12022_v1 }
 0x89a   : > { %v12031_v51 = vadd.f32 %v12030_v22, %v12029_v13  ;;  %v12037_v24 = vrot.slane %v12036_v53, 4 }
 0x89c   : > { %v12032_v34 = vrot.slane %v12031_v51, 2  ;;  %v12038_v49 = vadd.f32 %v12037_v24, %v12036_v53 }
 0x89e   : > { %v12033_v15 = vadd.f32 %v12032_v34, %v12031_v51  ;;  %v12039_v57 = vrot.slane %v12038_v49, 2 }
 0x8a0   : > { %v12034_v28 = vrot.slane %v12033_v15, 1  ;;  %v12040_v14 = vadd.f32 %v12039_v57, %v12038_v49 }
 0x8a2   : > { %v12041_v27 = vrot.slane %v12040_v14, 1  ;;  %v12035_v0 = vadd.f32 %v12034_v28, %v12033_v15 }
 0x8a4   : > { %v12042_v32 = vadd.f32 %v12041_v27, %v12040_v14  ;;  %v12057_v55 = vmul.f32 0.0625, %v12035_v0 }
 0x8a6   : > { %v12058_v18 = vmul.f32 0.0625, %v12042_v32  ;;  %v12061_v29 = vpack.c.bf16 %v12057_v55, %v12057_v55 }
 0x8a8   : > { %v12062_v38 = vpack.c.bf16 %v12058_v18, %v12058_v18 }
 0x8aa   : > { %12354 = vmatprep.mubr.bf16.mxu1 %v12062_v38 }
 0x8ab   : > { %12355 = vmatmul.mubr.bf16.vlgmr.msra.gmra.mxu1 %v12061_v29 }
 0x8b0   : > { %v11840_v43 = vpop.f32.mrf.mxu0 }
 0x8b1   : > { %v11841_v59 = vadd.f32 %v11840_v43, %v10096_v30 }
 0x8b2   : > { %v11842_v61 = vpop.f32.mrf.mxu0 }
 0x8b3   : > { %v11843_v7 = vadd.f32 %v11842_v61, %v10100_v17 }
 0x8b4   : > { %v11844_v63 = vpop.f32.mrf.mxu0 }
 0x8b5   : > { %v11845_v20 = vadd.f32 %v11844_v63, %v10096_v30 }
 0x8b6   : > { %v11846_v16 = vpop.f32.mrf.mxu0 }
 0x8b7   : > { %v11847_v8 = vadd.f32 %v11846_v16, %v10100_v17 }
 0x8cd   : > { %v11883_v10 = vpop.f32.mrf.mxu1 }
 0x8ce   : > { %v11884_v11 = vadd.f32 %v11883_v10, %v11841_v59 }
 0x8cf   : > { %v11885_v2 = vpop.f32.mrf.mxu1 }
 0x8d0   : > { %v11886_v5 = vadd.f32 %v11885_v2, %v11843_v7  ;;  %v12403_v7 = vld [vmem:[%s18754_s13] sm:$0x1] }
 0x8d1   : > { %v11887_v40 = vpop.f32.mrf.mxu1 }
 0x8d2   : > { %v11888_v48 = vadd.f32 %v11887_v40, %v11845_v20 }
 0x8d3   : > { %v11889_v52 = vpop.f32.mrf.mxu1 }
 0x8d4   : > { %v11890_v1 = vadd.f32 %v11889_v52, %v11847_v8 }
 0x8f0   : > { %v11926_v26 = vpop.f32.mrf.mxu0 }
 0x8f1   : > { %v11927_v4 = vadd.f32 %v11926_v26, %v11884_v11 }
 0x8f2   : > { %v11928_v3 = vpop.f32.mrf.mxu0 }
 0x8f3   : > { %v11929_v45 = vadd.f32 %v11928_v3, %v11886_v5  ;;  %v12409_v5 = vld [vmem:[#allocation6] sm:$0x1] }
 0x8f4   : > { %v11930_v9 = vpop.f32.mrf.mxu0 }
 0x8f5   : > { %v11931_v13 = vadd.f32 %v11930_v9, %v11888_v48 }
 0x8f6   : > { %v11932_v6 = vpop.f32.mrf.mxu0 }
 0x8f7   : > { %v11933_v53 = vadd.f32 %v11932_v6, %v11890_v1 }
 0x90d   : > { %v11969_v60 = vpop.f32.mrf.mxu1 }
 0x90e   : > { %v11970_v44 = vadd.f32 %v11969_v60, %v11927_v4 }
 0x90f   : > { %v11971_v31 = vpop.f32.mrf.mxu1 }
 0x910   : > { %v12012_v39 = vpop.f32.mrf.mxu0  ;;  %v11972_v56 = vadd.f32 %v11971_v31, %v11929_v45 }
 0x911   : > { %v11973_v22 = vpop.f32.mrf.mxu1  ;;  %v12013_v51 = vadd.f32 %v12012_v39, %v11970_v44 }
 0x912   : > { %v12014_v23 = vpop.f32.mrf.mxu0  ;;  %v11974_v24 = vadd.f32 %v11973_v22, %v11931_v13 }
 0x913   : > { %v11975_v49 = vpop.f32.mrf.mxu1  ;;  %v12015_v15 = vadd.f32 %v12014_v23, %v11972_v56  ;;  %v12023_v33 = vmax.f32 %v12013_v51, 0.0 }
 0x914   : > { %v12016_v34 = vpop.f32.mrf.mxu0  ;;  %v11976_v28 = vadd.f32 %v11975_v49, %v11933_v53 }
 0x915   : > { %v12017_v57 = vadd.f32 %v12016_v34, %v11974_v24  ;;  %v12024_v27 = vmax.f32 %v12015_v15, 0.0 }
 0x916   : > { %v12018_v14 = vpop.f32.mrf.mxu0 }
 0x917   : > { %v12027_v50 = vmax.f32 %v12017_v57, 0.0  ;;  %v12019_v46 = vadd.f32 %v12018_v14, %v11976_v28 }
 0x919   : > { %v12043_v0 = vadd.f32 %v12027_v50, %v12023_v33  ;;  %v12028_v12 = vmax.f32 %v12019_v46, 0.0 }
 0x91b   : > { %v12044_v32 = vrot.slane %v12043_v0, 4  ;;  %v12050_v19 = vadd.f32 %v12028_v12, %v12024_v27 }
 0x91d   : > { %v12045_v55 = vadd.f32 %v12044_v32, %v12043_v0  ;;  %v12051_v18 = vrot.slane %v12050_v19, 4 }
 0x91f   : > { %v12046_v35 = vrot.slane %v12045_v55, 2  ;;  %v12052_v38 = vadd.f32 %v12051_v18, %v12050_v19 }
 0x921   : > { %v12047_v62 = vadd.f32 %v12046_v35, %v12045_v55  ;;  %v12053_v29 = vrot.slane %v12052_v38, 2 }
 0x923   : > { %v12054_v54 = vadd.f32 %v12053_v29, %v12052_v38  ;;  %v12048_v47 = vrot.slane %v12047_v62, 1 }
 0x925   : > { %v12055_v36 = vrot.slane %v12054_v54, 1  ;;  %v12049_v42 = vadd.f32 %v12048_v47, %v12047_v62 }
 0x927   : > { %v12056_v21 = vadd.f32 %v12055_v36, %v12054_v54  ;;  %v12059_v25 = vmul.f32 0.0625, %v12049_v42 }
 0x929   : > { %v12060_v41 = vmul.f32 0.0625, %v12056_v21  ;;  %v12063_v61 = vpack.c.bf16 %v12059_v25, %v12059_v25 }
 0x92b   : > { %v12064_v43 = vpack.c.bf16 %v12060_v41, %v12060_v41 }
 0x92d   : > { %12394 = vmatprep.mubr.bf16.mxu0 %v12064_v43 }
 0x92e   : > { %12395 = vmatmul.mubr.bf16.vlgmr.msra.gmra.mxu0 %v12063_v61 }
 0x96b   : > { %v13871_v63 = vpop.f32.mrf.mxu1 }
 0x96d   : > { %v13872_v16 = vpop.f32.mrf.mxu1 }
 0x96e   : > { %v13873_v10 = vadd.f32 %v13872_v16, %v13871_v63 }
 0x96f   : > { %v13874_v58 = vpop.f32.mrf.mxu1 }
 0x970   : > { %v12357_v3 = vadd.f32 %v13873_v10, %v12129_v37 }
 0x971   : > { %v13875_v26 = vpop.f32.mrf.mxu1 }
 0x9ee   : > { %v13893_v2 = vpop.f32.mrf.mxu0 }
 0x9f0   : > { %v13894_v30 = vpop.f32.mrf.mxu0 }
 0x9f1   : > { %v13895_v17 = vadd.f32 %v13894_v30, %v13893_v2 }
 0x9f2   : > { %v13896_v40 = vpop.f32.mrf.mxu0 }
 0x9f3   : > { %v12397_v59 = vadd.f32 %v13895_v17, %v12357_v3 }
 0x9f4   : > { %v13897_v9 = vpop.f32.mrf.mxu0 }
 0x9f5   : > { %v12402_v11 = vmax.f32 %v12397_v59, 0.0 }
 0x9f7   : > { %v12404_v52 = vmul.f32 %v12403_v7, %v12402_v11 }
 0x9f9   : > { %v12406_v20 = vsel %vm12405_vm8, %v12404_v52, 0.0 }
 0x9fa   : > { %12407 = vadd.xlane.f32.xlu0 %v12406_v20 }
 0xa83   : > { %v12408_v4 = vpop.xlane.xlu0 %12407 }
 0xa84   : > { %v12410_v6 = vadd.f32 %v12409_v5, %v12408_v4 }
 0xa86   : > { %v12411_v60 = vsub.f32 0.0, %v12410_v6 }
 0xa88   : > { %v12412_v8 = vmul.f32 1.442695, %v12411_v60 }
 0xa8a   : > { %14826 = vpow2.f32 %v12412_v8 }
 0xa97   : > { %v14827_v48 = vpop.eup %14826 }
 0xa98   : > { %v12414_v45 = vadd.f32 1.0, %v14827_v48 }
 0xa9a   : > { %14828 = vrcp.f32 %v12414_v45 }
 0xaa7   : > { %v14829_v44 = vpop.eup %14828 }
 0xaa8   : > { %12418 = vst.msk [vmem:[%s492_s25] sm:$0x1] %vm12417_vm9, %v14829_v44 }
 0xaa9 PF: > { %s27_s20 = sadd.s32 1, %s14841_s20  }
 0xaaa   : > { %p24_p4 = scmp.ge.s32.totalorder %s27_s20, 4  }
 0xaac   :  { %26 = sbr.rel (!%p24_p4) target bundleno = 3 (0x3), region = 116 }

</bundles_post_ra>
